<compile_context>
chip_gen: v6e
topology: v6e:2x2x1
jax: 0.10.0
libtpu: 0.0.40
codegen_flags: <defaults>
</compile_context>

<pallas_src>
import jax
import jax.numpy as jnp
import numpy as np
from jax import lax
from jax.experimental import pallas as pl
from jax.experimental.pallas import tpu as pltpu


_EPS = 1e-5
_MAX_TN = 4096

# (Cin, Cout, stride, instance_norm, leaky_relu)
_LAYER_DEFS = [
    (4, 64, 2, False, True),
    (64, 128, 2, True, True),
    (128, 256, 2, True, True),
    (256, 512, 1, True, True),
    (512, 1, 1, False, False),
]


def _detect_vmem_limit():
    """Generation-aware scoped-VMEM budget (v5e/v6e: 96 MiB, v7x: 48 MiB)."""
    cap = 64 * 1024 * 1024
    try:
        info = pltpu.get_tpu_info()
        cap = int(getattr(info, "vmem_capacity_bytes", cap))
    except Exception:
        pass
    return int(min(cap * 3 // 4, 96 * 1024 * 1024))


_VMEM_LIMIT = _detect_vmem_limit()
_TILE_BUDGET = int(_VMEM_LIMIT * 0.7)   # headroom for pipeline bookkeeping


def _pick_spatial_tile(n, per_row_bytes, extra_bytes, budget_bytes):
    """Largest sublane-aligned spatial tile that fits the VMEM byte budget.

    Prefers an exact divisor of n; otherwise the last tile is padded (callers
    mask padded rows out of any reduction)."""
    cap = (budget_bytes - extra_bytes) // max(per_row_bytes, 1)
    cap = max(8, min(int(cap), _MAX_TN))
    cap -= cap % 8
    if cap >= n:
        return ((n + 7) // 8) * 8
    for d in range(cap, 7, -8):
        if n % d == 0:
            return d
    return cap


# ---------------------------------------------------------------------------
# Pallas kernel (conv-as-matmul, optional fused producer-IN / consumer-norm)
# ---------------------------------------------------------------------------
def _make_conv_kernel(*, pre_norm, do_lrelu, compute_stats, inv_n, tn, n_real,
                      mask_rows):
    def kernel(*refs):
        i = 0
        if pre_norm:
            pstat_ref = refs[i]          # (2, K) f32: [bf16-rounded mean, rstd]
            i += 1
        p_ref, w_ref, b_ref = refs[i], refs[i + 1], refs[i + 2]
        i += 3
        y_ref = refs[i]
        i += 1
        st_ref = refs[i] if compute_stats else None

        p = p_ref[...]                   # (TN, K) bf16 im2col patches
        if pre_norm:
            # Deferred InstanceNorm + LeakyReLU of the *previous* layer, applied
            # to the (9x channel-tiled) patch tile in f32 on the VPU.  The
            # border fill is bf16(mean), so padding normalizes to exactly 0.
            a = (p.astype(jnp.float32) - pstat_ref[0:1, :]) * pstat_ref[1:2, :]
            a = jnp.where(a > 0, a, 0.2 * a)
            p = a.astype(jnp.bfloat16)

        y = jnp.dot(p, w_ref[...], preferred_element_type=jnp.float32)
        y = y + b_ref[...]               # f32 bias

        if compute_stats:
            t = pl.program_id(2)
            yk = y
            if mask_rows:
                rows = t * tn + lax.broadcasted_iota(jnp.int32, y.shape, 0)
                yk = jnp.where(rows < n_real, y, 0.0)
            # Single combined (sum, sumsq) update per step.
            contrib = jnp.concatenate(
                [jnp.sum(yk, axis=0, keepdims=True),
                 jnp.sum(yk * yk, axis=0, keepdims=True)], axis=0)

            @pl.when(t == 0)
            def _():
                st_ref[...] = jnp.zeros_like(st_ref)

            st_ref[...] += contrib

            @pl.when(t == pl.num_programs(2) - 1)
            def _():
                mean = st_ref[0:1, :] * inv_n
                var = jnp.maximum(st_ref[1:2, :] * inv_n - mean * mean, 0.0)
                st_ref[...] = jnp.concatenate(
                    [mean, lax.rsqrt(var + _EPS)], axis=0)

            # Raw (pre-IN) conv output; IN + LReLU are applied by the consumer.
            y_ref[...] = y.astype(y_ref.dtype)
        else:
            if do_lrelu:
                y = jnp.where(y > 0, y, 0.2 * y)
            y_ref[...] = y.astype(y_ref.dtype)

    return kernel


# ---------------------------------------------------------------------------
# Pallas wrapper
# ---------------------------------------------------------------------------
def _conv_layer_pallas(patches, w_mat, bias2d, stats_prev, *, compute_stats,
                       do_lrelu, out_dtype, n_real):
    B, _, K = patches.shape
    Cout = w_mat.shape[1]
    out_bytes = int(np.dtype(out_dtype).itemsize)
    pre_norm = stats_prev is not None

    # VMEM-budgeted spatial tile (double-buffered patch + output rows, plus the
    # resident weight / bias / stats blocks).
    per_row = 2 * (2 * K + out_bytes * Cout)
    extra = (2 * 2 * K * Cout + 2 * 4 * Cout
             + (2 * 2 * 4 * K if pre_norm else 0)
             + (2 * 2 * 4 * Cout if compute_stats else 0))
    tn = _pick_spatial_tile(n_real, per_row, extra, _TILE_BUDGET)
    nt = pl.cdiv(n_real, tn)
    n_pad = nt * tn
    if n_pad != patches.shape[1]:
        patches = jnp.pad(patches, ((0, 0), (0, n_pad - patches.shape[1]), (0, 0)))
    mask_rows = n_pad != n_real

    # v7x megacore: with a single batch element the stats kernel's only parallel
    # axis would be B, so split Cout (per-channel stats are independent).  With
    # B >= 2 keep Cout whole to avoid re-reading the im2col patches.
    nco = 2 if (compute_stats and B == 1 and Cout % 256 == 0) else 1
    tco = Cout // nco

    kernel = _make_conv_kernel(pre_norm=pre_norm, do_lrelu=do_lrelu,
                               compute_stats=compute_stats, inv_n=1.0 / n_real,
                               tn=tn, n_real=n_real, mask_rows=mask_rows)

    in_specs, args = [], []
    if pre_norm:
        in_specs.append(pl.BlockSpec((None, 2, K), lambda b, co, t: (b, 0, 0)))
        args.append(stats_prev)
    in_specs += [
        pl.BlockSpec((None, tn, K), lambda b, co, t: (b, t, 0)),
        pl.BlockSpec((K, tco), lambda b, co, t: (0, co)),
        pl.BlockSpec((1, tco), lambda b, co, t: (0, co)),
    ]
    args += [patches, w_mat, bias2d]

    y_spec = pl.BlockSpec((None, tn, tco), lambda b, co, t: (b, t, co))
    if compute_stats:
        out_shape = (jax.ShapeDtypeStruct((B, n_pad, Cout), out_dtype),
                     jax.ShapeDtypeStruct((B, 2, Cout), jnp.float32))
        out_specs = (y_spec,
                     pl.BlockSpec((None, 2, tco), lambda b, co, t: (b, 0, co)))
        # Spatial axis carries the running sum/sumsq accumulation -> sequential.
        semantics = ("parallel", "parallel", "arbitrary")
    else:
        out_shape = jax.ShapeDtypeStruct((B, n_pad, Cout), out_dtype)
        out_specs = y_spec
        semantics = ("parallel", "parallel", "parallel")

    cost = pl.CostEstimate(
        flops=int(2 * B * n_pad * K * Cout), transcendentals=0,
        bytes_accessed=int(B * n_pad * K * 2 * nco + 2 * K * Cout + 4 * Cout
                           + B * n_pad * Cout * out_bytes
                           + (B * 2 * Cout * 4 if compute_stats else 0)
                           + (B * 2 * K * 4 if pre_norm else 0)))

    return pl.pallas_call(
        kernel,
        out_shape=out_shape,
        grid=(B, nco, nt),
        in_specs=in_specs,
        out_specs=out_specs,
        compiler_params=pltpu.CompilerParams(
            dimension_semantics=semantics, vmem_limit_bytes=_VMEM_LIMIT),
        cost_estimate=cost,
    )(*args)


# ---------------------------------------------------------------------------
# Plain-JAX glue: im2col patch extraction (slicing / concat only)
# ---------------------------------------------------------------------------
def _im2col(x_nhwc, *, k=3, stride=1, pad=1, fill=None):
    B, H, W, C = x_nhwc.shape
    if fill is None:
        xp = jnp.pad(x_nhwc, ((0, 0), (pad, pad), (pad, pad), (0, 0)))
    else:
        # Border filled with the previous layer's per-channel bf16(mean) so the
        # deferred InstanceNorm in the consumer kernel maps padding to exactly 0.
        xp = jnp.broadcast_to(fill[:, None, None, :].astype(x_nhwc.dtype),
                              (B, H + 2 * pad, W + 2 * pad, C))
        xp = lax.dynamic_update_slice(xp, x_nhwc, (0, pad, pad, 0))
    Hout = (H + 2 * pad - k) // stride + 1
    Wout = (W + 2 * pad - k) // stride + 1
    cols = []
    for ky in range(k):
        for kx in range(k):
            sl = xp[:,
                    ky: ky + stride * (Hout - 1) + 1: stride,
                    kx: kx + stride * (Wout - 1) + 1: stride,
                    :]
            cols.append(sl)
    patches = jnp.concatenate(cols, axis=-1)               # (B,Hout,Wout,9*C)
    return patches.reshape(B, Hout * Wout, k * k * C), Hout, Wout


# ---------------------------------------------------------------------------
# Parameters (PyTorch conv weight shape (Cout, Cin, 3, 3), deterministic init)
# ---------------------------------------------------------------------------
def init_params(key):
    params = []
    for i, (cin, cout, _, _, _) in enumerate(_LAYER_DEFS):
        kw, kb = jax.random.split(jax.random.fold_in(key, i))
        w_torch = jax.random.normal(kw, (cout, cin, 3, 3), jnp.float32) * 0.05
        b = jax.random.normal(kb, (cout,), jnp.float32) * 0.05
        w_hwio = jnp.transpose(w_torch, (2, 3, 1, 0))       # (3,3,Cin,Cout)
        w_mat = w_hwio.reshape(9 * cin, cout)                # im2col layout
        # Lane-dense store for the final Cout=1 layer (padded to 128, sliced back
        # outside).  Layer-1 Cout=64 is left unpadded: padding would double
        # layer-2's im2col K / HBM traffic for a store-path-only win.
        cout_pad = 128 if cout < 8 else cout
        w_mat = jnp.pad(w_mat, ((0, 0), (0, cout_pad - cout)))
        b2d = jnp.pad(b, (0, cout_pad - cout)).reshape(1, cout_pad)
        params.append({
            "w_mat": w_mat.astype(jnp.bfloat16),   # bf16 MXU operand
            "b2d": b2d,                            # f32 bias, added post-matmul
            "w_hwio": w_hwio, "b": b,              # f32 originals for the reference
        })
    return params


# ---------------------------------------------------------------------------
# Forward pass
# ---------------------------------------------------------------------------
def conditional_discriminator_forward(img_nchw, condition, params):
    B, _, H, W = img_nchw.shape
    # condition.view(B,1,1,1).repeat(1,1,H,W)
    cond_map = jnp.broadcast_to(condition.reshape(B, 1, 1, 1), (B, 1, H, W))
    d_in = jnp.concatenate([img_nchw, cond_map], axis=1)           # (B,4,H,W)
    x = jnp.transpose(d_in, (0, 2, 3, 1)).astype(jnp.bfloat16)     # NHWC bf16

    prev_stats = None   # (B,2,Cprev) f32: [bf16-rounded mean, rstd] of prev IN layer
    prev_fill = None    # (B,Cprev) bf16 border fill for im2col

    for p, (cin, cout, stride, do_norm, do_lrelu) in zip(params, _LAYER_DEFS):
        patches, Hout, Wout = _im2col(x, stride=stride, fill=prev_fill)
        n_real = Hout * Wout
        stats_tiled = (None if prev_stats is None
                       else jnp.tile(prev_stats, (1, 1, 9)))       # (B,2,9*Cin)

        if do_norm:
            # Producer: raw conv output (bf16) + per-channel stats.
            # Its IN + LeakyReLU are applied by the *next* layer's kernel.
            y, stats = _conv_layer_pallas(
                patches, p["w_mat"], p["b2d"], stats_tiled,
                compute_stats=True, do_lrelu=False,
                out_dtype=jnp.bfloat16, n_real=n_real)
            mean_q = stats[:, 0:1, :].astype(jnp.bfloat16)         # bf16-rounded mean
            prev_stats = jnp.concatenate(
                [mean_q.astype(jnp.float32), stats[:, 1:2, :]], axis=1)
            prev_fill = mean_q[:, 0, :]                            # (B,Cout) bf16
            act = y
        else:
            out_dtype = jnp.bfloat16 if do_lrelu else jnp.float32
            act = _conv_layer_pallas(
                patches, p["w_mat"], p["b2d"], stats_tiled,
                compute_stats=False, do_lrelu=do_lrelu,
                out_dtype=out_dtype, n_real=n_real)
            prev_stats = None
            prev_fill = None

        # Drop spatial row padding and (final layer) lane padding.
        x = act[:, :n_real, :cout].reshape(B, Hout, Wout, cout)

    return jnp.transpose(x.astype(jnp.float32), (0, 3, 1, 2))      # NCHW


# ---------------------------------------------------------------------------
# Pure-JAX reference for the correctness check.
# It mirrors the kernel's mixed-precision recipe exactly (bf16 matmul operands,
# bf16 activation / y storage, bf16-rounded mean, f32 accumulation + statistics)
# so the comparison validates the kernel rather than bf16 quantization noise.
# ---------------------------------------------------------------------------
def _reference_forward(img_nchw, condition, params):
    B, _, H, W = img_nchw.shape
    cond_map = jnp.broadcast_to(condition.reshape(B, 1, 1, 1), (B, 1, H, W))
    x = jnp.transpose(jnp.concatenate([img_nchw, cond_map], axis=1), (0, 2, 3, 1))
    xq = x.astype(jnp.bfloat16)
    for p, (cin, cout, stride, do_norm, do_lrelu) in zip(params, _LAYER_DEFS):
        y = lax.conv_general_dilated(
            xq, p["w_hwio"].astype(jnp.bfloat16),
            window_strides=(stride, stride), padding=((1, 1), (1, 1)),
            dimension_numbers=("NHWC", "HWIO", "NHWC"),
            preferred_element_type=jnp.float32) + p["b"]
        if do_norm:
            mean = jnp.mean(y, axis=(1, 2), keepdims=True)
            var = jnp.mean(jnp.square(y - mean), axis=(1, 2), keepdims=True)
            rstd = lax.rsqrt(var + _EPS)
            yq = y.astype(jnp.bfloat16).astype(jnp.float32)        # bf16 y storage
            meanq = mean.astype(jnp.bfloat16).astype(jnp.float32)  # bf16 mean / fill
            z = (yq - meanq) * rstd
            z = jnp.where(z > 0, z, 0.2 * z)
            xq = z.astype(jnp.bfloat16)
        elif do_lrelu:
            y = jnp.where(y > 0, y, 0.2 * y)
            xq = y.astype(jnp.bfloat16)
        else:
            xq = y                                                 # final layer, f32
    return jnp.transpose(xq.astype(jnp.float32), (0, 3, 1, 2))


if __name__ == "__main__":
    key = jax.random.PRNGKey(0)
    k_img, k_cond, k_par = jax.random.split(key, 3)

    B, H, W = 2, 16, 16
    img = jax.random.normal(k_img, (B, 3, H, W), jnp.float32)
    condition = jax.random.normal(k_cond, (B,), jnp.float32)   # one scalar per sample
    params = init_params(k_par)

    fwd = jax.jit(conditional_discriminator_forward)

    out = jax.block_until_ready(fwd(img, condition, params))
    assert out.shape == (B, 1, H // 8, W // 8), out.shape
    ref = jax.block_until_ready(_reference_forward(img, condition, params))
    np.testing.assert_allclose(np.asarray(out), np.asarray(ref), rtol=2e-2, atol=2e-2)

    # B == 1 also exercises the Cout-parallel stats grid axis (v7x megacore path).
    out1 = jax.block_until_ready(fwd(img[:1], condition[:1], params))
    assert out1.shape == (1, 1, H // 8, W // 8), out1.shape
    ref1 = jax.block_until_ready(_reference_forward(img[:1], condition[:1], params))
    np.testing.assert_allclose(np.asarray(out1), np.asarray(ref1), rtol=2e-2, atol=2e-2)

    print("KERNEL_OK")
</pallas_src>

<mosaic_0001>
module attributes {stable_mosaic.version = 11 : i64} {
  func.func @kernel(%arg0: i32, %arg1: i32, %arg2: i32, %arg3: memref<1x64x36xbf16, #tpu.memory_space<vmem>>, %arg4: memref<36x64xbf16, #tpu.memory_space<vmem>>, %arg5: memref<1x64xf32, #tpu.memory_space<vmem>>, %arg6: memref<1x64x64xbf16, #tpu.memory_space<vmem>>) attributes {dimension_semantics = [#tpu.dimension_semantics<parallel>, #tpu.dimension_semantics<parallel>, #tpu.dimension_semantics<parallel>], iteration_bounds = array<i64: 2, 1, 1>, scalar_prefetch = 0 : i64, scratch_operands = 0 : i64, tpu.core_type = #tpu.core_type<tc>, window_params = [{transform_indices = @transform_0, window_bounds = array<i64: 1, 64, 36>}, {transform_indices = @transform_1, window_bounds = array<i64: 36, 64>}, {transform_indices = @transform_2, window_bounds = array<i64: 1, 64>}, {transform_indices = @transform_3, window_bounds = array<i64: 1, 64, 64>}]} {
    %c0 = arith.constant 0 : index
    %c0_0 = arith.constant 0 : index
    %c0_1 = arith.constant 0 : index
    %0 = vector.load %arg3[%c0, %c0_0, %c0_1] : memref<1x64x36xbf16, #tpu.memory_space<vmem>>, vector<1x64x36xbf16>
    %1 = vector.shape_cast %0 : vector<1x64x36xbf16> to vector<64x36xbf16>
    %c0_2 = arith.constant 0 : index
    %c0_3 = arith.constant 0 : index
    %2 = vector.load %arg4[%c0_2, %c0_3] : memref<36x64xbf16, #tpu.memory_space<vmem>>, vector<36x64xbf16>
    %cst = arith.constant dense<0.000000e+00> : vector<64x64xf32>
    %3 = tpu.matmul %1, %2, %cst {dimension_numbers = #tpu.dot_dimension_numbers<[1], [0], [0], [1], [0, 0, 1, 1], [], []>} : vector<64x36xbf16>, vector<36x64xbf16>, vector<64x64xf32> -> vector<64x64xf32>
    %c0_4 = arith.constant 0 : index
    %c0_5 = arith.constant 0 : index
    %4 = vector.load %arg5[%c0_4, %c0_5] : memref<1x64xf32, #tpu.memory_space<vmem>>, vector<1x64xf32>
    %5 = vector.broadcast %4 : vector<1x64xf32> to vector<64x64xf32>
    %6 = arith.addf %3, %5 : vector<64x64xf32>
    %cst_6 = arith.constant 0.000000e+00 : f32
    %7 = vector.broadcast %cst_6 : f32 to vector<64x64xf32>
    %8 = arith.cmpf ogt, %6, %7 : vector<64x64xf32>
    %cst_7 = arith.constant 2.000000e-01 : f32
    %9 = vector.broadcast %cst_7 : f32 to vector<64x64xf32>
    %10 = arith.mulf %9, %6 : vector<64x64xf32>
    %11 = arith.select %8, %6, %10 : vector<64x64xi1>, vector<64x64xf32>
    %12 = arith.truncf %11 : vector<64x64xf32> to vector<64x64xbf16>
    %c0_8 = arith.constant 0 : index
    %c0_9 = arith.constant 0 : index
    %c0_10 = arith.constant 0 : index
    %13 = vector.load %arg6[%c0_8, %c0_9, %c0_10] : memref<1x64x64xbf16, #tpu.memory_space<vmem>>, vector<1x64x64xbf16>
    %14 = vector.shape_cast %13 : vector<1x64x64xbf16> to vector<64x64xbf16>
    %15 = vector.shape_cast %12 : vector<64x64xbf16> to vector<1x64x64xbf16>
    tpu.vector_store %arg6[%c0_8, %c0_9, %c0_10], %15 {strides = array<i32>} : memref<1x64x64xbf16, #tpu.memory_space<vmem>>, vector<1x64x64xbf16>,
    return
  }
  func.func @transform_0(%arg0: i32, %arg1: i32, %arg2: i32) -> (i32, i32, i32) {
    %c0_i32 = arith.constant 0 : i32
    %c0_i32_0 = arith.constant 0 : i32
    return %arg0, %arg2, %c0_i32 : i32, i32, i32
  }
  func.func @transform_1(%arg0: i32, %arg1: i32, %arg2: i32) -> (i32, i32) {
    %c0_i32 = arith.constant 0 : i32
    %c0_i32_0 = arith.constant 0 : i32
    return %c0_i32, %arg1 : i32, i32
  }
  func.func @transform_2(%arg0: i32, %arg1: i32, %arg2: i32) -> (i32, i32) {
    %c0_i32 = arith.constant 0 : i32
    %c0_i32_0 = arith.constant 0 : i32
    return %c0_i32, %arg1 : i32, i32
  }
  func.func @transform_3(%arg0: i32, %arg1: i32, %arg2: i32) -> (i32, i32, i32) {
    %c0_i32 = arith.constant 0 : i32
    return %arg0, %arg2, %arg1 : i32, i32, i32
  }
}

module attributes {stable_mosaic.version = 11 : i64} {
  func.func @kernel(%arg0: i32, %arg1: i32, %arg2: i32, %arg3: memref<1x16x576xbf16, #tpu.memory_space<vmem>>, %arg4: memref<576x128xbf16, #tpu.memory_space<vmem>>, %arg5: memref<1x128xf32, #tpu.memory_space<vmem>>, %arg6: memref<1x16x128xbf16, #tpu.memory_space<vmem>>, %arg7: memref<1x2x128xf32, #tpu.memory_space<vmem>>) attributes {dimension_semantics = [#tpu.dimension_semantics<parallel>, #tpu.dimension_semantics<parallel>, #tpu.dimension_semantics<arbitrary>], iteration_bounds = array<i64: 2, 1, 1>, scalar_prefetch = 0 : i64, scratch_operands = 0 : i64, tpu.core_type = #tpu.core_type<tc>, window_params = [{transform_indices = @transform_0, window_bounds = array<i64: 1, 16, 576>}, {transform_indices = @transform_1, window_bounds = array<i64: 576, 128>}, {transform_indices = @transform_2, window_bounds = array<i64: 1, 128>}, {transform_indices = @transform_3, window_bounds = array<i64: 1, 16, 128>}, {transform_indices = @transform_4, window_bounds = array<i64: 1, 2, 128>}]} {
    %c0 = arith.constant 0 : index
    %c0_0 = arith.constant 0 : index
    %c0_1 = arith.constant 0 : index
    %0 = vector.load %arg3[%c0, %c0_0, %c0_1] : memref<1x16x576xbf16, #tpu.memory_space<vmem>>, vector<1x16x576xbf16>
    %1 = vector.shape_cast %0 : vector<1x16x576xbf16> to vector<16x576xbf16>
    %c0_2 = arith.constant 0 : index
    %c0_3 = arith.constant 0 : index
    %2 = vector.load %arg4[%c0_2, %c0_3] : memref<576x128xbf16, #tpu.memory_space<vmem>>, vector<576x128xbf16>
    %cst = arith.constant dense<0.000000e+00> : vector<16x128xf32>
    %3 = tpu.matmul %1, %2, %cst {dimension_numbers = #tpu.dot_dimension_numbers<[1], [0], [0], [1], [0, 0, 1, 1], [], []>} : vector<16x576xbf16>, vector<576x128xbf16>, vector<16x128xf32> -> vector<16x128xf32>
    %c0_4 = arith.constant 0 : index
    %c0_5 = arith.constant 0 : index
    %4 = vector.load %arg5[%c0_4, %c0_5] : memref<1x128xf32, #tpu.memory_space<vmem>>, vector<1x128xf32>
    %5 = vector.broadcast %4 : vector<1x128xf32> to vector<16x128xf32>
    %6 = arith.addf %3, %5 : vector<16x128xf32>
    %cst_6 = arith.constant dense<0.000000e+00> : vector<128xf32>
    %7 = vector.multi_reduction <add>, %6, %cst_6 [0] : vector<16x128xf32> to vector<128xf32>
    %8 = vector.shape_cast %7 : vector<128xf32> to vector<1x128xf32>
    %9 = arith.mulf %6, %6 : vector<16x128xf32>
    %cst_7 = arith.constant dense<0.000000e+00> : vector<128xf32>
    %10 = vector.multi_reduction <add>, %9, %cst_7 [0] : vector<16x128xf32> to vector<128xf32>
    %11 = vector.shape_cast %10 : vector<128xf32> to vector<1x128xf32>
    %12 = tpu.concatenate %8, %11 in 0 : vector<1x128xf32>, vector<1x128xf32> -> vector<2x128xf32>
    %c0_i32 = arith.constant 0 : i32
    %13 = arith.cmpi eq, %arg2, %c0_i32 : i32
    %14 = arith.extui %13 : i1 to i32
    %c0_i32_8 = arith.constant 0 : i32
    %15 = arith.cmpi ne, %14, %c0_i32_8 : i32
    scf.if %15 {
      %cst_20 = arith.constant 0.000000e+00 : f32
      %29 = vector.broadcast %cst_20 : f32 to vector<2x128xf32>
      %c0_21 = arith.constant 0 : index
      %c0_22 = arith.constant 0 : index
      %c0_23 = arith.constant 0 : index
      %30 = vector.load %arg7[%c0_21, %c0_22, %c0_23] : memref<1x2x128xf32, #tpu.memory_space<vmem>>, vector<1x2x128xf32>
      %31 = vector.shape_cast %30 : vector<1x2x128xf32> to vector<2x128xf32>
      %32 = vector.shape_cast %29 : vector<2x128xf32> to vector<1x2x128xf32>
      tpu.vector_store %arg7[%c0_21, %c0_22, %c0_23], %32 {strides = array<i32>} : memref<1x2x128xf32, #tpu.memory_space<vmem>>, vector<1x2x128xf32>,
    } else {
    }
    %c0_9 = arith.constant 0 : index
    %c0_10 = arith.constant 0 : index
    %c0_11 = arith.constant 0 : index
    %16 = vector.load %arg7[%c0_9, %c0_10, %c0_11] : memref<1x2x128xf32, #tpu.memory_space<vmem>>, vector<1x2x128xf32>
    %17 = vector.shape_cast %16 : vector<1x2x128xf32> to vector<2x128xf32>
    %18 = arith.addf %17, %12 : vector<2x128xf32>
    %c0_12 = arith.constant 0 : index
    %c0_13 = arith.constant 0 : index
    %c0_14 = arith.constant 0 : index
    %19 = vector.load %arg7[%c0_12, %c0_13, %c0_14] : memref<1x2x128xf32, #tpu.memory_space<vmem>>, vector<1x2x128xf32>
    %20 = vector.shape_cast %19 : vector<1x2x128xf32> to vector<2x128xf32>
    %21 = vector.shape_cast %18 : vector<2x128xf32> to vector<1x2x128xf32>
    tpu.vector_store %arg7[%c0_12, %c0_13, %c0_14], %21 {strides = array<i32>} : memref<1x2x128xf32, #tpu.memory_space<vmem>>, vector<1x2x128xf32>,
    %c0_i32_15 = arith.constant 0 : i32
    %22 = arith.cmpi eq, %arg2, %c0_i32_15 : i32
    %23 = arith.extui %22 : i1 to i32
    %c0_i32_16 = arith.constant 0 : i32
    %24 = arith.cmpi ne, %23, %c0_i32_16 : i32
    scf.if %24 {
      %c0_20 = arith.constant 0 : index
      %c0_21 = arith.constant 0 : index
      %c0_22 = arith.constant 0 : index
      %29 = vector.load %arg7[%c0_20, %c0_21, %c0_22] : memref<1x2x128xf32, #tpu.memory_space<vmem>>, vector<1x1x128xf32>
      %30 = vector.shape_cast %29 : vector<1x1x128xf32> to vector<1x128xf32>
      %cst_23 = arith.constant 6.250000e-02 : f32
      %31 = vector.broadcast %cst_23 : f32 to vector<1x128xf32>
      %32 = arith.mulf %30, %31 : vector<1x128xf32>
      %c0_24 = arith.constant 0 : index
      %c1 = arith.constant 1 : index
      %c0_25 = arith.constant 0 : index
      %33 = vector.load %arg7[%c0_24, %c1, %c0_25] : memref<1x2x128xf32, #tpu.memory_space<vmem>>, vector<1x1x128xf32>
      %34 = vector.shape_cast %33 : vector<1x1x128xf32> to vector<1x128xf32>
      %cst_26 = arith.constant 6.250000e-02 : f32
      %35 = vector.broadcast %cst_26 : f32 to vector<1x128xf32>
      %36 = arith.mulf %34, %35 : vector<1x128xf32>
      %37 = arith.mulf %32, %32 : vector<1x128xf32>
      %38 = arith.subf %36, %37 : vector<1x128xf32>
      %cst_27 = arith.constant 0.000000e+00 : f32
      %39 = vector.broadcast %cst_27 : f32 to vector<1x128xf32>
      %40 = arith.maximumf %38, %39 : vector<1x128xf32>
      %cst_28 = arith.constant 9.99999974E-6 : f32
      %41 = vector.broadcast %cst_28 : f32 to vector<1x128xf32>
      %42 = arith.addf %40, %41 : vector<1x128xf32>
      %43 = math.rsqrt %42 : vector<1x128xf32>
      %44 = tpu.concatenate %32, %43 in 0 : vector<1x128xf32>, vector<1x128xf32> -> vector<2x128xf32>
      %c0_29 = arith.constant 0 : index
      %c0_30 = arith.constant 0 : index
      %c0_31 = arith.constant 0 : index
      %45 = vector.load %arg7[%c0_29, %c0_30, %c0_31] : memref<1x2x128xf32, #tpu.memory_space<vmem>>, vector<1x2x128xf32>
      %46 = vector.shape_cast %45 : vector<1x2x128xf32> to vector<2x128xf32>
      %47 = vector.shape_cast %44 : vector<2x128xf32> to vector<1x2x128xf32>
      tpu.vector_store %arg7[%c0_29, %c0_30, %c0_31], %47 {strides = array<i32>} : memref<1x2x128xf32, #tpu.memory_space<vmem>>, vector<1x2x128xf32>,
    } else {
    }
    %25 = arith.truncf %6 : vector<16x128xf32> to vector<16x128xbf16>
    %c0_17 = arith.constant 0 : index
    %c0_18 = arith.constant 0 : index
    %c0_19 = arith.constant 0 : index
    %26 = vector.load %arg6[%c0_17, %c0_18, %c0_19] : memref<1x16x128xbf16, #tpu.memory_space<vmem>>, vector<1x16x128xbf16>
    %27 = vector.shape_cast %26 : vector<1x16x128xbf16> to vector<16x128xbf16>
    %28 = vector.shape_cast %25 : vector<16x128xbf16> to vector<1x16x128xbf16>
    tpu.vector_store %arg6[%c0_17, %c0_18, %c0_19], %28 {strides = array<i32>} : memref<1x16x128xbf16, #tpu.memory_space<vmem>>, vector<1x16x128xbf16>,
    return
  }
  func.func @transform_0(%arg0: i32, %arg1: i32, %arg2: i32) -> (i32, i32, i32) {
    %c0_i32 = arith.constant 0 : i32
    %c0_i32_0 = arith.constant 0 : i32
    return %arg0, %arg2, %c0_i32 : i32, i32, i32
  }
  func.func @transform_1(%arg0: i32, %arg1: i32, %arg2: i32) -> (i32, i32) {
    %c0_i32 = arith.constant 0 : i32
    %c0_i32_0 = arith.constant 0 : i32
    return %c0_i32, %arg1 : i32, i32
  }
  func.func @transform_2(%arg0: i32, %arg1: i32, %arg2: i32) -> (i32, i32) {
    %c0_i32 = arith.constant 0 : i32
    %c0_i32_0 = arith.constant 0 : i32
    return %c0_i32, %arg1 : i32, i32
  }
  func.func @transform_3(%arg0: i32, %arg1: i32, %arg2: i32) -> (i32, i32, i32) {
    %c0_i32 = arith.constant 0 : i32
    return %arg0, %arg2, %arg1 : i32, i32, i32
  }
  func.func @transform_4(%arg0: i32, %arg1: i32, %arg2: i32) -> (i32, i32, i32) {
    %c0_i32 = arith.constant 0 : i32
    %c0_i32_0 = arith.constant 0 : i32
    return %arg0, %c0_i32, %arg1 : i32, i32, i32
  }
}

module attributes {stable_mosaic.version = 11 : i64} {
  func.func @kernel(%arg0: i32, %arg1: i32, %arg2: i32, %arg3: memref<1x2x1152xf32, #tpu.memory_space<vmem>>, %arg4: memref<1x8x1152xbf16, #tpu.memory_space<vmem>>, %arg5: memref<1152x256xbf16, #tpu.memory_space<vmem>>, %arg6: memref<1x256xf32, #tpu.memory_space<vmem>>, %arg7: memref<1x8x256xbf16, #tpu.memory_space<vmem>>, %arg8: memref<1x2x256xf32, #tpu.memory_space<vmem>>) attributes {dimension_semantics = [#tpu.dimension_semantics<parallel>, #tpu.dimension_semantics<parallel>, #tpu.dimension_semantics<arbitrary>], iteration_bounds = array<i64: 2, 1, 1>, scalar_prefetch = 0 : i64, scratch_operands = 0 : i64, tpu.core_type = #tpu.core_type<tc>, window_params = [{transform_indices = @transform_0, window_bounds = array<i64: 1, 2, 1152>}, {transform_indices = @transform_1, window_bounds = array<i64: 1, 8, 1152>}, {transform_indices = @transform_2, window_bounds = array<i64: 1152, 256>}, {transform_indices = @transform_3, window_bounds = array<i64: 1, 256>}, {transform_indices = @transform_4, window_bounds = array<i64: 1, 8, 256>}, {transform_indices = @transform_5, window_bounds = array<i64: 1, 2, 256>}]} {
    %c0 = arith.constant 0 : index
    %c0_0 = arith.constant 0 : index
    %c0_1 = arith.constant 0 : index
    %0 = vector.load %arg4[%c0, %c0_0, %c0_1] : memref<1x8x1152xbf16, #tpu.memory_space<vmem>>, vector<1x8x1152xbf16>
    %1 = vector.shape_cast %0 : vector<1x8x1152xbf16> to vector<8x1152xbf16>
    %2 = arith.extf %1 : vector<8x1152xbf16> to vector<8x1152xf32>
    %c0_2 = arith.constant 0 : index
    %c0_3 = arith.constant 0 : index
    %c0_4 = arith.constant 0 : index
    %3 = vector.load %arg3[%c0_2, %c0_3, %c0_4] : memref<1x2x1152xf32, #tpu.memory_space<vmem>>, vector<1x1x1152xf32>
    %4 = vector.shape_cast %3 : vector<1x1x1152xf32> to vector<1x1152xf32>
    %5 = vector.broadcast %4 : vector<1x1152xf32> to vector<8x1152xf32>
    %6 = arith.subf %2, %5 : vector<8x1152xf32>
    %c0_5 = arith.constant 0 : index
    %c1 = arith.constant 1 : index
    %c0_6 = arith.constant 0 : index
    %7 = vector.load %arg3[%c0_5, %c1, %c0_6] : memref<1x2x1152xf32, #tpu.memory_space<vmem>>, vector<1x1x1152xf32>
    %8 = vector.shape_cast %7 : vector<1x1x1152xf32> to vector<1x1152xf32>
    %9 = vector.broadcast %8 : vector<1x1152xf32> to vector<8x1152xf32>
    %10 = arith.mulf %6, %9 : vector<8x1152xf32>
    %cst = arith.constant 0.000000e+00 : f32
    %11 = vector.broadcast %cst : f32 to vector<8x1152xf32>
    %12 = arith.cmpf ogt, %10, %11 : vector<8x1152xf32>
    %cst_7 = arith.constant 2.000000e-01 : f32
    %13 = vector.broadcast %cst_7 : f32 to vector<8x1152xf32>
    %14 = arith.mulf %13, %10 : vector<8x1152xf32>
    %15 = arith.select %12, %10, %14 : vector<8x1152xi1>, vector<8x1152xf32>
    %16 = arith.truncf %15 : vector<8x1152xf32> to vector<8x1152xbf16>
    %c0_8 = arith.constant 0 : index
    %c0_9 = arith.constant 0 : index
    %17 = vector.load %arg5[%c0_8, %c0_9] : memref<1152x256xbf16, #tpu.memory_space<vmem>>, vector<1152x256xbf16>
    %cst_10 = arith.constant dense<0.000000e+00> : vector<8x256xf32>
    %18 = tpu.matmul %16, %17, %cst_10 {dimension_numbers = #tpu.dot_dimension_numbers<[1], [0], [0], [1], [0, 0, 1, 1], [], []>} : vector<8x1152xbf16>, vector<1152x256xbf16>, vector<8x256xf32> -> vector<8x256xf32>
    %c0_11 = arith.constant 0 : index
    %c0_12 = arith.constant 0 : index
    %19 = vector.load %arg6[%c0_11, %c0_12] : memref<1x256xf32, #tpu.memory_space<vmem>>, vector<1x256xf32>
    %20 = vector.broadcast %19 : vector<1x256xf32> to vector<8x256xf32>
    %21 = arith.addf %18, %20 : vector<8x256xf32>
    %c8_i32 = arith.constant 8 : i32
    %22 = arith.muli %arg2, %c8_i32 : i32
    %23 = tpu.iota {dimensions = array<i32: 0>} : vector<8x256xi32>
    %24 = vector.broadcast %22 : i32 to vector<8x256xi32>
    %25 = arith.addi %24, %23 : vector<8x256xi32>
    %c4_i32 = arith.constant 4 : i32
    %26 = vector.broadcast %c4_i32 : i32 to vector<8x256xi32>
    %27 = arith.cmpi slt, %25, %26 : vector<8x256xi32>
    %cst_13 = arith.constant 0.000000e+00 : f32
    %28 = vector.broadcast %cst_13 : f32 to vector<8x256xf32>
    %29 = arith.select %27, %21, %28 : vector<8x256xi1>, vector<8x256xf32>
    %cst_14 = arith.constant dense<0.000000e+00> : vector<256xf32>
    %30 = vector.multi_reduction <add>, %29, %cst_14 [0] : vector<8x256xf32> to vector<256xf32>
    %31 = vector.shape_cast %30 : vector<256xf32> to vector<1x256xf32>
    %32 = arith.mulf %29, %29 : vector<8x256xf32>
    %cst_15 = arith.constant dense<0.000000e+00> : vector<256xf32>
    %33 = vector.multi_reduction <add>, %32, %cst_15 [0] : vector<8x256xf32> to vector<256xf32>
    %34 = vector.shape_cast %33 : vector<256xf32> to vector<1x256xf32>
    %35 = tpu.concatenate %31, %34 in 0 : vector<1x256xf32>, vector<1x256xf32> -> vector<2x256xf32>
    %c0_i32 = arith.constant 0 : i32
    %36 = arith.cmpi eq, %arg2, %c0_i32 : i32
    %37 = arith.extui %36 : i1 to i32
    %c0_i32_16 = arith.constant 0 : i32
    %38 = arith.cmpi ne, %37, %c0_i32_16 : i32
    scf.if %38 {
      %cst_28 = arith.constant 0.000000e+00 : f32
      %52 = vector.broadcast %cst_28 : f32 to vector<2x256xf32>
      %c0_29 = arith.constant 0 : index
      %c0_30 = arith.constant 0 : index
      %c0_31 = arith.constant 0 : index
      %53 = vector.load %arg8[%c0_29, %c0_30, %c0_31] : memref<1x2x256xf32, #tpu.memory_space<vmem>>, vector<1x2x256xf32>
      %54 = vector.shape_cast %53 : vector<1x2x256xf32> to vector<2x256xf32>
      %55 = vector.shape_cast %52 : vector<2x256xf32> to vector<1x2x256xf32>
      tpu.vector_store %arg8[%c0_29, %c0_30, %c0_31], %55 {strides = array<i32>} : memref<1x2x256xf32, #tpu.memory_space<vmem>>, vector<1x2x256xf32>,
    } else {
    }
    %c0_17 = arith.constant 0 : index
    %c0_18 = arith.constant 0 : index
    %c0_19 = arith.constant 0 : index
    %39 = vector.load %arg8[%c0_17, %c0_18, %c0_19] : memref<1x2x256xf32, #tpu.memory_space<vmem>>, vector<1x2x256xf32>
    %40 = vector.shape_cast %39 : vector<1x2x256xf32> to vector<2x256xf32>
    %41 = arith.addf %40, %35 : vector<2x256xf32>
    %c0_20 = arith.constant 0 : index
    %c0_21 = arith.constant 0 : index
    %c0_22 = arith.constant 0 : index
    %42 = vector.load %arg8[%c0_20, %c0_21, %c0_22] : memref<1x2x256xf32, #tpu.memory_space<vmem>>, vector<1x2x256xf32>
    %43 = vector.shape_cast %42 : vector<1x2x256xf32> to vector<2x256xf32>
    %44 = vector.shape_cast %41 : vector<2x256xf32> to vector<1x2x256xf32>
    tpu.vector_store %arg8[%c0_20, %c0_21, %c0_22], %44 {strides = array<i32>} : memref<1x2x256xf32, #tpu.memory_space<vmem>>, vector<1x2x256xf32>,
    %c0_i32_23 = arith.constant 0 : i32
    %45 = arith.cmpi eq, %arg2, %c0_i32_23 : i32
    %46 = arith.extui %45 : i1 to i32
    %c0_i32_24 = arith.constant 0 : i32
    %47 = arith.cmpi ne, %46, %c0_i32_24 : i32
    scf.if %47 {
      %c0_28 = arith.constant 0 : index
      %c0_29 = arith.constant 0 : index
      %c0_30 = arith.constant 0 : index
      %52 = vector.load %arg8[%c0_28, %c0_29, %c0_30] : memref<1x2x256xf32, #tpu.memory_space<vmem>>, vector<1x1x256xf32>
      %53 = vector.shape_cast %52 : vector<1x1x256xf32> to vector<1x256xf32>
      %cst_31 = arith.constant 2.500000e-01 : f32
      %54 = vector.broadcast %cst_31 : f32 to vector<1x256xf32>
      %55 = arith.mulf %53, %54 : vector<1x256xf32>
      %c0_32 = arith.constant 0 : index
      %c1_33 = arith.constant 1 : index
      %c0_34 = arith.constant 0 : index
      %56 = vector.load %arg8[%c0_32, %c1_33, %c0_34] : memref<1x2x256xf32, #tpu.memory_space<vmem>>, vector<1x1x256xf32>
      %57 = vector.shape_cast %56 : vector<1x1x256xf32> to vector<1x256xf32>
      %cst_35 = arith.constant 2.500000e-01 : f32
      %58 = vector.broadcast %cst_35 : f32 to vector<1x256xf32>
      %59 = arith.mulf %57, %58 : vector<1x256xf32>
      %60 = arith.mulf %55, %55 : vector<1x256xf32>
      %61 = arith.subf %59, %60 : vector<1x256xf32>
      %cst_36 = arith.constant 0.000000e+00 : f32
      %62 = vector.broadcast %cst_36 : f32 to vector<1x256xf32>
      %63 = arith.maximumf %61, %62 : vector<1x256xf32>
      %cst_37 = arith.constant 9.99999974E-6 : f32
      %64 = vector.broadcast %cst_37 : f32 to vector<1x256xf32>
      %65 = arith.addf %63, %64 : vector<1x256xf32>
      %66 = math.rsqrt %65 : vector<1x256xf32>
      %67 = tpu.concatenate %55, %66 in 0 : vector<1x256xf32>, vector<1x256xf32> -> vector<2x256xf32>
      %c0_38 = arith.constant 0 : index
      %c0_39 = arith.constant 0 : index
      %c0_40 = arith.constant 0 : index
      %68 = vector.load %arg8[%c0_38, %c0_39, %c0_40] : memref<1x2x256xf32, #tpu.memory_space<vmem>>, vector<1x2x256xf32>
      %69 = vector.shape_cast %68 : vector<1x2x256xf32> to vector<2x256xf32>
      %70 = vector.shape_cast %67 : vector<2x256xf32> to vector<1x2x256xf32>
      tpu.vector_store %arg8[%c0_38, %c0_39, %c0_40], %70 {strides = array<i32>} : memref<1x2x256xf32, #tpu.memory_space<vmem>>, vector<1x2x256xf32>,
    } else {
    }
    %48 = arith.truncf %21 : vector<8x256xf32> to vector<8x256xbf16>
    %c0_25 = arith.constant 0 : index
    %c0_26 = arith.constant 0 : index
    %c0_27 = arith.constant 0 : index
    %49 = vector.load %arg7[%c0_25, %c0_26, %c0_27] : memref<1x8x256xbf16, #tpu.memory_space<vmem>>, vector<1x8x256xbf16>
    %50 = vector.shape_cast %49 : vector<1x8x256xbf16> to vector<8x256xbf16>
    %51 = vector.shape_cast %48 : vector<8x256xbf16> to vector<1x8x256xbf16>
    tpu.vector_store %arg7[%c0_25, %c0_26, %c0_27], %51 {strides = array<i32>} : memref<1x8x256xbf16, #tpu.memory_space<vmem>>, vector<1x8x256xbf16>,
    return
  }
  func.func @transform_0(%arg0: i32, %arg1: i32, %arg2: i32) -> (i32, i32, i32) {
    %c0_i32 = arith.constant 0 : i32
    %c0_i32_0 = arith.constant 0 : i32
    %c0_i32_1 = arith.constant 0 : i32
    return %arg0, %c0_i32, %c0_i32_0 : i32, i32, i32
  }
  func.func @transform_1(%arg0: i32, %arg1: i32, %arg2: i32) -> (i32, i32, i32) {
    %c0_i32 = arith.constant 0 : i32
    %c0_i32_0 = arith.constant 0 : i32
    return %arg0, %arg2, %c0_i32 : i32, i32, i32
  }
  func.func @transform_2(%arg0: i32, %arg1: i32, %arg2: i32) -> (i32, i32) {
    %c0_i32 = arith.constant 0 : i32
    %c0_i32_0 = arith.constant 0 : i32
    return %c0_i32, %arg1 : i32, i32
  }
  func.func @transform_3(%arg0: i32, %arg1: i32, %arg2: i32) -> (i32, i32) {
    %c0_i32 = arith.constant 0 : i32
    %c0_i32_0 = arith.constant 0 : i32
    return %c0_i32, %arg1 : i32, i32
  }
  func.func @transform_4(%arg0: i32, %arg1: i32, %arg2: i32) -> (i32, i32, i32) {
    %c0_i32 = arith.constant 0 : i32
    return %arg0, %arg2, %arg1 : i32, i32, i32
  }
  func.func @transform_5(%arg0: i32, %arg1: i32, %arg2: i32) -> (i32, i32, i32) {
    %c0_i32 = arith.constant 0 : i32
    %c0_i32_0 = arith.constant 0 : i32
    return %arg0, %c0_i32, %arg1 : i32, i32, i32
  }
}

module attributes {stable_mosaic.version = 11 : i64} {
  func.func @kernel(%arg0: i32, %arg1: i32, %arg2: i32, %arg3: memref<1x2x2304xf32, #tpu.memory_space<vmem>>, %arg4: memref<1x8x2304xbf16, #tpu.memory_space<vmem>>, %arg5: memref<2304x512xbf16, #tpu.memory_space<vmem>>, %arg6: memref<1x512xf32, #tpu.memory_space<vmem>>, %arg7: memref<1x8x512xbf16, #tpu.memory_space<vmem>>, %arg8: memref<1x2x512xf32, #tpu.memory_space<vmem>>) attributes {dimension_semantics = [#tpu.dimension_semantics<parallel>, #tpu.dimension_semantics<parallel>, #tpu.dimension_semantics<arbitrary>], iteration_bounds = array<i64: 2, 1, 1>, scalar_prefetch = 0 : i64, scratch_operands = 0 : i64, tpu.core_type = #tpu.core_type<tc>, window_params = [{transform_indices = @transform_0, window_bounds = array<i64: 1, 2, 2304>}, {transform_indices = @transform_1, window_bounds = array<i64: 1, 8, 2304>}, {transform_indices = @transform_2, window_bounds = array<i64: 2304, 512>}, {transform_indices = @transform_3, window_bounds = array<i64: 1, 512>}, {transform_indices = @transform_4, window_bounds = array<i64: 1, 8, 512>}, {transform_indices = @transform_5, window_bounds = array<i64: 1, 2, 512>}]} {
    %c0 = arith.constant 0 : index
    %c0_0 = arith.constant 0 : index
    %c0_1 = arith.constant 0 : index
    %0 = vector.load %arg4[%c0, %c0_0, %c0_1] : memref<1x8x2304xbf16, #tpu.memory_space<vmem>>, vector<1x8x2304xbf16>
    %1 = vector.shape_cast %0 : vector<1x8x2304xbf16> to vector<8x2304xbf16>
    %2 = arith.extf %1 : vector<8x2304xbf16> to vector<8x2304xf32>
    %c0_2 = arith.constant 0 : index
    %c0_3 = arith.constant 0 : index
    %c0_4 = arith.constant 0 : index
    %3 = vector.load %arg3[%c0_2, %c0_3, %c0_4] : memref<1x2x2304xf32, #tpu.memory_space<vmem>>, vector<1x1x2304xf32>
    %4 = vector.shape_cast %3 : vector<1x1x2304xf32> to vector<1x2304xf32>
    %5 = vector.broadcast %4 : vector<1x2304xf32> to vector<8x2304xf32>
    %6 = arith.subf %2, %5 : vector<8x2304xf32>
    %c0_5 = arith.constant 0 : index
    %c1 = arith.constant 1 : index
    %c0_6 = arith.constant 0 : index
    %7 = vector.load %arg3[%c0_5, %c1, %c0_6] : memref<1x2x2304xf32, #tpu.memory_space<vmem>>, vector<1x1x2304xf32>
    %8 = vector.shape_cast %7 : vector<1x1x2304xf32> to vector<1x2304xf32>
    %9 = vector.broadcast %8 : vector<1x2304xf32> to vector<8x2304xf32>
    %10 = arith.mulf %6, %9 : vector<8x2304xf32>
    %cst = arith.constant 0.000000e+00 : f32
    %11 = vector.broadcast %cst : f32 to vector<8x2304xf32>
    %12 = arith.cmpf ogt, %10, %11 : vector<8x2304xf32>
    %cst_7 = arith.constant 2.000000e-01 : f32
    %13 = vector.broadcast %cst_7 : f32 to vector<8x2304xf32>
    %14 = arith.mulf %13, %10 : vector<8x2304xf32>
    %15 = arith.select %12, %10, %14 : vector<8x2304xi1>, vector<8x2304xf32>
    %16 = arith.truncf %15 : vector<8x2304xf32> to vector<8x2304xbf16>
    %c0_8 = arith.constant 0 : index
    %c0_9 = arith.constant 0 : index
    %17 = vector.load %arg5[%c0_8, %c0_9] : memref<2304x512xbf16, #tpu.memory_space<vmem>>, vector<2304x512xbf16>
    %cst_10 = arith.constant dense<0.000000e+00> : vector<8x512xf32>
    %18 = tpu.matmul %16, %17, %cst_10 {dimension_numbers = #tpu.dot_dimension_numbers<[1], [0], [0], [1], [0, 0, 1, 1], [], []>} : vector<8x2304xbf16>, vector<2304x512xbf16>, vector<8x512xf32> -> vector<8x512xf32>
    %c0_11 = arith.constant 0 : index
    %c0_12 = arith.constant 0 : index
    %19 = vector.load %arg6[%c0_11, %c0_12] : memref<1x512xf32, #tpu.memory_space<vmem>>, vector<1x512xf32>
    %20 = vector.broadcast %19 : vector<1x512xf32> to vector<8x512xf32>
    %21 = arith.addf %18, %20 : vector<8x512xf32>
    %c8_i32 = arith.constant 8 : i32
    %22 = arith.muli %arg2, %c8_i32 : i32
    %23 = tpu.iota {dimensions = array<i32: 0>} : vector<8x512xi32>
    %24 = vector.broadcast %22 : i32 to vector<8x512xi32>
    %25 = arith.addi %24, %23 : vector<8x512xi32>
    %c4_i32 = arith.constant 4 : i32
    %26 = vector.broadcast %c4_i32 : i32 to vector<8x512xi32>
    %27 = arith.cmpi slt, %25, %26 : vector<8x512xi32>
    %cst_13 = arith.constant 0.000000e+00 : f32
    %28 = vector.broadcast %cst_13 : f32 to vector<8x512xf32>
    %29 = arith.select %27, %21, %28 : vector<8x512xi1>, vector<8x512xf32>
    %cst_14 = arith.constant dense<0.000000e+00> : vector<512xf32>
    %30 = vector.multi_reduction <add>, %29, %cst_14 [0] : vector<8x512xf32> to vector<512xf32>
    %31 = vector.shape_cast %30 : vector<512xf32> to vector<1x512xf32>
    %32 = arith.mulf %29, %29 : vector<8x512xf32>
    %cst_15 = arith.constant dense<0.000000e+00> : vector<512xf32>
    %33 = vector.multi_reduction <add>, %32, %cst_15 [0] : vector<8x512xf32> to vector<512xf32>
    %34 = vector.shape_cast %33 : vector<512xf32> to vector<1x512xf32>
    %35 = tpu.concatenate %31, %34 in 0 : vector<1x512xf32>, vector<1x512xf32> -> vector<2x512xf32>
    %c0_i32 = arith.constant 0 : i32
    %36 = arith.cmpi eq, %arg2, %c0_i32 : i32
    %37 = arith.extui %36 : i1 to i32
    %c0_i32_16 = arith.constant 0 : i32
    %38 = arith.cmpi ne, %37, %c0_i32_16 : i32
    scf.if %38 {
      %cst_28 = arith.constant 0.000000e+00 : f32
      %52 = vector.broadcast %cst_28 : f32 to vector<2x512xf32>
      %c0_29 = arith.constant 0 : index
      %c0_30 = arith.constant 0 : index
      %c0_31 = arith.constant 0 : index
      %53 = vector.load %arg8[%c0_29, %c0_30, %c0_31] : memref<1x2x512xf32, #tpu.memory_space<vmem>>, vector<1x2x512xf32>
      %54 = vector.shape_cast %53 : vector<1x2x512xf32> to vector<2x512xf32>
      %55 = vector.shape_cast %52 : vector<2x512xf32> to vector<1x2x512xf32>
      tpu.vector_store %arg8[%c0_29, %c0_30, %c0_31], %55 {strides = array<i32>} : memref<1x2x512xf32, #tpu.memory_space<vmem>>, vector<1x2x512xf32>,
    } else {
    }
    %c0_17 = arith.constant 0 : index
    %c0_18 = arith.constant 0 : index
    %c0_19 = arith.constant 0 : index
    %39 = vector.load %arg8[%c0_17, %c0_18, %c0_19] : memref<1x2x512xf32, #tpu.memory_space<vmem>>, vector<1x2x512xf32>
    %40 = vector.shape_cast %39 : vector<1x2x512xf32> to vector<2x512xf32>
    %41 = arith.addf %40, %35 : vector<2x512xf32>
    %c0_20 = arith.constant 0 : index
    %c0_21 = arith.constant 0 : index
    %c0_22 = arith.constant 0 : index
    %42 = vector.load %arg8[%c0_20, %c0_21, %c0_22] : memref<1x2x512xf32, #tpu.memory_space<vmem>>, vector<1x2x512xf32>
    %43 = vector.shape_cast %42 : vector<1x2x512xf32> to vector<2x512xf32>
    %44 = vector.shape_cast %41 : vector<2x512xf32> to vector<1x2x512xf32>
    tpu.vector_store %arg8[%c0_20, %c0_21, %c0_22], %44 {strides = array<i32>} : memref<1x2x512xf32, #tpu.memory_space<vmem>>, vector<1x2x512xf32>,
    %c0_i32_23 = arith.constant 0 : i32
    %45 = arith.cmpi eq, %arg2, %c0_i32_23 : i32
    %46 = arith.extui %45 : i1 to i32
    %c0_i32_24 = arith.constant 0 : i32
    %47 = arith.cmpi ne, %46, %c0_i32_24 : i32
    scf.if %47 {
      %c0_28 = arith.constant 0 : index
      %c0_29 = arith.constant 0 : index
      %c0_30 = arith.constant 0 : index
      %52 = vector.load %arg8[%c0_28, %c0_29, %c0_30] : memref<1x2x512xf32, #tpu.memory_space<vmem>>, vector<1x1x512xf32>
      %53 = vector.shape_cast %52 : vector<1x1x512xf32> to vector<1x512xf32>
      %cst_31 = arith.constant 2.500000e-01 : f32
      %54 = vector.broadcast %cst_31 : f32 to vector<1x512xf32>
      %55 = arith.mulf %53, %54 : vector<1x512xf32>
      %c0_32 = arith.constant 0 : index
      %c1_33 = arith.constant 1 : index
      %c0_34 = arith.constant 0 : index
      %56 = vector.load %arg8[%c0_32, %c1_33, %c0_34] : memref<1x2x512xf32, #tpu.memory_space<vmem>>, vector<1x1x512xf32>
      %57 = vector.shape_cast %56 : vector<1x1x512xf32> to vector<1x512xf32>
      %cst_35 = arith.constant 2.500000e-01 : f32
      %58 = vector.broadcast %cst_35 : f32 to vector<1x512xf32>
      %59 = arith.mulf %57, %58 : vector<1x512xf32>
      %60 = arith.mulf %55, %55 : vector<1x512xf32>
      %61 = arith.subf %59, %60 : vector<1x512xf32>
      %cst_36 = arith.constant 0.000000e+00 : f32
      %62 = vector.broadcast %cst_36 : f32 to vector<1x512xf32>
      %63 = arith.maximumf %61, %62 : vector<1x512xf32>
      %cst_37 = arith.constant 9.99999974E-6 : f32
      %64 = vector.broadcast %cst_37 : f32 to vector<1x512xf32>
      %65 = arith.addf %63, %64 : vector<1x512xf32>
      %66 = math.rsqrt %65 : vector<1x512xf32>
      %67 = tpu.concatenate %55, %66 in 0 : vector<1x512xf32>, vector<1x512xf32> -> vector<2x512xf32>
      %c0_38 = arith.constant 0 : index
      %c0_39 = arith.constant 0 : index
      %c0_40 = arith.constant 0 : index
      %68 = vector.load %arg8[%c0_38, %c0_39, %c0_40] : memref<1x2x512xf32, #tpu.memory_space<vmem>>, vector<1x2x512xf32>
      %69 = vector.shape_cast %68 : vector<1x2x512xf32> to vector<2x512xf32>
      %70 = vector.shape_cast %67 : vector<2x512xf32> to vector<1x2x512xf32>
      tpu.vector_store %arg8[%c0_38, %c0_39, %c0_40], %70 {strides = array<i32>} : memref<1x2x512xf32, #tpu.memory_space<vmem>>, vector<1x2x512xf32>,
    } else {
    }
    %48 = arith.truncf %21 : vector<8x512xf32> to vector<8x512xbf16>
    %c0_25 = arith.constant 0 : index
    %c0_26 = arith.constant 0 : index
    %c0_27 = arith.constant 0 : index
    %49 = vector.load %arg7[%c0_25, %c0_26, %c0_27] : memref<1x8x512xbf16, #tpu.memory_space<vmem>>, vector<1x8x512xbf16>
    %50 = vector.shape_cast %49 : vector<1x8x512xbf16> to vector<8x512xbf16>
    %51 = vector.shape_cast %48 : vector<8x512xbf16> to vector<1x8x512xbf16>
    tpu.vector_store %arg7[%c0_25, %c0_26, %c0_27], %51 {strides = array<i32>} : memref<1x8x512xbf16, #tpu.memory_space<vmem>>, vector<1x8x512xbf16>,
    return
  }
  func.func @transform_0(%arg0: i32, %arg1: i32, %arg2: i32) -> (i32, i32, i32) {
    %c0_i32 = arith.constant 0 : i32
    %c0_i32_0 = arith.constant 0 : i32
    %c0_i32_1 = arith.constant 0 : i32
    return %arg0, %c0_i32, %c0_i32_0 : i32, i32, i32
  }
  func.func @transform_1(%arg0: i32, %arg1: i32, %arg2: i32) -> (i32, i32, i32) {
    %c0_i32 = arith.constant 0 : i32
    %c0_i32_0 = arith.constant 0 : i32
    return %arg0, %arg2, %c0_i32 : i32, i32, i32
  }
  func.func @transform_2(%arg0: i32, %arg1: i32, %arg2: i32) -> (i32, i32) {
    %c0_i32 = arith.constant 0 : i32
    %c0_i32_0 = arith.constant 0 : i32
    return %c0_i32, %arg1 : i32, i32
  }
  func.func @transform_3(%arg0: i32, %arg1: i32, %arg2: i32) -> (i32, i32) {
    %c0_i32 = arith.constant 0 : i32
    %c0_i32_0 = arith.constant 0 : i32
    return %c0_i32, %arg1 : i32, i32
  }
  func.func @transform_4(%arg0: i32, %arg1: i32, %arg2: i32) -> (i32, i32, i32) {
    %c0_i32 = arith.constant 0 : i32
    return %arg0, %arg2, %arg1 : i32, i32, i32
  }
  func.func @transform_5(%arg0: i32, %arg1: i32, %arg2: i32) -> (i32, i32, i32) {
    %c0_i32 = arith.constant 0 : i32
    %c0_i32_0 = arith.constant 0 : i32
    return %arg0, %c0_i32, %arg1 : i32, i32, i32
  }
}

module attributes {stable_mosaic.version = 11 : i64} {
  func.func @kernel(%arg0: i32, %arg1: i32, %arg2: i32, %arg3: memref<1x2x4608xf32, #tpu.memory_space<vmem>>, %arg4: memref<1x8x4608xbf16, #tpu.memory_space<vmem>>, %arg5: memref<4608x128xbf16, #tpu.memory_space<vmem>>, %arg6: memref<1x128xf32, #tpu.memory_space<vmem>>, %arg7: memref<1x8x128xf32, #tpu.memory_space<vmem>>) attributes {dimension_semantics = [#tpu.dimension_semantics<parallel>, #tpu.dimension_semantics<parallel>, #tpu.dimension_semantics<parallel>], iteration_bounds = array<i64: 2, 1, 1>, scalar_prefetch = 0 : i64, scratch_operands = 0 : i64, tpu.core_type = #tpu.core_type<tc>, window_params = [{transform_indices = @transform_0, window_bounds = array<i64: 1, 2, 4608>}, {transform_indices = @transform_1, window_bounds = array<i64: 1, 8, 4608>}, {transform_indices = @transform_2, window_bounds = array<i64: 4608, 128>}, {transform_indices = @transform_3, window_bounds = array<i64: 1, 128>}, {transform_indices = @transform_4, window_bounds = array<i64: 1, 8, 128>}]} {
    %c0 = arith.constant 0 : index
    %c0_0 = arith.constant 0 : index
    %c0_1 = arith.constant 0 : index
    %0 = vector.load %arg4[%c0, %c0_0, %c0_1] : memref<1x8x4608xbf16, #tpu.memory_space<vmem>>, vector<1x8x4608xbf16>
    %1 = vector.shape_cast %0 : vector<1x8x4608xbf16> to vector<8x4608xbf16>
    %2 = arith.extf %1 : vector<8x4608xbf16> to vector<8x4608xf32>
    %c0_2 = arith.constant 0 : index
    %c0_3 = arith.constant 0 : index
    %c0_4 = arith.constant 0 : index
    %3 = vector.load %arg3[%c0_2, %c0_3, %c0_4] : memref<1x2x4608xf32, #tpu.memory_space<vmem>>, vector<1x1x4608xf32>
    %4 = vector.shape_cast %3 : vector<1x1x4608xf32> to vector<1x4608xf32>
    %5 = vector.broadcast %4 : vector<1x4608xf32> to vector<8x4608xf32>
    %6 = arith.subf %2, %5 : vector<8x4608xf32>
    %c0_5 = arith.constant 0 : index
    %c1 = arith.constant 1 : index
    %c0_6 = arith.constant 0 : index
    %7 = vector.load %arg3[%c0_5, %c1, %c0_6] : memref<1x2x4608xf32, #tpu.memory_space<vmem>>, vector<1x1x4608xf32>
    %8 = vector.shape_cast %7 : vector<1x1x4608xf32> to vector<1x4608xf32>
    %9 = vector.broadcast %8 : vector<1x4608xf32> to vector<8x4608xf32>
    %10 = arith.mulf %6, %9 : vector<8x4608xf32>
    %cst = arith.constant 0.000000e+00 : f32
    %11 = vector.broadcast %cst : f32 to vector<8x4608xf32>
    %12 = arith.cmpf ogt, %10, %11 : vector<8x4608xf32>
    %cst_7 = arith.constant 2.000000e-01 : f32
    %13 = vector.broadcast %cst_7 : f32 to vector<8x4608xf32>
    %14 = arith.mulf %13, %10 : vector<8x4608xf32>
    %15 = arith.select %12, %10, %14 : vector<8x4608xi1>, vector<8x4608xf32>
    %16 = arith.truncf %15 : vector<8x4608xf32> to vector<8x4608xbf16>
    %c0_8 = arith.constant 0 : index
    %c0_9 = arith.constant 0 : index
    %17 = vector.load %arg5[%c0_8, %c0_9] : memref<4608x128xbf16, #tpu.memory_space<vmem>>, vector<4608x128xbf16>
    %cst_10 = arith.constant dense<0.000000e+00> : vector<8x128xf32>
    %18 = tpu.matmul %16, %17, %cst_10 {dimension_numbers = #tpu.dot_dimension_numbers<[1], [0], [0], [1], [0, 0, 1, 1], [], []>} : vector<8x4608xbf16>, vector<4608x128xbf16>, vector<8x128xf32> -> vector<8x128xf32>
    %c0_11 = arith.constant 0 : index
    %c0_12 = arith.constant 0 : index
    %19 = vector.load %arg6[%c0_11, %c0_12] : memref<1x128xf32, #tpu.memory_space<vmem>>, vector<1x128xf32>
    %20 = vector.broadcast %19 : vector<1x128xf32> to vector<8x128xf32>
    %21 = arith.addf %18, %20 : vector<8x128xf32>
    %c0_13 = arith.constant 0 : index
    %c0_14 = arith.constant 0 : index
    %c0_15 = arith.constant 0 : index
    %22 = vector.load %arg7[%c0_13, %c0_14, %c0_15] : memref<1x8x128xf32, #tpu.memory_space<vmem>>, vector<1x8x128xf32>
    %23 = vector.shape_cast %22 : vector<1x8x128xf32> to vector<8x128xf32>
    %24 = vector.shape_cast %21 : vector<8x128xf32> to vector<1x8x128xf32>
    tpu.vector_store %arg7[%c0_13, %c0_14, %c0_15], %24 {strides = array<i32>} : memref<1x8x128xf32, #tpu.memory_space<vmem>>, vector<1x8x128xf32>,
    return
  }
  func.func @transform_0(%arg0: i32, %arg1: i32, %arg2: i32) -> (i32, i32, i32) {
    %c0_i32 = arith.constant 0 : i32
    %c0_i32_0 = arith.constant 0 : i32
    %c0_i32_1 = arith.constant 0 : i32
    return %arg0, %c0_i32, %c0_i32_0 : i32, i32, i32
  }
  func.func @transform_1(%arg0: i32, %arg1: i32, %arg2: i32) -> (i32, i32, i32) {
    %c0_i32 = arith.constant 0 : i32
    %c0_i32_0 = arith.constant 0 : i32
    return %arg0, %arg2, %c0_i32 : i32, i32, i32
  }
  func.func @transform_2(%arg0: i32, %arg1: i32, %arg2: i32) -> (i32, i32) {
    %c0_i32 = arith.constant 0 : i32
    %c0_i32_0 = arith.constant 0 : i32
    return %c0_i32, %arg1 : i32, i32
  }
  func.func @transform_3(%arg0: i32, %arg1: i32, %arg2: i32) -> (i32, i32) {
    %c0_i32 = arith.constant 0 : i32
    %c0_i32_0 = arith.constant 0 : i32
    return %c0_i32, %arg1 : i32, i32
  }
  func.func @transform_4(%arg0: i32, %arg1: i32, %arg2: i32) -> (i32, i32, i32) {
    %c0_i32 = arith.constant 0 : i32
    return %arg0, %arg2, %arg1 : i32, i32, i32
  }
}

</mosaic_0001>

<bundles_post_ra>
// kernel: tile.19
= control target key start
LH: loop header
LB: loop body
LE: loop exit
PB: predicated region body
PF: predicated region fallthrough
CT: control target
= control target key end

     0   :  { %s6_s8 = smov 3  ;;  %s23_s13 = smov 3  ;;  %s279_s0 = inlined_call_operand.vmem [shape: f32[2,2,9,128], index: 0, kind: input, shape index: {}]   ;;  %s280_s1 = inlined_call_operand.vmem [shape: f32[2,2,1152], index: 1, kind: output, shape index: {}]  }
   0x1   :  { %v2_v0 = vld [vmem:[%s279_s0] sm:$0xff]   ;;  %v176_v1 = vld [vmem:[%s279_s0 + $0x11] sm:$0xff]  }
   0x2   :  { %v177_v2 = vld [vmem:[%s279_s0 + $0x20] sm:$0xff]   ;;  %3 = vst [vmem:[#allocation0] ss:$8 sm:$0xf] %v2_v0   ;;  %v179_v5 = vld [vmem:[%s279_s0 + $0x31] sm:$0xff]  }
   0x3   :  { %4 = vst [vmem:[#allocation0] ss:$8 sm:$0xf0] %v2_v0   ;;  %v175_v3 = vld [vmem:[%s279_s0 + $0x8] ss:$8 sm:%s6_s8]  }
   0x4   :  { %13 = vst [vmem:[#allocation0 + $0x9] ss:$8 sm:$0xf] %v176_v1   ;;  %15 = vst [vmem:[#allocation0 + $0x9] ss:$8 sm:$0xf0] %v176_v1  }
   0x5   :  { %19 = vst [vmem:[#allocation0 + $0x48] ss:$8 sm:$0xf] %v177_v2   ;;  %21 = vst [vmem:[#allocation0 + $0x48] ss:$8 sm:$0xf0] %v177_v2  }
   0x6   :  { %v178_v4 = vld [vmem:[%s279_s0 + $0x28] ss:$8 sm:%s23_s13]   ;;  %9 = vst [vmem:[#allocation0 + $0x40] ss:$-63 sm:$0x3] %v175_v3  }
   0x7   :  { %26 = vst [vmem:[#allocation0 + $0x88] ss:$-63 sm:$0x3] %v178_v4   ;;  %30 = vst [vmem:[#allocation0 + $0x51] ss:$8 sm:$0xf] %v179_v5  }
   0x8   :  { %32 = vst [vmem:[#allocation0 + $0x51] ss:$8 sm:$0xf0] %v179_v5  }
   0xb   :  { %v42_v6 = vld [vmem:[#allocation0 + $0x8] sm:$0x3]  ;;  %v48_v7 = vld [vmem:[#allocation0 + $0x10] sm:$0x3]  ;;  %v55_v8 = vld [vmem:[#allocation0 + $0x18] sm:$0x3] }
   0xc   :  { %180 = vst [vmem:[%s280_s1 + $0x2] sm:$0x3] %v42_v6  ;;  %181 = vst [vmem:[%s280_s1 + $0x4] sm:$0x3] %v48_v7  ;;  %v62_v10 = vld [vmem:[#allocation0 + $0x20] sm:$0x3] }
   0xd   :  { %v37_v9 = vld [vmem:[#allocation0] sm:$0x3]  ;;  %182 = vst [vmem:[%s280_s1 + $0x6] sm:$0x3] %v55_v8  ;;  %v69_v11 = vld [vmem:[#allocation0 + $0x28] sm:$0x3] }
   0xe   :  { %40 = vst [vmem:[%s280_s1] sm:$0x3] %v37_v9  ;;  %183 = vst [vmem:[%s280_s1 + $0x8] sm:$0x3] %v62_v10  ;;  %v76_v12 = vld [vmem:[#allocation0 + $0x30] sm:$0x3] }
   0xf   :  { %184 = vst [vmem:[%s280_s1 + $0xa] sm:$0x3] %v69_v11  ;;  %v83_v13 = vld [vmem:[#allocation0 + $0x38] sm:$0x3]  ;;  %v90_v14 = vld [vmem:[#allocation0 + $0x40] sm:$0x3] }
  0x10   :  { %185 = vst [vmem:[%s280_s1 + $0xc] sm:$0x3] %v76_v12  ;;  %186 = vst [vmem:[%s280_s1 + $0xe] sm:$0x3] %v83_v13  ;;  %v97_v15 = vld [vmem:[#allocation0 + $0x48] sm:$0x3] }
  0x11   :  { %187 = vst [vmem:[%s280_s1 + $0x10] sm:$0x3] %v90_v14  ;;  %v104_v16 = vld [vmem:[#allocation0 + $0x50] sm:$0x3]  ;;  %v111_v17 = vld [vmem:[#allocation0 + $0x58] sm:$0x3] }
  0x12   :  { %188 = vst [vmem:[%s280_s1 + $0x12] sm:$0x3] %v97_v15  ;;  %189 = vst [vmem:[%s280_s1 + $0x14] sm:$0x3] %v104_v16  ;;  %v118_v18 = vld [vmem:[#allocation0 + $0x60] sm:$0x3] }
  0x13   :  { %190 = vst [vmem:[%s280_s1 + $0x16] sm:$0x3] %v111_v17  ;;  %v125_v19 = vld [vmem:[#allocation0 + $0x68] sm:$0x3]  ;;  %v132_v20 = vld [vmem:[#allocation0 + $0x70] sm:$0x3] }
  0x14   :  { %191 = vst [vmem:[%s280_s1 + $0x18] sm:$0x3] %v118_v18  ;;  %192 = vst [vmem:[%s280_s1 + $0x1a] sm:$0x3] %v125_v19  ;;  %v139_v21 = vld [vmem:[#allocation0 + $0x78] sm:$0x3] }
  0x15   :  { %193 = vst [vmem:[%s280_s1 + $0x1c] sm:$0x3] %v132_v20  ;;  %v146_v22 = vld [vmem:[#allocation0 + $0x80] sm:$0x3]  ;;  %v153_v23 = vld [vmem:[#allocation0 + $0x88] sm:$0x3] }
  0x16   :  { %194 = vst [vmem:[%s280_s1 + $0x1e] sm:$0x3] %v139_v21  ;;  %195 = vst [vmem:[%s280_s1 + $0x20] sm:$0x3] %v146_v22 }
  0x17   :  { %196 = vst [vmem:[%s280_s1 + $0x22] sm:$0x3] %v153_v23 }

// kernel: conditional_discriminator_forward.5
= control target key start
LH: loop header
LB: loop body
LE: loop exit
PB: predicated region body
PF: predicated region fallthrough
CT: control target
= control target key end

     0   :  { %8 = vsyncpa [#allocation3], 0  ;;  %s943_s0 = inlined_call_operand.vmem [shape: bf16[2,64,36], index: 0, kind: input, shape index: {}]   ;;  %s944_s1 = inlined_call_operand.hbm [shape: bf16[36,64], index: 1, kind: input, shape index: {}]   ;;  %s945_s2 = inlined_call_operand.hbm [shape: f32[1,64], index: 2, kind: input, shape index: {}]   ;;  %s946_s3 = inlined_call_operand.vmem [shape: bf16[2,64,64], index: 3, kind: output, shape index: {}]  }
   0x1   :  { %9 = vsyncpa [#allocation5], 0  ;;  %s832_s12 = smov 0   ;;  %s834_s13 = smov 0  }
   0x2   :  { %s836_s14 = smov 0  }
   0x3 LB: > { %s596_s15 = sadd.s32 4294967295, %s806_s14   ;;  %s34_s16 = sadd.s32 1, %s802_s13  ;;  %s806_s14 = sphi %s836_s14, %s15_s14   ;;  %s802_s13 = sphi %s834_s13, %s951_s13   ;;  %s798_s12 = sphi %s832_s12, %s950_s12  }
   0x4   : > { %p36_p0 = scmp.ge.s32.totalorder %s34_s16, 2  ;;  %p598_p1 = scmp.ge.s32.totalorder %s806_s14, 1 }
   0x5   : > { %p149_p2 = scmp.lt.s32.totalorder %s806_s14, 3  ;;  %p857_p4 = scmp.eq.s32.totalorder %s596_s15, 0 }
   0x6   : > { %s953_s16 = smov (%p36_p0, %s34_s16), 0  ;;  %s808_s19 = smov [#allocation2]  }
   0x7   : > { %p853_p3 = pnand %p598_p1, %p149_p2  ;;  %s163_s20 = sshll.u32 %s808_s19, 4  ;;  %s164_s20 = int_to_ptr.vmem [resolvable:$true] %s163_s20 }
   0x8   : > { %s809_s22 = smov [#allocation4]   ;;  %s735_s24 = scalar_lea.vmem %s164_s20, 320 }
   0x9   : > { %p678_p5 = pneg %p853_p3  ;;  %s179_s23 = sshll.u32 %s809_s22, 4  ;;  %s180_s23 = int_to_ptr.vmem [resolvable:$true] %s179_s23 }
   0xa   : > { %p736_p8 = scmp.ne.s32.totalorder %s164_s20, %s735_s24  ;;  %p743_p11 = scmp.lt.s32.totalorder %s164_s20, %s164_s20 }
   0xb   : > { %p865_p6 = pnand %p857_p4, %p678_p5  ;;  %p744_p12 = scmp.lt.s32.totalorder %s735_s24, %s735_s24 }
   0xd   : > { %p726_p7 = pneg %p865_p6  ;;  %p745_p13 = por %p744_p12, %p743_p11 }
   0xf   : > { %p738_p9 = pnand %p736_p8, %p726_p7 }
  0x11   : > { %p739_p10 = pneg %p738_p9 }
  0x13   : > { %p746_p0 = pnand %p745_p13, %p739_p10 }
  0x15   : > { %749 = shalt.err (!%p746_p0)
}
  0x16   : > { %s810_s25 = smov 64   ;;  %s811_s26 = smov 4  }
  0x17   : > { %681 = dma.hbm_to_vmem [thread:$0]  (!%p865_p6), %s944_s1, 320, %s164_s20, [#allocation3], %s810_s25, %s810_s25, %s811_s26  }
  0x18   : > { %s761_s29 = scalar_lea.vmem %s180_s23, 16  ;;  %s768_s30 = scalar_lea.vmem %s180_s23, 32 }
  0x19   : > { %p762_p1 = scmp.ne.s32.totalorder %s180_s23, %s761_s29  ;;  %p769_p8 = scmp.lt.s32.totalorder %s180_s23, %s180_s23 }
  0x1a   : > { %p770_p9 = scmp.lt.s32.totalorder %s768_s30, %s761_s29 }
  0x1b   : > { %p764_p2 = pnand %p762_p1, %p726_p7 }
  0x1c   : > { %p771_p10 = por %p770_p9, %p769_p8 }
  0x1d   : > { %p765_p5 = pneg %p764_p2 }
  0x1f   : > { %p772_p11 = pnand %p771_p10, %p765_p5 }
  0x21   : > { %775 = shalt.err (!%p772_p11)
}
  0x22   : > { %684 = dma.hbm_to_vmem [thread:$0]  (!%p865_p6), %s945_s2, 16, %s180_s23, [#allocation5]  }
  0x23   : > { %205 = sbr.rel (%p853_p3) target bundleno = 266 (0x10a), region = 32 }
  0x28   : > { %789 = dma.done.wait (%p857_p4), [#allocation3], 320  }
  0x29   : > { %791 = vsyncadd (%p857_p4), [#allocation3], 4294966976 }
  0x2a   : > { %793 = dma.done.wait (%p857_p4), [#allocation5], 16  }
  0x2b   : > { %795 = vsyncadd (%p857_p4), [#allocation5], 4294967280  ;;  %p245_p7 = scmp.lt.s32.totalorder %s798_s12, 1  ;;  %vm336_vm0 = vcmask 1041408   ;;  %vm323_vm1 = vcmask 293888   ;;  %v718_v1 = vld [vmem:[#allocation2 + $0x8] sm:$0xff]  }
  0x2c   : > { %v717_v0 = vld [vmem:[#allocation2 + $0x10] ss:$0 sps:$4 sm:$0x33]   ;;  %v719_v3 = vld [vmem:[#allocation2] sm:$0xff]   ;;  %v609_v8 = vld [vmem:[#allocation4] ss:$0 sm:$0xff] }
  0x2d   : > { %s955_s12 = smov (!%p245_p7, %s798_s12), 1  ;;  %668 = vmatprep.subr.msk.bf16.mxu0 %vm336_vm0, %v717_v0  ;;  %669 = vmatprep.subr.msk.bf16.mxu1 %vm336_vm0, %v717_v0  ;;  %v338_v2 = vsel %vm336_vm0, %v717_v0, 0  ;;  %vm461_vm4 = vcmask 519168  }
  0x2e   : > { %s631_s6 = sshll.u32 %s955_s12, 5  ;;  %649 = vmatpush3.bf16.msra.mxu0 %v338_v2  ;;  %665 = vmatpush3.bf16.msra.mxu1 %v338_v2 }
  0x2f   : > { %s252_s9 = scalar_lea.vmem %s943_s0, %s631_s6  ;;  %650 = vmatprep.subr.bf16.mxu0 %v718_v1  ;;  %663 = vmatprep.subr.bf16.mxu1 %v718_v1  ;;  %s916_s15 = scalar_lea.vmem %s946_s3, %s631_s6 }
  0x30   : > { %v720_v4 = vld [vmem:[%s252_s9] sm:$0xff]   ;;  %v721_v5 = vld [vmem:[%s252_s9 + $0x10] sm:$0xff]   ;;  %v722_v6 = vld [vmem:[%s252_s9 + $0x8] sm:$0xff]  }
  0x31   : > { %654 = vmatprep.mubr.msk.bf16.mxu0 %vm323_vm1, %v720_v4  ;;  %658 = vmatprep.mubr.msk.bf16.mxu1 %vm323_vm1, %v721_v5  ;;  %v723_v7 = vld [vmem:[%s252_s9 + $0x18] sm:$0xff]  }
  0x32   : > { %651 = vmatpush3.bf16.msra.mxu0 %v718_v1  ;;  %666 = vmatpush3.bf16.msra.mxu1 %v718_v1 }
  0x33   : > { %652 = vmatprep.subr.bf16.mxu0 %v719_v3  ;;  %664 = vmatprep.subr.bf16.mxu1 %v719_v3 }
  0x36   : > { %653 = vmatpush3.bf16.msra.mxu0 %v719_v3  ;;  %667 = vmatpush3.bf16.msra.mxu1 %v719_v3 }
  0x39   : > { %655 = vmatmul.mubr.msk.bf16.vlgmr.msra.gmra.mxu0 %vm323_vm1, %v722_v6  ;;  %659 = vmatmul.mubr.msk.bf16.vlgmr.msra.gmra.mxu1 %vm323_vm1, %v723_v7 }
  0xf9   : > { %v656_v9 = vpop.f32.mrf.mxu0  ;;  %v660_v10 = vpop.f32.mrf.mxu1 }
  0xfa   : > { %v383_v11 = vadd.f32 %v656_v9, %v609_v8  ;;  %v399_v12 = vadd.f32 %v660_v10, %v609_v8 }
  0xfb   : > { %v374_v13 = vpop.f32.mrf.mxu0  ;;  %v390_v14 = vpop.f32.mrf.mxu1 }
  0xfc   : > { %vm407_vm2 = vcmp.gt.f32.partialorder %v383_v11, 0.0  ;;  %v415_v15 = vmul.f32 0.2, %v383_v11  ;;  %vm411_vm3 = vcmp.gt.f32.partialorder %v399_v12, 0.0  ;;  %v419_v16 = vmul.f32 0.2, %v399_v12 }
  0xfd   : > { %v375_v17 = vadd.f32 %v609_v8, %v374_v13  ;;  %v391_v18 = vadd.f32 %v609_v8, %v390_v14  ;;  %v657_v19 = vpop.f32.mrf.mxu0  ;;  %v661_v20 = vpop.f32.mrf.mxu1 }
  0xfe   : > { %v423_v21 = vsel %vm407_vm2, %v383_v11, %v415_v15  ;;  %v427_v22 = vsel %vm411_vm3, %v399_v12, %v419_v16  ;;  %v386_v23 = vadd.f32 %v657_v19, %v609_v8  ;;  %v402_v24 = vadd.f32 %v661_v20, %v609_v8 }
  0xff   : > { %v635_v25 = vpack.c.bf16 %v423_v21, %v423_v21  ;;  %v639_v26 = vpack.c.bf16 %v427_v22, %v427_v22  ;;  %vm405_vm5 = vcmp.gt.f32.partialorder %v375_v17, 0.0  ;;  %v413_v27 = vmul.f32 0.2, %v375_v17  ;;  %v377_v28 = vpop.f32.mrf.mxu0  ;;  %v393_v29 = vpop.f32.mrf.mxu1 }
 0x100   : > { %vm409_vm6 = vcmp.gt.f32.partialorder %v391_v18, 0.0  ;;  %v417_v30 = vmul.f32 0.2, %v391_v18  ;;  %vm408_vm7 = vcmp.gt.f32.partialorder %v386_v23, 0.0  ;;  %v416_v31 = vmul.f32 0.2, %v386_v23 }
 0x101   : > { %464 = vst.msk [vmem:[%s916_s15 + $0x8] sm:$0xf] %vm461_vm4, %v635_v25  ;;  %468 = vst.msk [vmem:[%s916_s15 + $0x18] sm:$0xf] %vm461_vm4, %v639_v26  ;;  %v421_v32 = vsel %vm405_vm5, %v375_v17, %v413_v27  ;;  %vm412_vm8 = vcmp.gt.f32.partialorder %v402_v24, 0.0  ;;  %v378_v34 = vadd.f32 %v609_v8, %v377_v28  ;;  %v394_v38 = vadd.f32 %v609_v8, %v393_v29 }
 0x102   : > { %v420_v33 = vmul.f32 0.2, %v402_v24  ;;  %v633_v35 = vpack.c.bf16 %v421_v32, %v421_v32  ;;  %v425_v36 = vsel %vm409_vm6, %v391_v18, %v417_v30  ;;  %v424_v37 = vsel %vm408_vm7, %v386_v23, %v416_v31 }
 0x103   : > { %v637_v39 = vpack.c.bf16 %v425_v36, %v425_v36  ;;  %v636_v40 = vpack.c.bf16 %v424_v37, %v424_v37  ;;  %vm406_vm9 = vcmp.gt.f32.partialorder %v378_v34, 0.0  ;;  %v414_v43 = vmul.f32 0.2, %v378_v34 }
 0x104   : > { %v428_v41 = vsel %vm412_vm8, %v402_v24, %v420_v33  ;;  %462 = vst.msk [vmem:[%s916_s15] sm:$0xf] %vm461_vm4, %v633_v35  ;;  %vm410_vm10 = vcmp.gt.f32.partialorder %v394_v38, 0.0  ;;  %v418_v44 = vmul.f32 0.2, %v394_v38 }
 0x105   : > { %v640_v42 = vpack.c.bf16 %v428_v41, %v428_v41  ;;  %466 = vst.msk [vmem:[%s916_s15 + $0x10] sm:$0xf] %vm461_vm4, %v637_v39  ;;  %465 = vst.msk [vmem:[%s916_s15 + $0xc] sm:$0xf] %vm461_vm4, %v636_v40  ;;  %v422_v45 = vsel %vm406_vm9, %v378_v34, %v414_v43 }
 0x106   : > { %v426_v46 = vsel %vm410_vm10, %v394_v38, %v418_v44  ;;  %v634_v47 = vpack.c.bf16 %v422_v45, %v422_v45 }
 0x107   : > { %469 = vst.msk [vmem:[%s916_s15 + $0x1c] sm:$0xf] %vm461_vm4, %v640_v42  ;;  %v638_v48 = vpack.c.bf16 %v426_v46, %v426_v46 }
 0x108   : > { %463 = vst.msk [vmem:[%s916_s15 + $0x4] sm:$0xf] %vm461_vm4, %v634_v47 }
 0x109   : > { %467 = vst.msk [vmem:[%s916_s15 + $0x14] sm:$0xf] %vm461_vm4, %v638_v48 }
 0x10a PF: > { %s15_s14 = sadd.s32 1, %s806_s14   ;;  %s950_s12 = smov %s802_s13 }
 0x10b   : > { %p12_p3 = scmp.ge.s32.totalorder %s15_s14, 4   ;;  %s951_s13 = smov %s953_s16 }
 0x10d   :  { %14 = sbr.rel (!%p12_p3) target bundleno = 3 (0x3), region = 73 }
 0x112   :  { %506 = vsyncpa [#allocation3], 1 }
 0x113   :  { %508 = vsyncpa [#allocation3 + $0x1], 1 }
 0x114   :  { %509 = vsyncpa [#allocation5], 1 }

// kernel: conditional_discriminator_forward.6
= control target key start
LH: loop header
LB: loop body
LE: loop exit
PB: predicated region body
PF: predicated region fallthrough
CT: control target
= control target key end

     0   :  { %10 = vsyncpa [#allocation3], 0  ;;  %s1438_s0 = inlined_call_operand.vmem [shape: bf16[2,16,576], index: 0, kind: input, shape index: {}]   ;;  %s1439_s1 = inlined_call_operand.hbm [shape: bf16[576,128], index: 1, kind: input, shape index: {}]   ;;  %s1440_s2 = inlined_call_operand.hbm [shape: f32[1,128], index: 2, kind: input, shape index: {}]   ;;  %s1441_s3 = inlined_call_operand.vmem [shape: bf16[2,16,128], index: 3, kind: output, shape index: {0}]   ;;  %s1442_s4 = inlined_call_operand.vmem [shape: f32[2,2,128], index: 4, kind: output, shape index: {1}]  }
   0x1   :  { %11 = vsyncpa [#allocation5], 0  ;;  %s1332_s15 = smov 0   ;;  %s1334_s16 = smov 0  }
   0x2   :  { %s1336_s17 = smov 0  }
   0x3 LB: > { %s993_s18 = sadd.s32 4294967295, %s1299_s17   ;;  %s36_s19 = sadd.s32 1, %s1295_s16  ;;  %s1299_s17 = sphi %s1336_s17, %s17_s17   ;;  %s1295_s16 = sphi %s1334_s16, %s1447_s16   ;;  %s1291_s15 = sphi %s1332_s15, %s1446_s15  }
   0x4   : > { %p38_p0 = scmp.ge.s32.totalorder %s36_s19, 2  ;;  %p995_p1 = scmp.ge.s32.totalorder %s1299_s17, 1 }
   0x5   : > { %p179_p2 = scmp.lt.s32.totalorder %s1299_s17, 3  ;;  %p1357_p4 = scmp.eq.s32.totalorder %s993_s18, 0 }
   0x6   : > { %s1449_s19 = smov (%p38_p0, %s36_s19), 0  ;;  %s1301_s22 = smov [#allocation2]  }
   0x7   : > { %p1353_p3 = pnand %p995_p1, %p179_p2  ;;  %s193_s23 = sshll.u32 %s1301_s22, 4  ;;  %s194_s23 = int_to_ptr.vmem [resolvable:$true] %s193_s23 }
   0x8   : > { %s1302_s25 = smov [#allocation4]   ;;  %s1228_s27 = scalar_lea.vmem %s194_s23, 4608 }
   0x9   : > { %p1131_p5 = pneg %p1353_p3  ;;  %s209_s26 = sshll.u32 %s1302_s25, 4  ;;  %s210_s26 = int_to_ptr.vmem [resolvable:$true] %s209_s26 }
   0xa   : > { %p1229_p8 = scmp.ne.s32.totalorder %s194_s23, %s1228_s27  ;;  %p1236_p11 = scmp.lt.s32.totalorder %s194_s23, %s194_s23 }
   0xb   : > { %p1365_p6 = pnand %p1357_p4, %p1131_p5  ;;  %p1237_p12 = scmp.lt.s32.totalorder %s1228_s27, %s1228_s27 }
   0xd   : > { %p1219_p7 = pneg %p1365_p6  ;;  %p1238_p13 = por %p1237_p12, %p1236_p11 }
   0xf   : > { %p1231_p9 = pnand %p1229_p8, %p1219_p7 }
  0x11   : > { %p1232_p10 = pneg %p1231_p9 }
  0x13   : > { %p1239_p0 = pnand %p1238_p13, %p1232_p10 }
  0x15   : > { %1242 = shalt.err (!%p1239_p0)
}
  0x16   : > { %s1303_s28 = smov 64   ;;  %s1304_s29 = smov 4  }
  0x17   : > { %1134 = dma.hbm_to_vmem [thread:$0]  (!%p1365_p6), %s1439_s1, 4608, %s194_s23, [#allocation3], %s1303_s28, %s1303_s28, %s1304_s29  }
  0x18   : > { %s1254_s6 = scalar_lea.vmem %s210_s26, 16  ;;  %s1261_s7 = scalar_lea.vmem %s210_s26, 32 }
  0x19   : > { %p1255_p1 = scmp.ne.s32.totalorder %s210_s26, %s1254_s6  ;;  %p1262_p8 = scmp.lt.s32.totalorder %s210_s26, %s210_s26 }
  0x1a   : > { %p1263_p9 = scmp.lt.s32.totalorder %s1261_s7, %s1254_s6 }
  0x1b   : > { %p1257_p2 = pnand %p1255_p1, %p1219_p7 }
  0x1c   : > { %p1264_p10 = por %p1263_p9, %p1262_p8 }
  0x1d   : > { %p1258_p5 = pneg %p1257_p2 }
  0x1f   : > { %p1265_p11 = pnand %p1264_p10, %p1258_p5 }
  0x21   : > { %1268 = shalt.err (!%p1265_p11)
}
  0x22   : > { %1137 = dma.hbm_to_vmem [thread:$0]  (!%p1365_p6), %s1440_s2, 16, %s210_s26, [#allocation5]  }
  0x23   : > { %236 = sbr.rel (%p1353_p3) target bundleno = 346 (0x15a), region = 32 }
  0x28   : > { %1282 = dma.done.wait (%p1357_p4), [#allocation3], 4608  }
  0x29   : > { %1284 = vsyncadd (%p1357_p4), [#allocation3], 4294962688 }
  0x2a   : > { %1286 = dma.done.wait (%p1357_p4), [#allocation5], 16  }
  0x2b   : > { %1288 = vsyncadd (%p1357_p4), [#allocation5], 4294967280  ;;  %p286_p7 = scmp.lt.s32.totalorder %s1291_s15, 1  ;;  %v1305_v0 = vmov 0.0   ;;  %v1172_v1 = vld [vmem:[#allocation2 + $0x78] sm:$0xff]   ;;  %v1176_v5 = vld [vmem:[#allocation2 + $0x70] sm:$0xff]  }
  0x2c   : > { %v1173_v2 = vld [vmem:[#allocation2 + $0x38] sm:$0xff]   ;;  %1061 = vmatprep.subr.bf16.mxu0 %v1172_v1  ;;  %v1177_v6 = vld [vmem:[#allocation2 + $0x30] sm:$0xff]   ;;  %v1180_v9 = vld [vmem:[#allocation2 + $0x68] sm:$0xff]   ;;  %vm1306_vm0 = vmmov 0   ;;  %vm643_vm1 = vcmask 523264   ;;  %vm786_vm2 = vcmask 1040384  }
  0x2d   : > { %s1451_s15 = smov (!%p286_p7, %s1291_s15), 1  ;;  %v1174_v3 = vld [vmem:[#allocation2 + $0xf8] sm:$0xff]   ;;  %1062 = vmatpush3.bf16.msra.mxu0 %v1173_v2  ;;  %v1178_v7 = vld [vmem:[#allocation2 + $0xf0] sm:$0xff]   ;;  %v1181_v10 = vld [vmem:[#allocation2 + $0x28] sm:$0xff]  }
  0x2e   : > { %s1005_s10 = sshll.u32 %s1451_s15, 1  ;;  %v1175_v4 = vld [vmem:[#allocation2 + $0xb8] sm:$0xff]   ;;  %1083 = vmatprep.subr.bf16.mxu1 %v1174_v3  ;;  %1063 = vmatprep.subr.bf16.mxu0 %v1176_v5  ;;  %v1179_v8 = vld [vmem:[#allocation2 + $0xb0] sm:$0xff]   ;;  %v1182_v11 = vld [vmem:[#allocation2 + $0xe8] sm:$0xff]   ;;  %s1122_s14 = smul.u32 40, %s1451_s15 }
  0x2f   : > { %s1405_s13 = scalar_lea.vmem %s1442_s4, %s1005_s10  ;;  %1084 = vmatpush3.bf16.msra.mxu1 %v1175_v4  ;;  %v1183_v12 = vld [vmem:[#allocation2 + $0xa8] sm:$0xff]   ;;  %v1184_v13 = vld [vmem:[#allocation2 + $0x60] sm:$0xff]   ;;  %v1188_v17 = vld [vmem:[#allocation2 + $0x58] sm:$0xff]   ;;  %s1053_s22 = sshll.u32 %s1451_s15, 3 }
  0x30   : > { %792 = vst [vmem:[%s1405_s13] sm:$0x3] %v1305_v0  ;;  %1085 = vmatprep.subr.bf16.mxu1 %v1178_v7  ;;  %v1185_v14 = vld [vmem:[#allocation2 + $0x20] sm:$0xff]   ;;  %v1189_v18 = vld [vmem:[#allocation2 + $0x18] sm:$0xff]   ;;  %v1192_v21 = vld [vmem:[#allocation2 + $0x50] sm:$0xff]   ;;  %s294_s21 = scalar_lea.vmem %s1438_s0, %s1122_s14  ;;  %s307_s25 = scalar_lea.vmem %s1441_s3, %s1053_s22 }
  0x31   : > { %1064 = vmatpush3.bf16.msra.mxu0 %v1177_v6  ;;  %v1186_v15 = vld [vmem:[#allocation2 + $0xe0] sm:$0xff]   ;;  %v1190_v19 = vld [vmem:[#allocation2 + $0xd8] sm:$0xff]   ;;  %v1193_v22 = vld [vmem:[#allocation2 + $0x10] sm:$0xff]  }
  0x32   : > { %1065 = vmatprep.subr.bf16.mxu0 %v1180_v9  ;;  %v1187_v16 = vld [vmem:[#allocation2 + $0xa0] sm:$0xff]   ;;  %v1191_v20 = vld [vmem:[#allocation2 + $0x98] sm:$0xff]   ;;  %v1194_v23 = vld [vmem:[#allocation2 + $0xd0] sm:$0xff]  }
  0x33   : > { %1086 = vmatpush3.bf16.msra.mxu1 %v1179_v8  ;;  %v1195_v24 = vld [vmem:[#allocation2 + $0x90] sm:$0xff]   ;;  %v1196_v25 = vld [vmem:[#allocation2 + $0x48] sm:$0xff]   ;;  %v1200_v29 = vld [vmem:[#allocation2 + $0x40] sm:$0xff]  }
  0x34   : > { %1087 = vmatprep.subr.bf16.mxu1 %v1182_v11  ;;  %v1197_v26 = vld [vmem:[#allocation2 + $0x8] sm:$0xff]   ;;  %v1201_v30 = vld [vmem:[#allocation2] sm:$0xff]   ;;  %v1210_v37 = vld [vmem:[#allocation2 + $0x118] sm:$0xff]  }
  0x35   : > { %1066 = vmatpush3.bf16.msra.mxu0 %v1181_v10  ;;  %v1198_v27 = vld [vmem:[#allocation2 + $0xc8] sm:$0xff]   ;;  %v1202_v31 = vld [vmem:[#allocation2 + $0xc0] sm:$0xff]   ;;  %v1211_v38 = vld [vmem:[#allocation2 + $0x110] sm:$0xff]  }
  0x36   : > { %1067 = vmatprep.subr.bf16.mxu0 %v1184_v13  ;;  %v1199_v28 = vld [vmem:[#allocation2 + $0x88] sm:$0xff]   ;;  %v1203_v32 = vld [vmem:[%s294_s21] ss:$20 sps:$4 sm:$0xff]   ;;  %v1205_v33 = vld [vmem:[%s294_s21 + $0x4] ss:$20 sps:$4 sm:$0xff]  }
  0x37   : > { %1088 = vmatpush3.bf16.msra.mxu1 %v1183_v12  ;;  %v1206_v34 = vld [vmem:[#allocation2 + $0x80] sm:$0xff]   ;;  %679 = vmatprep.mubr.bf16.mxu0 %v1205_v33  ;;  %v1207_v35 = vld [vmem:[%s294_s21 + $0x8] ss:$20 sps:$4 sm:$0xff]  }
  0x38   : > { %1089 = vmatprep.subr.bf16.mxu1 %v1186_v15  ;;  %v1209_v36 = vld [vmem:[%s294_s21 + $0xc] ss:$20 sps:$4 sm:$0xff]   ;;  %v1214_v41 = vld [vmem:[%s294_s21 + $0x10] ss:$20 sps:$4 sm:$0xff]  }
  0x39   : > { %1068 = vmatpush3.bf16.msra.mxu0 %v1185_v14  ;;  %720 = vmatprep.mubr.bf16.mxu1 %v1209_v36  ;;  %v1212_v39 = vld [vmem:[#allocation2 + $0x108] sm:$0xff]   ;;  %v1213_v40 = vld [vmem:[#allocation2 + $0x100] sm:$0xff]  }
  0x3a   : > { %1069 = vmatprep.subr.bf16.mxu0 %v1188_v17  ;;  %v1006_v50 = vld [vmem:[#allocation4] ss:$0 sm:$0xff] }
  0x3b   : > { %1090 = vmatpush3.bf16.msra.mxu1 %v1187_v16 }
  0x3c   : > { %1091 = vmatprep.subr.bf16.mxu1 %v1190_v19 }
  0x3d   : > { %1070 = vmatpush3.bf16.msra.mxu0 %v1189_v18  ;;  %v793_v18 = vld [vmem:[%s1405_s13] sm:$0x3] }
  0x3e   : > { %1071 = vmatprep.subr.bf16.mxu0 %v1192_v21 }
  0x3f   : > { %1092 = vmatpush3.bf16.msra.mxu1 %v1191_v20 }
  0x40   : > { %1093 = vmatprep.subr.bf16.mxu1 %v1194_v23 }
  0x41   : > { %1072 = vmatpush3.bf16.msra.mxu0 %v1193_v22 }
  0x42   : > { %1073 = vmatprep.subr.bf16.mxu0 %v1196_v25 }
  0x43   : > { %1094 = vmatpush3.bf16.msra.mxu1 %v1195_v24 }
  0x44   : > { %1095 = vmatprep.subr.bf16.mxu1 %v1198_v27 }
  0x45   : > { %1074 = vmatpush3.bf16.msra.mxu0 %v1197_v26 }
  0x46   : > { %1075 = vmatprep.subr.bf16.mxu0 %v1200_v29 }
  0x47   : > { %1096 = vmatpush3.bf16.msra.mxu1 %v1199_v28 }
  0x48   : > { %1097 = vmatprep.subr.bf16.mxu1 %v1202_v31 }
  0x49   : > { %1076 = vmatpush3.bf16.msra.mxu0 %v1201_v30 }
  0x4a   : > { %1110 = vmatprep.subr.bf16.mxu0 %v1305_v0 }
  0x4b   : > { %1098 = vmatpush3.bf16.msra.mxu1 %v1206_v34 }
  0x4c   : > { %680 = vmatmul.mubr.bf16.vlgmr.msra.gmra.mxu0 %v1203_v32 }
  0x4d   : > { %1118 = vmatprep.mubr.msk.bf16.mxu0 %vm1306_vm0, %v1305_v0  ;;  %1111 = vmatpush3.bf16.msra.mxu0 %v1210_v37 }
  0x4e   : > { %721 = vmatmul.mubr.bf16.vlgmr.msra.gmra.mxu1 %v1207_v35  ;;  %1112 = vmatprep.subr.bf16.mxu0 %v1305_v0 }
  0x51   : > { %1113 = vmatpush3.bf16.msra.mxu0 %v1211_v38 }
  0x52   : > { %1114 = vmatprep.subr.bf16.mxu0 %v1305_v0 }
  0x55   : > { %1115 = vmatpush3.bf16.msra.mxu0 %v1212_v39 }
  0x56   : > { %1116 = vmatprep.subr.bf16.mxu0 %v1305_v0 }
  0x59   : > { %1117 = vmatpush3.bf16.msra.mxu0 %v1213_v40 }
  0x5c   : > { %1119 = vmatmul.mubr.msk.bf16.vlgmr.msra.gmra.mxu0 %vm643_vm1, %v1214_v41 }
 0x10c   : > { %v1077_v42 = vpop.f32.mrf.mxu0 }
 0x10e   : > { %v1078_v43 = vpop.f32.mrf.mxu0  ;;  %v1099_v44 = vpop.f32.mrf.mxu1 }
 0x10f   : > { %v1079_v49 = vadd.f32 %v1078_v43, %v1077_v42 }
 0x110   : > { %v1080_v45 = vpop.f32.mrf.mxu0  ;;  %v1100_v46 = vpop.f32.mrf.mxu1 }
 0x111   : > { %v682_v53 = vadd.f32 %v1079_v49, %v1006_v50  ;;  %v1101_v54 = vadd.f32 %v1100_v46, %v1099_v44 }
 0x112   : > { %v1081_v47 = vpop.f32.mrf.mxu0  ;;  %v1102_v48 = vpop.f32.mrf.mxu1 }
 0x113   : > { %v1082_v51 = vadd.f32 %v1081_v47, %v1080_v45  ;;  %v723_v58 = vadd.f32 %v1101_v54, %v682_v53 }
 0x114   : > { %v1103_v52 = vpop.f32.mrf.mxu1 }
 0x115   : > { %v685_v55 = vadd.f32 %v1082_v51, %v1006_v50  ;;  %v1104_v56 = vadd.f32 %v1103_v52, %v1102_v48 }
 0x117   : > { %v726_v61 = vadd.f32 %v1104_v56, %v685_v55 }
 0x11c   : > { %v763_v57 = vpop.f32.mrf.mxu0 }
 0x11d   : > { %v764_v60 = vadd.f32 %v763_v57, %v723_v58 }
 0x11e   : > { %v1120_v59 = vpop.f32.mrf.mxu0 }
 0x11f   : > { %v777_v1 = vmul.f32 %v764_v60, %v764_v60 }
 0x120   : > { %v766_v62 = vpop.f32.mrf.mxu0 }
 0x121   : > { %v767_v63 = vadd.f32 %v766_v62, %v726_v61 }
 0x122   : > { %v1121_v0 = vpop.f32.mrf.mxu0 }
 0x123   : > { %v770_v2 = vadd.f32 %v767_v63, %v764_v60  ;;  %v778_v3 = vmul.f32 %v767_v63, %v767_v63  ;;  %v1059_v4 = vpack.c.bf16 %v767_v63, %v764_v60 }
 0x125   : > { %v771_v5 = vrot.slane %v770_v2, 4  ;;  %v779_v6 = vadd.f32 %v778_v3, %v777_v1  ;;  %1060 = vst [vmem:[%s307_s25] sm:$0xff] %v1059_v4  }
 0x127   : > { %v772_v7 = vadd.f32 %v771_v5, %v770_v2  ;;  %v780_v8 = vrot.slane %v779_v6, 4 }
 0x129   : > { %v773_v9 = vrot.slane %v772_v7, 2  ;;  %v781_v10 = vadd.f32 %v780_v8, %v779_v6 }
 0x12b   : > { %v774_v11 = vadd.f32 %v773_v9, %v772_v7  ;;  %v782_v12 = vrot.slane %v781_v10, 2 }
 0x12d   : > { %v775_v13 = vrot.slane %v774_v11, 1  ;;  %v783_v14 = vadd.f32 %v782_v12, %v781_v10 }
 0x12f   : > { %v784_v15 = vrot.slane %v783_v14, 1  ;;  %v776_v16 = vadd.f32 %v775_v13, %v774_v11 }
 0x131   : > { %v785_v17 = vadd.f32 %v784_v15, %v783_v14 }
 0x133   : > { %v787_v19 = vsel %vm786_vm2, %v776_v16, %v785_v17 }
 0x134   : > { %v794_v20 = vadd.f32 %v793_v18, %v787_v19 }
 0x136   : > { %795 = vst [vmem:[%s1405_s13] sm:$0x3] %v794_v20 }
 0x13d   : > { %v799_v21 = vld [vmem:[%s1405_s13] sm:$0x1]  ;;  %v801_v22 = vld [vmem:[%s1405_s13 + $0x1] sm:$0x1] }
 0x13e   : > { %v800_v23 = vmul.f32 0.0625, %v799_v21  ;;  %v802_v24 = vmul.f32 0.0625, %v801_v22 }
 0x140   : > { %v803_v25 = vmul.f32 %v800_v23, %v800_v23 }
 0x142   : > { %v804_v26 = vsub.f32 %v802_v24, %v803_v25 }
 0x144   : > { %v805_v27 = vmax.f32 %v804_v26, 0.0 }
 0x146   : > { %v806_v28 = vadd.f32 1e-05, %v805_v27 }
 0x148   : > { %1215 = vrsqrt.f32 %v806_v28 }
 0x155   : > { %v1216_v29 = vpop.eup %1215 }
 0x156   : > { %v809_v30 = vrot.slane %v1216_v29, 7 }
 0x158   : > { %v811_v31 = vsel %vm786_vm2, %v800_v23, %v809_v30 }
 0x159   : > { %812 = vst [vmem:[%s1405_s13] sm:$0x3] %v811_v31 }
 0x15a PF: > { %s17_s17 = sadd.s32 1, %s1299_s17   ;;  %s1446_s15 = smov %s1295_s16 }
 0x15b   : > { %p14_p3 = scmp.ge.s32.totalorder %s17_s17, 4   ;;  %s1447_s16 = smov %s1449_s19 }
 0x15d   :  { %16 = sbr.rel (!%p14_p3) target bundleno = 3 (0x3), region = 93 }
 0x162   :  { %879 = vsyncpa [#allocation3], 1 }
 0x163   :  { %881 = vsyncpa [#allocation3 + $0x1], 1 }
 0x164   :  { %882 = vsyncpa [#allocation5], 1 }

// kernel: tile.24
= control target key start
LH: loop header
LB: loop body
LE: loop exit
PB: predicated region body
PF: predicated region fallthrough
CT: control target
= control target key end

     0   :  { %s44_s12 = smov 3  ;;  %s69_s19 = smov 3  ;;  %s583_s0 = inlined_call_operand.vmem [shape: f32[2,2,9,256], index: 0, kind: input, shape index: {}]   ;;  %s584_s1 = inlined_call_operand.vmem [shape: f32[2,2,2304], index: 1, kind: output, shape index: {}]  }
   0x1   :  { %v2_v0 = vld [vmem:[%s583_s0] sm:$0xff]   ;;  %v383_v1 = vld [vmem:[%s583_s0 + $0x8] sm:$0xff]   ;;  %v393_v11 = vld [vmem:[%s583_s0 + $0x78] sm:$0x1]  }
   0x2   :  { %v384_v2 = vld [vmem:[%s583_s0 + $0x10] ss:$8 sm:$0x7]   ;;  %3 = vst [vmem:[#allocation0] ss:$16 sm:$0x3] %v2_v0  }
   0x3   :  { %4 = vst [vmem:[#allocation0] ss:$16 sm:$0xc] %v2_v0   ;;  %5 = vst [vmem:[#allocation0] ss:$16 sm:$0x30] %v2_v0  }
   0x4   :  { %6 = vst [vmem:[#allocation0] ss:$16 sm:$0xc0] %v2_v0   ;;  %10 = vst [vmem:[#allocation0 + $0x8] ss:$16 sm:$0x3] %v383_v1  }
   0x5   :  { %12 = vst [vmem:[#allocation0 + $0x8] ss:$16 sm:$0xc] %v383_v1   ;;  %14 = vst [vmem:[#allocation0 + $0x8] ss:$16 sm:$0x30] %v383_v1  }
   0x6   :  { %16 = vst [vmem:[#allocation0 + $0x8] ss:$16 sm:$0xc0] %v383_v1   ;;  %20 = vst [vmem:[#allocation0 + $0x80] ss:$8 sm:$0x3] %v384_v2  }
   0x7   :  { %22 = vst [vmem:[#allocation0 - $0x1] sm:$0x4] %v384_v2   ;;  %v385_v3 = vld [vmem:[%s583_s0 + $0x21] sm:$0xff]   ;;  %v386_v4 = vld [vmem:[%s583_s0 + $0x29] sm:$0xff]   ;;  %96 = vst [vmem:[#allocation0 + $0x119] sm:$0x1] %v393_v11  }
   0x8   :  { %v387_v5 = vld [vmem:[%s583_s0 + $0x38] ss:$8 sm:%s44_s12]   ;;  %26 = vst [vmem:[#allocation0 + $0x11] ss:$16 sm:$0x3] %v385_v3  }
   0x9   :  { %28 = vst [vmem:[#allocation0 + $0x11] ss:$16 sm:$0xc] %v385_v3   ;;  %30 = vst [vmem:[#allocation0 + $0x11] ss:$16 sm:$0x30] %v385_v3  }
   0xa   :  { %32 = vst [vmem:[#allocation0 + $0x2e1] ss:$-104 sm:$0xc0] %v385_v3   ;;  %36 = vst [vmem:[#allocation0 + $0x19] ss:$16 sm:$0x3] %v386_v4  }
   0xb   :  { %38 = vst [vmem:[#allocation0 + $0x19] ss:$16 sm:$0xc] %v386_v4   ;;  %40 = vst [vmem:[#allocation0 + $0x19] ss:$16 sm:$0x30] %v386_v4  }
   0xc   :  { %42 = vst [vmem:[#allocation0 + $0x49] ss:$8 sm:$0xc0] %v386_v4   ;;  %47 = vst [vmem:[#allocation0 + $0x89] ss:$7 sm:$0x3] %v387_v5  }
   0xd   :  { %v388_v6 = vld [vmem:[%s583_s0 + $0x41] sm:$0xff]   ;;  %v389_v7 = vld [vmem:[%s583_s0 + $0x49] sm:$0xff]  }
   0xe   :  { %v390_v8 = vld [vmem:[%s583_s0 + $0x58] ss:$8 sm:%s69_s19]   ;;  %51 = vst [vmem:[#allocation0 + $0xa0] ss:$16 sm:$0x3] %v388_v6  }
   0xf   :  { %53 = vst [vmem:[#allocation0 + $0xa0] ss:$16 sm:$0xc] %v388_v6   ;;  %55 = vst [vmem:[#allocation0 + $0xa0] ss:$16 sm:$0x30] %v388_v6  }
  0x10   :  { %57 = vst [vmem:[#allocation0 + $0x370] ss:$-104 sm:$0xc0] %v388_v6   ;;  %61 = vst [vmem:[#allocation0 + $0xa8] ss:$16 sm:$0x3] %v389_v7  }
  0x11   :  { %63 = vst [vmem:[#allocation0 + $0xa8] ss:$16 sm:$0xc] %v389_v7   ;;  %65 = vst [vmem:[#allocation0 + $0xa8] ss:$16 sm:$0x30] %v389_v7  }
  0x12   :  { %67 = vst [vmem:[#allocation0 + $0xd8] ss:$8 sm:$0xc0] %v389_v7   ;;  %72 = vst [vmem:[#allocation0 + $0x118] ss:$-135 sm:$0x3] %v390_v8  }
  0x13   :  { %v391_v9 = vld [vmem:[%s583_s0 + $0x61] sm:$0xff]   ;;  %v392_v10 = vld [vmem:[%s583_s0 + $0x69] sm:$0xff]   ;;  %v119_v15 = vld [vmem:[#allocation0 + $0x18] sm:$0x3] }
  0x14   :  { %76 = vst [vmem:[#allocation0 + $0xa1] ss:$16 sm:$0x3] %v391_v9   ;;  %78 = vst [vmem:[#allocation0 + $0xa1] ss:$16 sm:$0xc] %v391_v9  }
  0x15   :  { %80 = vst [vmem:[#allocation0 + $0xa1] ss:$16 sm:$0x30] %v391_v9   ;;  %82 = vst [vmem:[#allocation0 + $0x371] ss:$-104 sm:$0xc0] %v391_v9  }
  0x16   :  { %86 = vst [vmem:[#allocation0 + $0xa9] ss:$16 sm:$0x3] %v392_v10   ;;  %88 = vst [vmem:[#allocation0 + $0xa9] ss:$16 sm:$0xc] %v392_v10  }
  0x17   :  { %90 = vst [vmem:[#allocation0 + $0xa9] ss:$16 sm:$0x30] %v392_v10   ;;  %92 = vst [vmem:[#allocation0 + $0xd9] ss:$8 sm:$0xc0] %v392_v10  }
  0x18   :  { %v101_v12 = vld [vmem:[#allocation0] sm:$0x3]  ;;  %v106_v13 = vld [vmem:[#allocation0 + $0x8] sm:$0x3]  ;;  %v112_v14 = vld [vmem:[#allocation0 + $0x10] sm:$0x3] }
  0x19   :  { %104 = vst [vmem:[%s584_s1] sm:$0x3] %v101_v12  ;;  %394 = vst [vmem:[%s584_s1 + $0x2] sm:$0x3] %v106_v13  ;;  %v126_v16 = vld [vmem:[#allocation0 + $0x20] sm:$0x3] }
  0x1a   :  { %395 = vst [vmem:[%s584_s1 + $0x4] sm:$0x3] %v112_v14  ;;  %396 = vst [vmem:[%s584_s1 + $0x6] sm:$0x3] %v119_v15  ;;  %v133_v17 = vld [vmem:[#allocation0 + $0x28] sm:$0x3] }
  0x1b   :  { %v140_v18 = vld [vmem:[#allocation0 + $0x30] sm:$0x3]  ;;  %397 = vst [vmem:[%s584_s1 + $0x8] sm:$0x3] %v126_v16  ;;  %398 = vst [vmem:[%s584_s1 + $0xa] sm:$0x3] %v133_v17 }
  0x1c   :  { %399 = vst [vmem:[%s584_s1 + $0xc] sm:$0x3] %v140_v18  ;;  %v147_v19 = vld [vmem:[#allocation0 + $0x38] sm:$0x3]  ;;  %v154_v20 = vld [vmem:[#allocation0 + $0x40] sm:$0x3] }
  0x1d   :  { %v161_v21 = vld [vmem:[#allocation0 + $0x48] sm:$0x3]  ;;  %400 = vst [vmem:[%s584_s1 + $0xe] sm:$0x3] %v147_v19  ;;  %401 = vst [vmem:[%s584_s1 + $0x10] sm:$0x3] %v154_v20 }
  0x1e   :  { %402 = vst [vmem:[%s584_s1 + $0x12] sm:$0x3] %v161_v21  ;;  %v168_v22 = vld [vmem:[#allocation0 + $0x50] sm:$0x3]  ;;  %v175_v23 = vld [vmem:[#allocation0 + $0x58] sm:$0x3] }
  0x1f   :  { %v182_v24 = vld [vmem:[#allocation0 + $0x60] sm:$0x3]  ;;  %403 = vst [vmem:[%s584_s1 + $0x14] sm:$0x3] %v168_v22  ;;  %404 = vst [vmem:[%s584_s1 + $0x16] sm:$0x3] %v175_v23 }
  0x20   :  { %405 = vst [vmem:[%s584_s1 + $0x18] sm:$0x3] %v182_v24  ;;  %v189_v25 = vld [vmem:[#allocation0 + $0x68] sm:$0x3]  ;;  %v196_v26 = vld [vmem:[#allocation0 + $0x70] sm:$0x3] }
  0x21   :  { %v203_v27 = vld [vmem:[#allocation0 + $0x78] sm:$0x3]  ;;  %406 = vst [vmem:[%s584_s1 + $0x1a] sm:$0x3] %v189_v25  ;;  %407 = vst [vmem:[%s584_s1 + $0x1c] sm:$0x3] %v196_v26 }
  0x22   :  { %408 = vst [vmem:[%s584_s1 + $0x1e] sm:$0x3] %v203_v27  ;;  %v210_v28 = vld [vmem:[#allocation0 + $0x80] sm:$0x3]  ;;  %v217_v29 = vld [vmem:[#allocation0 + $0x88] sm:$0x3] }
  0x23   :  { %v224_v30 = vld [vmem:[#allocation0 + $0x90] sm:$0x3]  ;;  %409 = vst [vmem:[%s584_s1 + $0x20] sm:$0x3] %v210_v28  ;;  %410 = vst [vmem:[%s584_s1 + $0x22] sm:$0x3] %v217_v29 }
  0x24   :  { %411 = vst [vmem:[%s584_s1 + $0x24] sm:$0x3] %v224_v30  ;;  %v231_v31 = vld [vmem:[#allocation0 + $0x98] sm:$0x3]  ;;  %v238_v32 = vld [vmem:[#allocation0 + $0xa0] sm:$0x3] }
  0x25   :  { %v245_v33 = vld [vmem:[#allocation0 + $0xa8] sm:$0x3]  ;;  %412 = vst [vmem:[%s584_s1 + $0x26] sm:$0x3] %v231_v31  ;;  %413 = vst [vmem:[%s584_s1 + $0x28] sm:$0x3] %v238_v32 }
  0x26   :  { %414 = vst [vmem:[%s584_s1 + $0x2a] sm:$0x3] %v245_v33  ;;  %v252_v34 = vld [vmem:[#allocation0 + $0xb0] sm:$0x3]  ;;  %v259_v35 = vld [vmem:[#allocation0 + $0xb8] sm:$0x3] }
  0x27   :  { %v266_v36 = vld [vmem:[#allocation0 + $0xc0] sm:$0x3]  ;;  %415 = vst [vmem:[%s584_s1 + $0x2c] sm:$0x3] %v252_v34  ;;  %416 = vst [vmem:[%s584_s1 + $0x2e] sm:$0x3] %v259_v35 }
  0x28   :  { %417 = vst [vmem:[%s584_s1 + $0x30] sm:$0x3] %v266_v36  ;;  %v273_v37 = vld [vmem:[#allocation0 + $0xc8] sm:$0x3]  ;;  %v280_v38 = vld [vmem:[#allocation0 + $0xd0] sm:$0x3] }
  0x29   :  { %v287_v39 = vld [vmem:[#allocation0 + $0xd8] sm:$0x3]  ;;  %418 = vst [vmem:[%s584_s1 + $0x32] sm:$0x3] %v273_v37  ;;  %419 = vst [vmem:[%s584_s1 + $0x34] sm:$0x3] %v280_v38 }
  0x2a   :  { %420 = vst [vmem:[%s584_s1 + $0x36] sm:$0x3] %v287_v39  ;;  %v294_v40 = vld [vmem:[#allocation0 + $0xe0] sm:$0x3]  ;;  %v301_v41 = vld [vmem:[#allocation0 + $0xe8] sm:$0x3] }
  0x2b   :  { %v308_v42 = vld [vmem:[#allocation0 + $0xf0] sm:$0x3]  ;;  %421 = vst [vmem:[%s584_s1 + $0x38] sm:$0x3] %v294_v40  ;;  %422 = vst [vmem:[%s584_s1 + $0x3a] sm:$0x3] %v301_v41 }
  0x2c   :  { %423 = vst [vmem:[%s584_s1 + $0x3c] sm:$0x3] %v308_v42  ;;  %v315_v43 = vld [vmem:[#allocation0 + $0xf8] sm:$0x3]  ;;  %v322_v44 = vld [vmem:[#allocation0 + $0x100] sm:$0x3] }
  0x2d   :  { %v329_v45 = vld [vmem:[#allocation0 + $0x108] sm:$0x3]  ;;  %424 = vst [vmem:[%s584_s1 + $0x3e] sm:$0x3] %v315_v43  ;;  %425 = vst [vmem:[%s584_s1 + $0x40] sm:$0x3] %v322_v44 }
  0x2e   :  { %426 = vst [vmem:[%s584_s1 + $0x42] sm:$0x3] %v329_v45  ;;  %v336_v46 = vld [vmem:[#allocation0 + $0x110] sm:$0x3]  ;;  %v343_v47 = vld [vmem:[#allocation0 + $0x118] sm:$0x3] }
  0x2f   :  { %427 = vst [vmem:[%s584_s1 + $0x44] sm:$0x3] %v336_v46  ;;  %428 = vst [vmem:[%s584_s1 + $0x46] sm:$0x3] %v343_v47 }

// kernel: tile.29
= control target key start
LH: loop header
LB: loop body
LE: loop exit
PB: predicated region body
PF: predicated region fallthrough
CT: control target
= control target key end

     0   :  { %vm76_vm0 = vcmask 1044484   ;;  %s1245_s0 = inlined_call_operand.vmem [shape: f32[2,2,9,512], index: 0, kind: input, shape index: {}]   ;;  %s1246_s1 = inlined_call_operand.vmem [shape: f32[2,2,4608], index: 1, kind: output, shape index: {}]  }
   0x1   :  { %v2_v0 = vld [vmem:[%s1245_s0] sm:$0xff]   ;;  %v864_v1 = vld [vmem:[%s1245_s0 + $0x8] sm:$0xff]   ;;  %v865_v2 = vld [vmem:[%s1245_s0 + $0x10] sm:$0xff]  }
   0x2   :  { %3 = vst [vmem:[#allocation0] sm:$0x1] %v2_v0   ;;  %5 = vst [vmem:[#allocation0 + $0x1f] sm:$0x2] %v2_v0   ;;  %v866_v3 = vld [vmem:[%s1245_s0 + $0x18] sm:$0xff]   ;;  %v869_v7 = vld [vmem:[%s1245_s0 + $0x41] sm:$0xff]  }
   0x3   :  { %7 = vst [vmem:[#allocation0 + $0x3e] sm:$0x4] %v2_v0   ;;  %9 = vst [vmem:[#allocation0 + $0x5d] sm:$0x8] %v2_v0   ;;  %v868_v5 = vld [vmem:[%s1245_s0 + $0x3c] sm:$0x10]  }
   0x4   :  { %11 = vst [vmem:[#allocation0 + $0x7c] sm:$0x10] %v2_v0   ;;  %13 = vst [vmem:[#allocation0 + $0x9b] sm:$0x20] %v2_v0   ;;  %v870_v8 = vld [vmem:[%s1245_s0 + $0x49] sm:$0xff]   ;;  %v871_v9 = vld [vmem:[%s1245_s0 + $0x51] sm:$0xff]  }
   0x5   :  { %15 = vst [vmem:[#allocation0 + $0xba] sm:$0x40] %v2_v0   ;;  %17 = vst [vmem:[#allocation0 + $0xd9] sm:$0x80] %v2_v0   ;;  %v872_v10 = vld [vmem:[%s1245_s0 + $0x59] sm:$0xff]   ;;  %v874_v12 = vld [vmem:[%s1245_s0 + $0x81] sm:$0xff]  }
   0x6   :  { %21 = vst [vmem:[#allocation0 + $0x8] sm:$0x1] %v864_v1   ;;  %23 = vst [vmem:[#allocation0 + $0x27] sm:$0x2] %v864_v1   ;;  %v875_v13 = vld [vmem:[%s1245_s0 + $0x89] sm:$0xff]   ;;  %v876_v14 = vld [vmem:[%s1245_s0 + $0x91] sm:$0xff]  }
   0x7   :  { %25 = vst [vmem:[#allocation0 + $0x46] sm:$0x4] %v864_v1   ;;  %27 = vst [vmem:[#allocation0 + $0x65] sm:$0x8] %v864_v1   ;;  %v877_v15 = vld [vmem:[%s1245_s0 + $0x99] sm:$0xff]   ;;  %v879_v17 = vld [vmem:[%s1245_s0 + $0xc1] sm:$0xff]  }
   0x8   :  { %29 = vst [vmem:[#allocation0 + $0x84] sm:$0x10] %v864_v1   ;;  %31 = vst [vmem:[#allocation0 + $0xa3] sm:$0x20] %v864_v1   ;;  %v880_v18 = vld [vmem:[%s1245_s0 + $0xc9] sm:$0xff]   ;;  %v881_v19 = vld [vmem:[%s1245_s0 + $0xd1] sm:$0xff]  }
   0x9   :  { %33 = vst [vmem:[#allocation0 + $0xc2] sm:$0x40] %v864_v1   ;;  %35 = vst [vmem:[#allocation0 + $0xe1] sm:$0x80] %v864_v1   ;;  %v882_v20 = vld [vmem:[%s1245_s0 + $0xd9] sm:$0xff]  }
   0xa   :  { %39 = vst [vmem:[#allocation0 + $0x10] sm:$0x1] %v865_v2   ;;  %41 = vst [vmem:[#allocation0 + $0x2f] sm:$0x2] %v865_v2  }
   0xb   :  { %43 = vst [vmem:[#allocation0 + $0x4e] sm:$0x4] %v865_v2   ;;  %45 = vst [vmem:[#allocation0 + $0x6d] sm:$0x8] %v865_v2  }
   0xc   :  { %47 = vst [vmem:[#allocation0 + $0x8c] sm:$0x10] %v865_v2   ;;  %49 = vst [vmem:[#allocation0 + $0xab] sm:$0x20] %v865_v2  }
   0xd   :  { %51 = vst [vmem:[#allocation0 + $0xca] sm:$0x40] %v865_v2   ;;  %53 = vst [vmem:[#allocation0 + $0xe9] sm:$0x80] %v865_v2  }
   0xe   :  { %v867_v4 = vld [vmem:[%s1245_s0 + $0x20] ss:$8 sm:$0xf]   ;;  %57 = vst [vmem:[#allocation0 + $0x18] sm:$0x1] %v866_v3  }
   0xf   :  { %59 = vst [vmem:[#allocation0 + $0x37] sm:$0x2] %v866_v3   ;;  %61 = vst [vmem:[#allocation0 + $0x56] sm:$0x4] %v866_v3   ;;  %v77_v6 = vsel %vm76_vm0, %v868_v5, %v867_v4 }
  0x10   :  { %63 = vst [vmem:[#allocation0 + $0x75] sm:$0x8] %v866_v3   ;;  %65 = vst [vmem:[#allocation0 + $0x94] sm:$0x10] %v866_v3  }
  0x11   :  { %67 = vst [vmem:[#allocation0 + $0xb3] sm:$0x20] %v866_v3   ;;  %69 = vst [vmem:[#allocation0 + $0xd2] sm:$0x40] %v866_v3  }
  0x12   :  { %71 = vst [vmem:[#allocation0 + $0xf1] sm:$0x80] %v866_v3   ;;  %79 = vst [vmem:[#allocation0 + $0x100] ss:$8 sm:$0xf] %v77_v6  }
  0x13   :  { %81 = vst [vmem:[#allocation0 - $0x3] sm:$0x10] %v77_v6   ;;  %85 = vst [vmem:[#allocation0 + $0x21] sm:$0x1] %v869_v7  }
  0x14   :  { %87 = vst [vmem:[#allocation0 + $0x40] sm:$0x2] %v869_v7   ;;  %89 = vst [vmem:[#allocation0 + $0x5f] sm:$0x4] %v869_v7  }
  0x15   :  { %91 = vst [vmem:[#allocation0 + $0x7e] sm:$0x8] %v869_v7   ;;  %93 = vst [vmem:[#allocation0 + $0x9d] sm:$0x10] %v869_v7  }
  0x16   :  { %95 = vst [vmem:[#allocation0 + $0xbc] sm:$0x20] %v869_v7   ;;  %97 = vst [vmem:[#allocation0 + $0x5f1] ss:$-216 sm:$0xc0] %v869_v7  }
  0x17   :  { %101 = vst [vmem:[#allocation0 + $0x29] sm:$0x1] %v870_v8   ;;  %103 = vst [vmem:[#allocation0 + $0x48] sm:$0x2] %v870_v8  }
  0x18   :  { %105 = vst [vmem:[#allocation0 + $0x67] sm:$0x4] %v870_v8   ;;  %107 = vst [vmem:[#allocation0 + $0x86] sm:$0x8] %v870_v8  }
  0x19   :  { %109 = vst [vmem:[#allocation0 + $0xa5] sm:$0x10] %v870_v8   ;;  %111 = vst [vmem:[#allocation0 + $0xc4] sm:$0x20] %v870_v8  }
  0x1a   :  { %113 = vst [vmem:[#allocation0 + $0x5f9] ss:$-216 sm:$0xc0] %v870_v8   ;;  %117 = vst [vmem:[#allocation0 + $0x31] sm:$0x1] %v871_v9  }
  0x1b   :  { %119 = vst [vmem:[#allocation0 + $0x50] sm:$0x2] %v871_v9   ;;  %121 = vst [vmem:[#allocation0 + $0x6f] sm:$0x4] %v871_v9   ;;  %v294_v22 = vld [vmem:[#allocation0] sm:$0x3] }
  0x1c   :  { %123 = vst [vmem:[#allocation0 + $0x8e] sm:$0x8] %v871_v9   ;;  %125 = vst [vmem:[#allocation0 + $0xad] sm:$0x10] %v871_v9   ;;  %v319_v26 = vld [vmem:[#allocation0 + $0x20] sm:$0x3] }
  0x1d   :  { %127 = vst [vmem:[#allocation0 + $0xcc] sm:$0x20] %v871_v9   ;;  %129 = vst [vmem:[#allocation0 + $0x601] ss:$-216 sm:$0xc0] %v871_v9  }
  0x1e   :  { %v873_v11 = vld [vmem:[%s1245_s0 + $0x68] ss:$8 sm:$0xf]   ;;  %133 = vst [vmem:[#allocation0 + $0x39] sm:$0x1] %v872_v10   ;;  %297 = vst [vmem:[%s1246_s1] sm:$0x3] %v294_v22 }
  0x1f   :  { %135 = vst [vmem:[#allocation0 + $0x58] sm:$0x2] %v872_v10   ;;  %137 = vst [vmem:[#allocation0 + $0x77] sm:$0x4] %v872_v10   ;;  %v299_v23 = vld [vmem:[#allocation0 + $0x8] sm:$0x3] }
  0x20   :  { %139 = vst [vmem:[#allocation0 + $0x96] sm:$0x8] %v872_v10   ;;  %141 = vst [vmem:[#allocation0 + $0xb5] sm:$0x10] %v872_v10   ;;  %v326_v27 = vld [vmem:[#allocation0 + $0x28] sm:$0x3] }
  0x21   :  { %143 = vst [vmem:[#allocation0 + $0xd4] sm:$0x20] %v872_v10   ;;  %145 = vst [vmem:[#allocation0 + $0xc9] ss:$8 sm:$0xc0] %v872_v10  }
  0x22   :  { %149 = vst [vmem:[#allocation0 + $0x109] ss:$8 sm:$0x7] %v873_v11   ;;  %151 = vst [vmem:[#allocation0 + $0x11d] sm:$0x8] %v873_v11  }
  0x23   :  { %155 = vst [vmem:[#allocation0 + $0x140] sm:$0x1] %v874_v12   ;;  %157 = vst [vmem:[#allocation0 + $0x15f] sm:$0x2] %v874_v12   ;;  %v305_v24 = vld [vmem:[#allocation0 + $0x10] sm:$0x3] }
  0x24   :  { %159 = vst [vmem:[#allocation0 + $0x17e] sm:$0x4] %v874_v12   ;;  %161 = vst [vmem:[#allocation0 + $0x19d] sm:$0x8] %v874_v12   ;;  %v312_v25 = vld [vmem:[#allocation0 + $0x18] sm:$0x3] }
  0x25   :  { %163 = vst [vmem:[#allocation0 + $0x1bc] sm:$0x10] %v874_v12   ;;  %165 = vst [vmem:[#allocation0 + $0x1db] sm:$0x20] %v874_v12   ;;  %v333_v28 = vld [vmem:[#allocation0 + $0x30] sm:$0x3] }
  0x26   :  { %167 = vst [vmem:[#allocation0 + $0x710] ss:$-216 sm:$0xc0] %v874_v12   ;;  %171 = vst [vmem:[#allocation0 + $0x148] sm:$0x1] %v875_v13  }
  0x27   :  { %173 = vst [vmem:[#allocation0 + $0x167] sm:$0x2] %v875_v13   ;;  %175 = vst [vmem:[#allocation0 + $0x186] sm:$0x4] %v875_v13   ;;  %v340_v29 = vld [vmem:[#allocation0 + $0x38] sm:$0x3] }
  0x28   :  { %177 = vst [vmem:[#allocation0 + $0x1a5] sm:$0x8] %v875_v13   ;;  %179 = vst [vmem:[#allocation0 + $0x1c4] sm:$0x10] %v875_v13   ;;  %v347_v30 = vld [vmem:[#allocation0 + $0x40] sm:$0x3] }
  0x29   :  { %181 = vst [vmem:[#allocation0 + $0x1e3] sm:$0x20] %v875_v13   ;;  %183 = vst [vmem:[#allocation0 + $0x718] ss:$-216 sm:$0xc0] %v875_v13  }
  0x2a   :  { %187 = vst [vmem:[#allocation0 + $0x150] sm:$0x1] %v876_v14   ;;  %189 = vst [vmem:[#allocation0 + $0x16f] sm:$0x2] %v876_v14   ;;  %v354_v31 = vld [vmem:[#allocation0 + $0x48] sm:$0x3] }
  0x2b   :  { %191 = vst [vmem:[#allocation0 + $0x18e] sm:$0x4] %v876_v14   ;;  %193 = vst [vmem:[#allocation0 + $0x1ad] sm:$0x8] %v876_v14   ;;  %v361_v32 = vld [vmem:[#allocation0 + $0x50] sm:$0x3] }
  0x2c   :  { %195 = vst [vmem:[#allocation0 + $0x1cc] sm:$0x10] %v876_v14   ;;  %197 = vst [vmem:[#allocation0 + $0x1eb] sm:$0x20] %v876_v14   ;;  %v368_v33 = vld [vmem:[#allocation0 + $0x58] sm:$0x3] }
  0x2d   :  { %199 = vst [vmem:[#allocation0 + $0x720] ss:$-216 sm:$0xc0] %v876_v14   ;;  %203 = vst [vmem:[#allocation0 + $0x158] sm:$0x1] %v877_v15  }
  0x2e   :  { %205 = vst [vmem:[#allocation0 + $0x177] sm:$0x2] %v877_v15   ;;  %207 = vst [vmem:[#allocation0 + $0x196] sm:$0x4] %v877_v15   ;;  %v375_v34 = vld [vmem:[#allocation0 + $0x60] sm:$0x3] }
  0x2f   :  { %209 = vst [vmem:[#allocation0 + $0x1b5] sm:$0x8] %v877_v15   ;;  %211 = vst [vmem:[#allocation0 + $0x1d4] sm:$0x10] %v877_v15   ;;  %v382_v35 = vld [vmem:[#allocation0 + $0x68] sm:$0x3] }
  0x30   :  { %213 = vst [vmem:[#allocation0 + $0x1f3] sm:$0x20] %v877_v15   ;;  %215 = vst [vmem:[#allocation0 + $0x1e8] ss:$8 sm:$0xc0] %v877_v15  }
  0x31   :  { %v878_v16 = vld [vmem:[%s1245_s0 + $0xa8] ss:$8 sm:$0xf]   ;;  %225 = vst [vmem:[#allocation0 + $0x141] sm:$0x1] %v879_v17  }
  0x32   :  { %219 = vst [vmem:[#allocation0 + $0x228] ss:$8 sm:$0x7] %v878_v16   ;;  %221 = vst [vmem:[#allocation0 + $0x11e] sm:$0x8] %v878_v16  }
  0x33   :  { %227 = vst [vmem:[#allocation0 + $0x160] sm:$0x2] %v879_v17   ;;  %229 = vst [vmem:[#allocation0 + $0x17f] sm:$0x4] %v879_v17   ;;  %v389_v36 = vld [vmem:[#allocation0 + $0x70] sm:$0x3] }
  0x34   :  { %231 = vst [vmem:[#allocation0 + $0x19e] sm:$0x8] %v879_v17   ;;  %233 = vst [vmem:[#allocation0 + $0x1bd] sm:$0x10] %v879_v17   ;;  %v396_v37 = vld [vmem:[#allocation0 + $0x78] sm:$0x3] }
  0x35   :  { %235 = vst [vmem:[#allocation0 + $0x1dc] sm:$0x20] %v879_v17   ;;  %237 = vst [vmem:[#allocation0 + $0x711] ss:$-216 sm:$0xc0] %v879_v17  }
  0x36   :  { %241 = vst [vmem:[#allocation0 + $0x149] sm:$0x1] %v880_v18   ;;  %243 = vst [vmem:[#allocation0 + $0x168] sm:$0x2] %v880_v18   ;;  %v403_v38 = vld [vmem:[#allocation0 + $0x80] sm:$0x3] }
  0x37   :  { %245 = vst [vmem:[#allocation0 + $0x187] sm:$0x4] %v880_v18   ;;  %247 = vst [vmem:[#allocation0 + $0x1a6] sm:$0x8] %v880_v18   ;;  %v410_v39 = vld [vmem:[#allocation0 + $0x88] sm:$0x3] }
  0x38   :  { %249 = vst [vmem:[#allocation0 + $0x1c5] sm:$0x10] %v880_v18   ;;  %251 = vst [vmem:[#allocation0 + $0x1e4] sm:$0x20] %v880_v18   ;;  %v417_v40 = vld [vmem:[#allocation0 + $0x90] sm:$0x3] }
  0x39   :  { %253 = vst [vmem:[#allocation0 + $0x719] ss:$-216 sm:$0xc0] %v880_v18   ;;  %v883_v21 = vld [vmem:[%s1245_s0 + $0xe8] ss:$8 sm:$0x7]  }
  0x3a   :  { %257 = vst [vmem:[#allocation0 + $0x151] sm:$0x1] %v881_v19   ;;  %259 = vst [vmem:[#allocation0 + $0x170] sm:$0x2] %v881_v19   ;;  %v424_v41 = vld [vmem:[#allocation0 + $0x98] sm:$0x3] }
  0x3b   :  { %261 = vst [vmem:[#allocation0 + $0x18f] sm:$0x4] %v881_v19   ;;  %263 = vst [vmem:[#allocation0 + $0x1ae] sm:$0x8] %v881_v19   ;;  %v431_v42 = vld [vmem:[#allocation0 + $0xa0] sm:$0x3] }
  0x3c   :  { %265 = vst [vmem:[#allocation0 + $0x1cd] sm:$0x10] %v881_v19   ;;  %267 = vst [vmem:[#allocation0 + $0x1ec] sm:$0x20] %v881_v19   ;;  %v438_v43 = vld [vmem:[#allocation0 + $0xa8] sm:$0x3] }
  0x3d   :  { %269 = vst [vmem:[#allocation0 + $0x721] ss:$-216 sm:$0xc0] %v881_v19   ;;  %273 = vst [vmem:[#allocation0 + $0x159] sm:$0x1] %v882_v20  }
  0x3e   :  { %275 = vst [vmem:[#allocation0 + $0x178] sm:$0x2] %v882_v20   ;;  %277 = vst [vmem:[#allocation0 + $0x197] sm:$0x4] %v882_v20   ;;  %v445_v44 = vld [vmem:[#allocation0 + $0xb0] sm:$0x3] }
  0x3f   :  { %279 = vst [vmem:[#allocation0 + $0x1b6] sm:$0x8] %v882_v20   ;;  %281 = vst [vmem:[#allocation0 + $0x1d5] sm:$0x10] %v882_v20   ;;  %v452_v45 = vld [vmem:[#allocation0 + $0xb8] sm:$0x3] }
  0x40   :  { %283 = vst [vmem:[#allocation0 + $0x1f4] sm:$0x20] %v882_v20   ;;  %285 = vst [vmem:[#allocation0 + $0x1e9] ss:$8 sm:$0xc0] %v882_v20  }
  0x41   :  { %289 = vst [vmem:[#allocation0 + $0x229] ss:$8 sm:$0x7] %v883_v21   ;;  %884 = vst [vmem:[%s1246_s1 + $0x2] sm:$0x3] %v299_v23 }
  0x42   :  { %885 = vst [vmem:[%s1246_s1 + $0x4] sm:$0x3] %v305_v24  ;;  %886 = vst [vmem:[%s1246_s1 + $0x6] sm:$0x3] %v312_v25  ;;  %v459_v46 = vld [vmem:[#allocation0 + $0xc0] sm:$0x3] }
  0x43   :  { %887 = vst [vmem:[%s1246_s1 + $0x8] sm:$0x3] %v319_v26  ;;  %888 = vst [vmem:[%s1246_s1 + $0xa] sm:$0x3] %v326_v27  ;;  %v466_v47 = vld [vmem:[#allocation0 + $0xc8] sm:$0x3] }
  0x44   :  { %889 = vst [vmem:[%s1246_s1 + $0xc] sm:$0x3] %v333_v28  ;;  %890 = vst [vmem:[%s1246_s1 + $0xe] sm:$0x3] %v340_v29  ;;  %v473_v48 = vld [vmem:[#allocation0 + $0xd0] sm:$0x3] }
  0x45   :  { %891 = vst [vmem:[%s1246_s1 + $0x10] sm:$0x3] %v347_v30  ;;  %892 = vst [vmem:[%s1246_s1 + $0x12] sm:$0x3] %v354_v31  ;;  %v480_v49 = vld [vmem:[#allocation0 + $0xd8] sm:$0x3] }
  0x46   :  { %893 = vst [vmem:[%s1246_s1 + $0x14] sm:$0x3] %v361_v32  ;;  %894 = vst [vmem:[%s1246_s1 + $0x16] sm:$0x3] %v368_v33  ;;  %v487_v50 = vld [vmem:[#allocation0 + $0xe0] sm:$0x3] }
  0x47   :  { %895 = vst [vmem:[%s1246_s1 + $0x18] sm:$0x3] %v375_v34  ;;  %896 = vst [vmem:[%s1246_s1 + $0x1a] sm:$0x3] %v382_v35  ;;  %v494_v51 = vld [vmem:[#allocation0 + $0xe8] sm:$0x3] }
  0x48   :  { %897 = vst [vmem:[%s1246_s1 + $0x1c] sm:$0x3] %v389_v36  ;;  %898 = vst [vmem:[%s1246_s1 + $0x1e] sm:$0x3] %v396_v37  ;;  %v501_v52 = vld [vmem:[#allocation0 + $0xf0] sm:$0x3] }
  0x49   :  { %899 = vst [vmem:[%s1246_s1 + $0x20] sm:$0x3] %v403_v38  ;;  %900 = vst [vmem:[%s1246_s1 + $0x22] sm:$0x3] %v410_v39  ;;  %v508_v53 = vld [vmem:[#allocation0 + $0xf8] sm:$0x3] }
  0x4a   :  { %901 = vst [vmem:[%s1246_s1 + $0x24] sm:$0x3] %v417_v40  ;;  %902 = vst [vmem:[%s1246_s1 + $0x26] sm:$0x3] %v424_v41  ;;  %v515_v54 = vld [vmem:[#allocation0 + $0x100] sm:$0x3] }
  0x4b   :  { %903 = vst [vmem:[%s1246_s1 + $0x28] sm:$0x3] %v431_v42  ;;  %904 = vst [vmem:[%s1246_s1 + $0x2a] sm:$0x3] %v438_v43  ;;  %v522_v55 = vld [vmem:[#allocation0 + $0x108] sm:$0x3] }
  0x4c   :  { %905 = vst [vmem:[%s1246_s1 + $0x2c] sm:$0x3] %v445_v44  ;;  %906 = vst [vmem:[%s1246_s1 + $0x2e] sm:$0x3] %v452_v45  ;;  %v529_v56 = vld [vmem:[#allocation0 + $0x110] sm:$0x3] }
  0x4d   :  { %907 = vst [vmem:[%s1246_s1 + $0x30] sm:$0x3] %v459_v46  ;;  %908 = vst [vmem:[%s1246_s1 + $0x32] sm:$0x3] %v466_v47  ;;  %v536_v57 = vld [vmem:[#allocation0 + $0x118] sm:$0x3] }
  0x4e   :  { %909 = vst [vmem:[%s1246_s1 + $0x34] sm:$0x3] %v473_v48  ;;  %910 = vst [vmem:[%s1246_s1 + $0x36] sm:$0x3] %v480_v49  ;;  %v543_v58 = vld [vmem:[#allocation0 + $0x120] sm:$0x3] }
  0x4f   :  { %911 = vst [vmem:[%s1246_s1 + $0x38] sm:$0x3] %v487_v50  ;;  %912 = vst [vmem:[%s1246_s1 + $0x3a] sm:$0x3] %v494_v51  ;;  %v550_v59 = vld [vmem:[#allocation0 + $0x128] sm:$0x3] }
  0x50   :  { %913 = vst [vmem:[%s1246_s1 + $0x3c] sm:$0x3] %v501_v52  ;;  %914 = vst [vmem:[%s1246_s1 + $0x3e] sm:$0x3] %v508_v53  ;;  %v557_v60 = vld [vmem:[#allocation0 + $0x130] sm:$0x3] }
  0x51   :  { %915 = vst [vmem:[%s1246_s1 + $0x40] sm:$0x3] %v515_v54  ;;  %916 = vst [vmem:[%s1246_s1 + $0x42] sm:$0x3] %v522_v55  ;;  %v564_v61 = vld [vmem:[#allocation0 + $0x138] sm:$0x3] }
  0x52   :  { %917 = vst [vmem:[%s1246_s1 + $0x44] sm:$0x3] %v529_v56  ;;  %918 = vst [vmem:[%s1246_s1 + $0x46] sm:$0x3] %v536_v57  ;;  %v571_v62 = vld [vmem:[#allocation0 + $0x140] sm:$0x3] }
  0x53   :  { %919 = vst [vmem:[%s1246_s1 + $0x48] sm:$0x3] %v543_v58  ;;  %920 = vst [vmem:[%s1246_s1 + $0x4a] sm:$0x3] %v550_v59  ;;  %v578_v63 = vld [vmem:[#allocation0 + $0x148] sm:$0x3] }
  0x54   :  { %921 = vst [vmem:[%s1246_s1 + $0x4c] sm:$0x3] %v557_v60  ;;  %922 = vst [vmem:[%s1246_s1 + $0x4e] sm:$0x3] %v564_v61  ;;  %v585_v0 = vld [vmem:[#allocation0 + $0x150] sm:$0x3] }
  0x55   :  { %923 = vst [vmem:[%s1246_s1 + $0x50] sm:$0x3] %v571_v62  ;;  %924 = vst [vmem:[%s1246_s1 + $0x52] sm:$0x3] %v578_v63  ;;  %v592_v1 = vld [vmem:[#allocation0 + $0x158] sm:$0x3] }
  0x56   :  { %v599_v2 = vld [vmem:[#allocation0 + $0x160] sm:$0x3]  ;;  %925 = vst [vmem:[%s1246_s1 + $0x54] sm:$0x3] %v585_v0  ;;  %926 = vst [vmem:[%s1246_s1 + $0x56] sm:$0x3] %v592_v1 }
  0x57   :  { %927 = vst [vmem:[%s1246_s1 + $0x58] sm:$0x3] %v599_v2  ;;  %v606_v3 = vld [vmem:[#allocation0 + $0x168] sm:$0x3]  ;;  %v613_v4 = vld [vmem:[#allocation0 + $0x170] sm:$0x3] }
  0x58   :  { %v620_v5 = vld [vmem:[#allocation0 + $0x178] sm:$0x3]  ;;  %928 = vst [vmem:[%s1246_s1 + $0x5a] sm:$0x3] %v606_v3  ;;  %929 = vst [vmem:[%s1246_s1 + $0x5c] sm:$0x3] %v613_v4 }
  0x59   :  { %930 = vst [vmem:[%s1246_s1 + $0x5e] sm:$0x3] %v620_v5  ;;  %v627_v6 = vld [vmem:[#allocation0 + $0x180] sm:$0x3]  ;;  %v634_v7 = vld [vmem:[#allocation0 + $0x188] sm:$0x3] }
  0x5a   :  { %v641_v8 = vld [vmem:[#allocation0 + $0x190] sm:$0x3]  ;;  %931 = vst [vmem:[%s1246_s1 + $0x60] sm:$0x3] %v627_v6  ;;  %932 = vst [vmem:[%s1246_s1 + $0x62] sm:$0x3] %v634_v7 }
  0x5b   :  { %933 = vst [vmem:[%s1246_s1 + $0x64] sm:$0x3] %v641_v8  ;;  %v648_v9 = vld [vmem:[#allocation0 + $0x198] sm:$0x3]  ;;  %v655_v10 = vld [vmem:[#allocation0 + $0x1a0] sm:$0x3] }
  0x5c   :  { %v662_v11 = vld [vmem:[#allocation0 + $0x1a8] sm:$0x3]  ;;  %934 = vst [vmem:[%s1246_s1 + $0x66] sm:$0x3] %v648_v9  ;;  %935 = vst [vmem:[%s1246_s1 + $0x68] sm:$0x3] %v655_v10 }
  0x5d   :  { %936 = vst [vmem:[%s1246_s1 + $0x6a] sm:$0x3] %v662_v11  ;;  %v669_v12 = vld [vmem:[#allocation0 + $0x1b0] sm:$0x3]  ;;  %v676_v13 = vld [vmem:[#allocation0 + $0x1b8] sm:$0x3] }
  0x5e   :  { %v683_v14 = vld [vmem:[#allocation0 + $0x1c0] sm:$0x3]  ;;  %937 = vst [vmem:[%s1246_s1 + $0x6c] sm:$0x3] %v669_v12  ;;  %938 = vst [vmem:[%s1246_s1 + $0x6e] sm:$0x3] %v676_v13 }
  0x5f   :  { %939 = vst [vmem:[%s1246_s1 + $0x70] sm:$0x3] %v683_v14  ;;  %v690_v15 = vld [vmem:[#allocation0 + $0x1c8] sm:$0x3]  ;;  %v697_v16 = vld [vmem:[#allocation0 + $0x1d0] sm:$0x3] }
  0x60   :  { %v704_v17 = vld [vmem:[#allocation0 + $0x1d8] sm:$0x3]  ;;  %940 = vst [vmem:[%s1246_s1 + $0x72] sm:$0x3] %v690_v15  ;;  %941 = vst [vmem:[%s1246_s1 + $0x74] sm:$0x3] %v697_v16 }
  0x61   :  { %942 = vst [vmem:[%s1246_s1 + $0x76] sm:$0x3] %v704_v17  ;;  %v711_v18 = vld [vmem:[#allocation0 + $0x1e0] sm:$0x3]  ;;  %v718_v19 = vld [vmem:[#allocation0 + $0x1e8] sm:$0x3] }
  0x62   :  { %v725_v20 = vld [vmem:[#allocation0 + $0x1f0] sm:$0x3]  ;;  %943 = vst [vmem:[%s1246_s1 + $0x78] sm:$0x3] %v711_v18  ;;  %944 = vst [vmem:[%s1246_s1 + $0x7a] sm:$0x3] %v718_v19 }
  0x63   :  { %945 = vst [vmem:[%s1246_s1 + $0x7c] sm:$0x3] %v725_v20  ;;  %v732_v21 = vld [vmem:[#allocation0 + $0x1f8] sm:$0x3]  ;;  %v739_v22 = vld [vmem:[#allocation0 + $0x200] sm:$0x3] }
  0x64   :  { %v746_v23 = vld [vmem:[#allocation0 + $0x208] sm:$0x3]  ;;  %946 = vst [vmem:[%s1246_s1 + $0x7e] sm:$0x3] %v732_v21  ;;  %947 = vst [vmem:[%s1246_s1 + $0x80] sm:$0x3] %v739_v22 }
  0x65   :  { %948 = vst [vmem:[%s1246_s1 + $0x82] sm:$0x3] %v746_v23  ;;  %v753_v24 = vld [vmem:[#allocation0 + $0x210] sm:$0x3]  ;;  %v760_v25 = vld [vmem:[#allocation0 + $0x218] sm:$0x3] }
  0x66   :  { %v767_v26 = vld [vmem:[#allocation0 + $0x220] sm:$0x3]  ;;  %949 = vst [vmem:[%s1246_s1 + $0x84] sm:$0x3] %v753_v24  ;;  %950 = vst [vmem:[%s1246_s1 + $0x86] sm:$0x3] %v760_v25 }
  0x67   :  { %951 = vst [vmem:[%s1246_s1 + $0x88] sm:$0x3] %v767_v26  ;;  %v774_v27 = vld [vmem:[#allocation0 + $0x228] sm:$0x3]  ;;  %v781_v28 = vld [vmem:[#allocation0 + $0x230] sm:$0x3] }
  0x68   :  { %v788_v29 = vld [vmem:[#allocation0 + $0x238] sm:$0x3]  ;;  %952 = vst [vmem:[%s1246_s1 + $0x8a] sm:$0x3] %v774_v27  ;;  %953 = vst [vmem:[%s1246_s1 + $0x8c] sm:$0x3] %v781_v28 }
  0x69   :  { %954 = vst [vmem:[%s1246_s1 + $0x8e] sm:$0x3] %v788_v29 }

// kernel: conditional_discriminator_forward.7
= control target key start
LH: loop header
LB: loop body
LE: loop exit
PB: predicated region body
PF: predicated region fallthrough
CT: control target
= control target key end

     0   :  { %11 = vsyncpa [#allocation3], 0  ;;  %s2447_s18 = smov 0   ;;  %s2449_s19 = smov 0   ;;  %s3038_s0 = inlined_call_operand.vmem [shape: f32[2,2,1152], index: 0, kind: input, shape index: {}]   ;;  %s3039_s1 = inlined_call_operand.vmem [shape: bf16[2,8,1152], index: 1, kind: input, shape index: {}]   ;;  %s3040_s2 = inlined_call_operand.vmem [shape: bf16[1152,256], index: 2, kind: input, shape index: {}]   ;;  %s3041_s3 = inlined_call_operand.hbm [shape: f32[1,256], index: 3, kind: input, shape index: {}]   ;;  %s3042_s4 = inlined_call_operand.vmem [shape: bf16[2,8,256], index: 4, kind: output, shape index: {0}]   ;;  %s3043_s5 = inlined_call_operand.vmem [shape: f32[2,2,256], index: 5, kind: output, shape index: {1}]  }
   0x1   :  { %s2451_s20 = smov 0  }
   0x2 LB: > { %s1932_s21 = sadd.s32 4294967295, %s2411_s20   ;;  %s36_s22 = sadd.s32 1, %s2407_s19  ;;  %s2411_s20 = sphi %s2451_s20, %s17_s20   ;;  %s2407_s19 = sphi %s2449_s19, %s3047_s19   ;;  %s2403_s18 = sphi %s2447_s18, %s3046_s18  }
   0x3   : > { %p38_p0 = scmp.ge.s32.totalorder %s36_s22, 2  ;;  %p1934_p1 = scmp.ge.s32.totalorder %s2411_s20, 1 }
   0x4   : > { %p205_p2 = scmp.lt.s32.totalorder %s2411_s20, 3  ;;  %p2472_p4 = scmp.eq.s32.totalorder %s1932_s21, 0 }
   0x5   : > { %s3049_s22 = smov (%p38_p0, %s36_s22), 0  ;;  %s2413_s25 = smov [#allocation2]  }
   0x6   : > { %p2468_p3 = pnand %p1934_p1, %p205_p2  ;;  %s230_s26 = sshll.u32 %s2413_s25, 4  ;;  %s231_s26 = int_to_ptr.vmem [resolvable:$true] %s230_s26 }
   0x7   : > { %s2370_s27 = scalar_lea.vmem %s231_s26, 32  ;;  %p2378_p11 = scmp.lt.s32.totalorder %s231_s26, %s231_s26 }
   0x8   : > { %p2107_p5 = pneg %p2468_p3  ;;  %p2371_p8 = scmp.ne.s32.totalorder %s231_s26, %s2370_s27 }
   0x9   : > { %p2379_p12 = scmp.lt.s32.totalorder %s2370_s27, %s2370_s27 }
   0xa   : > { %p2108_p6 = pnand %p2472_p4, %p2107_p5 }
   0xb   : > { %p2380_p13 = por %p2379_p12, %p2378_p11 }
   0xc   : > { %p2361_p7 = pneg %p2108_p6 }
   0xe   : > { %p2373_p9 = pnand %p2371_p8, %p2361_p7 }
  0x10   : > { %p2374_p10 = pneg %p2373_p9 }
  0x12   : > { %p2381_p0 = pnand %p2380_p13, %p2374_p10 }
  0x14   : > { %2384 = shalt.err (!%p2381_p0)
}
  0x15   : > { %2110 = dma.hbm_to_vmem [thread:$0]  (!%p2108_p6), %s3041_s3, 32, %s231_s26, [#allocation3]  }
  0x16   : > { %263 = sbr.rel (%p2468_p3) target bundleno = 446 (0x1be), region = 36 }
  0x1b   : > { %2398 = dma.done.wait (%p2472_p4), [#allocation3], 32  }
  0x1c   : > { %2400 = vsyncadd (%p2472_p4), [#allocation3], 4294967264  ;;  %v2141_v0 = vld [vmem:[%s3040_s2 + $0x74] ss:$8 sps:$4 sm:$0xff]   ;;  %v2143_v1 = vld [vmem:[%s3040_s2 + $0x70] ss:$8 sps:$4 sm:$0xff]   ;;  %v387_v35 = vlaneseq }
  0x1d   : > { %1413 = vmatprep.subr.bf16.mxu0 %v2141_v0  ;;  %v2144_v2 = vld [vmem:[%s3040_s2 + $0x174] ss:$8 sps:$4 sm:$0xff]   ;;  %v2146_v3 = vld [vmem:[%s3040_s2 + $0x170] ss:$8 sps:$4 sm:$0xff]   ;;  %v2147_v4 = vld [vmem:[%s3040_s2 + $0x64] ss:$8 sps:$4 sm:$0xff]  }
  0x1e   : > { %1414 = vmatpush1.bf16.msra.mxu0 %v2143_v1  ;;  %v2149_v5 = vld [vmem:[%s3040_s2 + $0x60] ss:$8 sps:$4 sm:$0xff]   ;;  %1454 = vmatprep.subr.bf16.mxu1 %v2144_v2  ;;  %v2150_v6 = vld [vmem:[%s3040_s2 + $0x164] ss:$8 sps:$4 sm:$0xff]   ;;  %v2153_v8 = vld [vmem:[%s3040_s2 + $0x54] ss:$8 sps:$4 sm:$0xff]  }
  0x1f   : > { %1455 = vmatpush1.bf16.msra.mxu1 %v2146_v3  ;;  %1415 = vmatprep.subr.bf16.mxu0 %v2147_v4  ;;  %v2152_v7 = vld [vmem:[%s3040_s2 + $0x160] ss:$8 sps:$4 sm:$0xff]   ;;  %v2155_v9 = vld [vmem:[%s3040_s2 + $0x50] ss:$8 sps:$4 sm:$0xff]   ;;  %v2156_v10 = vld [vmem:[%s3040_s2 + $0x154] ss:$8 sps:$4 sm:$0xff]  }
  0x20   : > { %1456 = vmatprep.subr.bf16.mxu1 %v2150_v6  ;;  %v2159_v11 = vld [vmem:[%s3040_s2 + $0x44] ss:$8 sps:$4 sm:$0xff]   ;;  %v2158_v12 = vld [vmem:[%s3040_s2 + $0x150] ss:$8 sps:$4 sm:$0xff]   ;;  %v2161_v14 = vld [vmem:[%s3040_s2 + $0x40] ss:$8 sps:$4 sm:$0xff]  }
  0x21   : > { %v2162_v13 = vld [vmem:[%s3040_s2 + $0x144] ss:$8 sps:$4 sm:$0xff]   ;;  %v2165_v15 = vld [vmem:[%s3040_s2 + $0x34] ss:$8 sps:$4 sm:$0xff]   ;;  %v2164_v16 = vld [vmem:[%s3040_s2 + $0x140] ss:$8 sps:$4 sm:$0xff]  }
  0x22   : > { %1416 = vmatpush1.bf16.msra.mxu0 %v2149_v5  ;;  %v2168_v17 = vld [vmem:[%s3040_s2 + $0x134] ss:$8 sps:$4 sm:$0xff]   ;;  %v2167_v18 = vld [vmem:[%s3040_s2 + $0x30] ss:$8 sps:$4 sm:$0xff]   ;;  %v2171_v19 = vld [vmem:[%s3040_s2 + $0x24] ss:$8 sps:$4 sm:$0xff]  }
  0x23   : > { %1417 = vmatprep.subr.bf16.mxu0 %v2153_v8  ;;  %1457 = vmatpush1.bf16.msra.mxu1 %v2152_v7  ;;  %v2170_v20 = vld [vmem:[%s3040_s2 + $0x130] ss:$8 sps:$4 sm:$0xff]   ;;  %v2174_v21 = vld [vmem:[%s3040_s2 + $0x124] ss:$8 sps:$4 sm:$0xff]   ;;  %v2173_v22 = vld [vmem:[%s3040_s2 + $0x20] ss:$8 sps:$4 sm:$0xff]  }
  0x24   : > { %1458 = vmatprep.subr.bf16.mxu1 %v2156_v10  ;;  %v2177_v23 = vld [vmem:[%s3040_s2 + $0x14] ss:$8 sps:$4 sm:$0xff]   ;;  %v2176_v24 = vld [vmem:[%s3040_s2 + $0x120] ss:$8 sps:$4 sm:$0xff]   ;;  %v2179_v26 = vld [vmem:[%s3040_s2 + $0x10] ss:$8 sps:$4 sm:$0xff]  }
  0x25   : > { %v2180_v25 = vld [vmem:[%s3040_s2 + $0x114] ss:$8 sps:$4 sm:$0xff]   ;;  %v2183_v27 = vld [vmem:[%s3040_s2 + $0x4] ss:$8 sps:$4 sm:$0xff]   ;;  %v2182_v28 = vld [vmem:[%s3040_s2 + $0x110] ss:$8 sps:$4 sm:$0xff]  }
  0x26   : > { %1418 = vmatpush1.bf16.msra.mxu0 %v2155_v9  ;;  %v2186_v29 = vld [vmem:[%s3040_s2 + $0x104] ss:$8 sps:$4 sm:$0xff]   ;;  %p322_p1 = scmp.lt.s32.totalorder %s2403_s18, 1  ;;  %v2185_v30 = vld [vmem:[%s3040_s2] ss:$8 sps:$4 sm:$0xff]   ;;  %v2612_v40 = vshrl.u32 %v387_v35, 7 }
  0x27   : > { %1419 = vmatprep.subr.bf16.mxu0 %v2159_v11  ;;  %1459 = vmatpush1.bf16.msra.mxu1 %v2158_v12  ;;  %v2189_v31 = vld [vmem:[%s3040_s2 + $0xf4] ss:$8 sps:$4 sm:$0xff]   ;;  %v2188_v32 = vld [vmem:[%s3040_s2 + $0x100] ss:$8 sps:$4 sm:$0xff]   ;;  %v2191_v34 = vld [vmem:[%s3040_s2 + $0xf0] ss:$8 sps:$4 sm:$0xff]  }
  0x28   : > { %1460 = vmatprep.subr.bf16.mxu1 %v2162_v13  ;;  %v2192_v33 = vld [vmem:[%s3040_s2 + $0x1f4] ss:$8 sps:$4 sm:$0xff]   ;;  %s3051_s18 = smov (!%p322_p1, %s2403_s18), 1  ;;  %v2195_v36 = vld [vmem:[%s3040_s2 + $0xe4] ss:$8 sps:$4 sm:$0xff]   ;;  %v2637_v45 = vsub.s32 1, %v2612_v40 }
  0x29   : > { %v2194_v37 = vld [vmem:[%s3040_s2 + $0x1f0] ss:$8 sps:$4 sm:$0xff]   ;;  %v2198_v38 = vld [vmem:[%s3040_s2 + $0x1e4] ss:$8 sps:$4 sm:$0xff]   ;;  %s2101_s21 = smul.u32 18, %s3051_s18  ;;  %v2640_v46 = vsub.s32 0, %v2612_v40 }
  0x2a   : > { %1420 = vmatpush1.bf16.msra.mxu0 %v2161_v14  ;;  %v2197_v39 = vld [vmem:[%s3040_s2 + $0xe0] ss:$8 sps:$4 sm:$0xff]   ;;  %s2102_s25 = smul.u32 36, %s3051_s18  ;;  %v2201_v41 = vld [vmem:[%s3040_s2 + $0xd4] ss:$8 sps:$4 sm:$0xff]   ;;  %v401_v48 = vsub.s32 3, %v2612_v40 }
  0x2b   : > { %1421 = vmatprep.subr.bf16.mxu0 %v2165_v15  ;;  %1461 = vmatpush1.bf16.msra.mxu1 %v2164_v16  ;;  %v2200_v42 = vld [vmem:[%s3040_s2 + $0x1e0] ss:$8 sps:$4 sm:$0xff]   ;;  %v2204_v43 = vld [vmem:[%s3040_s2 + $0x1d4] ss:$8 sps:$4 sm:$0xff]   ;;  %v2203_v44 = vld [vmem:[%s3040_s2 + $0xd0] ss:$8 sps:$4 sm:$0xff]   ;;  %s2629_s11 = scalar_lea.vmem %s3038_s0, %s2101_s21 }
  0x2c   : > { %1462 = vmatprep.subr.bf16.mxu1 %v2168_v17  ;;  %s2634_s14 = scalar_lea.vmem %s3039_s1, %s2102_s25  ;;  %v2207_v47 = vld [vmem:[%s3040_s2 + $0xc4] ss:$8 sps:$4 sm:$0xff]   ;;  %v2206_v49 = vld [vmem:[%s3040_s2 + $0x1d0] ss:$8 sps:$4 sm:$0xff]   ;;  %v397_v50 = vsub.s32 2, %v2612_v40  ;;  %s2099_s23 = sshll.u32 %s3051_s18, 2 }
  0x2d   : > { %v2210_v51 = vld [vmem:[%s3040_s2 + $0x1c4] ss:$8 sps:$4 sm:$0xff]   ;;  %v2209_v54 = vld [vmem:[%s3040_s2 + $0xc0] ss:$8 sps:$4 sm:$0xff]   ;;  %v2213_v61 = vld [vmem:[%s3040_s2 + $0xb4] ss:$8 sps:$4 sm:$0xff]   ;;  %s3005_s26 = scalar_lea.vmem %s3043_s5, %s2099_s23 }
  0x2e   : > { %1422 = vmatpush1.bf16.msra.mxu0 %v2167_v18  ;;  %v368_v52 = vld [vmem:[%s2634_s14] sm:$0xff]  ;;  %v369_v1 = vld [vmem:[%s2634_s14 + $0x8] sm:$0xff]  ;;  %v2216_v3 = vld [vmem:[%s3040_s2 + $0x1b4] ss:$8 sps:$4 sm:$0xff]   ;;  %vm1623_vm9 = vcmp.lt.s32.totalorder %v2612_v40, 4  ;;  %s2098_s27 = sshll.u32 %s3051_s18, 3 }
  0x2f   : > { %1423 = vmatprep.subr.bf16.mxu0 %v2171_v19  ;;  %1463 = vmatpush1.bf16.msra.mxu1 %v2170_v20  ;;  %v2655_v53 = vld [vmem:[%s2629_s11] ss:$2 sm:$0xff]  ;;  %v373_v55 = vunpack.c.l.bf16 %v368_v52  ;;  %v374_v56 = vunpack.c.h.bf16 %v368_v52  ;;  %v2663_v58 = vld [vmem:[%s2629_s11 + $0x1] ss:$2 sm:$0xff]  ;;  %v375_v4 = vunpack.c.l.bf16 %v369_v1  ;;  %v376_v5 = vunpack.c.h.bf16 %v369_v1  ;;  %v2215_v7 = vld [vmem:[%s3040_s2 + $0xb0] ss:$8 sps:$4 sm:$0xff]   ;;  %s355_s30 = scalar_lea.vmem %s3042_s4, %s2098_s27 }
  0x30   : > { %1464 = vmatprep.subr.bf16.mxu1 %v2174_v21  ;;  %v394_v57 = vrot.slane %v2655_v53, %v2637_v45  ;;  %v390_v59 = vrot.slane %v2655_v53, %v2640_v46  ;;  %v2212_v60 = vld [vmem:[%s3040_s2 + $0x1c0] ss:$8 sps:$4 sm:$0xff]   ;;  %v454_v62 = vrot.slane %v2663_v58, %v2637_v45  ;;  %v402_v63 = vrot.slane %v2655_v53, %v401_v48  ;;  %v2219_v11 = vld [vmem:[%s3040_s2 + $0xa4] ss:$8 sps:$4 sm:$0xff]   ;;  %v2218_v13 = vld [vmem:[%s3040_s2 + $0x1b0] ss:$8 sps:$4 sm:$0xff]  }
  0x31   : > { %v398_v2 = vrot.slane %v2655_v53, %v397_v50  ;;  %v462_v6 = vrot.slane %v2663_v58, %v401_v48  ;;  %v450_v10 = vrot.slane %v2663_v58, %v2640_v46  ;;  %v458_v16 = vrot.slane %v2663_v58, %v397_v50  ;;  %v2222_v17 = vld [vmem:[%s3040_s2 + $0x1a4] ss:$8 sps:$4 sm:$0xff]   ;;  %v2221_v19 = vld [vmem:[%s3040_s2 + $0xa0] ss:$8 sps:$4 sm:$0xff]   ;;  %v2251_v52 = vld [vmem:[%s3040_s2 + $0x254] ss:$8 sps:$4 sm:$0xff]  }
  0x32   : > { %1424 = vmatpush1.bf16.msra.mxu0 %v2173_v22  ;;  %v433_v0 = vsub.f32 %v374_v56, %v394_v57  ;;  %v432_v9 = vsub.f32 %v373_v55, %v390_v59  ;;  %v435_v12 = vsub.f32 %v376_v5, %v402_v63  ;;  %v2225_v22 = vld [vmem:[%s3040_s2 + $0x94] ss:$8 sps:$4 sm:$0xff]   ;;  %v2234_v35 = vld [vmem:[%s3040_s2 + $0x184] ss:$8 sps:$4 sm:$0xff]   ;;  %v2249_v56 = vld [vmem:[%s3040_s2 + $0x250] ss:$8 sps:$4 sm:$0xff]  }
  0x33   : > { %1425 = vmatprep.subr.bf16.mxu0 %v2177_v23  ;;  %1465 = vmatpush1.bf16.msra.mxu1 %v2176_v24  ;;  %v434_v15 = vsub.f32 %v375_v4, %v398_v2  ;;  %v2245_v48 = vld [vmem:[%s3040_s2 + $0x264] ss:$8 sps:$4 sm:$0xff]   ;;  %v2254_v55 = vld [vmem:[%s3040_s2 + $0x354] ss:$8 sps:$4 sm:$0xff]   ;;  %v2252_v59 = vld [vmem:[%s3040_s2 + $0x350] ss:$8 sps:$4 sm:$0xff]  }
  0x34   : > { %1466 = vmatprep.subr.bf16.mxu1 %v2180_v25  ;;  %v493_v8 = vmul.f32 %v454_v62, %v433_v0  ;;  %v495_v18 = vmul.f32 %v462_v6, %v435_v12  ;;  %v492_v21 = vmul.f32 %v450_v10, %v432_v9  ;;  %v2224_v25 = vld [vmem:[%s3040_s2 + $0x1a0] ss:$8 sps:$4 sm:$0xff]   ;;  %v2248_v50 = vld [vmem:[%s3040_s2 + $0x364] ss:$8 sps:$4 sm:$0xff]   ;;  %v2263_v62 = vld [vmem:[%s3040_s2 + $0x234] ss:$8 sps:$4 sm:$0xff]  }
  0x35   : > { %v2257_v57 = vld [vmem:[%s3040_s2 + $0x244] ss:$8 sps:$4 sm:$0xff]   ;;  %v2258_v63 = vld [vmem:[%s3040_s2 + $0x340] ss:$8 sps:$4 sm:$0xff]   ;;  %v2266_v0 = vld [vmem:[%s3040_s2 + $0x334] ss:$8 sps:$4 sm:$0xff]  }
  0x36   : > { %1426 = vmatpush1.bf16.msra.mxu0 %v2179_v26  ;;  %vm502_vm0 = vcmp.gt.f32.partialorder %v493_v8, 0.0  ;;  %v511_v14 = vmul.f32 0.2, %v493_v8  ;;  %vm504_vm1 = vcmp.gt.f32.partialorder %v495_v18, 0.0  ;;  %v513_v24 = vmul.f32 0.2, %v495_v18 }
  0x37   : > { %1427 = vmatprep.subr.bf16.mxu0 %v2183_v27  ;;  %1467 = vmatpush1.bf16.msra.mxu1 %v2182_v28  ;;  %v494_v26 = vmul.f32 %v458_v16, %v434_v15  ;;  %v2228_v27 = vld [vmem:[%s3040_s2 + $0x194] ss:$8 sps:$4 sm:$0xff]   ;;  %vm501_vm2 = vcmp.gt.f32.partialorder %v492_v21, 0.0  ;;  %v2261_v1 = vld [vmem:[%s3040_s2 + $0x230] ss:$8 sps:$4 sm:$0xff]   ;;  %v409_v6 = vsub.s32 5, %v2612_v40 }
  0x38   : > { %1468 = vmatprep.subr.bf16.mxu1 %v2186_v29  ;;  %v520_v20 = vsel %vm502_vm0, %v493_v8, %v511_v14  ;;  %v522_v28 = vsel %vm504_vm1, %v495_v18, %v513_v24  ;;  %v2227_v29 = vld [vmem:[%s3040_s2 + $0x90] ss:$8 sps:$4 sm:$0xff]   ;;  %v2269_v2 = vld [vmem:[%s3040_s2 + $0x224] ss:$8 sps:$4 sm:$0xff]   ;;  %v2267_v5 = vld [vmem:[%s3040_s2 + $0x220] ss:$8 sps:$4 sm:$0xff]  }
  0x39   : > { %v529_v23 = vpack.c.bf16 %v520_v20, %v520_v20  ;;  %vm503_vm3 = vcmp.gt.f32.partialorder %v494_v26, 0.0  ;;  %v2272_v4 = vld [vmem:[%s3040_s2 + $0x324] ss:$8 sps:$4 sm:$0xff]   ;;  %v2275_v8 = vld [vmem:[%s3040_s2 + $0x214] ss:$8 sps:$4 sm:$0xff]   ;;  %v417_v10 = vsub.s32 7, %v2612_v40  ;;  %v410_v14 = vrot.slane %v2655_v53, %v409_v6 }
  0x3a   : > { %1428 = vmatpush1.bf16.msra.mxu0 %v2185_v30  ;;  %v510_v30 = vmul.f32 0.2, %v492_v21  ;;  %v2270_v9 = vld [vmem:[%s3040_s2 + $0x320] ss:$8 sps:$4 sm:$0xff]   ;;  %v2278_v12 = vld [vmem:[%s3040_s2 + $0x314] ss:$8 sps:$4 sm:$0xff]   ;;  %v470_v18 = vrot.slane %v2663_v58, %v409_v6 }
  0x3b   : > { %1429 = vmatprep.subr.bf16.mxu0 %v2189_v31  ;;  %1469 = vmatpush1.bf16.msra.mxu1 %v2188_v32  ;;  %v531_v31 = vpack.c.bf16 %v522_v28, %v522_v28  ;;  %v2231_v32 = vld [vmem:[%s3040_s2 + $0x84] ss:$8 sps:$4 sm:$0xff]   ;;  %v2276_v20 = vld [vmem:[%s3040_s2 + $0x310] ss:$8 sps:$4 sm:$0xff]   ;;  %v418_v24 = vrot.slane %v2655_v53, %v417_v10  ;;  %vm1652_vm10 = vcmask 1040384  }
  0x3c   : > { %1470 = vmatprep.subr.bf16.mxu1 %v2192_v33  ;;  %1445 = vmatprep.mubr.bf16.mxu0 %v529_v23  ;;  %v2230_v33 = vld [vmem:[%s3040_s2 + $0x190] ss:$8 sps:$4 sm:$0xff]   ;;  %v2281_v16 = vld [vmem:[%s3040_s2 + $0x204] ss:$8 sps:$4 sm:$0xff]  }
  0x3d   : > { %1486 = vmatprep.mubr.bf16.mxu1 %v531_v31  ;;  %v2308_v6 = vld [vmem:[%s3040_s2 + $0x3c4] ss:$8 sps:$4 sm:$0xff]  }
  0x3e   : > { %1430 = vmatpush2.bf16.msra.mxu0 %v2191_v34  ;;  %v512_v34 = vmul.f32 0.2, %v494_v26 }
  0x3f   : > { %1431 = vmatprep.subr.bf16.mxu0 %v2195_v36  ;;  %1471 = vmatpush2.bf16.msra.mxu1 %v2194_v37  ;;  %v2233_v36 = vld [vmem:[%s3040_s2 + $0x80] ss:$8 sps:$4 sm:$0xff]   ;;  %v519_v37 = vsel %vm501_vm2, %v492_v21, %v510_v30  ;;  %v2284_v21 = vld [vmem:[%s3040_s2 + $0x304] ss:$8 sps:$4 sm:$0xff]  }
  0x40   : > { %1472 = vmatprep.subr.bf16.mxu1 %v2198_v38  ;;  %v2239_v38 = vld [vmem:[%s3040_s2 + $0x274] ss:$8 sps:$4 sm:$0xff]  }
  0x42   : > { %1432 = vmatpush2.bf16.msra.mxu0 %v2197_v39  ;;  %v2236_v39 = vld [vmem:[%s3040_s2 + $0x180] ss:$8 sps:$4 sm:$0xff]  }
  0x43   : > { %1433 = vmatprep.subr.bf16.mxu0 %v2201_v41  ;;  %1473 = vmatpush2.bf16.msra.mxu1 %v2200_v42  ;;  %v521_v41 = vsel %vm503_vm3, %v494_v26, %v512_v34  ;;  %v528_v42 = vpack.c.bf16 %v519_v37, %v519_v37  ;;  %v371_v26 = vld [vmem:[%s2634_s14 + $0x18] sm:$0xff]  ;;  %v2282_v34 = vld [vmem:[%s3040_s2 + $0x300] ss:$8 sps:$4 sm:$0xff]  }
  0x44   : > { %1474 = vmatprep.subr.bf16.mxu1 %v2204_v43  ;;  %v2242_v43 = vld [vmem:[%s3040_s2 + $0x374] ss:$8 sps:$4 sm:$0xff]   ;;  %v379_v30 = vunpack.c.l.bf16 %v371_v26  ;;  %v380_v31 = vunpack.c.h.bf16 %v371_v26  ;;  %v2327_v26 = vld [vmem:[%s3040_s2 + $0x280] ss:$8 sps:$4 sm:$0xff]  }
  0x46   : > { %1434 = vmatpush2.bf16.msra.mxu0 %v2203_v44  ;;  %v2237_v44 = vld [vmem:[%s3040_s2 + $0x270] ss:$8 sps:$4 sm:$0xff]   ;;  %v439_v37 = vsub.f32 %v380_v31, %v418_v24 }
  0x47   : > { %1435 = vmatprep.subr.bf16.mxu0 %v2207_v47  ;;  %1475 = vmatpush2.bf16.msra.mxu1 %v2206_v49  ;;  %v530_v47 = vpack.c.bf16 %v521_v41, %v521_v41  ;;  %v2240_v49 = vld [vmem:[%s3040_s2 + $0x370] ss:$8 sps:$4 sm:$0xff]  }
  0x48   : > { %1476 = vmatprep.subr.bf16.mxu1 %v2210_v51  ;;  %v2243_v51 = vld [vmem:[%s3040_s2 + $0x260] ss:$8 sps:$4 sm:$0xff]  }
  0x4a   : > { %1436 = vmatpush2.bf16.msra.mxu0 %v2209_v54  ;;  %v2246_v54 = vld [vmem:[%s3040_s2 + $0x360] ss:$8 sps:$4 sm:$0xff]  }
  0x4b   : > { %1437 = vmatprep.subr.bf16.mxu0 %v2213_v61  ;;  %1477 = vmatpush2.bf16.msra.mxu1 %v2212_v60  ;;  %v2260_v60 = vld [vmem:[%s3040_s2 + $0x344] ss:$8 sps:$4 sm:$0xff]   ;;  %v2255_v61 = vld [vmem:[%s3040_s2 + $0x240] ss:$8 sps:$4 sm:$0xff]  }
  0x4c   : > { %1478 = vmatprep.subr.bf16.mxu1 %v2216_v3  ;;  %v2264_v3 = vld [vmem:[%s3040_s2 + $0x330] ss:$8 sps:$4 sm:$0xff]  }
  0x4e   : > { %1438 = vmatpush2.bf16.msra.mxu0 %v2215_v7  ;;  %v405_v7 = vsub.s32 4, %v2612_v40 }
  0x4f   : > { %1439 = vmatprep.subr.bf16.mxu0 %v2219_v11  ;;  %1479 = vmatpush2.bf16.msra.mxu1 %v2218_v13  ;;  %v413_v11 = vsub.s32 6, %v2612_v40  ;;  %v2273_v13 = vld [vmem:[%s3040_s2 + $0x210] ss:$8 sps:$4 sm:$0xff]  }
  0x50   : > { %1480 = vmatprep.subr.bf16.mxu1 %v2222_v17  ;;  %v406_v15 = vrot.slane %v2655_v53, %v405_v7  ;;  %v370_v17 = vld [vmem:[%s2634_s14 + $0x10] sm:$0xff] }
  0x51   : > { %v378_v23 = vunpack.c.h.bf16 %v370_v17 }
  0x52   : > { %1440 = vmatpush2.bf16.msra.mxu0 %v2221_v19  ;;  %v466_v19 = vrot.slane %v2663_v58, %v405_v7 }
  0x53   : > { %1441 = vmatprep.subr.bf16.mxu0 %v2225_v22  ;;  %1481 = vmatpush2.bf16.msra.mxu1 %v2224_v25  ;;  %v377_v22 = vunpack.c.l.bf16 %v370_v17  ;;  %v414_v25 = vrot.slane %v2655_v53, %v413_v11  ;;  %v437_v28 = vsub.f32 %v378_v23, %v410_v14  ;;  %v474_v53 = vrot.slane %v2663_v58, %v413_v11  ;;  %v2314_v11 = vld [vmem:[%s3040_s2 + $0x3b4] ss:$8 sps:$4 sm:$0xff]   ;;  %v2312_v14 = vld [vmem:[%s3040_s2 + $0x3b0] ss:$8 sps:$4 sm:$0xff]  }
  0x54   : > { %1482 = vmatprep.subr.bf16.mxu1 %v2228_v27  ;;  %v2279_v27 = vld [vmem:[%s3040_s2 + $0x200] ss:$8 sps:$4 sm:$0xff]   ;;  %v2323_v17 = vld [vmem:[%s3040_s2 + $0x294] ss:$8 sps:$4 sm:$0xff]   ;;  %v2324_v23 = vld [vmem:[%s3040_s2 + $0x390] ss:$8 sps:$4 sm:$0xff]  }
  0x56   : > { %1442 = vmatpush2.bf16.msra.mxu0 %v2227_v29  ;;  %v436_v29 = vsub.f32 %v377_v22, %v406_v15  ;;  %v2320_v15 = vld [vmem:[%s3040_s2 + $0x3a4] ss:$8 sps:$4 sm:$0xff]  }
  0x57   : > { %1443 = vmatprep.subr.bf16.mxu0 %v2231_v32  ;;  %1483 = vmatpush2.bf16.msra.mxu1 %v2230_v33  ;;  %v2287_v32 = vld [vmem:[%s3040_s2 + $0x2f4] ss:$8 sps:$4 sm:$0xff]   ;;  %v478_v33 = vrot.slane %v2663_v58, %v417_v10  ;;  %v2285_v58 = vld [vmem:[%s3040_s2 + $0x2f0] ss:$8 sps:$4 sm:$0xff]   ;;  %v2306_v10 = vld [vmem:[%s3040_s2 + $0x3c0] ss:$8 sps:$4 sm:$0xff]  }
  0x58   : > { %1484 = vmatprep.subr.bf16.mxu1 %v2234_v35  ;;  %v497_v35 = vmul.f32 %v470_v18, %v437_v28  ;;  %v2318_v18 = vld [vmem:[%s3040_s2 + $0x3a0] ss:$8 sps:$4 sm:$0xff]   ;;  %v2329_v22 = vld [vmem:[%s3040_s2 + $0x284] ss:$8 sps:$4 sm:$0xff]   ;;  %v2335_v28 = vld [vmem:[%s3040_s2 + $0x474] ss:$8 sps:$4 sm:$0xff]  }
  0x5a   : > { %1444 = vmatpush2.bf16.msra.mxu0 %v2233_v36  ;;  %v2840_v36 = vmul.f32 %v466_v19, %v436_v29  ;;  %vm506_vm4 = vcmp.gt.f32.partialorder %v497_v35, 0.0  ;;  %v515_v41 = vmul.f32 0.2, %v497_v35  ;;  %v2326_v19 = vld [vmem:[%s3040_s2 + $0x394] ss:$8 sps:$4 sm:$0xff]  }
  0x5b   : > { %1495 = vmatprep.subr.bf16.mxu0 %v2239_v38  ;;  %1485 = vmatpush2.bf16.msra.mxu1 %v2236_v39  ;;  %v438_v38 = vsub.f32 %v379_v30, %v414_v25  ;;  %v2290_v39 = vld [vmem:[%s3040_s2 + $0x3f4] ss:$8 sps:$4 sm:$0xff]   ;;  %v2332_v25 = vld [vmem:[%s3040_s2 + $0x384] ss:$8 sps:$4 sm:$0xff]   ;;  %v2330_v29 = vld [vmem:[%s3040_s2 + $0x380] ss:$8 sps:$4 sm:$0xff]  }
  0x5c   : > { %1536 = vmatprep.subr.bf16.mxu1 %v2242_v43  ;;  %v499_v43 = vmul.f32 %v478_v33, %v439_v37  ;;  %vm505_vm6 = vcmp.gt.f32.partialorder %v2840_v36, 0.0  ;;  %v2339_v37 = vld [vmem:[%s3040_s2 + $0x450] ss:$8 sps:$4 sm:$0xff]  }
  0x5d   : > { %1446 = vmatmul.mubr.bf16.vlgmr.msra.gmra.mxu0 %v528_v42  ;;  %v2293_v42 = vld [vmem:[%s3040_s2 + $0x2e4] ss:$8 sps:$4 sm:$0xff]  }
  0x5e   : > { %1496 = vmatpush1.bf16.msra.mxu0 %v2237_v44  ;;  %1487 = vmatmul.mubr.bf16.vlgmr.msra.gmra.mxu1 %v530_v47  ;;  %v2851_v44 = vmul.f32 %v474_v53, %v438_v38  ;;  %v2288_v47 = vld [vmem:[%s3040_s2 + $0x3f0] ss:$8 sps:$4 sm:$0xff]   ;;  %vm508_vm5 = vcmp.gt.f32.partialorder %v499_v43, 0.0  ;;  %v2338_v53 = vld [vmem:[%s3040_s2 + $0x464] ss:$8 sps:$4 sm:$0xff]  }
  0x5f   : > { %1497 = vmatprep.subr.bf16.mxu0 %v2245_v48  ;;  %1537 = vmatpush1.bf16.msra.mxu1 %v2240_v49  ;;  %v2296_v48 = vld [vmem:[%s3040_s2 + $0x3e4] ss:$8 sps:$4 sm:$0xff]   ;;  %v524_v49 = vsel %vm506_vm4, %v497_v35, %v515_v41  ;;  %v2414_v35 = vmov 0   ;;  %v2345_v41 = vld [vmem:[%s3040_s2 + $0x430] ss:$8 sps:$4 sm:$0xff]  }
  0x60   : > { %1538 = vmatprep.subr.bf16.mxu1 %v2248_v50  ;;  %v533_v50 = vpack.c.bf16 %v524_v49, %v524_v49  ;;  %v516_v24 = vmul.f32 0.2, %v2851_v44  ;;  %vm507_vm7 = vcmp.gt.f32.partialorder %v2851_v44, 0.0  ;;  %v2344_v38 = vld [vmem:[%s3040_s2 + $0x444] ss:$8 sps:$4 sm:$0xff]  }
  0x61   : > { %v2356_v49 = vld [vmem:[%s3040_s2 + $0x404] ss:$8 sps:$4 sm:$0xff]  }
  0x62   : > { %1498 = vmatpush1.bf16.msra.mxu0 %v2243_v51  ;;  %v517_v51 = vmul.f32 0.2, %v499_v43  ;;  %1527 = vmatprep.mubr.bf16.mxu0 %v533_v50  ;;  %v525_v30 = vsel %vm507_vm7, %v2851_v44, %v516_v24  ;;  %v2353_v44 = vld [vmem:[%s3040_s2 + $0x414] ss:$8 sps:$4 sm:$0xff]   ;;  %v2354_v50 = vld [vmem:[%s3040_s2 + $0x400] ss:$8 sps:$4 sm:$0xff]  }
  0x63   : > { %1499 = vmatprep.subr.bf16.mxu0 %v2251_v52  ;;  %1539 = vmatpush1.bf16.msra.mxu1 %v2246_v54  ;;  %v2291_v52 = vld [vmem:[%s3040_s2 + $0x2e0] ss:$8 sps:$4 sm:$0xff]   ;;  %v534_v33 = vpack.c.bf16 %v525_v30, %v525_v30 }
  0x64   : > { %1540 = vmatprep.subr.bf16.mxu1 %v2254_v55  ;;  %v2294_v54 = vld [vmem:[%s3040_s2 + $0x3e0] ss:$8 sps:$4 sm:$0xff]   ;;  %v2299_v55 = vld [vmem:[%s3040_s2 + $0x2d4] ss:$8 sps:$4 sm:$0xff]  }
  0x66   : > { %1500 = vmatpush1.bf16.msra.mxu0 %v2249_v56  ;;  %v526_v56 = vsel %vm508_vm5, %v499_v43, %v517_v51  ;;  %v2348_v43 = vld [vmem:[%s3040_s2 + $0x420] ss:$8 sps:$4 sm:$0xff]  }
  0x67   : > { %1501 = vmatprep.subr.bf16.mxu0 %v2257_v57  ;;  %1541 = vmatpush1.bf16.msra.mxu1 %v2252_v59  ;;  %v535_v57 = vpack.c.bf16 %v526_v56, %v526_v56  ;;  %v372_v59 = vld [vmem:[%s2634_s14 + $0x20] sm:$0xf] }
  0x68   : > { %1542 = vmatprep.subr.bf16.mxu1 %v2260_v60  ;;  %v1946_v60 = vld [vmem:[%s2629_s11 + $0x10] ss:$2 sm:$0x1] }
  0x69   : > { %1568 = vmatprep.mubr.bf16.mxu1 %v535_v57 }
  0x6a   : > { %1502 = vmatpush1.bf16.msra.mxu0 %v2255_v61  ;;  %v2302_v61 = vld [vmem:[%s3040_s2 + $0x3d4] ss:$8 sps:$4 sm:$0xff]  }
  0x6b   : > { %1503 = vmatprep.subr.bf16.mxu0 %v2263_v62  ;;  %1543 = vmatpush1.bf16.msra.mxu1 %v2258_v63  ;;  %v381_v62 = vunpack.c.l.bf16 %v372_v59  ;;  %v422_v63 = vrot.slane %v1946_v60, %v2640_v46 }
  0x6c   : > { %1544 = vmatprep.subr.bf16.mxu1 %v2266_v0  ;;  %v1948_v0 = vld [vmem:[%s2629_s11 + $0x11] ss:$2 sm:$0x1] }
  0x6e   : > { %1504 = vmatpush1.bf16.msra.mxu0 %v2261_v1  ;;  %v2297_v1 = vld [vmem:[%s3040_s2 + $0x2d0] ss:$8 sps:$4 sm:$0xff]  }
  0x6f   : > { %1505 = vmatprep.subr.bf16.mxu0 %v2269_v2  ;;  %1545 = vmatpush1.bf16.msra.mxu1 %v2264_v3  ;;  %v482_v2 = vrot.slane %v1948_v0, %v2640_v46  ;;  %v2305_v3 = vld [vmem:[%s3040_s2 + $0x2c4] ss:$8 sps:$4 sm:$0xff]  }
  0x70   : > { %1546 = vmatprep.subr.bf16.mxu1 %v2272_v4  ;;  %v440_v4 = vsub.f32 %v381_v62, %v422_v63 }
  0x72   : > { %1506 = vmatpush1.bf16.msra.mxu0 %v2267_v5  ;;  %v2300_v5 = vld [vmem:[%s3040_s2 + $0x3d0] ss:$8 sps:$4 sm:$0xff]   ;;  %v2888_v7 = vmul.f32 %v482_v2, %v440_v4 }
  0x73   : > { %1507 = vmatprep.subr.bf16.mxu0 %v2275_v8  ;;  %1547 = vmatpush1.bf16.msra.mxu1 %v2270_v9  ;;  %v2303_v8 = vld [vmem:[%s3040_s2 + $0x2c0] ss:$8 sps:$4 sm:$0xff]   ;;  %v2311_v9 = vld [vmem:[%s3040_s2 + $0x2b4] ss:$8 sps:$4 sm:$0xff]  }
  0x74   : > { %1548 = vmatprep.subr.bf16.mxu1 %v2278_v12  ;;  %v2309_v12 = vld [vmem:[%s3040_s2 + $0x2b0] ss:$8 sps:$4 sm:$0xff]   ;;  %vm509_vm8 = vcmp.gt.f32.partialorder %v2888_v7, 0.0 }
  0x76   : > { %1508 = vmatpush1.bf16.msra.mxu0 %v2273_v13  ;;  %v2317_v13 = vld [vmem:[%s3040_s2 + $0x2a4] ss:$8 sps:$4 sm:$0xff]  }
  0x77   : > { %1509 = vmatprep.subr.bf16.mxu0 %v2281_v16  ;;  %1549 = vmatpush1.bf16.msra.mxu1 %v2276_v20  ;;  %v2315_v16 = vld [vmem:[%s3040_s2 + $0x2a0] ss:$8 sps:$4 sm:$0xff]   ;;  %v2321_v20 = vld [vmem:[%s3040_s2 + $0x290] ss:$8 sps:$4 sm:$0xff]  }
  0x78   : > { %1550 = vmatprep.subr.bf16.mxu1 %v2284_v21  ;;  %v514_v21 = vmul.f32 0.2, %v2840_v36 }
  0x7a   : > { %1510 = vmatpush1.bf16.msra.mxu0 %v2279_v27  ;;  %v523_v27 = vsel %vm505_vm6, %v2840_v36, %v514_v21  ;;  %v2341_v36 = vld [vmem:[%s3040_s2 + $0x454] ss:$8 sps:$4 sm:$0xff]  }
  0x7b   : > { %1511 = vmatprep.subr.bf16.mxu0 %v2287_v32  ;;  %1551 = vmatpush1.bf16.msra.mxu1 %v2282_v34  ;;  %v532_v31 = vpack.c.bf16 %v523_v27, %v523_v27  ;;  %v2333_v32 = vld [vmem:[%s3040_s2 + $0x470] ss:$8 sps:$4 sm:$0xff]   ;;  %v2336_v34 = vld [vmem:[%s3040_s2 + $0x460] ss:$8 sps:$4 sm:$0xff]  }
  0x7c   : > { %1552 = vmatprep.subr.bf16.mxu1 %v2290_v39  ;;  %v2342_v39 = vld [vmem:[%s3040_s2 + $0x440] ss:$8 sps:$4 sm:$0xff]  }
  0x7e   : > { %1512 = vmatpush2.bf16.msra.mxu0 %v2285_v58  ;;  %v2347_v58 = vld [vmem:[%s3040_s2 + $0x434] ss:$8 sps:$4 sm:$0xff]  }
  0x7f   : > { %1513 = vmatprep.subr.bf16.mxu0 %v2293_v42  ;;  %1553 = vmatpush2.bf16.msra.mxu1 %v2288_v47  ;;  %v2350_v42 = vld [vmem:[%s3040_s2 + $0x424] ss:$8 sps:$4 sm:$0xff]   ;;  %v2351_v47 = vld [vmem:[%s3040_s2 + $0x410] ss:$8 sps:$4 sm:$0xff]  }
  0x80   : > { %1554 = vmatprep.subr.bf16.mxu1 %v2296_v48  ;;  %v518_v48 = vmul.f32 0.2, %v2888_v7 }
  0x82   : > { %1514 = vmatpush2.bf16.msra.mxu0 %v2291_v52  ;;  %v527_v51 = vsel %vm509_vm8, %v2888_v7, %v518_v48 }
  0x83   : > { %1515 = vmatprep.subr.bf16.mxu0 %v2299_v55  ;;  %1555 = vmatpush2.bf16.msra.mxu1 %v2294_v54  ;;  %v536_v52 = vpack.c.bf16 %v527_v51, %v527_v51  ;;  %v2415_v54 = vmov 0.0   ;;  %v681_v55 = vld [vmem:[#allocation2] sm:$0x3] }
  0x84   : > { %1556 = vmatprep.subr.bf16.mxu1 %v2302_v61  ;;  %1659 = vst [vmem:[%s3005_s26] sm:$0xf] %v2415_v54  ;;  %v686_v56 = vrot.slane %v681_v55, %v2640_v46  ;;  %v690_v57 = vrot.slane %v681_v55, %v2637_v45 }
  0x86   : > { %1516 = vmatpush2.bf16.msra.mxu0 %v2297_v1 }
  0x87   : > { %1517 = vmatprep.subr.bf16.mxu0 %v2305_v3  ;;  %1557 = vmatpush2.bf16.msra.mxu1 %v2300_v5 }
  0x88   : > { %1558 = vmatprep.subr.bf16.mxu1 %v2308_v6 }
  0x8a   : > { %1518 = vmatpush2.bf16.msra.mxu0 %v2303_v8 }
  0x8b   : > { %1519 = vmatprep.subr.bf16.mxu0 %v2311_v9  ;;  %1559 = vmatpush2.bf16.msra.mxu1 %v2306_v10 }
  0x8c   : > { %1560 = vmatprep.subr.bf16.mxu1 %v2314_v11 }
  0x8e   : > { %1520 = vmatpush2.bf16.msra.mxu0 %v2309_v12 }
  0x8f   : > { %1521 = vmatprep.subr.bf16.mxu0 %v2317_v13  ;;  %1561 = vmatpush2.bf16.msra.mxu1 %v2312_v14 }
  0x90   : > { %1562 = vmatprep.subr.bf16.mxu1 %v2320_v15 }
  0x92   : > { %1522 = vmatpush2.bf16.msra.mxu0 %v2315_v16 }
  0x93   : > { %1523 = vmatprep.subr.bf16.mxu0 %v2323_v17  ;;  %1563 = vmatpush2.bf16.msra.mxu1 %v2318_v18 }
  0x94   : > { %1564 = vmatprep.subr.bf16.mxu1 %v2326_v19 }
  0x96   : > { %1524 = vmatpush2.bf16.msra.mxu0 %v2321_v20 }
  0x97   : > { %1525 = vmatprep.subr.bf16.mxu0 %v2329_v22  ;;  %1565 = vmatpush2.bf16.msra.mxu1 %v2324_v23 }
  0x98   : > { %1566 = vmatprep.subr.bf16.mxu1 %v2332_v25 }
  0x9a   : > { %1526 = vmatpush2.bf16.msra.mxu0 %v2327_v26 }
  0x9b   : > { %1577 = vmatprep.subr.bf16.mxu0 %v2335_v28  ;;  %1567 = vmatpush2.bf16.msra.mxu1 %v2330_v29 }
  0x9d   : > { %1528 = vmatmul.mubr.bf16.vlgmr.msra.gmra.mxu0 %v532_v31 }
  0x9e   : > { %1578 = vmatpush1.bf16.msra.mxu0 %v2333_v32  ;;  %1609 = vmatprep.mubr.bf16.mxu0 %v2414_v35 }
  0x9f   : > { %1569 = vmatmul.mubr.bf16.vlgmr.msra.gmra.mxu1 %v534_v33  ;;  %1579 = vmatprep.subr.bf16.mxu0 %v2338_v53 }
  0xa2   : > { %1580 = vmatpush1.bf16.msra.mxu0 %v2336_v34 }
  0xa3   : > { %1581 = vmatprep.subr.bf16.mxu0 %v2341_v36 }
  0xa6   : > { %1582 = vmatpush1.bf16.msra.mxu0 %v2339_v37 }
  0xa7   : > { %1583 = vmatprep.subr.bf16.mxu0 %v2344_v38 }
  0xaa   : > { %1584 = vmatpush1.bf16.msra.mxu0 %v2342_v39 }
  0xab   : > { %1585 = vmatprep.subr.bf16.mxu0 %v2347_v58 }
  0xae   : > { %1586 = vmatpush1.bf16.msra.mxu0 %v2345_v41  ;;  %v2416_v41 = vmov 1983009808  }
  0xaf   : > { %1587 = vmatprep.subr.bf16.mxu0 %v2350_v42  ;;  %v1665_v42 = vunpack.c.l.s4 %v2416_v41 }
  0xb2   : > { %1588 = vmatpush1.bf16.msra.mxu0 %v2348_v43 }
  0xb3   : > { %1589 = vmatprep.subr.bf16.mxu0 %v2353_v44 }
  0xb6   : > { %1590 = vmatpush1.bf16.msra.mxu0 %v2351_v47 }
  0xb7   : > { %1591 = vmatprep.subr.bf16.mxu0 %v2356_v49 }
  0xba   : > { %1592 = vmatpush1.bf16.msra.mxu0 %v2354_v50 }
  0xbd   : > { %1610 = vmatmul.mubr.bf16.vlgmr.msra.gmra.mxu0 %v536_v52  ;;  %v1666_v52 = vunpack.c.0.s8 %v1665_v42 }
 0x11d   : > { %v1447_v59 = vpop.f32.mrf.mxu0 }
 0x11e   : > { %v1448_v60 = vadd.f32 %v1447_v59, %v686_v56  ;;  %v1488_v62 = vpop.f32.mrf.mxu1 }
 0x11f   : > { %v1449_v61 = vpop.f32.mrf.mxu0 }
 0x120   : > { %v1450_v63 = vadd.f32 %v1449_v61, %v690_v57  ;;  %v1489_v0 = vadd.f32 %v1488_v62, %v1448_v60  ;;  %v1490_v2 = vpop.f32.mrf.mxu1  ;;  %v1669_v60 = vsub.s32 %v1666_v52, %v2612_v40 }
 0x121   : > { %v1451_v1 = vpop.f32.mrf.mxu0 }
 0x122   : > { %v1491_v3 = vadd.f32 %v1490_v2, %v1450_v63  ;;  %v1492_v5 = vpop.f32.mrf.mxu1 }
 0x123   : > { %v1452_v4 = vpop.f32.mrf.mxu0 }
 0x124   : > { %v1493_v6 = vpop.f32.mrf.mxu1 }
 0x15d   : > { %v1529_v7 = vpop.f32.mrf.mxu0 }
 0x15e   : > { %v1530_v15 = vadd.f32 %v1529_v7, %v1489_v0  ;;  %v1660_v0 = vld [vmem:[%s3005_s26] sm:$0xf] }
 0x15f   : > { %v1531_v8 = vpop.f32.mrf.mxu0  ;;  %v1570_v9 = vpop.f32.mrf.mxu1 }
 0x160   : > { %v1532_v16 = vadd.f32 %v1531_v8, %v1491_v3  ;;  %v1571_v17 = vadd.f32 %v1570_v9, %v1530_v15 }
 0x161   : > { %v1533_v10 = vpop.f32.mrf.mxu0  ;;  %v1572_v11 = vpop.f32.mrf.mxu1 }
 0x162   : > { %v1573_v19 = vadd.f32 %v1572_v11, %v1532_v16 }
 0x163   : > { %v1534_v12 = vpop.f32.mrf.mxu0  ;;  %v1574_v13 = vpop.f32.mrf.mxu1 }
 0x165   : > { %v1575_v14 = vpop.f32.mrf.mxu1 }
 0x17d   : > { %v1611_v18 = vpop.f32.mrf.mxu0 }
 0x17e   : > { %v1612_v20 = vadd.f32 %v1611_v18, %v1571_v17 }
 0x17f   : > { %v1613_v21 = vpop.f32.mrf.mxu0 }
 0x180   : > { %v1624_v22 = vsel %vm1623_vm9, %v1612_v20, 0.0  ;;  %v1614_v23 = vadd.f32 %v1613_v21, %v1573_v19 }
 0x181   : > { %v1626_v24 = vrot.slane %v1624_v22, 4  ;;  %v1638_v25 = vmul.f32 %v1624_v22, %v1624_v22  ;;  %v1615_v26 = vpop.f32.mrf.mxu0 }
 0x182   : > { %v1625_v27 = vsel %vm1623_vm9, %v1614_v23, 0.0  ;;  %v2100_v28 = vpack.c.bf16 %v1614_v23, %v1612_v20 }
 0x183   : > { %v1627_v29 = vadd.f32 %v1626_v24, %v1624_v22  ;;  %v1640_v30 = vrot.slane %v1638_v25, 4  ;;  %v1632_v31 = vrot.slane %v1625_v27, 4  ;;  %v1639_v32 = vmul.f32 %v1625_v27, %v1625_v27  ;;  %v1616_v33 = vpop.f32.mrf.mxu0 }
 0x184   : > { %1731 = vst [vmem:[%s355_s30] sm:$0xff] %v2100_v28 }
 0x185   : > { %v1628_v53 = vrot.slane %v1627_v29, 2  ;;  %v1641_v34 = vadd.f32 %v1640_v30, %v1638_v25  ;;  %v1633_v35 = vadd.f32 %v1632_v31, %v1625_v27  ;;  %v1646_v36 = vrot.slane %v1639_v32, 4 }
 0x187   : > { %v1629_v37 = vadd.f32 %v1628_v53, %v1627_v29  ;;  %v1642_v38 = vrot.slane %v1641_v34, 2  ;;  %v1634_v39 = vrot.slane %v1633_v35, 2  ;;  %v1647_v58 = vadd.f32 %v1646_v36, %v1639_v32 }
 0x189   : > { %v1643_v43 = vadd.f32 %v1642_v38, %v1641_v34  ;;  %v1635_v44 = vadd.f32 %v1634_v39, %v1633_v35  ;;  %v1648_v47 = vrot.slane %v1647_v58, 2  ;;  %v1630_v48 = vrot.slane %v1629_v37, 1 }
 0x18b   : > { %v1644_v49 = vrot.slane %v1643_v43, 1  ;;  %v1636_v50 = vrot.slane %v1635_v44, 1  ;;  %v1649_v51 = vadd.f32 %v1648_v47, %v1647_v58  ;;  %v1631_v56 = vadd.f32 %v1630_v48, %v1629_v37 }
 0x18d   : > { %v1645_v54 = vadd.f32 %v1644_v49, %v1643_v43  ;;  %v1650_v55 = vrot.slane %v1649_v51, 1  ;;  %v1637_v57 = vadd.f32 %v1636_v50, %v1635_v44 }
 0x18f   : > { %v1651_v59 = vadd.f32 %v1650_v55, %v1649_v51  ;;  %v1653_v61 = vsel %vm1652_vm10, %v1631_v56, %v1645_v54 }
 0x191   : > { %v1654_v62 = vsel %vm1652_vm10, %v1637_v57, %v1651_v59 }
 0x192   : > { %v1663_v63 = vcombine.low %v1653_v61, %v1654_v62 }
 0x194   : > { %v1670_v1 = vrot.slane %v1663_v63, %v1669_v60 }
 0x196   : > { %v1672_v2 = vadd.f32 %v1670_v1, %v1660_v0 }
 0x198   : > { %1673 = vst [vmem:[%s3005_s26] sm:$0xf] %v1672_v2 }
 0x19f   : > { %v1677_v3 = vld [vmem:[%s3005_s26] ss:$2 sm:$0x3]  ;;  %v2093_v4 = vld [vmem:[%s3005_s26 + $0x1] ss:$2 sm:$0x3] }
 0x1a0   : > { %v1678_v5 = vmul.f32 0.25, %v1677_v3  ;;  %v1681_v6 = vmul.f32 0.25, %v2093_v4 }
 0x1a2   : > { %v1682_v7 = vmul.f32 %v1678_v5, %v1678_v5  ;;  %v1691_v11 = vrot.slane %v1678_v5, %v2640_v46  ;;  %v1695_v12 = vrot.slane %v1678_v5, %v2637_v45 }
 0x1a4   : > { %v1683_v8 = vsub.f32 %v1681_v6, %v1682_v7 }
 0x1a6   : > { %v1684_v9 = vmax.f32 %v1683_v8, 0.0 }
 0x1a8   : > { %v1685_v10 = vadd.f32 1e-05, %v1684_v9 }
 0x1aa   : > { %2357 = vrsqrt.f32 %v1685_v10 }
 0x1b7   : > { %v2358_v40 = vpop.eup %2357 }
 0x1b8   : > { %v1702_v13 = vrot.slane %v2358_v40, %v2640_v46  ;;  %v1706_v14 = vrot.slane %v2358_v40, %v2637_v45 }
 0x1ba   : > { %v1709_v15 = vsel %vm1652_vm10, %v1691_v11, %v1702_v13  ;;  %v1710_v16 = vsel %vm1652_vm10, %v1695_v12, %v1706_v14 }
 0x1bb   : > { %v1713_v17 = vcombine.low %v1709_v15, %v1710_v16 }
 0x1bd   : > { %2094 = vst.sshfl [vmem:[%s3005_s26] sm:$0x33 pattern:$0x76325410] %v1713_v17 }
 0x1be PF: > { %s17_s20 = sadd.s32 1, %s2411_s20   ;;  %s3046_s18 = smov %s2407_s19 }
 0x1bf   : > { %p14_p2 = scmp.ge.s32.totalorder %s17_s20, 4   ;;  %s3047_s19 = smov %s3049_s22 }
 0x1c1   :  { %16 = sbr.rel (!%p14_p2) target bundleno = 2 (0x2), region = 102 }
 0x1c6   :  { %1795 = vsyncpa [#allocation3], 1 }
 0x1c7   :  { %1797 = vsyncpa [#allocation3 + $0x1], 1 }

// kernel: conditional_discriminator_forward.8
= control target key start
LH: loop header
LB: loop body
LE: loop exit
PB: predicated region body
PF: predicated region fallthrough
CT: control target
= control target key end

     0   :  { %s6860_s18 = smov 0   ;;  %s6862_s19 = smov 0   ;;  %s8952_s0 = inlined_call_operand.vmem [shape: f32[2,2,2304], index: 0, kind: input, shape index: {}]   ;;  %s8953_s1 = inlined_call_operand.vmem [shape: bf16[2,8,2304], index: 1, kind: input, shape index: {}]   ;;  %s8954_s2 = inlined_call_operand.vmem [shape: bf16[2304,512], index: 2, kind: input, shape index: {}]   ;;  %s8955_s3 = inlined_call_operand.vmem [shape: f32[1,512], index: 3, kind: input, shape index: {}]   ;;  %s8956_s4 = inlined_call_operand.vmem [shape: bf16[2,8,512], index: 4, kind: output, shape index: {0}]   ;;  %s8957_s5 = inlined_call_operand.vmem [shape: f32[2,2,512], index: 5, kind: output, shape index: {1}]  }
   0x1   :  { %s6864_s20 = smov 0  }
   0x2 LB: > { %s35_s21 = sadd.s32 1, %s6823_s19  ;;  %p5313_p0 = scmp.ge.s32.totalorder %s6827_s20, 1  ;;  %s6827_s20 = sphi %s6864_s20, %s16_s20   ;;  %s6823_s19 = sphi %s6862_s19, %s8959_s19   ;;  %s6819_s18 = sphi %s6860_s18, %s8958_s18  }
   0x3   : > { %p37_p1 = scmp.ge.s32.totalorder %s35_s21, 2  ;;  %p252_p2 = scmp.lt.s32.totalorder %s6827_s20, 3 }
   0x5   : > { %s8961_s21 = smov (%p37_p1, %s35_s21), 0  ;;  %p253_p3 = pnand %p5313_p0, %p252_p2 }
   0x6   : > { %p315_p4 = scmp.lt.s32.totalorder (!%p253_p3), %s6819_s18, 1 }
   0x7   : > { %256 = sbr.rel (%p253_p3) target bundleno = 852 (0x354), region = 36 }
   0xc   : > { %v5938_v0 = vld [vmem:[%s8954_s2 + $0xe4] ss:$16 sps:$4 sm:$0xff]   ;;  %v5942_v2 = vld [vmem:[%s8954_s2 + $0xe0] ss:$16 sps:$4 sm:$0xff]   ;;  %s8963_s18 = smov (!%p315_p4, %s6819_s18), 1  ;;  %v399_v36 = vlaneseq }
   0xd   : > { %v5940_v1 = vld [vmem:[%s8954_s2 + $0x2e4] ss:$16 sps:$4 sm:$0xff]   ;;  %4174 = vmatprep.subr.bf16.mxu0 %v5938_v0  ;;  %v5943_v3 = vld [vmem:[%s8954_s2 + $0x2e0] ss:$16 sps:$4 sm:$0xff]   ;;  %s5911_s12 = smul.u32 72, %s8963_s18  ;;  %s5906_s13 = sshll.u32 %s8963_s18, 4 }
   0xe   : > { %4215 = vmatprep.subr.bf16.mxu1 %v5940_v1  ;;  %v5944_v4 = vld [vmem:[%s8954_s2 + $0xc4] ss:$16 sps:$4 sm:$0xff]   ;;  %4175 = vmatpush1.bf16.msra.mxu0 %v5942_v2  ;;  %v5948_v6 = vld [vmem:[%s8954_s2 + $0xc0] ss:$16 sps:$4 sm:$0xff]   ;;  %v7002_v40 = vshrl.u32 %v399_v36, 7  ;;  %s5910_s17 = smul.u32 36, %s8963_s18  ;;  %s8732_s27 = scalar_lea.vmem %s8956_s4, %s5906_s13 }
   0xf   : > { %4216 = vmatpush1.bf16.msra.mxu1 %v5943_v3  ;;  %v5946_v5 = vld [vmem:[%s8954_s2 + $0x2c4] ss:$16 sps:$4 sm:$0xff]   ;;  %4176 = vmatprep.subr.bf16.mxu0 %v5944_v4  ;;  %v5949_v7 = vld [vmem:[%s8954_s2 + $0x2c0] ss:$16 sps:$4 sm:$0xff]   ;;  %s7023_s30 = scalar_lea.vmem %s8953_s1, %s5911_s12 }
  0x10   : > { %4217 = vmatprep.subr.bf16.mxu1 %v5946_v5  ;;  %v5950_v8 = vld [vmem:[%s8954_s2 + $0xa4] ss:$16 sps:$4 sm:$0xff]   ;;  %v5954_v10 = vld [vmem:[%s8954_s2 + $0xa0] ss:$16 sps:$4 sm:$0xff]   ;;  %s7031_s10 = scalar_lea.vmem %s8952_s0, %s5910_s17  ;;  %v7034_v47 = vsub.s32 1, %v7002_v40  ;;  %v7040_v49 = vsub.s32 3, %v7002_v40 }
  0x11   : > { %v5952_v9 = vld [vmem:[%s8954_s2 + $0x2a4] ss:$16 sps:$4 sm:$0xff]   ;;  %v5955_v11 = vld [vmem:[%s8954_s2 + $0x2a0] ss:$16 sps:$4 sm:$0xff]   ;;  %v7043_v50 = vsub.s32 0, %v7002_v40  ;;  %v7053_v54 = vsub.s32 2, %v7002_v40 }
  0x12   : > { %4177 = vmatpush1.bf16.msra.mxu0 %v5948_v6  ;;  %v5956_v12 = vld [vmem:[%s8954_s2 + $0x84] ss:$16 sps:$4 sm:$0xff]   ;;  %v5960_v14 = vld [vmem:[%s8954_s2 + $0x80] ss:$16 sps:$4 sm:$0xff]   ;;  %v365_v59 = vld [vmem:[%s7023_s30 + $0x8] sm:$0xff] }
  0x13   : > { %4218 = vmatpush1.bf16.msra.mxu1 %v5949_v7  ;;  %4178 = vmatprep.subr.bf16.mxu0 %v5950_v8  ;;  %v5958_v13 = vld [vmem:[%s8954_s2 + $0x284] ss:$16 sps:$4 sm:$0xff]   ;;  %v5961_v15 = vld [vmem:[%s8954_s2 + $0x280] ss:$16 sps:$4 sm:$0xff]   ;;  %v375_v63 = vunpack.c.l.bf16 %v365_v59  ;;  %v376_v0 = vunpack.c.h.bf16 %v365_v59 }
  0x14   : > { %4219 = vmatprep.subr.bf16.mxu1 %v5952_v9  ;;  %v5962_v16 = vld [vmem:[%s8954_s2 + $0x64] ss:$16 sps:$4 sm:$0xff]   ;;  %v5966_v18 = vld [vmem:[%s8954_s2 + $0x60] ss:$16 sps:$4 sm:$0xff]  }
  0x15   : > { %v5964_v17 = vld [vmem:[%s8954_s2 + $0x264] ss:$16 sps:$4 sm:$0xff]   ;;  %v5967_v19 = vld [vmem:[%s8954_s2 + $0x260] ss:$16 sps:$4 sm:$0xff]  }
  0x16   : > { %4179 = vmatpush1.bf16.msra.mxu0 %v5954_v10  ;;  %v5968_v20 = vld [vmem:[%s8954_s2 + $0x44] ss:$16 sps:$4 sm:$0xff]   ;;  %v5972_v22 = vld [vmem:[%s8954_s2 + $0x40] ss:$16 sps:$4 sm:$0xff]  }
  0x17   : > { %4220 = vmatpush1.bf16.msra.mxu1 %v5955_v11  ;;  %4180 = vmatprep.subr.bf16.mxu0 %v5956_v12  ;;  %v5970_v21 = vld [vmem:[%s8954_s2 + $0x244] ss:$16 sps:$4 sm:$0xff]   ;;  %v5973_v23 = vld [vmem:[%s8954_s2 + $0x240] ss:$16 sps:$4 sm:$0xff]  }
  0x18   : > { %4221 = vmatprep.subr.bf16.mxu1 %v5958_v13  ;;  %v5974_v24 = vld [vmem:[%s8954_s2 + $0x24] ss:$16 sps:$4 sm:$0xff]   ;;  %v5978_v26 = vld [vmem:[%s8954_s2 + $0x20] ss:$16 sps:$4 sm:$0xff]  }
  0x19   : > { %v5976_v25 = vld [vmem:[%s8954_s2 + $0x224] ss:$16 sps:$4 sm:$0xff]   ;;  %v5979_v27 = vld [vmem:[%s8954_s2 + $0x220] ss:$16 sps:$4 sm:$0xff]  }
  0x1a   : > { %4181 = vmatpush1.bf16.msra.mxu0 %v5960_v14  ;;  %v5980_v28 = vld [vmem:[%s8954_s2 + $0x4] ss:$16 sps:$4 sm:$0xff]   ;;  %v5984_v30 = vld [vmem:[%s8954_s2] ss:$16 sps:$4 sm:$0xff]  }
  0x1b   : > { %4222 = vmatpush1.bf16.msra.mxu1 %v5961_v15  ;;  %4182 = vmatprep.subr.bf16.mxu0 %v5962_v16  ;;  %v5982_v29 = vld [vmem:[%s8954_s2 + $0x204] ss:$16 sps:$4 sm:$0xff]   ;;  %v5985_v31 = vld [vmem:[%s8954_s2 + $0x200] ss:$16 sps:$4 sm:$0xff]  }
  0x1c   : > { %4223 = vmatprep.subr.bf16.mxu1 %v5964_v17  ;;  %v5986_v32 = vld [vmem:[%s8954_s2 + $0x1e4] ss:$16 sps:$4 sm:$0xff]   ;;  %v5990_v34 = vld [vmem:[%s8954_s2 + $0x1e0] ss:$16 sps:$4 sm:$0xff]  }
  0x1d   : > { %v5988_v33 = vld [vmem:[%s8954_s2 + $0x3e4] ss:$16 sps:$4 sm:$0xff]   ;;  %v5991_v35 = vld [vmem:[%s8954_s2 + $0x3e0] ss:$16 sps:$4 sm:$0xff]  }
  0x1e   : > { %4183 = vmatpush1.bf16.msra.mxu0 %v5966_v18  ;;  %v5992_v37 = vld [vmem:[%s8954_s2 + $0x1c4] ss:$16 sps:$4 sm:$0xff]   ;;  %v5996_v39 = vld [vmem:[%s8954_s2 + $0x1c0] ss:$16 sps:$4 sm:$0xff]  }
  0x1f   : > { %4224 = vmatpush1.bf16.msra.mxu1 %v5967_v19  ;;  %4184 = vmatprep.subr.bf16.mxu0 %v5968_v20  ;;  %v5994_v38 = vld [vmem:[%s8954_s2 + $0x3c4] ss:$16 sps:$4 sm:$0xff]   ;;  %v5997_v41 = vld [vmem:[%s8954_s2 + $0x3c0] ss:$16 sps:$4 sm:$0xff]  }
  0x20   : > { %4225 = vmatprep.subr.bf16.mxu1 %v5970_v21  ;;  %v5998_v42 = vld [vmem:[%s8954_s2 + $0x1a4] ss:$16 sps:$4 sm:$0xff]   ;;  %v6002_v44 = vld [vmem:[%s8954_s2 + $0x1a0] ss:$16 sps:$4 sm:$0xff]  }
  0x21   : > { %v6000_v43 = vld [vmem:[%s8954_s2 + $0x3a4] ss:$16 sps:$4 sm:$0xff]   ;;  %v6003_v45 = vld [vmem:[%s8954_s2 + $0x3a0] ss:$16 sps:$4 sm:$0xff]  }
  0x22   : > { %4185 = vmatpush1.bf16.msra.mxu0 %v5972_v22  ;;  %v6004_v46 = vld [vmem:[%s8954_s2 + $0x184] ss:$16 sps:$4 sm:$0xff]   ;;  %v6008_v51 = vld [vmem:[%s8954_s2 + $0x180] ss:$16 sps:$4 sm:$0xff]  }
  0x23   : > { %4226 = vmatpush1.bf16.msra.mxu1 %v5973_v23  ;;  %4186 = vmatprep.subr.bf16.mxu0 %v5974_v24  ;;  %v6006_v48 = vld [vmem:[%s8954_s2 + $0x384] ss:$16 sps:$4 sm:$0xff]   ;;  %v6009_v52 = vld [vmem:[%s8954_s2 + $0x380] ss:$16 sps:$4 sm:$0xff]  }
  0x24   : > { %4227 = vmatprep.subr.bf16.mxu1 %v5976_v25  ;;  %v364_v53 = vld [vmem:[%s7023_s30] sm:$0xff] }
  0x25   : > { %v373_v55 = vunpack.c.l.bf16 %v364_v53  ;;  %v374_v56 = vunpack.c.h.bf16 %v364_v53  ;;  %v7056_v57 = vld [vmem:[%s7031_s10] ss:$2 sm:$0xff]  ;;  %v7059_v58 = vld [vmem:[%s7031_s10 + $0x1] ss:$2 sm:$0xff] }
  0x26   : > { %4187 = vmatpush1.bf16.msra.mxu0 %v5978_v26  ;;  %v6010_v60 = vld [vmem:[%s8954_s2 + $0x164] ss:$16 sps:$4 sm:$0xff]   ;;  %v406_v61 = vrot.slane %v7056_v57, %v7034_v47  ;;  %v523_v62 = vrot.slane %v7059_v58, %v7034_v47  ;;  %v414_v2 = vrot.slane %v7056_v57, %v7040_v49  ;;  %v531_v3 = vrot.slane %v7059_v58, %v7040_v49  ;;  %v6014_v7 = vld [vmem:[%s8954_s2 + $0x160] ss:$16 sps:$4 sm:$0xff]  }
  0x27   : > { %4228 = vmatpush1.bf16.msra.mxu1 %v5979_v27  ;;  %4188 = vmatprep.subr.bf16.mxu0 %v5980_v28  ;;  %v6012_v1 = vld [vmem:[%s8954_s2 + $0x364] ss:$16 sps:$4 sm:$0xff]   ;;  %v402_v4 = vrot.slane %v7056_v57, %v7043_v50  ;;  %v410_v6 = vrot.slane %v7056_v57, %v7053_v54  ;;  %v6015_v8 = vld [vmem:[%s8954_s2 + $0x360] ss:$16 sps:$4 sm:$0xff]   ;;  %v519_v10 = vrot.slane %v7059_v58, %v7043_v50 }
  0x28   : > { %4229 = vmatprep.subr.bf16.mxu1 %v5982_v29  ;;  %v490_v5 = vsub.f32 %v374_v56, %v406_v61  ;;  %v492_v9 = vsub.f32 %v376_v0, %v414_v2  ;;  %v527_v11 = vrot.slane %v7059_v58, %v7053_v54  ;;  %v6016_v12 = vld [vmem:[%s8954_s2 + $0x144] ss:$16 sps:$4 sm:$0xff]   ;;  %v6020_v20 = vld [vmem:[%s8954_s2 + $0x140] ss:$16 sps:$4 sm:$0xff]  }
  0x29   : > { %v489_v14 = vsub.f32 %v373_v55, %v402_v4  ;;  %v491_v15 = vsub.f32 %v375_v63, %v410_v6  ;;  %v6018_v16 = vld [vmem:[%s8954_s2 + $0x344] ss:$16 sps:$4 sm:$0xff]   ;;  %v6021_v21 = vld [vmem:[%s8954_s2 + $0x340] ss:$16 sps:$4 sm:$0xff]  }
  0x2a   : > { %4189 = vmatpush1.bf16.msra.mxu0 %v5984_v30  ;;  %v607_v13 = vmul.f32 %v523_v62, %v490_v5  ;;  %v609_v17 = vmul.f32 %v531_v3, %v492_v9  ;;  %v6022_v25 = vld [vmem:[%s8954_s2 + $0x124] ss:$16 sps:$4 sm:$0xff]   ;;  %v6026_v29 = vld [vmem:[%s8954_s2 + $0x120] ss:$16 sps:$4 sm:$0xff]  }
  0x2b   : > { %4230 = vmatpush1.bf16.msra.mxu1 %v5985_v31  ;;  %4190 = vmatprep.subr.bf16.mxu0 %v5986_v32  ;;  %v606_v23 = vmul.f32 %v519_v10, %v489_v14  ;;  %v608_v24 = vmul.f32 %v527_v11, %v491_v15  ;;  %v6024_v26 = vld [vmem:[%s8954_s2 + $0x324] ss:$16 sps:$4 sm:$0xff]   ;;  %v6027_v30 = vld [vmem:[%s8954_s2 + $0x320] ss:$16 sps:$4 sm:$0xff]   ;;  %v7214_v10 = vsub.s32 4, %v7002_v40  ;;  %v7217_v11 = vsub.s32 6, %v7002_v40 }
  0x2c   : > { %4231 = vmatprep.subr.bf16.mxu1 %v5988_v33  ;;  %vm625_vm0 = vcmp.gt.f32.partialorder %v607_v13, 0.0  ;;  %v643_v18 = vmul.f32 0.2, %v607_v13  ;;  %vm627_vm1 = vcmp.gt.f32.partialorder %v609_v17, 0.0  ;;  %v645_v19 = vmul.f32 0.2, %v609_v17 }
  0x2d   : > { %v6028_v32 = vld [vmem:[%s8954_s2 + $0x104] ss:$16 sps:$4 sm:$0xff]   ;;  %v642_v33 = vmul.f32 0.2, %v606_v23  ;;  %vm624_vm2 = vcmp.gt.f32.partialorder %v606_v23, 0.0  ;;  %vm626_vm3 = vcmp.gt.f32.partialorder %v608_v24, 0.0 }
  0x2e   : > { %4191 = vmatpush2.bf16.msra.mxu0 %v5990_v34  ;;  %v661_v22 = vsel %vm625_vm0, %v607_v13, %v643_v18  ;;  %v663_v28 = vsel %vm627_vm1, %v609_v17, %v645_v19  ;;  %v644_v34 = vmul.f32 0.2, %v608_v24  ;;  %v6032_v36 = vld [vmem:[%s8954_s2 + $0x100] ss:$16 sps:$4 sm:$0xff]   ;;  %v6048_v55 = vld [vmem:[%s8954_s2 + $0x4a4] ss:$16 sps:$4 sm:$0xff]   ;;  %v418_v19 = vrot.slane %v7056_v57, %v7214_v10 }
  0x2f   : > { %4232 = vmatpush2.bf16.msra.mxu1 %v5991_v35  ;;  %4192 = vmatprep.subr.bf16.mxu0 %v5992_v37  ;;  %v7108_v27 = vpack.c.bf16 %v661_v22, %v661_v22  ;;  %v7116_v31 = vpack.c.bf16 %v663_v28, %v663_v28  ;;  %v6030_v35 = vld [vmem:[%s8954_s2 + $0x304] ss:$16 sps:$4 sm:$0xff]   ;;  %v6033_v37 = vld [vmem:[%s8954_s2 + $0x300] ss:$16 sps:$4 sm:$0xff]  }
  0x30   : > { %4233 = vmatprep.subr.bf16.mxu1 %v5994_v38  ;;  %v660_v38 = vsel %vm624_vm2, %v606_v23, %v642_v33  ;;  %v6043_v53 = vld [vmem:[%s8954_s2 + $0x6c0] ss:$16 sps:$4 sm:$0xff]   ;;  %v6051_v56 = vld [vmem:[%s8954_s2 + $0x6a4] ss:$16 sps:$4 sm:$0xff]   ;;  %v543_v33 = vrot.slane %v7059_v58, %v7217_v11  ;;  %vm4917_vm2 = vcmp.lt.s32.totalorder %v7002_v40, 4 }
  0x31   : > { %4206 = vmatprep.mubr.bf16.mxu0 %v7108_v27  ;;  %4247 = vmatprep.mubr.bf16.mxu1 %v7116_v31  ;;  %v6046_v59 = vld [vmem:[%s8954_s2 + $0x4a0] ss:$16 sps:$4 sm:$0xff]   ;;  %v6054_v61 = vld [vmem:[%s8954_s2 + $0x484] ss:$16 sps:$4 sm:$0xff]  }
  0x32   : > { %4193 = vmatpush2.bf16.msra.mxu0 %v5996_v39  ;;  %v662_v39 = vsel %vm626_vm3, %v608_v24, %v644_v34  ;;  %v6057_v62 = vld [vmem:[%s8954_s2 + $0x684] ss:$16 sps:$4 sm:$0xff]   ;;  %v6052_v63 = vld [vmem:[%s8954_s2 + $0x480] ss:$16 sps:$4 sm:$0xff]   ;;  %v367_v24 = vld [vmem:[%s7023_s30 + $0x18] sm:$0xff]  ;;  %vm4974_vm3 = vcmask 1040384  }
  0x33   : > { %4234 = vmatpush2.bf16.msra.mxu1 %v5997_v41  ;;  %4194 = vmatprep.subr.bf16.mxu0 %v5998_v42  ;;  %v6036_v41 = vld [vmem:[%s8954_s2 + $0x4e4] ss:$16 sps:$4 sm:$0xff]   ;;  %v6055_v0 = vld [vmem:[%s8954_s2 + $0x680] ss:$16 sps:$4 sm:$0xff]  }
  0x34   : > { %4235 = vmatprep.subr.bf16.mxu1 %v6000_v43  ;;  %v6039_v42 = vld [vmem:[%s8954_s2 + $0x6e4] ss:$16 sps:$4 sm:$0xff]   ;;  %v7138_v43 = vpack.c.bf16 %v660_v38, %v660_v38  ;;  %v6058_v3 = vld [vmem:[%s8954_s2 + $0x460] ss:$16 sps:$4 sm:$0xff]  }
  0x35   : > { %v6063_v2 = vld [vmem:[%s8954_s2 + $0x664] ss:$16 sps:$4 sm:$0xff]   ;;  %v6061_v4 = vld [vmem:[%s8954_s2 + $0x660] ss:$16 sps:$4 sm:$0xff]  }
  0x36   : > { %4195 = vmatpush2.bf16.msra.mxu0 %v6002_v44  ;;  %v7140_v44 = vpack.c.bf16 %v662_v39, %v662_v39  ;;  %v6066_v5 = vld [vmem:[%s8954_s2 + $0x444] ss:$16 sps:$4 sm:$0xff]   ;;  %v6064_v9 = vld [vmem:[%s8954_s2 + $0x440] ss:$16 sps:$4 sm:$0xff]  }
  0x37   : > { %4236 = vmatpush2.bf16.msra.mxu1 %v6003_v45  ;;  %4196 = vmatprep.subr.bf16.mxu0 %v6004_v46  ;;  %v6034_v45 = vld [vmem:[%s8954_s2 + $0x4e0] ss:$16 sps:$4 sm:$0xff]   ;;  %v6069_v6 = vld [vmem:[%s8954_s2 + $0x644] ss:$16 sps:$4 sm:$0xff]  }
  0x38   : > { %4237 = vmatprep.subr.bf16.mxu1 %v6006_v48  ;;  %v6037_v46 = vld [vmem:[%s8954_s2 + $0x6e0] ss:$16 sps:$4 sm:$0xff]   ;;  %v6042_v48 = vld [vmem:[%s8954_s2 + $0x4c4] ss:$16 sps:$4 sm:$0xff]  }
  0x39   : > { %v6072_v13 = vld [vmem:[%s8954_s2 + $0x424] ss:$16 sps:$4 sm:$0xff]   ;;  %v6070_v15 = vld [vmem:[%s8954_s2 + $0x420] ss:$16 sps:$4 sm:$0xff]  }
  0x3a   : > { %4197 = vmatpush2.bf16.msra.mxu0 %v6008_v51  ;;  %v6045_v51 = vld [vmem:[%s8954_s2 + $0x6c4] ss:$16 sps:$4 sm:$0xff]   ;;  %v6076_v34 = vld [vmem:[%s8954_s2 + $0x400] ss:$16 sps:$4 sm:$0xff]  }
  0x3b   : > { %4238 = vmatpush2.bf16.msra.mxu1 %v6009_v52  ;;  %4198 = vmatprep.subr.bf16.mxu0 %v6010_v60  ;;  %v6040_v52 = vld [vmem:[%s8954_s2 + $0x4c0] ss:$16 sps:$4 sm:$0xff]   ;;  %v6075_v14 = vld [vmem:[%s8954_s2 + $0x624] ss:$16 sps:$4 sm:$0xff]  }
  0x3c   : > { %4239 = vmatprep.subr.bf16.mxu1 %v6012_v1  ;;  %v6049_v60 = vld [vmem:[%s8954_s2 + $0x6a0] ss:$16 sps:$4 sm:$0xff]   ;;  %v6060_v1 = vld [vmem:[%s8954_s2 + $0x464] ss:$16 sps:$4 sm:$0xff]  }
  0x3d   : > { %v366_v22 = vld [vmem:[%s7023_s30 + $0x10] sm:$0xff] }
  0x3e   : > { %4199 = vmatpush2.bf16.msra.mxu0 %v6014_v7  ;;  %v7205_v7 = vsub.s32 5, %v7002_v40  ;;  %v377_v28 = vunpack.c.l.bf16 %v366_v22  ;;  %v6079_v39 = vld [vmem:[%s8954_s2 + $0x600] ss:$16 sps:$4 sm:$0xff]  }
  0x3f   : > { %4240 = vmatpush2.bf16.msra.mxu1 %v6015_v8  ;;  %4200 = vmatprep.subr.bf16.mxu0 %v6016_v12  ;;  %v7208_v8 = vsub.s32 7, %v7002_v40  ;;  %v6067_v12 = vld [vmem:[%s8954_s2 + $0x640] ss:$16 sps:$4 sm:$0xff]  }
  0x40   : > { %4241 = vmatprep.subr.bf16.mxu1 %v6018_v16  ;;  %v6073_v16 = vld [vmem:[%s8954_s2 + $0x620] ss:$16 sps:$4 sm:$0xff]   ;;  %v422_v17 = vrot.slane %v7056_v57, %v7205_v7  ;;  %v539_v23 = vrot.slane %v7059_v58, %v7205_v7 }
  0x41   : > { %v430_v18 = vrot.slane %v7056_v57, %v7208_v8 }
  0x42   : > { %4201 = vmatpush2.bf16.msra.mxu0 %v6020_v20  ;;  %v426_v20 = vrot.slane %v7056_v57, %v7217_v11  ;;  %v6081_v57 = vld [vmem:[%s8954_s2 + $0x604] ss:$16 sps:$4 sm:$0xff]  }
  0x43   : > { %4242 = vmatpush2.bf16.msra.mxu1 %v6021_v21  ;;  %4202 = vmatprep.subr.bf16.mxu0 %v6022_v25  ;;  %v6078_v21 = vld [vmem:[%s8954_s2 + $0x404] ss:$16 sps:$4 sm:$0xff]   ;;  %v547_v25 = vrot.slane %v7059_v58, %v7208_v8 }
  0x44   : > { %4243 = vmatprep.subr.bf16.mxu1 %v6024_v26  ;;  %v535_v26 = vrot.slane %v7059_v58, %v7214_v10  ;;  %v6087_v58 = vld [vmem:[%s8954_s2 + $0x7e4] ss:$16 sps:$4 sm:$0xff]  }
  0x46   : > { %4203 = vmatpush2.bf16.msra.mxu0 %v6026_v29  ;;  %v378_v29 = vunpack.c.h.bf16 %v366_v22  ;;  %v6120_v22 = vld [vmem:[%s8954_s2 + $0x524] ss:$16 sps:$4 sm:$0xff]  }
  0x47   : > { %4244 = vmatpush2.bf16.msra.mxu1 %v6027_v30  ;;  %4204 = vmatprep.subr.bf16.mxu0 %v6028_v32  ;;  %v379_v30 = vunpack.c.l.bf16 %v367_v24  ;;  %v380_v32 = vunpack.c.h.bf16 %v367_v24  ;;  %v6118_v24 = vld [vmem:[%s8954_s2 + $0x520] ss:$16 sps:$4 sm:$0xff]  }
  0x48   : > { %4245 = vmatprep.subr.bf16.mxu1 %v6030_v35  ;;  %v494_v35 = vsub.f32 %v378_v29, %v422_v17  ;;  %v6109_v17 = vld [vmem:[%s8954_s2 + $0x760] ss:$16 sps:$4 sm:$0xff]   ;;  %v6129_v29 = vld [vmem:[%s8954_s2 + $0x704] ss:$16 sps:$4 sm:$0xff]  }
  0x49   : > { %v495_v38 = vsub.f32 %v379_v30, %v426_v20  ;;  %v6112_v20 = vld [vmem:[%s8954_s2 + $0x540] ss:$16 sps:$4 sm:$0xff]  }
  0x4a   : > { %4205 = vmatpush2.bf16.msra.mxu0 %v6032_v36  ;;  %v496_v36 = vsub.f32 %v380_v32, %v430_v18  ;;  %v6114_v18 = vld [vmem:[%s8954_s2 + $0x544] ss:$16 sps:$4 sm:$0xff]   ;;  %v6124_v30 = vld [vmem:[%s8954_s2 + $0x500] ss:$16 sps:$4 sm:$0xff]  }
  0x4b   : > { %4246 = vmatpush2.bf16.msra.mxu1 %v6033_v37  ;;  %4256 = vmatprep.subr.bf16.mxu0 %v6036_v41  ;;  %v493_v37 = vsub.f32 %v377_v28, %v418_v19  ;;  %v6084_v41 = vld [vmem:[%s8954_s2 + $0x5e4] ss:$16 sps:$4 sm:$0xff]   ;;  %v6127_v32 = vld [vmem:[%s8954_s2 + $0x700] ss:$16 sps:$4 sm:$0xff]  }
  0x4c   : > { %4297 = vmatprep.subr.bf16.mxu1 %v6039_v42  ;;  %v611_v42 = vmul.f32 %v539_v23, %v494_v35  ;;  %v6117_v19 = vld [vmem:[%s8954_s2 + $0x744] ss:$16 sps:$4 sm:$0xff]  }
  0x4d   : > { %4207 = vmatmul.mubr.bf16.vlgmr.msra.gmra.mxu0 %v7138_v43  ;;  %v6123_v23 = vld [vmem:[%s8954_s2 + $0x724] ss:$16 sps:$4 sm:$0xff]  }
  0x4e   : > { %4248 = vmatmul.mubr.bf16.vlgmr.msra.gmra.mxu1 %v7140_v44  ;;  %4257 = vmatpush1.bf16.msra.mxu0 %v6034_v45  ;;  %v613_v45 = vmul.f32 %v547_v25, %v496_v36  ;;  %vm629_vm4 = vcmp.gt.f32.partialorder %v611_v42, 0.0  ;;  %v6121_v25 = vld [vmem:[%s8954_s2 + $0x720] ss:$16 sps:$4 sm:$0xff]   ;;  %v6132_v35 = vld [vmem:[%s8954_s2 + $0x8e4] ss:$16 sps:$4 sm:$0xff]  }
  0x4f   : > { %4298 = vmatpush1.bf16.msra.mxu1 %v6037_v46  ;;  %4258 = vmatprep.subr.bf16.mxu0 %v6042_v48  ;;  %v7270_v46 = vmul.f32 %v535_v26, %v493_v37  ;;  %v7272_v48 = vmul.f32 %v543_v33, %v495_v38  ;;  %v6126_v26 = vld [vmem:[%s8954_s2 + $0x504] ss:$16 sps:$4 sm:$0xff]  }
  0x50   : > { %4299 = vmatprep.subr.bf16.mxu1 %v6045_v51  ;;  %v647_v51 = vmul.f32 0.2, %v611_v42  ;;  %vm631_vm5 = vcmp.gt.f32.partialorder %v613_v45, 0.0  ;;  %v6135_v36 = vld [vmem:[%s8954_s2 + $0xae4] ss:$16 sps:$4 sm:$0xff]  }
  0x51   : > { %v648_v28 = vmul.f32 0.2, %v7272_v48  ;;  %vm628_vm6 = vcmp.gt.f32.partialorder %v7270_v46, 0.0  ;;  %vm630_vm7 = vcmp.gt.f32.partialorder %v7272_v48, 0.0 }
  0x52   : > { %4259 = vmatpush1.bf16.msra.mxu0 %v6040_v52  ;;  %v649_v52 = vmul.f32 0.2, %v613_v45 }
  0x53   : > { %4300 = vmatpush1.bf16.msra.mxu1 %v6043_v53  ;;  %4260 = vmatprep.subr.bf16.mxu0 %v6048_v55  ;;  %v6082_v53 = vld [vmem:[%s8954_s2 + $0x5e0] ss:$16 sps:$4 sm:$0xff]  }
  0x54   : > { %4301 = vmatprep.subr.bf16.mxu1 %v6051_v56  ;;  %v6085_v55 = vld [vmem:[%s8954_s2 + $0x7e0] ss:$16 sps:$4 sm:$0xff]   ;;  %v6090_v56 = vld [vmem:[%s8954_s2 + $0x5c4] ss:$16 sps:$4 sm:$0xff]  }
  0x56   : > { %4261 = vmatpush1.bf16.msra.mxu0 %v6046_v59  ;;  %v6093_v59 = vld [vmem:[%s8954_s2 + $0x7c4] ss:$16 sps:$4 sm:$0xff]  }
  0x57   : > { %4302 = vmatpush1.bf16.msra.mxu1 %v6049_v60  ;;  %4262 = vmatprep.subr.bf16.mxu0 %v6054_v61  ;;  %v665_v60 = vsel %vm629_vm4, %v611_v42, %v647_v51  ;;  %v667_v61 = vsel %vm631_vm5, %v613_v45, %v649_v52  ;;  %v6141_v42 = vld [vmem:[%s8954_s2 + $0xac4] ss:$16 sps:$4 sm:$0xff]   ;;  %v6136_v45 = vld [vmem:[%s8954_s2 + $0x8c0] ss:$16 sps:$4 sm:$0xff]  }
  0x58   : > { %4303 = vmatprep.subr.bf16.mxu1 %v6057_v62  ;;  %v7286_v62 = vpack.c.bf16 %v665_v60, %v665_v60  ;;  %v6147_v51 = vld [vmem:[%s8954_s2 + $0xaa4] ss:$16 sps:$4 sm:$0xff]   ;;  %v6142_v60 = vld [vmem:[%s8954_s2 + $0x8a0] ss:$16 sps:$4 sm:$0xff]  }
  0x59   : > { %v7413_v52 = vld [vmem:[%s7023_s30 + $0x20] sm:$0xff] }
  0x5a   : > { %4263 = vmatpush1.bf16.msra.mxu0 %v6052_v63  ;;  %v7288_v63 = vpack.c.bf16 %v667_v61, %v667_v61  ;;  %4288 = vmatprep.mubr.bf16.mxu0 %v7286_v62 }
  0x5b   : > { %4304 = vmatpush1.bf16.msra.mxu1 %v6055_v0  ;;  %4264 = vmatprep.subr.bf16.mxu0 %v6060_v1  ;;  %v6088_v0 = vld [vmem:[%s8954_s2 + $0x5c0] ss:$16 sps:$4 sm:$0xff]  }
  0x5c   : > { %4305 = vmatprep.subr.bf16.mxu1 %v6063_v2  ;;  %v6091_v1 = vld [vmem:[%s8954_s2 + $0x7c0] ss:$16 sps:$4 sm:$0xff]   ;;  %v6096_v2 = vld [vmem:[%s8954_s2 + $0x5a4] ss:$16 sps:$4 sm:$0xff]   ;;  %4329 = vmatprep.mubr.bf16.mxu1 %v7288_v63 }
  0x5e   : > { %4265 = vmatpush1.bf16.msra.mxu0 %v6058_v3  ;;  %v6099_v3 = vld [vmem:[%s8954_s2 + $0x7a4] ss:$16 sps:$4 sm:$0xff]  }
  0x5f   : > { %4306 = vmatpush1.bf16.msra.mxu1 %v6061_v4  ;;  %4266 = vmatprep.subr.bf16.mxu0 %v6066_v5  ;;  %v6094_v4 = vld [vmem:[%s8954_s2 + $0x5a0] ss:$16 sps:$4 sm:$0xff]  }
  0x60   : > { %4307 = vmatprep.subr.bf16.mxu1 %v6069_v6  ;;  %v6097_v5 = vld [vmem:[%s8954_s2 + $0x7a0] ss:$16 sps:$4 sm:$0xff]   ;;  %v6102_v6 = vld [vmem:[%s8954_s2 + $0x584] ss:$16 sps:$4 sm:$0xff]  }
  0x62   : > { %4267 = vmatpush1.bf16.msra.mxu0 %v6064_v9  ;;  %v6105_v9 = vld [vmem:[%s8954_s2 + $0x784] ss:$16 sps:$4 sm:$0xff]  }
  0x63   : > { %4308 = vmatpush1.bf16.msra.mxu1 %v6067_v12  ;;  %4268 = vmatprep.subr.bf16.mxu0 %v6072_v13  ;;  %v6100_v12 = vld [vmem:[%s8954_s2 + $0x580] ss:$16 sps:$4 sm:$0xff]  }
  0x64   : > { %4309 = vmatprep.subr.bf16.mxu1 %v6075_v14  ;;  %v6103_v13 = vld [vmem:[%s8954_s2 + $0x780] ss:$16 sps:$4 sm:$0xff]   ;;  %v6108_v14 = vld [vmem:[%s8954_s2 + $0x564] ss:$16 sps:$4 sm:$0xff]  }
  0x66   : > { %4269 = vmatpush1.bf16.msra.mxu0 %v6070_v15  ;;  %v6111_v15 = vld [vmem:[%s8954_s2 + $0x764] ss:$16 sps:$4 sm:$0xff]  }
  0x67   : > { %4310 = vmatpush1.bf16.msra.mxu1 %v6073_v16  ;;  %4270 = vmatprep.subr.bf16.mxu0 %v6078_v21  ;;  %v6106_v16 = vld [vmem:[%s8954_s2 + $0x560] ss:$16 sps:$4 sm:$0xff]  }
  0x68   : > { %4311 = vmatprep.subr.bf16.mxu1 %v6081_v57  ;;  %v6115_v21 = vld [vmem:[%s8954_s2 + $0x740] ss:$16 sps:$4 sm:$0xff]   ;;  %v646_v57 = vmul.f32 0.2, %v7270_v46 }
  0x6a   : > { %4271 = vmatpush1.bf16.msra.mxu0 %v6076_v34  ;;  %v664_v33 = vsel %vm628_vm6, %v7270_v46, %v646_v57  ;;  %v666_v34 = vsel %vm630_vm7, %v7272_v48, %v648_v28  ;;  %v6139_v46 = vld [vmem:[%s8954_s2 + $0xac0] ss:$16 sps:$4 sm:$0xff]   ;;  %v6144_v48 = vld [vmem:[%s8954_s2 + $0x8a4] ss:$16 sps:$4 sm:$0xff]  }
  0x6b   : > { %4312 = vmatpush1.bf16.msra.mxu1 %v6079_v39  ;;  %4272 = vmatprep.subr.bf16.mxu0 %v6084_v41  ;;  %v7382_v37 = vpack.c.bf16 %v664_v33, %v664_v33  ;;  %v7384_v38 = vpack.c.bf16 %v666_v34, %v666_v34  ;;  %v6130_v39 = vld [vmem:[%s8954_s2 + $0x8e0] ss:$16 sps:$4 sm:$0xff]   ;;  %v6165_v57 = vld [vmem:[%s8954_s2 + $0xa44] ss:$16 sps:$4 sm:$0xff]  }
  0x6c   : > { %4313 = vmatprep.subr.bf16.mxu1 %v6087_v58  ;;  %v6133_v41 = vld [vmem:[%s8954_s2 + $0xae0] ss:$16 sps:$4 sm:$0xff]   ;;  %v6138_v58 = vld [vmem:[%s8954_s2 + $0x8c4] ss:$16 sps:$4 sm:$0xff]  }
  0x6d   : > { %v6171_v33 = vld [vmem:[%s8954_s2 + $0xa24] ss:$16 sps:$4 sm:$0xff]   ;;  %v6166_v34 = vld [vmem:[%s8954_s2 + $0x820] ss:$16 sps:$4 sm:$0xff]  }
  0x6e   : > { %4273 = vmatpush2.bf16.msra.mxu0 %v6082_v53  ;;  %v382_v53 = vunpack.c.h.bf16 %v7413_v52 }
  0x6f   : > { %4314 = vmatpush2.bf16.msra.mxu1 %v6085_v55  ;;  %4274 = vmatprep.subr.bf16.mxu0 %v6090_v56  ;;  %v7417_v55 = vld [vmem:[%s7031_s10 + $0x10] ss:$2 sm:$0xff]  ;;  %v7420_v56 = vld [vmem:[%s7031_s10 + $0x11] ss:$2 sm:$0xff] }
  0x70   : > { %4315 = vmatprep.subr.bf16.mxu1 %v6093_v59  ;;  %v7423_v59 = vld [vmem:[%s7023_s30 + $0x28] sm:$0xff]  ;;  %v438_v61 = vrot.slane %v7417_v55, %v7034_v47 }
  0x72   : > { %4275 = vmatpush2.bf16.msra.mxu0 %v6088_v0  ;;  %v555_v0 = vrot.slane %v7420_v56, %v7034_v47 }
  0x73   : > { %4316 = vmatpush2.bf16.msra.mxu1 %v6091_v1  ;;  %4276 = vmatprep.subr.bf16.mxu0 %v6096_v2  ;;  %v384_v1 = vunpack.c.h.bf16 %v7423_v59  ;;  %v6145_v2 = vld [vmem:[%s8954_s2 + $0xaa0] ss:$16 sps:$4 sm:$0xff]  }
  0x74   : > { %4317 = vmatprep.subr.bf16.mxu1 %v6099_v3  ;;  %v446_v3 = vrot.slane %v7417_v55, %v7040_v49 }
  0x76   : > { %4277 = vmatpush2.bf16.msra.mxu0 %v6094_v4  ;;  %v563_v4 = vrot.slane %v7420_v56, %v7040_v49 }
  0x77   : > { %4318 = vmatpush2.bf16.msra.mxu1 %v6097_v5  ;;  %4278 = vmatprep.subr.bf16.mxu0 %v6102_v6  ;;  %v6150_v5 = vld [vmem:[%s8954_s2 + $0x884] ss:$16 sps:$4 sm:$0xff]  }
  0x78   : > { %4319 = vmatprep.subr.bf16.mxu1 %v6105_v9  ;;  %v6153_v6 = vld [vmem:[%s8954_s2 + $0xa84] ss:$16 sps:$4 sm:$0xff]   ;;  %v498_v9 = vsub.f32 %v382_v53, %v438_v61  ;;  %v6187_v61 = vld [vmem:[%s8954_s2 + $0xbc0] ss:$16 sps:$4 sm:$0xff]  }
  0x79   : > { %v6189_v53 = vld [vmem:[%s8954_s2 + $0xbc4] ss:$16 sps:$4 sm:$0xff]  }
  0x7a   : > { %4279 = vmatpush2.bf16.msra.mxu0 %v6100_v12  ;;  %v6148_v12 = vld [vmem:[%s8954_s2 + $0x880] ss:$16 sps:$4 sm:$0xff]  }
  0x7b   : > { %4320 = vmatpush2.bf16.msra.mxu1 %v6103_v13  ;;  %4280 = vmatprep.subr.bf16.mxu0 %v6108_v14  ;;  %v500_v13 = vsub.f32 %v384_v1, %v446_v3  ;;  %v6151_v14 = vld [vmem:[%s8954_s2 + $0xa80] ss:$16 sps:$4 sm:$0xff]   ;;  %v6195_v1 = vld [vmem:[%s8954_s2 + $0xba4] ss:$16 sps:$4 sm:$0xff]  }
  0x7c   : > { %4321 = vmatprep.subr.bf16.mxu1 %v6111_v15  ;;  %v615_v15 = vmul.f32 %v555_v0, %v498_v9  ;;  %v6192_v0 = vld [vmem:[%s8954_s2 + $0x9a4] ss:$16 sps:$4 sm:$0xff]   ;;  %v6193_v3 = vld [vmem:[%s8954_s2 + $0xba0] ss:$16 sps:$4 sm:$0xff]   ;;  %v383_v9 = vunpack.c.l.bf16 %v7423_v59 }
  0x7d   : > { %v6207_v59 = vld [vmem:[%s8954_s2 + $0xb64] ss:$16 sps:$4 sm:$0xff]  }
  0x7e   : > { %4281 = vmatpush2.bf16.msra.mxu0 %v6106_v16  ;;  %v6156_v16 = vld [vmem:[%s8954_s2 + $0x864] ss:$16 sps:$4 sm:$0xff]   ;;  %vm633_vm8 = vcmp.gt.f32.partialorder %v615_v15, 0.0 }
  0x7f   : > { %4322 = vmatpush2.bf16.msra.mxu1 %v6109_v17  ;;  %4282 = vmatprep.subr.bf16.mxu0 %v6114_v18  ;;  %v617_v17 = vmul.f32 %v563_v4, %v500_v13  ;;  %v6159_v18 = vld [vmem:[%s8954_s2 + $0xa64] ss:$16 sps:$4 sm:$0xff]   ;;  %v442_v13 = vrot.slane %v7417_v55, %v7053_v54 }
  0x80   : > { %4323 = vmatprep.subr.bf16.mxu1 %v6117_v19  ;;  %v651_v19 = vmul.f32 0.2, %v615_v15  ;;  %v6198_v4 = vld [vmem:[%s8954_s2 + $0x984] ss:$16 sps:$4 sm:$0xff]  }
  0x81   : > { %vm635_vm9 = vcmp.gt.f32.partialorder %v617_v17, 0.0 }
  0x82   : > { %4283 = vmatpush2.bf16.msra.mxu0 %v6112_v20  ;;  %v653_v20 = vmul.f32 0.2, %v617_v17 }
  0x83   : > { %4324 = vmatpush2.bf16.msra.mxu1 %v6115_v21  ;;  %4284 = vmatprep.subr.bf16.mxu0 %v6120_v22  ;;  %v669_v21 = vsel %vm633_vm8, %v615_v15, %v651_v19  ;;  %v6154_v22 = vld [vmem:[%s8954_s2 + $0x860] ss:$16 sps:$4 sm:$0xff]   ;;  %v559_v19 = vrot.slane %v7420_v56, %v7053_v54 }
  0x84   : > { %4325 = vmatprep.subr.bf16.mxu1 %v6123_v23  ;;  %v6157_v23 = vld [vmem:[%s8954_s2 + $0xa60] ss:$16 sps:$4 sm:$0xff]  }
  0x85   : > { %v6199_v15 = vld [vmem:[%s8954_s2 + $0xb80] ss:$16 sps:$4 sm:$0xff]  }
  0x86   : > { %4285 = vmatpush2.bf16.msra.mxu0 %v6118_v24  ;;  %v7464_v24 = vpack.c.bf16 %v669_v21, %v669_v21  ;;  %v6205_v21 = vld [vmem:[%s8954_s2 + $0xb60] ss:$16 sps:$4 sm:$0xff]  }
  0x87   : > { %4326 = vmatpush2.bf16.msra.mxu1 %v6121_v25  ;;  %4286 = vmatprep.subr.bf16.mxu0 %v6126_v26  ;;  %v671_v25 = vsel %vm635_vm9, %v617_v17, %v653_v20  ;;  %v6162_v26 = vld [vmem:[%s8954_s2 + $0x844] ss:$16 sps:$4 sm:$0xff]   ;;  %v551_v17 = vrot.slane %v7420_v56, %v7043_v50  ;;  %v6202_v20 = vld [vmem:[%s8954_s2 + $0x960] ss:$16 sps:$4 sm:$0xff]  }
  0x88   : > { %4327 = vmatprep.subr.bf16.mxu1 %v6129_v29  ;;  %v7472_v28 = vpack.c.bf16 %v671_v25, %v671_v25  ;;  %v6160_v29 = vld [vmem:[%s8954_s2 + $0x840] ss:$16 sps:$4 sm:$0xff]   ;;  %v454_v25 = vrot.slane %v7417_v55, %v7205_v7 }
  0x8a   : > { %4287 = vmatpush2.bf16.msra.mxu0 %v6124_v30  ;;  %v6163_v30 = vld [vmem:[%s8954_s2 + $0xa40] ss:$16 sps:$4 sm:$0xff]  }
  0x8b   : > { %4328 = vmatpush2.bf16.msra.mxu1 %v6127_v32  ;;  %4338 = vmatprep.subr.bf16.mxu0 %v6132_v35  ;;  %v6168_v32 = vld [vmem:[%s8954_s2 + $0x824] ss:$16 sps:$4 sm:$0xff]   ;;  %v6169_v35 = vld [vmem:[%s8954_s2 + $0xa20] ss:$16 sps:$4 sm:$0xff]  }
  0x8c   : > { %4379 = vmatprep.subr.bf16.mxu1 %v6135_v36  ;;  %v6174_v36 = vld [vmem:[%s8954_s2 + $0x804] ss:$16 sps:$4 sm:$0xff]  }
  0x8d   : > { %4289 = vmatmul.mubr.bf16.vlgmr.msra.gmra.mxu0 %v7382_v37 }
  0x8e   : > { %4330 = vmatmul.mubr.bf16.vlgmr.msra.gmra.mxu1 %v7384_v38  ;;  %4339 = vmatpush1.bf16.msra.mxu0 %v6130_v39  ;;  %v6177_v39 = vld [vmem:[%s8954_s2 + $0xa04] ss:$16 sps:$4 sm:$0xff]  }
  0x8f   : > { %4380 = vmatpush1.bf16.msra.mxu1 %v6133_v41  ;;  %4340 = vmatprep.subr.bf16.mxu0 %v6138_v58  ;;  %v6172_v41 = vld [vmem:[%s8954_s2 + $0x800] ss:$16 sps:$4 sm:$0xff]  }
  0x90   : > { %4381 = vmatprep.subr.bf16.mxu1 %v6141_v42  ;;  %4370 = vmatprep.mubr.bf16.mxu0 %v7464_v24  ;;  %v6175_v58 = vld [vmem:[%s8954_s2 + $0xa00] ss:$16 sps:$4 sm:$0xff]   ;;  %v6180_v42 = vld [vmem:[%s8954_s2 + $0x9e4] ss:$16 sps:$4 sm:$0xff]  }
  0x91   : > { %4411 = vmatprep.mubr.bf16.mxu1 %v7472_v28 }
  0x92   : > { %4341 = vmatpush1.bf16.msra.mxu0 %v6136_v45  ;;  %v6183_v45 = vld [vmem:[%s8954_s2 + $0xbe4] ss:$16 sps:$4 sm:$0xff]  }
  0x93   : > { %4382 = vmatpush1.bf16.msra.mxu1 %v6139_v46  ;;  %4342 = vmatprep.subr.bf16.mxu0 %v6144_v48  ;;  %v6178_v46 = vld [vmem:[%s8954_s2 + $0x9e0] ss:$16 sps:$4 sm:$0xff]  }
  0x94   : > { %4383 = vmatprep.subr.bf16.mxu1 %v6147_v51  ;;  %v6181_v48 = vld [vmem:[%s8954_s2 + $0xbe0] ss:$16 sps:$4 sm:$0xff]   ;;  %v6186_v51 = vld [vmem:[%s8954_s2 + $0x9c4] ss:$16 sps:$4 sm:$0xff]  }
  0x96   : > { %4343 = vmatpush1.bf16.msra.mxu0 %v6142_v60  ;;  %v6184_v60 = vld [vmem:[%s8954_s2 + $0x9c0] ss:$16 sps:$4 sm:$0xff]  }
  0x97   : > { %4384 = vmatpush1.bf16.msra.mxu1 %v6145_v2  ;;  %4344 = vmatprep.subr.bf16.mxu0 %v6150_v5  ;;  %v6190_v2 = vld [vmem:[%s8954_s2 + $0x9a0] ss:$16 sps:$4 sm:$0xff]   ;;  %v6201_v5 = vld [vmem:[%s8954_s2 + $0xb84] ss:$16 sps:$4 sm:$0xff]  }
  0x98   : > { %4385 = vmatprep.subr.bf16.mxu1 %v6153_v6  ;;  %v381_v6 = vunpack.c.l.bf16 %v7413_v52  ;;  %v6204_v52 = vld [vmem:[%s8954_s2 + $0x964] ss:$16 sps:$4 sm:$0xff]  }
  0x9a   : > { %4345 = vmatpush1.bf16.msra.mxu0 %v6148_v12  ;;  %v434_v12 = vrot.slane %v7417_v55, %v7043_v50 }
  0x9b   : > { %4386 = vmatpush1.bf16.msra.mxu1 %v6151_v14  ;;  %4346 = vmatprep.subr.bf16.mxu0 %v6156_v16  ;;  %v6196_v14 = vld [vmem:[%s8954_s2 + $0x980] ss:$16 sps:$4 sm:$0xff]  }
  0x9c   : > { %4387 = vmatprep.subr.bf16.mxu1 %v6159_v18  ;;  %v497_v16 = vsub.f32 %v381_v6, %v434_v12  ;;  %v499_v18 = vsub.f32 %v383_v9, %v442_v13  ;;  %v6220_v9 = vld [vmem:[%s8954_s2 + $0x900] ss:$16 sps:$4 sm:$0xff]  }
  0x9d   : > { %v6223_v12 = vld [vmem:[%s8954_s2 + $0xb00] ss:$16 sps:$4 sm:$0xff]  }
  0x9e   : > { %4347 = vmatpush1.bf16.msra.mxu0 %v6154_v22  ;;  %v6210_v22 = vld [vmem:[%s8954_s2 + $0x944] ss:$16 sps:$4 sm:$0xff]  }
  0x9f   : > { %4388 = vmatpush1.bf16.msra.mxu1 %v6157_v23  ;;  %4348 = vmatprep.subr.bf16.mxu0 %v6162_v26  ;;  %v6213_v23 = vld [vmem:[%s8954_s2 + $0xb44] ss:$16 sps:$4 sm:$0xff]   ;;  %v571_v26 = vrot.slane %v7420_v56, %v7205_v7  ;;  %v579_v7 = vrot.slane %v7420_v56, %v7208_v8 }
  0xa0   : > { %4389 = vmatprep.subr.bf16.mxu1 %v6165_v57  ;;  %v462_v57 = vrot.slane %v7417_v55, %v7208_v8  ;;  %v6219_v8 = vld [vmem:[%s8954_s2 + $0xb24] ss:$16 sps:$4 sm:$0xff]  }
  0xa2   : > { %4349 = vmatpush1.bf16.msra.mxu0 %v6160_v29  ;;  %v450_v29 = vrot.slane %v7417_v55, %v7214_v10 }
  0xa3   : > { %4390 = vmatpush1.bf16.msra.mxu1 %v6163_v30  ;;  %4350 = vmatprep.subr.bf16.mxu0 %v6168_v32  ;;  %v458_v30 = vrot.slane %v7417_v55, %v7217_v11  ;;  %v6208_v32 = vld [vmem:[%s8954_s2 + $0x940] ss:$16 sps:$4 sm:$0xff]  }
  0xa4   : > { %4391 = vmatprep.subr.bf16.mxu1 %v6171_v33  ;;  %v614_v33 = vmul.f32 %v551_v17, %v497_v16  ;;  %v6211_v55 = vld [vmem:[%s8954_s2 + $0xb40] ss:$16 sps:$4 sm:$0xff]   ;;  %v6231_v16 = vld [vmem:[%s8954_s2 + $0xee4] ss:$16 sps:$4 sm:$0xff]  }
  0xa6   : > { %4351 = vmatpush1.bf16.msra.mxu0 %v6166_v34  ;;  %v616_v34 = vmul.f32 %v559_v19, %v499_v18  ;;  %vm632_vm10 = vcmp.gt.f32.partialorder %v614_v33, 0.0  ;;  %v6226_v19 = vld [vmem:[%s8954_s2 + $0xce0] ss:$16 sps:$4 sm:$0xff]  }
  0xa7   : > { %4392 = vmatpush1.bf16.msra.mxu1 %v6169_v35  ;;  %4352 = vmatprep.subr.bf16.mxu0 %v6174_v36  ;;  %v370_v35 = vld [vmem:[%s7023_s30 + $0x30] sm:$0xff]  ;;  %v371_v36 = vld [vmem:[%s7023_s30 + $0x38] sm:$0xff] }
  0xa8   : > { %4393 = vmatprep.subr.bf16.mxu1 %v6177_v39  ;;  %v567_v39 = vrot.slane %v7420_v56, %v7214_v10  ;;  %v575_v10 = vrot.slane %v7420_v56, %v7217_v11  ;;  %v652_v11 = vmul.f32 0.2, %v616_v34  ;;  %vm634_vm11 = vcmp.gt.f32.partialorder %v616_v34, 0.0 }
  0xaa   : > { %4353 = vmatpush1.bf16.msra.mxu0 %v6172_v41  ;;  %v385_v41 = vunpack.c.l.bf16 %v370_v35 }
  0xab   : > { %4394 = vmatpush1.bf16.msra.mxu1 %v6175_v58  ;;  %4354 = vmatprep.subr.bf16.mxu0 %v6180_v42  ;;  %v386_v58 = vunpack.c.h.bf16 %v370_v35  ;;  %v387_v42 = vunpack.c.l.bf16 %v371_v36  ;;  %v6241_v35 = vld [vmem:[%s8954_s2 + $0xea0] ss:$16 sps:$4 sm:$0xff]  }
  0xac   : > { %4395 = vmatprep.subr.bf16.mxu1 %v6183_v45  ;;  %v388_v45 = vunpack.c.h.bf16 %v371_v36  ;;  %v6246_v36 = vld [vmem:[%s8954_s2 + $0xc84] ss:$16 sps:$4 sm:$0xff]  }
  0xae   : > { %4355 = vmatpush2.bf16.msra.mxu0 %v6178_v46  ;;  %v6216_v46 = vld [vmem:[%s8954_s2 + $0x924] ss:$16 sps:$4 sm:$0xff]  }
  0xaf   : > { %4396 = vmatpush2.bf16.msra.mxu1 %v6181_v48  ;;  %4356 = vmatprep.subr.bf16.mxu0 %v6186_v51  ;;  %v6214_v48 = vld [vmem:[%s8954_s2 + $0x920] ss:$16 sps:$4 sm:$0xff]   ;;  %v502_v51 = vsub.f32 %v386_v58, %v454_v25  ;;  %v6237_v25 = vld [vmem:[%s8954_s2 + $0xec4] ss:$16 sps:$4 sm:$0xff]  }
  0xb0   : > { %4397 = vmatprep.subr.bf16.mxu1 %v6189_v53  ;;  %v504_v53 = vsub.f32 %v388_v45, %v462_v57  ;;  %v6255_v58 = vld [vmem:[%s8954_s2 + $0xe64] ss:$16 sps:$4 sm:$0xff]   ;;  %v6253_v45 = vld [vmem:[%s8954_s2 + $0xe60] ss:$16 sps:$4 sm:$0xff]  }
  0xb1   : > { %v619_v56 = vmul.f32 %v571_v26, %v502_v51  ;;  %v6264_v51 = vld [vmem:[%s8954_s2 + $0xc24] ss:$16 sps:$4 sm:$0xff]  }
  0xb2   : > { %4357 = vmatpush2.bf16.msra.mxu0 %v6184_v60  ;;  %v501_v60 = vsub.f32 %v385_v41, %v450_v29  ;;  %v6232_v29 = vld [vmem:[%s8954_s2 + $0xcc0] ss:$16 sps:$4 sm:$0xff]   ;;  %v6252_v41 = vld [vmem:[%s8954_s2 + $0xc64] ss:$16 sps:$4 sm:$0xff]  }
  0xb3   : > { %4398 = vmatpush2.bf16.msra.mxu1 %v6187_v61  ;;  %4358 = vmatprep.subr.bf16.mxu0 %v6192_v0  ;;  %v503_v61 = vsub.f32 %v387_v42, %v458_v30  ;;  %v6217_v0 = vld [vmem:[%s8954_s2 + $0xb20] ss:$16 sps:$4 sm:$0xff]   ;;  %v655_v13 = vmul.f32 0.2, %v619_v56  ;;  %vm637_vm12 = vcmp.gt.f32.partialorder %v619_v56, 0.0 }
  0xb4   : > { %4399 = vmatprep.subr.bf16.mxu1 %v6195_v1  ;;  %v650_v1 = vmul.f32 0.2, %v614_v33  ;;  %v6235_v30 = vld [vmem:[%s8954_s2 + $0xec0] ss:$16 sps:$4 sm:$0xff]  }
  0xb5   : > { %v7626_v6 = vmul.f32 %v575_v10, %v503_v61  ;;  %v6250_v42 = vld [vmem:[%s8954_s2 + $0xc60] ss:$16 sps:$4 sm:$0xff]  }
  0xb6   : > { %4359 = vmatpush2.bf16.msra.mxu0 %v6190_v2  ;;  %v6222_v2 = vld [vmem:[%s8954_s2 + $0x904] ss:$16 sps:$4 sm:$0xff]   ;;  %v6256_v10 = vld [vmem:[%s8954_s2 + $0xc40] ss:$16 sps:$4 sm:$0xff]  }
  0xb7   : > { %4400 = vmatpush2.bf16.msra.mxu1 %v6193_v3  ;;  %4360 = vmatprep.subr.bf16.mxu0 %v6198_v4  ;;  %v621_v3 = vmul.f32 %v579_v7, %v504_v53  ;;  %v7621_v4 = vmul.f32 %v567_v39, %v501_v60  ;;  %v6249_v7 = vld [vmem:[%s8954_s2 + $0xe84] ss:$16 sps:$4 sm:$0xff]   ;;  %v6244_v39 = vld [vmem:[%s8954_s2 + $0xc80] ss:$16 sps:$4 sm:$0xff]   ;;  %vm638_vm15 = vcmp.gt.f32.partialorder %v7626_v6, 0.0 }
  0xb8   : > { %4401 = vmatprep.subr.bf16.mxu1 %v6201_v5  ;;  %v6225_v5 = vld [vmem:[%s8954_s2 + $0xb04] ss:$16 sps:$4 sm:$0xff]   ;;  %v6262_v60 = vld [vmem:[%s8954_s2 + $0xc20] ss:$16 sps:$4 sm:$0xff]  }
  0xb9   : > { %vm639_vm13 = vcmp.gt.f32.partialorder %v621_v3, 0.0  ;;  %v6267_v53 = vld [vmem:[%s8954_s2 + $0xe24] ss:$16 sps:$4 sm:$0xff]   ;;  %v6265_v61 = vld [vmem:[%s8954_s2 + $0xe20] ss:$16 sps:$4 sm:$0xff]   ;;  %vm636_vm14 = vcmp.gt.f32.partialorder %v7621_v4, 0.0 }
  0xba   : > { %4361 = vmatpush2.bf16.msra.mxu0 %v6196_v14  ;;  %v657_v14 = vmul.f32 0.2, %v621_v3 }
  0xbb   : > { %4402 = vmatpush2.bf16.msra.mxu1 %v6199_v15  ;;  %4362 = vmatprep.subr.bf16.mxu0 %v6204_v52  ;;  %v668_v15 = vsel %vm632_vm10, %v614_v33, %v650_v1  ;;  %v670_v52 = vsel %vm634_vm11, %v616_v34, %v652_v11  ;;  %v6243_v33 = vld [vmem:[%s8954_s2 + $0xea4] ss:$16 sps:$4 sm:$0xff]   ;;  %v6238_v34 = vld [vmem:[%s8954_s2 + $0xca0] ss:$16 sps:$4 sm:$0xff]  }
  0xbc   : > { %4403 = vmatprep.subr.bf16.mxu1 %v6207_v59  ;;  %v6228_v59 = vld [vmem:[%s8954_s2 + $0xce4] ss:$16 sps:$4 sm:$0xff]   ;;  %v7640_v17 = vpack.c.bf16 %v668_v15, %v668_v15  ;;  %v7642_v18 = vpack.c.bf16 %v670_v52, %v670_v52  ;;  %v6271_v11 = vld [vmem:[%s8954_s2 + $0xe00] ss:$16 sps:$4 sm:$0xff]  }
  0xbd   : > { %v6273_v1 = vld [vmem:[%s8954_s2 + $0xe04] ss:$16 sps:$4 sm:$0xff]   ;;  %v6283_v15 = vld [vmem:[%s8954_s2 + $0xfc0] ss:$16 sps:$4 sm:$0xff]  }
  0xbe   : > { %4363 = vmatpush2.bf16.msra.mxu0 %v6202_v20  ;;  %v673_v20 = vsel %vm637_vm12, %v619_v56, %v655_v13  ;;  %v6276_v56 = vld [vmem:[%s8954_s2 + $0xde4] ss:$16 sps:$4 sm:$0xff]  }
  0xbf   : > { %4404 = vmatpush2.bf16.msra.mxu1 %v6205_v21  ;;  %4364 = vmatprep.subr.bf16.mxu0 %v6210_v22  ;;  %v675_v21 = vsel %vm639_vm13, %v621_v3, %v657_v14  ;;  %v6229_v22 = vld [vmem:[%s8954_s2 + $0xee0] ss:$16 sps:$4 sm:$0xff]   ;;  %v7656_v26 = vpack.c.bf16 %v673_v20, %v673_v20  ;;  %v6279_v3 = vld [vmem:[%s8954_s2 + $0xfe4] ss:$16 sps:$4 sm:$0xff]  }
  0xc0   : > { %4405 = vmatprep.subr.bf16.mxu1 %v6213_v23  ;;  %v6234_v23 = vld [vmem:[%s8954_s2 + $0xcc4] ss:$16 sps:$4 sm:$0xff]   ;;  %v7658_v57 = vpack.c.bf16 %v675_v21, %v675_v21  ;;  %v6280_v14 = vld [vmem:[%s8954_s2 + $0xdc0] ss:$16 sps:$4 sm:$0xff]  }
  0xc1   : > { %v6285_v13 = vld [vmem:[%s8954_s2 + $0xfc4] ss:$16 sps:$4 sm:$0xff]  }
  0xc2   : > { %4365 = vmatpush2.bf16.msra.mxu0 %v6208_v32  ;;  %v6240_v32 = vld [vmem:[%s8954_s2 + $0xca4] ss:$16 sps:$4 sm:$0xff]  }
  0xc3   : > { %4406 = vmatpush2.bf16.msra.mxu1 %v6211_v55  ;;  %4366 = vmatprep.subr.bf16.mxu0 %v6216_v46  ;;  %v6247_v55 = vld [vmem:[%s8954_s2 + $0xe80] ss:$16 sps:$4 sm:$0xff]   ;;  %v6258_v46 = vld [vmem:[%s8954_s2 + $0xc44] ss:$16 sps:$4 sm:$0xff]  }
  0xc4   : > { %4407 = vmatprep.subr.bf16.mxu1 %v6219_v8  ;;  %v6261_v8 = vld [vmem:[%s8954_s2 + $0xe44] ss:$16 sps:$4 sm:$0xff]  }
  0xc5   : > { %v6288_v52 = vld [vmem:[%s8954_s2 + $0xda4] ss:$16 sps:$4 sm:$0xff]  }
  0xc6   : > { %4367 = vmatpush2.bf16.msra.mxu0 %v6214_v48  ;;  %v6259_v48 = vld [vmem:[%s8954_s2 + $0xe40] ss:$16 sps:$4 sm:$0xff]   ;;  %v6294_v20 = vld [vmem:[%s8954_s2 + $0xd84] ss:$16 sps:$4 sm:$0xff]  }
  0xc7   : > { %4408 = vmatpush2.bf16.msra.mxu1 %v6217_v0  ;;  %4368 = vmatprep.subr.bf16.mxu0 %v6222_v2  ;;  %v6270_v0 = vld [vmem:[%s8954_s2 + $0xc04] ss:$16 sps:$4 sm:$0xff]   ;;  %v6268_v2 = vld [vmem:[%s8954_s2 + $0xc00] ss:$16 sps:$4 sm:$0xff]  }
  0xc8   : > { %4409 = vmatprep.subr.bf16.mxu1 %v6225_v5  ;;  %v6274_v5 = vld [vmem:[%s8954_s2 + $0xde0] ss:$16 sps:$4 sm:$0xff]   ;;  %v6297_v21 = vld [vmem:[%s8954_s2 + $0xf84] ss:$16 sps:$4 sm:$0xff]  }
  0xca   : > { %4369 = vmatpush2.bf16.msra.mxu0 %v6220_v9  ;;  %v6277_v9 = vld [vmem:[%s8954_s2 + $0xfe0] ss:$16 sps:$4 sm:$0xff]  }
  0xcb   : > { %4410 = vmatpush2.bf16.msra.mxu1 %v6223_v12  ;;  %4420 = vmatprep.subr.bf16.mxu0 %v6228_v59  ;;  %v6282_v12 = vld [vmem:[%s8954_s2 + $0xdc4] ss:$16 sps:$4 sm:$0xff]  }
  0xcc   : > { %4461 = vmatprep.subr.bf16.mxu1 %v6231_v16  ;;  %v6291_v59 = vld [vmem:[%s8954_s2 + $0xfa4] ss:$16 sps:$4 sm:$0xff]   ;;  %v6286_v16 = vld [vmem:[%s8954_s2 + $0xda0] ss:$16 sps:$4 sm:$0xff]  }
  0xcd   : > { %4371 = vmatmul.mubr.bf16.vlgmr.msra.gmra.mxu0 %v7640_v17 }
  0xce   : > { %4412 = vmatmul.mubr.bf16.vlgmr.msra.gmra.mxu1 %v7642_v18  ;;  %4421 = vmatpush1.bf16.msra.mxu0 %v6226_v19  ;;  %v6289_v19 = vld [vmem:[%s8954_s2 + $0xfa0] ss:$16 sps:$4 sm:$0xff]  }
  0xcf   : > { %4462 = vmatpush1.bf16.msra.mxu1 %v6229_v22  ;;  %4422 = vmatprep.subr.bf16.mxu0 %v6234_v23  ;;  %v6292_v22 = vld [vmem:[%s8954_s2 + $0xd80] ss:$16 sps:$4 sm:$0xff]  }
  0xd0   : > { %4463 = vmatprep.subr.bf16.mxu1 %v6237_v25  ;;  %4452 = vmatprep.mubr.bf16.mxu0 %v7656_v26  ;;  %v6295_v23 = vld [vmem:[%s8954_s2 + $0xf80] ss:$16 sps:$4 sm:$0xff]  }
  0xd1   : > { %4493 = vmatprep.mubr.bf16.mxu1 %v7658_v57  ;;  %v7791_v25 = vld [vmem:[%s7023_s30 + $0x40] sm:$0xff] }
  0xd2   : > { %4423 = vmatpush1.bf16.msra.mxu0 %v6232_v29  ;;  %v7794_v29 = vld [vmem:[%s7031_s10 + $0x20] ss:$2 sm:$0x3] }
  0xd3   : > { %4464 = vmatpush1.bf16.msra.mxu1 %v6235_v30  ;;  %4424 = vmatprep.subr.bf16.mxu0 %v6240_v32  ;;  %v6300_v30 = vld [vmem:[%s8954_s2 + $0xd64] ss:$16 sps:$4 sm:$0xff]  }
  0xd4   : > { %4465 = vmatprep.subr.bf16.mxu1 %v6243_v33  ;;  %v6303_v32 = vld [vmem:[%s8954_s2 + $0xf64] ss:$16 sps:$4 sm:$0xff]   ;;  %v6298_v33 = vld [vmem:[%s8954_s2 + $0xd60] ss:$16 sps:$4 sm:$0xff]  }
  0xd6   : > { %4425 = vmatpush1.bf16.msra.mxu0 %v6238_v34  ;;  %v6301_v34 = vld [vmem:[%s8954_s2 + $0xf60] ss:$16 sps:$4 sm:$0xff]  }
  0xd7   : > { %4466 = vmatpush1.bf16.msra.mxu1 %v6241_v35  ;;  %4426 = vmatprep.subr.bf16.mxu0 %v6246_v36  ;;  %v390_v35 = vunpack.c.h.bf16 %v7791_v25  ;;  %v470_v36 = vrot.slane %v7794_v29, %v7034_v47 }
  0xd8   : > { %4467 = vmatprep.subr.bf16.mxu1 %v6249_v7  ;;  %v7812_v7 = vld [vmem:[%s7031_s10 + $0x21] ss:$2 sm:$0x3] }
  0xda   : > { %4427 = vmatpush1.bf16.msra.mxu0 %v6244_v39  ;;  %v6306_v39 = vld [vmem:[%s8954_s2 + $0xd44] ss:$16 sps:$4 sm:$0xff]  }
  0xdb   : > { %4468 = vmatpush1.bf16.msra.mxu1 %v6247_v55  ;;  %4428 = vmatprep.subr.bf16.mxu0 %v6252_v41  ;;  %v6309_v55 = vld [vmem:[%s8954_s2 + $0xf44] ss:$16 sps:$4 sm:$0xff]   ;;  %v6304_v41 = vld [vmem:[%s8954_s2 + $0xd40] ss:$16 sps:$4 sm:$0xff]  }
  0xdc   : > { %4469 = vmatprep.subr.bf16.mxu1 %v6255_v58  ;;  %v506_v58 = vsub.f32 %v390_v35, %v470_v36  ;;  %v6336_v35 = vld [vmem:[%s8954_s2 + $0x10a4] ss:$16 sps:$4 sm:$0xff]   ;;  %v6339_v36 = vld [vmem:[%s8954_s2 + $0xac] ss:$16 sps:$4 sm:$0xff]  }
  0xde   : > { %4429 = vmatpush1.bf16.msra.mxu0 %v6250_v42  ;;  %v587_v42 = vrot.slane %v7812_v7, %v7034_v47 }
  0xdf   : > { %4470 = vmatpush1.bf16.msra.mxu1 %v6253_v45  ;;  %4430 = vmatprep.subr.bf16.mxu0 %v6258_v46  ;;  %v6307_v45 = vld [vmem:[%s8954_s2 + $0xf40] ss:$16 sps:$4 sm:$0xff]   ;;  %v6312_v46 = vld [vmem:[%s8954_s2 + $0xd24] ss:$16 sps:$4 sm:$0xff]  }
  0xe0   : > { %4471 = vmatprep.subr.bf16.mxu1 %v6261_v8  ;;  %v6315_v8 = vld [vmem:[%s8954_s2 + $0xf24] ss:$16 sps:$4 sm:$0xff]  }
  0xe2   : > { %4431 = vmatpush1.bf16.msra.mxu0 %v6256_v10  ;;  %v6310_v10 = vld [vmem:[%s8954_s2 + $0xd20] ss:$16 sps:$4 sm:$0xff]  }
  0xe3   : > { %4472 = vmatpush1.bf16.msra.mxu1 %v6259_v48  ;;  %4432 = vmatprep.subr.bf16.mxu0 %v6264_v51  ;;  %v6313_v48 = vld [vmem:[%s8954_s2 + $0xf20] ss:$16 sps:$4 sm:$0xff]   ;;  %v6318_v51 = vld [vmem:[%s8954_s2 + $0xd04] ss:$16 sps:$4 sm:$0xff]  }
  0xe4   : > { %4473 = vmatprep.subr.bf16.mxu1 %v6267_v53  ;;  %v623_v53 = vmul.f32 %v587_v42, %v506_v58  ;;  %v6334_v42 = vld [vmem:[%s8954_s2 + $0x10a0] ss:$16 sps:$4 sm:$0xff]  }
  0xe6   : > { %4433 = vmatpush1.bf16.msra.mxu0 %v6262_v60  ;;  %v654_v60 = vmul.f32 0.2, %v7621_v4  ;;  %vm641_vm0 = vcmp.gt.f32.partialorder %v623_v53, 0.0 }
  0xe7   : > { %4474 = vmatpush1.bf16.msra.mxu1 %v6265_v61  ;;  %4434 = vmatprep.subr.bf16.mxu0 %v6270_v0  ;;  %v656_v61 = vmul.f32 0.2, %v7626_v6  ;;  %v6321_v0 = vld [vmem:[%s8954_s2 + $0xf04] ss:$16 sps:$4 sm:$0xff]  }
  0xe8   : > { %4475 = vmatprep.subr.bf16.mxu1 %v6273_v1  ;;  %v6316_v1 = vld [vmem:[%s8954_s2 + $0xd00] ss:$16 sps:$4 sm:$0xff]  }
  0xea   : > { %4435 = vmatpush1.bf16.msra.mxu0 %v6268_v2  ;;  %v6319_v2 = vld [vmem:[%s8954_s2 + $0xf00] ss:$16 sps:$4 sm:$0xff]  }
  0xeb   : > { %4476 = vmatpush1.bf16.msra.mxu1 %v6271_v11  ;;  %4436 = vmatprep.subr.bf16.mxu0 %v6276_v56  ;;  %v659_v11 = vmul.f32 0.2, %v623_v53  ;;  %v1272_v56 = vld [vmem:[%s8955_s3] sm:$0xf] }
  0xec   : > { %4477 = vmatprep.subr.bf16.mxu1 %v6279_v3  ;;  %v672_v3 = vsel %vm636_vm14, %v7621_v4, %v654_v60  ;;  %v6322_v4 = vld [vmem:[%s8954_s2 + $0x10e0] ss:$16 sps:$4 sm:$0xff]   ;;  %v6348_v60 = vld [vmem:[%s8954_s2 + $0x1064] ss:$16 sps:$4 sm:$0xff]  }
  0xee   : > { %4437 = vmatpush2.bf16.msra.mxu0 %v6274_v5  ;;  %v674_v5 = vsel %vm638_vm15, %v7626_v6, %v656_v61  ;;  %v677_v6 = vsel %vm641_vm0, %v623_v53, %v659_v11  ;;  %v6343_v53 = vld [vmem:[%s8954_s2 + $0x88] ss:$16 sps:$4 sm:$0xff]   ;;  %v6351_v61 = vld [vmem:[%s8954_s2 + $0x6c] ss:$16 sps:$4 sm:$0xff]  }
  0xef   : > { %4478 = vmatpush2.bf16.msra.mxu1 %v6277_v9  ;;  %4438 = vmatprep.subr.bf16.mxu0 %v6282_v12  ;;  %v6324_v9 = vld [vmem:[%s8954_s2 + $0x10e4] ss:$16 sps:$4 sm:$0xff]   ;;  %v6327_v12 = vld [vmem:[%s8954_s2 + $0xec] ss:$16 sps:$4 sm:$0xff]  }
  0xf0   : > { %4479 = vmatprep.subr.bf16.mxu1 %v6285_v13  ;;  %v7867_v13 = vpack.c.bf16 %v672_v3, %v672_v3  ;;  %v6357_v11 = vld [vmem:[%s8954_s2 + $0x4c] ss:$16 sps:$4 sm:$0xff]   ;;  %v6355_v3 = vld [vmem:[%s8954_s2 + $0x48] ss:$16 sps:$4 sm:$0xff]  }
  0xf2   : > { %4439 = vmatpush2.bf16.msra.mxu0 %v6280_v14  ;;  %v7869_v14 = vpack.c.bf16 %v674_v5, %v674_v5  ;;  %v6360_v5 = vld [vmem:[%s8954_s2 + $0x1024] ss:$16 sps:$4 sm:$0xff]  }
  0xf3   : > { %4480 = vmatpush2.bf16.msra.mxu1 %v6283_v15  ;;  %4440 = vmatprep.subr.bf16.mxu0 %v6288_v52  ;;  %v1277_v15 = vrot.slane %v1272_v56, %v7043_v50  ;;  %v6325_v52 = vld [vmem:[%s8954_s2 + $0xe8] ss:$16 sps:$4 sm:$0xff]  }
  0xf4   : > { %4481 = vmatprep.subr.bf16.mxu1 %v6291_v59  ;;  %v6330_v59 = vld [vmem:[%s8954_s2 + $0x10c4] ss:$16 sps:$4 sm:$0xff]  }
  0xf6   : > { %4441 = vmatpush2.bf16.msra.mxu0 %v6286_v16  ;;  %v6333_v16 = vld [vmem:[%s8954_s2 + $0xcc] ss:$16 sps:$4 sm:$0xff]  }
  0xf7   : > { %4482 = vmatpush2.bf16.msra.mxu1 %v6289_v19  ;;  %4442 = vmatprep.subr.bf16.mxu0 %v6294_v20  ;;  %v1281_v19 = vrot.slane %v1272_v56, %v7034_v47  ;;  %v7885_v20 = vpack.c.bf16 %v677_v6, %v677_v6  ;;  %v6352_v56 = vld [vmem:[%s8954_s2 + $0x1040] ss:$16 sps:$4 sm:$0xff]   ;;  %v6366_v6 = vld [vmem:[%s8954_s2 + $0x1004] ss:$16 sps:$4 sm:$0xff]  }
  0xf8   : > { %4483 = vmatprep.subr.bf16.mxu1 %v6297_v21 }
  0xfa   : > { %4443 = vmatpush2.bf16.msra.mxu0 %v6292_v22 }
  0xfb   : > { %4484 = vmatpush2.bf16.msra.mxu1 %v6295_v23  ;;  %4444 = vmatprep.subr.bf16.mxu0 %v6300_v30  ;;  %v6328_v23 = vld [vmem:[%s8954_s2 + $0x10c0] ss:$16 sps:$4 sm:$0xff]  }
  0xfc   : > { %4485 = vmatprep.subr.bf16.mxu1 %v6303_v32  ;;  %v6331_v32 = vld [vmem:[%s8954_s2 + $0xc8] ss:$16 sps:$4 sm:$0xff]  }
  0xfe   : > { %4445 = vmatpush2.bf16.msra.mxu0 %v6298_v33 }
  0xff   : > { %4486 = vmatpush2.bf16.msra.mxu1 %v6301_v34  ;;  %4446 = vmatprep.subr.bf16.mxu0 %v6306_v39 }
 0x100   : > { %4487 = vmatprep.subr.bf16.mxu1 %v6309_v55 }
 0x102   : > { %4447 = vmatpush2.bf16.msra.mxu0 %v6304_v41 }
 0x103   : > { %4488 = vmatpush2.bf16.msra.mxu1 %v6307_v45  ;;  %4448 = vmatprep.subr.bf16.mxu0 %v6312_v46  ;;  %v6337_v46 = vld [vmem:[%s8954_s2 + $0xa8] ss:$16 sps:$4 sm:$0xff]  }
 0x104   : > { %4489 = vmatprep.subr.bf16.mxu1 %v6315_v8 }
 0x106   : > { %4449 = vmatpush2.bf16.msra.mxu0 %v6310_v10 }
 0x107   : > { %4490 = vmatpush2.bf16.msra.mxu1 %v6313_v48  ;;  %4450 = vmatprep.subr.bf16.mxu0 %v6318_v51  ;;  %v6345_v48 = vld [vmem:[%s8954_s2 + $0x8c] ss:$16 sps:$4 sm:$0xff]   ;;  %v6340_v51 = vld [vmem:[%s8954_s2 + $0x1080] ss:$16 sps:$4 sm:$0xff]  }
 0x108   : > { %4491 = vmatprep.subr.bf16.mxu1 %v6321_v0  ;;  %v6346_v0 = vld [vmem:[%s8954_s2 + $0x1060] ss:$16 sps:$4 sm:$0xff]  }
 0x10a   : > { %4451 = vmatpush2.bf16.msra.mxu0 %v6316_v1  ;;  %v6349_v1 = vld [vmem:[%s8954_s2 + $0x68] ss:$16 sps:$4 sm:$0xff]  }
 0x10b   : > { %4492 = vmatpush2.bf16.msra.mxu1 %v6319_v2  ;;  %4502 = vmatprep.subr.bf16.mxu0 %v6324_v9  ;;  %v6354_v2 = vld [vmem:[%s8954_s2 + $0x1044] ss:$16 sps:$4 sm:$0xff]   ;;  %v6363_v9 = vld [vmem:[%s8954_s2 + $0x2c] ss:$16 sps:$4 sm:$0xff]  }
 0x10c   : > { %4543 = vmatprep.subr.bf16.mxu1 %v6327_v12  ;;  %v6358_v12 = vld [vmem:[%s8954_s2 + $0x1020] ss:$16 sps:$4 sm:$0xff]  }
 0x10d   : > { %v4208_v21 = vpop.f32.mrf.mxu0  ;;  %4453 = vmatmul.mubr.bf16.vlgmr.msra.gmra.mxu0 %v7867_v13 }
 0x10e   : > { %v4249_v22 = vpop.f32.mrf.mxu1  ;;  %4494 = vmatmul.mubr.bf16.vlgmr.msra.gmra.mxu1 %v7869_v14  ;;  %v4209_v30 = vadd.f32 %v4208_v21, %v1277_v15  ;;  %4503 = vmatpush1.bf16.msra.mxu0 %v6322_v4  ;;  %v6361_v4 = vld [vmem:[%s8954_s2 + $0x28] ss:$16 sps:$4 sm:$0xff]   ;;  %v6369_v15 = vld [vmem:[%s8954_s2 + $0xc] ss:$16 sps:$4 sm:$0xff]   ;;  %v6370_v21 = vld [vmem:[%s8954_s2 + $0x11e0] ss:$16 sps:$4 sm:$0xff]  }
 0x10f   : > { %4544 = vmatpush1.bf16.msra.mxu1 %v6325_v52  ;;  %v4210_v33 = vpop.f32.mrf.mxu0  ;;  %4504 = vmatprep.subr.bf16.mxu0 %v6330_v59  ;;  %v6364_v52 = vld [vmem:[%s8954_s2 + $0x1000] ss:$16 sps:$4 sm:$0xff]   ;;  %v6367_v59 = vld [vmem:[%s8954_s2 + $0x8] ss:$16 sps:$4 sm:$0xff]  }
 0x110   : > { %v4251_v34 = vpop.f32.mrf.mxu1  ;;  %4545 = vmatprep.subr.bf16.mxu1 %v6333_v16  ;;  %v7901_v39 = vadd.f32 %v4249_v22, %v4209_v30  ;;  %v4211_v55 = vadd.f32 %v4210_v33, %v1281_v19  ;;  %4534 = vmatprep.mubr.bf16.mxu0 %v7885_v20  ;;  %v6372_v16 = vld [vmem:[%s8954_s2 + $0x11e4] ss:$16 sps:$4 sm:$0xff]   ;;  %v6375_v19 = vld [vmem:[%s8954_s2 + $0x1ec] ss:$16 sps:$4 sm:$0xff]   ;;  %v6373_v22 = vld [vmem:[%s8954_s2 + $0x1e8] ss:$16 sps:$4 sm:$0xff]  }
 0x111   : > { %4575 = vmatprep.mubr.bf16.mxu1 %v7108_v27  ;;  %v4212_v41 = vpop.f32.mrf.mxu0  ;;  %v6342_v27 = vld [vmem:[%s8954_s2 + $0x1084] ss:$16 sps:$4 sm:$0xff]   ;;  %v6381_v30 = vld [vmem:[%s8954_s2 + $0x1cc] ss:$16 sps:$4 sm:$0xff]   ;;  %v6379_v33 = vld [vmem:[%s8954_s2 + $0x1c8] ss:$16 sps:$4 sm:$0xff]  }
 0x112   : > { %v4253_v58 = vpop.f32.mrf.mxu1  ;;  %v7908_v45 = vadd.f32 %v4251_v34, %v4211_v55  ;;  %4505 = vmatpush1.bf16.msra.mxu0 %v6328_v23  ;;  %v6378_v23 = vld [vmem:[%s8954_s2 + $0x11c4] ss:$16 sps:$4 sm:$0xff]   ;;  %v6385_v55 = vld [vmem:[%s8954_s2 + $0x1a8] ss:$16 sps:$4 sm:$0xff]  }
 0x113   : > { %4546 = vmatpush1.bf16.msra.mxu1 %v6331_v32  ;;  %v4213_v8 = vpop.f32.mrf.mxu0  ;;  %4506 = vmatprep.subr.bf16.mxu0 %v6336_v35  ;;  %v6376_v32 = vld [vmem:[%s8954_s2 + $0x11c0] ss:$16 sps:$4 sm:$0xff]   ;;  %v6384_v34 = vld [vmem:[%s8954_s2 + $0x11a4] ss:$16 sps:$4 sm:$0xff]   ;;  %v6387_v35 = vld [vmem:[%s8954_s2 + $0x1ac] ss:$16 sps:$4 sm:$0xff]  }
 0x114   : > { %v4254_v10 = vpop.f32.mrf.mxu1  ;;  %4547 = vmatprep.subr.bf16.mxu1 %v6339_v36  ;;  %v6382_v36 = vld [vmem:[%s8954_s2 + $0x11a0] ss:$16 sps:$4 sm:$0xff]   ;;  %v6390_v41 = vld [vmem:[%s8954_s2 + $0x1184] ss:$16 sps:$4 sm:$0xff]   ;;  %v6393_v58 = vld [vmem:[%s8954_s2 + $0x18c] ss:$16 sps:$4 sm:$0xff]   ;;  %v389_v8 = vunpack.c.l.bf16 %v7791_v25 }
 0x115   : > { %v466_v10 = vrot.slane %v7794_v29, %v7043_v50  ;;  %v6397_v25 = vld [vmem:[%s8954_s2 + $0x168] ss:$16 sps:$4 sm:$0xff]   ;;  %v583_v29 = vrot.slane %v7812_v7, %v7043_v50 }
 0x116   : > { %4507 = vmatpush1.bf16.msra.mxu0 %v6334_v42  ;;  %v6388_v42 = vld [vmem:[%s8954_s2 + $0x1180] ss:$16 sps:$4 sm:$0xff]   ;;  %v6403_v7 = vld [vmem:[%s8954_s2 + $0x148] ss:$16 sps:$4 sm:$0xff]  }
 0x117   : > { %4548 = vmatpush1.bf16.msra.mxu1 %v6337_v46  ;;  %4508 = vmatprep.subr.bf16.mxu0 %v6342_v27  ;;  %v6391_v46 = vld [vmem:[%s8954_s2 + $0x188] ss:$16 sps:$4 sm:$0xff]   ;;  %v6396_v27 = vld [vmem:[%s8954_s2 + $0x1164] ss:$16 sps:$4 sm:$0xff]  }
 0x118   : > { %4549 = vmatprep.subr.bf16.mxu1 %v6345_v48  ;;  %v6399_v48 = vld [vmem:[%s8954_s2 + $0x16c] ss:$16 sps:$4 sm:$0xff]  }
 0x11a   : > { %4509 = vmatpush1.bf16.msra.mxu0 %v6340_v51  ;;  %v6394_v51 = vld [vmem:[%s8954_s2 + $0x1160] ss:$16 sps:$4 sm:$0xff]  }
 0x11b   : > { %4550 = vmatpush1.bf16.msra.mxu1 %v6343_v53  ;;  %4510 = vmatprep.subr.bf16.mxu0 %v6348_v60  ;;  %v505_v53 = vsub.f32 %v389_v8, %v466_v10  ;;  %v6402_v60 = vld [vmem:[%s8954_s2 + $0x1144] ss:$16 sps:$4 sm:$0xff]  }
 0x11c   : > { %4551 = vmatprep.subr.bf16.mxu1 %v6351_v61  ;;  %v6405_v61 = vld [vmem:[%s8954_s2 + $0x14c] ss:$16 sps:$4 sm:$0xff]  }
 0x11e   : > { %4511 = vmatpush1.bf16.msra.mxu0 %v6346_v0  ;;  %v6400_v0 = vld [vmem:[%s8954_s2 + $0x1140] ss:$16 sps:$4 sm:$0xff]  }
 0x11f   : > { %4552 = vmatpush1.bf16.msra.mxu1 %v6349_v1  ;;  %4512 = vmatprep.subr.bf16.mxu0 %v6354_v2  ;;  %v622_v1 = vmul.f32 %v583_v29, %v505_v53  ;;  %v6408_v2 = vld [vmem:[%s8954_s2 + $0x1124] ss:$16 sps:$4 sm:$0xff]   ;;  %v6444_v29 = vld [vmem:[%s8954_s2 + $0x26c] ss:$16 sps:$4 sm:$0xff]  }
 0x120   : > { %4553 = vmatprep.subr.bf16.mxu1 %v6357_v11  ;;  %v6411_v11 = vld [vmem:[%s8954_s2 + $0x12c] ss:$16 sps:$4 sm:$0xff]  }
 0x121   : > { %vm640_vm1 = vcmp.gt.f32.partialorder %v622_v1, 0.0  ;;  %v6447_v53 = vld [vmem:[%s8954_s2 + $0x46c] ss:$16 sps:$4 sm:$0xff]  }
 0x122   : > { %4513 = vmatpush1.bf16.msra.mxu0 %v6352_v56  ;;  %v6406_v56 = vld [vmem:[%s8954_s2 + $0x1120] ss:$16 sps:$4 sm:$0xff]  }
 0x123   : > { %4554 = vmatpush1.bf16.msra.mxu1 %v6355_v3  ;;  %4514 = vmatprep.subr.bf16.mxu0 %v6360_v5  ;;  %v6409_v3 = vld [vmem:[%s8954_s2 + $0x128] ss:$16 sps:$4 sm:$0xff]   ;;  %v658_v5 = vmul.f32 0.2, %v622_v1 }
 0x124   : > { %4555 = vmatprep.subr.bf16.mxu1 %v6363_v9  ;;  %v6414_v9 = vld [vmem:[%s8954_s2 + $0x1104] ss:$16 sps:$4 sm:$0xff]  }
 0x126   : > { %4515 = vmatpush1.bf16.msra.mxu0 %v6358_v12  ;;  %v6417_v12 = vld [vmem:[%s8954_s2 + $0x10c] ss:$16 sps:$4 sm:$0xff]  }
 0x127   : > { %4556 = vmatpush1.bf16.msra.mxu1 %v6361_v4  ;;  %4516 = vmatprep.subr.bf16.mxu0 %v6366_v6  ;;  %v6412_v4 = vld [vmem:[%s8954_s2 + $0x1100] ss:$16 sps:$4 sm:$0xff]   ;;  %v6415_v6 = vld [vmem:[%s8954_s2 + $0x108] ss:$16 sps:$4 sm:$0xff]  }
 0x128   : > { %4557 = vmatprep.subr.bf16.mxu1 %v6369_v15  ;;  %v676_v15 = vsel %vm640_vm1, %v622_v1, %v658_v5  ;;  %v6448_v1 = vld [vmem:[%s8954_s2 + $0x248] ss:$16 sps:$4 sm:$0xff]  }
 0x129   : > { %v6457_v5 = vld [vmem:[%s8954_s2 + $0x428] ss:$16 sps:$4 sm:$0xff]  }
 0x12a   : > { %4517 = vmatpush1.bf16.msra.mxu0 %v6364_v52  ;;  %v6420_v52 = vld [vmem:[%s8954_s2 + $0x2ec] ss:$16 sps:$4 sm:$0xff]  }
 0x12b   : > { %4558 = vmatpush1.bf16.msra.mxu1 %v6367_v59  ;;  %4518 = vmatprep.subr.bf16.mxu0 %v6372_v16  ;;  %v6423_v59 = vld [vmem:[%s8954_s2 + $0x4ec] ss:$16 sps:$4 sm:$0xff]   ;;  %v6418_v16 = vld [vmem:[%s8954_s2 + $0x2e8] ss:$16 sps:$4 sm:$0xff]  }
 0x12c   : > { %4559 = vmatprep.subr.bf16.mxu1 %v6375_v19  ;;  %v6421_v19 = vld [vmem:[%s8954_s2 + $0x4e8] ss:$16 sps:$4 sm:$0xff]  }
 0x12e   : > { %4519 = vmatpush2.bf16.msra.mxu0 %v6370_v21  ;;  %v8086_v21 = vpack.c.bf16 %v676_v15, %v676_v15  ;;  %v6468_v15 = vld [vmem:[%s8954_s2 + $0x3ec] ss:$16 sps:$4 sm:$0xff]  }
 0x12f   : > { %4560 = vmatpush2.bf16.msra.mxu1 %v6373_v22  ;;  %4520 = vmatprep.subr.bf16.mxu0 %v6378_v23  ;;  %v6426_v22 = vld [vmem:[%s8954_s2 + $0x2cc] ss:$16 sps:$4 sm:$0xff]  }
 0x130   : > { %4561 = vmatprep.subr.bf16.mxu1 %v6381_v30  ;;  %v6429_v23 = vld [vmem:[%s8954_s2 + $0x4cc] ss:$16 sps:$4 sm:$0xff]   ;;  %v6424_v30 = vld [vmem:[%s8954_s2 + $0x2c8] ss:$16 sps:$4 sm:$0xff]  }
 0x132   : > { %4521 = vmatpush2.bf16.msra.mxu0 %v6376_v32  ;;  %v6427_v32 = vld [vmem:[%s8954_s2 + $0x4c8] ss:$16 sps:$4 sm:$0xff]  }
 0x133   : > { %4562 = vmatpush2.bf16.msra.mxu1 %v6379_v33  ;;  %4522 = vmatprep.subr.bf16.mxu0 %v6384_v34 }
 0x134   : > { %4563 = vmatprep.subr.bf16.mxu1 %v6387_v35 }
 0x136   : > { %4523 = vmatpush2.bf16.msra.mxu0 %v6382_v36 }
 0x137   : > { %4564 = vmatpush2.bf16.msra.mxu1 %v6385_v55  ;;  %4524 = vmatprep.subr.bf16.mxu0 %v6390_v41  ;;  %v6432_v41 = vld [vmem:[%s8954_s2 + $0x2ac] ss:$16 sps:$4 sm:$0xff]  }
 0x138   : > { %4565 = vmatprep.subr.bf16.mxu1 %v6393_v58  ;;  %v6435_v58 = vld [vmem:[%s8954_s2 + $0x4ac] ss:$16 sps:$4 sm:$0xff]  }
 0x13a   : > { %4525 = vmatpush2.bf16.msra.mxu0 %v6388_v42 }
 0x13b   : > { %4566 = vmatpush2.bf16.msra.mxu1 %v6391_v46  ;;  %4526 = vmatprep.subr.bf16.mxu0 %v6396_v27  ;;  %v6433_v46 = vld [vmem:[%s8954_s2 + $0x4a8] ss:$16 sps:$4 sm:$0xff]  }
 0x13c   : > { %4567 = vmatprep.subr.bf16.mxu1 %v6399_v48 }
 0x13e   : > { %4527 = vmatpush2.bf16.msra.mxu0 %v6394_v51  ;;  %v6438_v51 = vld [vmem:[%s8954_s2 + $0x28c] ss:$16 sps:$4 sm:$0xff]  }
 0x13f   : > { %4568 = vmatpush2.bf16.msra.mxu1 %v6397_v25  ;;  %4528 = vmatprep.subr.bf16.mxu0 %v6402_v60  ;;  %v6439_v25 = vld [vmem:[%s8954_s2 + $0x488] ss:$16 sps:$4 sm:$0xff]  }
 0x140   : > { %4569 = vmatprep.subr.bf16.mxu1 %v6405_v61  ;;  %v6442_v60 = vld [vmem:[%s8954_s2 + $0x268] ss:$16 sps:$4 sm:$0xff]  }
 0x141   : > { %v6445_v61 = vld [vmem:[%s8954_s2 + $0x468] ss:$16 sps:$4 sm:$0xff]  }
 0x142   : > { %4529 = vmatpush2.bf16.msra.mxu0 %v6400_v0  ;;  %v6450_v0 = vld [vmem:[%s8954_s2 + $0x24c] ss:$16 sps:$4 sm:$0xff]  }
 0x143   : > { %4570 = vmatpush2.bf16.msra.mxu1 %v6403_v7  ;;  %4530 = vmatprep.subr.bf16.mxu0 %v6408_v2  ;;  %v6453_v7 = vld [vmem:[%s8954_s2 + $0x44c] ss:$16 sps:$4 sm:$0xff]   ;;  %v6451_v2 = vld [vmem:[%s8954_s2 + $0x448] ss:$16 sps:$4 sm:$0xff]  }
 0x144   : > { %4571 = vmatprep.subr.bf16.mxu1 %v6411_v11  ;;  %v6456_v11 = vld [vmem:[%s8954_s2 + $0x22c] ss:$16 sps:$4 sm:$0xff]  }
 0x146   : > { %4531 = vmatpush2.bf16.msra.mxu0 %v6406_v56  ;;  %v6459_v56 = vld [vmem:[%s8954_s2 + $0x42c] ss:$16 sps:$4 sm:$0xff]  }
 0x147   : > { %4572 = vmatpush2.bf16.msra.mxu1 %v6409_v3  ;;  %4532 = vmatprep.subr.bf16.mxu0 %v6414_v9  ;;  %v6454_v3 = vld [vmem:[%s8954_s2 + $0x228] ss:$16 sps:$4 sm:$0xff]   ;;  %v6462_v9 = vld [vmem:[%s8954_s2 + $0x20c] ss:$16 sps:$4 sm:$0xff]  }
 0x148   : > { %4573 = vmatprep.subr.bf16.mxu1 %v6417_v12  ;;  %v6465_v12 = vld [vmem:[%s8954_s2 + $0x40c] ss:$16 sps:$4 sm:$0xff]  }
 0x14a   : > { %4533 = vmatpush2.bf16.msra.mxu0 %v6412_v4  ;;  %v6460_v4 = vld [vmem:[%s8954_s2 + $0x208] ss:$16 sps:$4 sm:$0xff]  }
 0x14b   : > { %4574 = vmatpush2.bf16.msra.mxu1 %v6415_v6  ;;  %4584 = vmatprep.subr.bf16.mxu0 %v6420_v52  ;;  %v6463_v6 = vld [vmem:[%s8954_s2 + $0x408] ss:$16 sps:$4 sm:$0xff]   ;;  %v6471_v52 = vld [vmem:[%s8954_s2 + $0x5ec] ss:$16 sps:$4 sm:$0xff]  }
 0x14c   : > { %4625 = vmatprep.subr.bf16.mxu1 %v6423_v59  ;;  %v6466_v59 = vld [vmem:[%s8954_s2 + $0x3e8] ss:$16 sps:$4 sm:$0xff]  }
 0x14d   : > { %v4290_v33 = vpop.f32.mrf.mxu0  ;;  %4535 = vmatmul.mubr.bf16.vlgmr.msra.gmra.mxu0 %v8086_v21 }
 0x14e   : > { %v4331_v34 = vpop.f32.mrf.mxu1  ;;  %4576 = vmatmul.mubr.bf16.vlgmr.msra.gmra.mxu1 %v7138_v43  ;;  %v4291_v35 = vadd.f32 %v4290_v33, %v7901_v39  ;;  %4585 = vmatpush1.bf16.msra.mxu0 %v6418_v16  ;;  %v6430_v39 = vld [vmem:[%s8954_s2 + $0x2a8] ss:$16 sps:$4 sm:$0xff]   ;;  %v6483_v33 = vld [vmem:[%s8954_s2 + $0x5ac] ss:$16 sps:$4 sm:$0xff]  }
 0x14f   : > { %4626 = vmatpush1.bf16.msra.mxu1 %v6421_v19  ;;  %v4292_v36 = vpop.f32.mrf.mxu0  ;;  %4586 = vmatprep.subr.bf16.mxu0 %v6426_v22  ;;  %v6469_v16 = vld [vmem:[%s8954_s2 + $0x5e8] ss:$16 sps:$4 sm:$0xff]   ;;  %v6474_v19 = vld [vmem:[%s8954_s2 + $0x3cc] ss:$16 sps:$4 sm:$0xff]  }
 0x150   : > { %v4333_v55 = vpop.f32.mrf.mxu1  ;;  %4627 = vmatprep.subr.bf16.mxu1 %v6429_v23  ;;  %v8109_v42 = vadd.f32 %v4331_v34, %v4291_v35  ;;  %v4293_v43 = vadd.f32 %v4292_v36, %v7908_v45  ;;  %4616 = vmatprep.mubr.bf16.mxu0 %v7116_v31  ;;  %v6441_v31 = vld [vmem:[%s8954_s2 + $0x48c] ss:$16 sps:$4 sm:$0xff]   ;;  %v6472_v23 = vld [vmem:[%s8954_s2 + $0x3c8] ss:$16 sps:$4 sm:$0xff]  }
 0x151   : > { %4657 = vmatprep.mubr.bf16.mxu1 %v7286_v62  ;;  %v4294_v8 = vpop.f32.mrf.mxu0  ;;  %v6436_v62 = vld [vmem:[%s8954_s2 + $0x288] ss:$16 sps:$4 sm:$0xff]   ;;  %v6477_v22 = vld [vmem:[%s8954_s2 + $0x5cc] ss:$16 sps:$4 sm:$0xff]  }
 0x152   : > { %v4335_v10 = vpop.f32.mrf.mxu1  ;;  %v8120_v27 = vadd.f32 %v4333_v55, %v4293_v43  ;;  %4587 = vmatpush1.bf16.msra.mxu0 %v6424_v30  ;;  %v6475_v30 = vld [vmem:[%s8954_s2 + $0x5c8] ss:$16 sps:$4 sm:$0xff]   ;;  %v6486_v36 = vld [vmem:[%s8954_s2 + $0x38c] ss:$16 sps:$4 sm:$0xff]  }
 0x153   : > { %4628 = vmatpush1.bf16.msra.mxu1 %v6427_v32  ;;  %v4295_v48 = vpop.f32.mrf.mxu0  ;;  %4588 = vmatprep.subr.bf16.mxu0 %v6432_v41  ;;  %v6480_v32 = vld [vmem:[%s8954_s2 + $0x3ac] ss:$16 sps:$4 sm:$0xff]   ;;  %v6478_v34 = vld [vmem:[%s8954_s2 + $0x3a8] ss:$16 sps:$4 sm:$0xff]  }
 0x154   : > { %v4336_v45 = vpop.f32.mrf.mxu1  ;;  %4629 = vmatprep.subr.bf16.mxu1 %v6435_v58  ;;  %v6481_v35 = vld [vmem:[%s8954_s2 + $0x5a8] ss:$16 sps:$4 sm:$0xff]   ;;  %v6489_v55 = vld [vmem:[%s8954_s2 + $0x58c] ss:$16 sps:$4 sm:$0xff]  }
 0x155   : > { %v6484_v41 = vld [vmem:[%s8954_s2 + $0x388] ss:$16 sps:$4 sm:$0xff]   ;;  %v6492_v43 = vld [vmem:[%s8954_s2 + $0x36c] ss:$16 sps:$4 sm:$0xff]  }
 0x156   : > { %4589 = vmatpush1.bf16.msra.mxu0 %v6430_v39  ;;  %v6487_v58 = vld [vmem:[%s8954_s2 + $0x588] ss:$16 sps:$4 sm:$0xff]   ;;  %v6495_v39 = vld [vmem:[%s8954_s2 + $0x56c] ss:$16 sps:$4 sm:$0xff]  }
 0x157   : > { %4630 = vmatpush1.bf16.msra.mxu1 %v6433_v46  ;;  %4590 = vmatprep.subr.bf16.mxu0 %v6438_v51  ;;  %v6490_v46 = vld [vmem:[%s8954_s2 + $0x368] ss:$16 sps:$4 sm:$0xff]   ;;  %v6498_v10 = vld [vmem:[%s8954_s2 + $0x34c] ss:$16 sps:$4 sm:$0xff]  }
 0x158   : > { %4631 = vmatprep.subr.bf16.mxu1 %v6441_v31  ;;  %v6493_v8 = vld [vmem:[%s8954_s2 + $0x568] ss:$16 sps:$4 sm:$0xff]   ;;  %v6501_v48 = vld [vmem:[%s8954_s2 + $0x54c] ss:$16 sps:$4 sm:$0xff]  }
 0x159   : > { %v6496_v45 = vld [vmem:[%s8954_s2 + $0x348] ss:$16 sps:$4 sm:$0xff]   ;;  %v6504_v31 = vld [vmem:[%s8954_s2 + $0x32c] ss:$16 sps:$4 sm:$0xff]  }
 0x15a   : > { %4591 = vmatpush1.bf16.msra.mxu0 %v6436_v62  ;;  %v6499_v51 = vld [vmem:[%s8954_s2 + $0x548] ss:$16 sps:$4 sm:$0xff]   ;;  %v6507_v62 = vld [vmem:[%s8954_s2 + $0x52c] ss:$16 sps:$4 sm:$0xff]  }
 0x15b   : > { %4632 = vmatpush1.bf16.msra.mxu1 %v6439_v25  ;;  %4592 = vmatprep.subr.bf16.mxu0 %v6444_v29  ;;  %v6502_v25 = vld [vmem:[%s8954_s2 + $0x328] ss:$16 sps:$4 sm:$0xff]  }
 0x15c   : > { %4633 = vmatprep.subr.bf16.mxu1 %v6447_v53  ;;  %v6505_v29 = vld [vmem:[%s8954_s2 + $0x528] ss:$16 sps:$4 sm:$0xff]   ;;  %v6510_v53 = vld [vmem:[%s8954_s2 + $0x30c] ss:$16 sps:$4 sm:$0xff]  }
 0x15e   : > { %4593 = vmatpush1.bf16.msra.mxu0 %v6442_v60  ;;  %v6513_v60 = vld [vmem:[%s8954_s2 + $0x50c] ss:$16 sps:$4 sm:$0xff]  }
 0x15f   : > { %4634 = vmatpush1.bf16.msra.mxu1 %v6445_v61  ;;  %4594 = vmatprep.subr.bf16.mxu0 %v6450_v0  ;;  %v6508_v61 = vld [vmem:[%s8954_s2 + $0x308] ss:$16 sps:$4 sm:$0xff]  }
 0x160   : > { %4635 = vmatprep.subr.bf16.mxu1 %v6453_v7  ;;  %v6511_v0 = vld [vmem:[%s8954_s2 + $0x508] ss:$16 sps:$4 sm:$0xff]   ;;  %v6516_v7 = vld [vmem:[%s8954_s2 + $0x6ec] ss:$16 sps:$4 sm:$0xff]  }
 0x162   : > { %4595 = vmatpush1.bf16.msra.mxu0 %v6448_v1  ;;  %v6519_v1 = vld [vmem:[%s8954_s2 + $0x8ec] ss:$16 sps:$4 sm:$0xff]  }
 0x163   : > { %4636 = vmatpush1.bf16.msra.mxu1 %v6451_v2  ;;  %4596 = vmatprep.subr.bf16.mxu0 %v6456_v11  ;;  %v6514_v2 = vld [vmem:[%s8954_s2 + $0x6e8] ss:$16 sps:$4 sm:$0xff]  }
 0x164   : > { %4637 = vmatprep.subr.bf16.mxu1 %v6459_v56  ;;  %v6517_v11 = vld [vmem:[%s8954_s2 + $0x8e8] ss:$16 sps:$4 sm:$0xff]   ;;  %v6522_v56 = vld [vmem:[%s8954_s2 + $0x6cc] ss:$16 sps:$4 sm:$0xff]  }
 0x166   : > { %4597 = vmatpush1.bf16.msra.mxu0 %v6454_v3  ;;  %v6525_v3 = vld [vmem:[%s8954_s2 + $0x8cc] ss:$16 sps:$4 sm:$0xff]  }
 0x167   : > { %4638 = vmatpush1.bf16.msra.mxu1 %v6457_v5  ;;  %4598 = vmatprep.subr.bf16.mxu0 %v6462_v9 }
 0x168   : > { %4639 = vmatprep.subr.bf16.mxu1 %v6465_v12 }
 0x16a   : > { %4599 = vmatpush1.bf16.msra.mxu0 %v6460_v4  ;;  %v6520_v4 = vld [vmem:[%s8954_s2 + $0x6c8] ss:$16 sps:$4 sm:$0xff]  }
 0x16b   : > { %4640 = vmatpush1.bf16.msra.mxu1 %v6463_v6  ;;  %4600 = vmatprep.subr.bf16.mxu0 %v6468_v15  ;;  %v6523_v6 = vld [vmem:[%s8954_s2 + $0x8c8] ss:$16 sps:$4 sm:$0xff]  }
 0x16c   : > { %4641 = vmatprep.subr.bf16.mxu1 %v6471_v52 }
 0x16e   : > { %4601 = vmatpush2.bf16.msra.mxu0 %v6466_v59 }
 0x16f   : > { %4642 = vmatpush2.bf16.msra.mxu1 %v6469_v16  ;;  %4602 = vmatprep.subr.bf16.mxu0 %v6474_v19 }
 0x170   : > { %4643 = vmatprep.subr.bf16.mxu1 %v6477_v22 }
 0x172   : > { %4603 = vmatpush2.bf16.msra.mxu0 %v6472_v23  ;;  %v6526_v23 = vld [vmem:[%s8954_s2 + $0x6a8] ss:$16 sps:$4 sm:$0xff]  }
 0x173   : > { %4644 = vmatpush2.bf16.msra.mxu1 %v6475_v30  ;;  %4604 = vmatprep.subr.bf16.mxu0 %v6480_v32  ;;  %v6529_v30 = vld [vmem:[%s8954_s2 + $0x8a8] ss:$16 sps:$4 sm:$0xff]  }
 0x174   : > { %4645 = vmatprep.subr.bf16.mxu1 %v6483_v33  ;;  %v6532_v33 = vld [vmem:[%s8954_s2 + $0x688] ss:$16 sps:$4 sm:$0xff]  }
 0x176   : > { %4605 = vmatpush2.bf16.msra.mxu0 %v6478_v34  ;;  %v6535_v34 = vld [vmem:[%s8954_s2 + $0x888] ss:$16 sps:$4 sm:$0xff]  }
 0x177   : > { %4646 = vmatpush2.bf16.msra.mxu1 %v6481_v35  ;;  %4606 = vmatprep.subr.bf16.mxu0 %v6486_v36  ;;  %v6540_v35 = vld [vmem:[%s8954_s2 + $0x66c] ss:$16 sps:$4 sm:$0xff]  }
 0x178   : > { %4647 = vmatprep.subr.bf16.mxu1 %v6489_v55  ;;  %v6543_v36 = vld [vmem:[%s8954_s2 + $0x86c] ss:$16 sps:$4 sm:$0xff]   ;;  %v6538_v55 = vld [vmem:[%s8954_s2 + $0x668] ss:$16 sps:$4 sm:$0xff]  }
 0x17a   : > { %4607 = vmatpush2.bf16.msra.mxu0 %v6484_v41  ;;  %v6541_v41 = vld [vmem:[%s8954_s2 + $0x868] ss:$16 sps:$4 sm:$0xff]  }
 0x17b   : > { %4648 = vmatpush2.bf16.msra.mxu1 %v6487_v58  ;;  %4608 = vmatprep.subr.bf16.mxu0 %v6492_v43  ;;  %v6546_v58 = vld [vmem:[%s8954_s2 + $0x64c] ss:$16 sps:$4 sm:$0xff]  }
 0x17c   : > { %4649 = vmatprep.subr.bf16.mxu1 %v6495_v39  ;;  %v6549_v43 = vld [vmem:[%s8954_s2 + $0x84c] ss:$16 sps:$4 sm:$0xff]   ;;  %v6544_v39 = vld [vmem:[%s8954_s2 + $0x648] ss:$16 sps:$4 sm:$0xff]  }
 0x17e   : > { %4609 = vmatpush2.bf16.msra.mxu0 %v6490_v46  ;;  %v6547_v46 = vld [vmem:[%s8954_s2 + $0x848] ss:$16 sps:$4 sm:$0xff]  }
 0x17f   : > { %4650 = vmatpush2.bf16.msra.mxu1 %v6493_v8  ;;  %4610 = vmatprep.subr.bf16.mxu0 %v6498_v10  ;;  %v6552_v8 = vld [vmem:[%s8954_s2 + $0x62c] ss:$16 sps:$4 sm:$0xff]  }
 0x180   : > { %4651 = vmatprep.subr.bf16.mxu1 %v6501_v48  ;;  %v6555_v10 = vld [vmem:[%s8954_s2 + $0x82c] ss:$16 sps:$4 sm:$0xff]   ;;  %v6550_v48 = vld [vmem:[%s8954_s2 + $0x628] ss:$16 sps:$4 sm:$0xff]  }
 0x182   : > { %4611 = vmatpush2.bf16.msra.mxu0 %v6496_v45  ;;  %v6553_v45 = vld [vmem:[%s8954_s2 + $0x828] ss:$16 sps:$4 sm:$0xff]  }
 0x183   : > { %4652 = vmatpush2.bf16.msra.mxu1 %v6499_v51  ;;  %4612 = vmatprep.subr.bf16.mxu0 %v6504_v31  ;;  %v6558_v51 = vld [vmem:[%s8954_s2 + $0x60c] ss:$16 sps:$4 sm:$0xff]  }
 0x184   : > { %4653 = vmatprep.subr.bf16.mxu1 %v6507_v62  ;;  %v6561_v31 = vld [vmem:[%s8954_s2 + $0x80c] ss:$16 sps:$4 sm:$0xff]   ;;  %v6556_v62 = vld [vmem:[%s8954_s2 + $0x608] ss:$16 sps:$4 sm:$0xff]  }
 0x186   : > { %4613 = vmatpush2.bf16.msra.mxu0 %v6502_v25  ;;  %v6559_v25 = vld [vmem:[%s8954_s2 + $0x808] ss:$16 sps:$4 sm:$0xff]  }
 0x187   : > { %4654 = vmatpush2.bf16.msra.mxu1 %v6505_v29  ;;  %4614 = vmatprep.subr.bf16.mxu0 %v6510_v53  ;;  %v6564_v29 = vld [vmem:[%s8954_s2 + $0x7ec] ss:$16 sps:$4 sm:$0xff]  }
 0x188   : > { %4655 = vmatprep.subr.bf16.mxu1 %v6513_v60  ;;  %v6567_v53 = vld [vmem:[%s8954_s2 + $0x9ec] ss:$16 sps:$4 sm:$0xff]   ;;  %v6562_v60 = vld [vmem:[%s8954_s2 + $0x7e8] ss:$16 sps:$4 sm:$0xff]  }
 0x18a   : > { %4615 = vmatpush2.bf16.msra.mxu0 %v6508_v61  ;;  %v6565_v61 = vld [vmem:[%s8954_s2 + $0x9e8] ss:$16 sps:$4 sm:$0xff]  }
 0x18b   : > { %4656 = vmatpush2.bf16.msra.mxu1 %v6511_v0  ;;  %4666 = vmatprep.subr.bf16.mxu0 %v6516_v7  ;;  %v6570_v0 = vld [vmem:[%s8954_s2 + $0x7cc] ss:$16 sps:$4 sm:$0xff]  }
 0x18c   : > { %4707 = vmatprep.subr.bf16.mxu1 %v6519_v1  ;;  %v6573_v7 = vld [vmem:[%s8954_s2 + $0x9cc] ss:$16 sps:$4 sm:$0xff]   ;;  %v6568_v1 = vld [vmem:[%s8954_s2 + $0x7c8] ss:$16 sps:$4 sm:$0xff]  }
 0x18d   : > { %v4372_v5 = vpop.f32.mrf.mxu0  ;;  %4617 = vmatmul.mubr.bf16.vlgmr.msra.gmra.mxu0 %v7140_v44  ;;  %v6528_v44 = vld [vmem:[%s8954_s2 + $0x6ac] ss:$16 sps:$4 sm:$0xff]  }
 0x18e   : > { %v4413_v9 = vpop.f32.mrf.mxu1  ;;  %4658 = vmatmul.mubr.bf16.vlgmr.msra.gmra.mxu1 %v7382_v37  ;;  %v4373_v12 = vadd.f32 %v4372_v5, %v8109_v42  ;;  %4667 = vmatpush1.bf16.msra.mxu0 %v6514_v2  ;;  %v6531_v37 = vld [vmem:[%s8954_s2 + $0x8ac] ss:$16 sps:$4 sm:$0xff]   ;;  %v6571_v2 = vld [vmem:[%s8954_s2 + $0x9c8] ss:$16 sps:$4 sm:$0xff]  }
 0x18f   : > { %4708 = vmatpush1.bf16.msra.mxu1 %v6517_v11  ;;  %v4374_v15 = vpop.f32.mrf.mxu0  ;;  %4668 = vmatprep.subr.bf16.mxu0 %v6522_v56  ;;  %v6576_v11 = vld [vmem:[%s8954_s2 + $0x7ac] ss:$16 sps:$4 sm:$0xff]   ;;  %v6577_v5 = vld [vmem:[%s8954_s2 + $0x9a8] ss:$16 sps:$4 sm:$0xff]  }
 0x190   : > { %v4415_v52 = vpop.f32.mrf.mxu1  ;;  %4709 = vmatprep.subr.bf16.mxu1 %v6525_v3  ;;  %v8311_v42 = vadd.f32 %v4413_v9, %v4373_v12  ;;  %v4375_v59 = vadd.f32 %v4374_v15, %v8120_v27  ;;  %4698 = vmatprep.mubr.bf16.mxu0 %v7288_v63  ;;  %v6534_v63 = vld [vmem:[%s8954_s2 + $0x68c] ss:$16 sps:$4 sm:$0xff]   ;;  %v6574_v3 = vld [vmem:[%s8954_s2 + $0x7a8] ss:$16 sps:$4 sm:$0xff]  }
 0x191   : > { %4739 = vmatprep.mubr.bf16.mxu1 %v7464_v24  ;;  %v4376_v16 = vpop.f32.mrf.mxu0  ;;  %v6537_v24 = vld [vmem:[%s8954_s2 + $0x88c] ss:$16 sps:$4 sm:$0xff]  }
 0x192   : > { %v4417_v19 = vpop.f32.mrf.mxu1  ;;  %v8316_v22 = vadd.f32 %v4415_v52, %v4375_v59  ;;  %4669 = vmatpush1.bf16.msra.mxu0 %v6520_v4  ;;  %v6579_v56 = vld [vmem:[%s8954_s2 + $0x9ac] ss:$16 sps:$4 sm:$0xff]   ;;  %v6580_v4 = vld [vmem:[%s8954_s2 + $0x788] ss:$16 sps:$4 sm:$0xff]  }
 0x193   : > { %4710 = vmatpush1.bf16.msra.mxu1 %v6523_v6  ;;  %v4377_v32 = vpop.f32.mrf.mxu0  ;;  %4670 = vmatprep.subr.bf16.mxu0 %v6528_v44  ;;  %v6582_v9 = vld [vmem:[%s8954_s2 + $0x78c] ss:$16 sps:$4 sm:$0xff]   ;;  %v6583_v6 = vld [vmem:[%s8954_s2 + $0x988] ss:$16 sps:$4 sm:$0xff]  }
 0x194   : > { %v4418_v27 = vpop.f32.mrf.mxu1  ;;  %4711 = vmatprep.subr.bf16.mxu1 %v6531_v37  ;;  %v6585_v12 = vld [vmem:[%s8954_s2 + $0x98c] ss:$16 sps:$4 sm:$0xff]   ;;  %v6586_v44 = vld [vmem:[%s8954_s2 + $0x768] ss:$16 sps:$4 sm:$0xff]  }
 0x195   : > { %v6588_v15 = vld [vmem:[%s8954_s2 + $0x76c] ss:$16 sps:$4 sm:$0xff]   ;;  %v6589_v37 = vld [vmem:[%s8954_s2 + $0x968] ss:$16 sps:$4 sm:$0xff]  }
 0x196   : > { %4671 = vmatpush1.bf16.msra.mxu0 %v6526_v23  ;;  %v6591_v52 = vld [vmem:[%s8954_s2 + $0x96c] ss:$16 sps:$4 sm:$0xff]   ;;  %v6592_v19 = vld [vmem:[%s8954_s2 + $0x748] ss:$16 sps:$4 sm:$0xff]  }
 0x197   : > { %4712 = vmatpush1.bf16.msra.mxu1 %v6529_v30  ;;  %4672 = vmatprep.subr.bf16.mxu0 %v6534_v63  ;;  %v6594_v59 = vld [vmem:[%s8954_s2 + $0x74c] ss:$16 sps:$4 sm:$0xff]   ;;  %v6595_v23 = vld [vmem:[%s8954_s2 + $0x948] ss:$16 sps:$4 sm:$0xff]  }
 0x198   : > { %4713 = vmatprep.subr.bf16.mxu1 %v6537_v24  ;;  %v6597_v16 = vld [vmem:[%s8954_s2 + $0x94c] ss:$16 sps:$4 sm:$0xff]   ;;  %v6598_v27 = vld [vmem:[%s8954_s2 + $0x728] ss:$16 sps:$4 sm:$0xff]  }
 0x199   : > { %v6600_v30 = vld [vmem:[%s8954_s2 + $0x72c] ss:$16 sps:$4 sm:$0xff]   ;;  %v6601_v63 = vld [vmem:[%s8954_s2 + $0x928] ss:$16 sps:$4 sm:$0xff]  }
 0x19a   : > { %4673 = vmatpush1.bf16.msra.mxu0 %v6532_v33  ;;  %v6603_v32 = vld [vmem:[%s8954_s2 + $0x92c] ss:$16 sps:$4 sm:$0xff]  }
 0x19b   : > { %4714 = vmatpush1.bf16.msra.mxu1 %v6535_v34  ;;  %4674 = vmatprep.subr.bf16.mxu0 %v6540_v35  ;;  %v6606_v24 = vld [vmem:[%s8954_s2 + $0x70c] ss:$16 sps:$4 sm:$0xff]   ;;  %v6604_v34 = vld [vmem:[%s8954_s2 + $0x708] ss:$16 sps:$4 sm:$0xff]  }
 0x19c   : > { %4715 = vmatprep.subr.bf16.mxu1 %v6543_v36  ;;  %v6609_v33 = vld [vmem:[%s8954_s2 + $0x90c] ss:$16 sps:$4 sm:$0xff]   ;;  %v6607_v35 = vld [vmem:[%s8954_s2 + $0x908] ss:$16 sps:$4 sm:$0xff]  }
 0x19d   : > { %v6612_v36 = vld [vmem:[%s8954_s2 + $0xaec] ss:$16 sps:$4 sm:$0xff]  }
 0x19e   : > { %4675 = vmatpush1.bf16.msra.mxu0 %v6538_v55  ;;  %v6615_v55 = vld [vmem:[%s8954_s2 + $0xcec] ss:$16 sps:$4 sm:$0xff]  }
 0x19f   : > { %4716 = vmatpush1.bf16.msra.mxu1 %v6541_v41  ;;  %4676 = vmatprep.subr.bf16.mxu0 %v6546_v58  ;;  %v6610_v41 = vld [vmem:[%s8954_s2 + $0xae8] ss:$16 sps:$4 sm:$0xff]  }
 0x1a0   : > { %4717 = vmatprep.subr.bf16.mxu1 %v6549_v43  ;;  %v6613_v58 = vld [vmem:[%s8954_s2 + $0xce8] ss:$16 sps:$4 sm:$0xff]   ;;  %v6618_v43 = vld [vmem:[%s8954_s2 + $0xacc] ss:$16 sps:$4 sm:$0xff]  }
 0x1a2   : > { %4677 = vmatpush1.bf16.msra.mxu0 %v6544_v39  ;;  %v6621_v39 = vld [vmem:[%s8954_s2 + $0xccc] ss:$16 sps:$4 sm:$0xff]  }
 0x1a3   : > { %4718 = vmatpush1.bf16.msra.mxu1 %v6547_v46  ;;  %4678 = vmatprep.subr.bf16.mxu0 %v6552_v8 }
 0x1a4   : > { %4719 = vmatprep.subr.bf16.mxu1 %v6555_v10 }
 0x1a6   : > { %4679 = vmatpush1.bf16.msra.mxu0 %v6550_v48  ;;  %v6616_v48 = vld [vmem:[%s8954_s2 + $0xac8] ss:$16 sps:$4 sm:$0xff]  }
 0x1a7   : > { %4720 = vmatpush1.bf16.msra.mxu1 %v6553_v45  ;;  %4680 = vmatprep.subr.bf16.mxu0 %v6558_v51  ;;  %v6619_v45 = vld [vmem:[%s8954_s2 + $0xcc8] ss:$16 sps:$4 sm:$0xff]  }
 0x1a8   : > { %4721 = vmatprep.subr.bf16.mxu1 %v6561_v31 }
 0x1aa   : > { %4681 = vmatpush1.bf16.msra.mxu0 %v6556_v62 }
 0x1ab   : > { %4722 = vmatpush1.bf16.msra.mxu1 %v6559_v25  ;;  %4682 = vmatprep.subr.bf16.mxu0 %v6564_v29  ;;  %v6622_v29 = vld [vmem:[%s8954_s2 + $0xaa8] ss:$16 sps:$4 sm:$0xff]  }
 0x1ac   : > { %4723 = vmatprep.subr.bf16.mxu1 %v6567_v53  ;;  %v6625_v53 = vld [vmem:[%s8954_s2 + $0xca8] ss:$16 sps:$4 sm:$0xff]  }
 0x1ae   : > { %4683 = vmatpush2.bf16.msra.mxu0 %v6562_v60 }
 0x1af   : > { %4724 = vmatpush2.bf16.msra.mxu1 %v6565_v61  ;;  %4684 = vmatprep.subr.bf16.mxu0 %v6570_v0  ;;  %v6628_v0 = vld [vmem:[%s8954_s2 + $0xa88] ss:$16 sps:$4 sm:$0xff]  }
 0x1b0   : > { %4725 = vmatprep.subr.bf16.mxu1 %v6573_v7  ;;  %v6631_v7 = vld [vmem:[%s8954_s2 + $0xc88] ss:$16 sps:$4 sm:$0xff]  }
 0x1b2   : > { %4685 = vmatpush2.bf16.msra.mxu0 %v6568_v1  ;;  %v6636_v1 = vld [vmem:[%s8954_s2 + $0xa6c] ss:$16 sps:$4 sm:$0xff]  }
 0x1b3   : > { %4726 = vmatpush2.bf16.msra.mxu1 %v6571_v2  ;;  %4686 = vmatprep.subr.bf16.mxu0 %v6576_v11  ;;  %v6639_v2 = vld [vmem:[%s8954_s2 + $0xc6c] ss:$16 sps:$4 sm:$0xff]   ;;  %v6634_v11 = vld [vmem:[%s8954_s2 + $0xa68] ss:$16 sps:$4 sm:$0xff]  }
 0x1b4   : > { %4727 = vmatprep.subr.bf16.mxu1 %v6579_v56  ;;  %v6637_v56 = vld [vmem:[%s8954_s2 + $0xc68] ss:$16 sps:$4 sm:$0xff]  }
 0x1b6   : > { %4687 = vmatpush2.bf16.msra.mxu0 %v6574_v3  ;;  %v6642_v3 = vld [vmem:[%s8954_s2 + $0xa4c] ss:$16 sps:$4 sm:$0xff]  }
 0x1b7   : > { %4728 = vmatpush2.bf16.msra.mxu1 %v6577_v5  ;;  %4688 = vmatprep.subr.bf16.mxu0 %v6582_v9  ;;  %v6645_v5 = vld [vmem:[%s8954_s2 + $0xc4c] ss:$16 sps:$4 sm:$0xff]   ;;  %v6640_v9 = vld [vmem:[%s8954_s2 + $0xa48] ss:$16 sps:$4 sm:$0xff]  }
 0x1b8   : > { %4729 = vmatprep.subr.bf16.mxu1 %v6585_v12  ;;  %v6643_v12 = vld [vmem:[%s8954_s2 + $0xc48] ss:$16 sps:$4 sm:$0xff]  }
 0x1ba   : > { %4689 = vmatpush2.bf16.msra.mxu0 %v6580_v4  ;;  %v6648_v4 = vld [vmem:[%s8954_s2 + $0xa2c] ss:$16 sps:$4 sm:$0xff]  }
 0x1bb   : > { %4730 = vmatpush2.bf16.msra.mxu1 %v6583_v6  ;;  %4690 = vmatprep.subr.bf16.mxu0 %v6588_v15  ;;  %v6651_v6 = vld [vmem:[%s8954_s2 + $0xc2c] ss:$16 sps:$4 sm:$0xff]   ;;  %v6646_v15 = vld [vmem:[%s8954_s2 + $0xa28] ss:$16 sps:$4 sm:$0xff]  }
 0x1bc   : > { %4731 = vmatprep.subr.bf16.mxu1 %v6591_v52  ;;  %v6649_v52 = vld [vmem:[%s8954_s2 + $0xc28] ss:$16 sps:$4 sm:$0xff]  }
 0x1be   : > { %4691 = vmatpush2.bf16.msra.mxu0 %v6586_v44  ;;  %v6654_v44 = vld [vmem:[%s8954_s2 + $0xa0c] ss:$16 sps:$4 sm:$0xff]  }
 0x1bf   : > { %4732 = vmatpush2.bf16.msra.mxu1 %v6589_v37  ;;  %4692 = vmatprep.subr.bf16.mxu0 %v6594_v59  ;;  %v6657_v37 = vld [vmem:[%s8954_s2 + $0xc0c] ss:$16 sps:$4 sm:$0xff]   ;;  %v6652_v59 = vld [vmem:[%s8954_s2 + $0xa08] ss:$16 sps:$4 sm:$0xff]  }
 0x1c0   : > { %4733 = vmatprep.subr.bf16.mxu1 %v6597_v16  ;;  %v6655_v16 = vld [vmem:[%s8954_s2 + $0xc08] ss:$16 sps:$4 sm:$0xff]  }
 0x1c2   : > { %4693 = vmatpush2.bf16.msra.mxu0 %v6592_v19  ;;  %v6660_v19 = vld [vmem:[%s8954_s2 + $0xbec] ss:$16 sps:$4 sm:$0xff]  }
 0x1c3   : > { %4734 = vmatpush2.bf16.msra.mxu1 %v6595_v23  ;;  %4694 = vmatprep.subr.bf16.mxu0 %v6600_v30  ;;  %v6663_v23 = vld [vmem:[%s8954_s2 + $0xdec] ss:$16 sps:$4 sm:$0xff]   ;;  %v6658_v30 = vld [vmem:[%s8954_s2 + $0xbe8] ss:$16 sps:$4 sm:$0xff]  }
 0x1c4   : > { %4735 = vmatprep.subr.bf16.mxu1 %v6603_v32  ;;  %v6661_v32 = vld [vmem:[%s8954_s2 + $0xde8] ss:$16 sps:$4 sm:$0xff]  }
 0x1c6   : > { %4695 = vmatpush2.bf16.msra.mxu0 %v6598_v27  ;;  %v6666_v27 = vld [vmem:[%s8954_s2 + $0xbcc] ss:$16 sps:$4 sm:$0xff]  }
 0x1c7   : > { %4736 = vmatpush2.bf16.msra.mxu1 %v6601_v63  ;;  %4696 = vmatprep.subr.bf16.mxu0 %v6606_v24  ;;  %v6669_v63 = vld [vmem:[%s8954_s2 + $0xdcc] ss:$16 sps:$4 sm:$0xff]   ;;  %v6664_v24 = vld [vmem:[%s8954_s2 + $0xbc8] ss:$16 sps:$4 sm:$0xff]  }
 0x1c8   : > { %4737 = vmatprep.subr.bf16.mxu1 %v6609_v33  ;;  %v6667_v33 = vld [vmem:[%s8954_s2 + $0xdc8] ss:$16 sps:$4 sm:$0xff]  }
 0x1ca   : > { %4697 = vmatpush2.bf16.msra.mxu0 %v6604_v34  ;;  %v6672_v34 = vld [vmem:[%s8954_s2 + $0xbac] ss:$16 sps:$4 sm:$0xff]  }
 0x1cb   : > { %4738 = vmatpush2.bf16.msra.mxu1 %v6607_v35  ;;  %4748 = vmatprep.subr.bf16.mxu0 %v6612_v36  ;;  %v6675_v35 = vld [vmem:[%s8954_s2 + $0xdac] ss:$16 sps:$4 sm:$0xff]   ;;  %v6670_v36 = vld [vmem:[%s8954_s2 + $0xba8] ss:$16 sps:$4 sm:$0xff]  }
 0x1cc   : > { %4789 = vmatprep.subr.bf16.mxu1 %v6615_v55  ;;  %v6673_v55 = vld [vmem:[%s8954_s2 + $0xda8] ss:$16 sps:$4 sm:$0xff]  }
 0x1cd   : > { %v4454_v46 = vpop.f32.mrf.mxu0  ;;  %4699 = vmatmul.mubr.bf16.vlgmr.msra.gmra.mxu0 %v7384_v38  ;;  %v6624_v38 = vld [vmem:[%s8954_s2 + $0xaac] ss:$16 sps:$4 sm:$0xff]  }
 0x1ce   : > { %v4495_v8 = vpop.f32.mrf.mxu1  ;;  %4740 = vmatmul.mubr.bf16.vlgmr.msra.gmra.mxu1 %v7640_v17  ;;  %v4455_v10 = vadd.f32 %v4454_v46, %v8311_v42  ;;  %4749 = vmatpush1.bf16.msra.mxu0 %v6610_v41  ;;  %v6627_v17 = vld [vmem:[%s8954_s2 + $0xcac] ss:$16 sps:$4 sm:$0xff]  }
 0x1cf   : > { %4790 = vmatpush1.bf16.msra.mxu1 %v6613_v58  ;;  %v8507_v51 = vpop.f32.mrf.mxu0  ;;  %4750 = vmatprep.subr.bf16.mxu0 %v6618_v43  ;;  %v6678_v41 = vld [vmem:[%s8954_s2 + $0xb8c] ss:$16 sps:$4 sm:$0xff]   ;;  %v6676_v43 = vld [vmem:[%s8954_s2 + $0xb88] ss:$16 sps:$4 sm:$0xff]  }
 0x1d0   : > { %v8509_v31 = vpop.f32.mrf.mxu1  ;;  %4791 = vmatprep.subr.bf16.mxu1 %v6621_v39  ;;  %v8517_v42 = vadd.f32 %v4495_v8, %v4455_v10  ;;  %4780 = vmatprep.mubr.bf16.mxu0 %v7472_v28  ;;  %v6630_v28 = vld [vmem:[%s8954_s2 + $0xa8c] ss:$16 sps:$4 sm:$0xff]   ;;  %v6679_v39 = vld [vmem:[%s8954_s2 + $0xd88] ss:$16 sps:$4 sm:$0xff]  }
 0x1d1   : > { %4821 = vmatprep.mubr.bf16.mxu1 %v7656_v26  ;;  %v4458_v62 = vpop.f32.mrf.mxu0  ;;  %v6633_v26 = vld [vmem:[%s8954_s2 + $0xc8c] ss:$16 sps:$4 sm:$0xff]   ;;  %v6682_v10 = vld [vmem:[%s8954_s2 + $0xb68] ss:$16 sps:$4 sm:$0xff]  }
 0x1d2   : > { %v4499_v25 = vpop.f32.mrf.mxu1  ;;  %4751 = vmatpush1.bf16.msra.mxu0 %v6616_v48  ;;  %v6681_v58 = vld [vmem:[%s8954_s2 + $0xd8c] ss:$16 sps:$4 sm:$0xff]   ;;  %v6685_v48 = vld [vmem:[%s8954_s2 + $0xd68] ss:$16 sps:$4 sm:$0xff]  }
 0x1d3   : > { %4792 = vmatpush1.bf16.msra.mxu1 %v6619_v45  ;;  %v4459_v60 = vpop.f32.mrf.mxu0  ;;  %4752 = vmatprep.subr.bf16.mxu0 %v6624_v38  ;;  %v6684_v46 = vld [vmem:[%s8954_s2 + $0xb6c] ss:$16 sps:$4 sm:$0xff]   ;;  %v6691_v62 = vld [vmem:[%s8954_s2 + $0xd48] ss:$16 sps:$4 sm:$0xff]  }
 0x1d4   : > { %v4500_v61 = vpop.f32.mrf.mxu1  ;;  %4793 = vmatprep.subr.bf16.mxu1 %v6627_v17  ;;  %v6687_v8 = vld [vmem:[%s8954_s2 + $0xd6c] ss:$16 sps:$4 sm:$0xff]   ;;  %v6688_v17 = vld [vmem:[%s8954_s2 + $0xb48] ss:$16 sps:$4 sm:$0xff]  }
 0x1d5   : > { %v6690_v45 = vld [vmem:[%s8954_s2 + $0xb4c] ss:$16 sps:$4 sm:$0xff]   ;;  %v6697_v60 = vld [vmem:[%s8954_s2 + $0xd28] ss:$16 sps:$4 sm:$0xff]  }
 0x1d6   : > { %4753 = vmatpush1.bf16.msra.mxu0 %v6622_v29  ;;  %v6693_v38 = vld [vmem:[%s8954_s2 + $0xd4c] ss:$16 sps:$4 sm:$0xff]  }
 0x1d7   : > { %4794 = vmatpush1.bf16.msra.mxu1 %v6625_v53  ;;  %4754 = vmatprep.subr.bf16.mxu0 %v6630_v28  ;;  %v6696_v25 = vld [vmem:[%s8954_s2 + $0xb2c] ss:$16 sps:$4 sm:$0xff]   ;;  %v6694_v53 = vld [vmem:[%s8954_s2 + $0xb28] ss:$16 sps:$4 sm:$0xff]  }
 0x1d8   : > { %4795 = vmatprep.subr.bf16.mxu1 %v6633_v26  ;;  %v6699_v29 = vld [vmem:[%s8954_s2 + $0xd2c] ss:$16 sps:$4 sm:$0xff]   ;;  %v6700_v26 = vld [vmem:[%s8954_s2 + $0xb08] ss:$16 sps:$4 sm:$0xff]  }
 0x1d9   : > { %v6702_v61 = vld [vmem:[%s8954_s2 + $0xb0c] ss:$16 sps:$4 sm:$0xff]  }
 0x1da   : > { %4755 = vmatpush1.bf16.msra.mxu0 %v6628_v0  ;;  %v6705_v28 = vld [vmem:[%s8954_s2 + $0xd0c] ss:$16 sps:$4 sm:$0xff]   ;;  %v6703_v0 = vld [vmem:[%s8954_s2 + $0xd08] ss:$16 sps:$4 sm:$0xff]  }
 0x1db   : > { %4796 = vmatpush1.bf16.msra.mxu1 %v6631_v7  ;;  %4756 = vmatprep.subr.bf16.mxu0 %v6636_v1  ;;  %v6708_v7 = vld [vmem:[%s8954_s2 + $0xeec] ss:$16 sps:$4 sm:$0xff]  }
 0x1dc   : > { %4797 = vmatprep.subr.bf16.mxu1 %v6639_v2  ;;  %v6711_v1 = vld [vmem:[%s8954_s2 + $0x10ec] ss:$16 sps:$4 sm:$0xff]   ;;  %v4457_v2 = vadd.f32 %v8507_v51, %v8316_v22 }
 0x1dd   : > { %v6717_v22 = vld [vmem:[%s8954_s2 + $0x10cc] ss:$16 sps:$4 sm:$0xff]  }
 0x1de   : > { %4757 = vmatpush1.bf16.msra.mxu0 %v6634_v11  ;;  %v6706_v11 = vld [vmem:[%s8954_s2 + $0xee8] ss:$16 sps:$4 sm:$0xff]  }
 0x1df   : > { %4798 = vmatpush1.bf16.msra.mxu1 %v6637_v56  ;;  %4758 = vmatprep.subr.bf16.mxu0 %v6642_v3  ;;  %v6709_v56 = vld [vmem:[%s8954_s2 + $0x10e8] ss:$16 sps:$4 sm:$0xff]   ;;  %v6714_v3 = vld [vmem:[%s8954_s2 + $0xecc] ss:$16 sps:$4 sm:$0xff]  }
 0x1e0   : > { %4799 = vmatprep.subr.bf16.mxu1 %v6645_v5 }
 0x1e2   : > { %4759 = vmatpush1.bf16.msra.mxu0 %v6640_v9  ;;  %v4498_v9 = vadd.f32 %v8509_v31, %v4457_v2 }
 0x1e3   : > { %4800 = vmatpush1.bf16.msra.mxu1 %v6643_v12  ;;  %4760 = vmatprep.subr.bf16.mxu0 %v6648_v4  ;;  %v6712_v4 = vld [vmem:[%s8954_s2 + $0xec8] ss:$16 sps:$4 sm:$0xff]  }
 0x1e4   : > { %4801 = vmatprep.subr.bf16.mxu1 %v6651_v6  ;;  %v6715_v6 = vld [vmem:[%s8954_s2 + $0x10c8] ss:$16 sps:$4 sm:$0xff]  }
 0x1e6   : > { %4761 = vmatpush1.bf16.msra.mxu0 %v6646_v15 }
 0x1e7   : > { %4802 = vmatpush1.bf16.msra.mxu1 %v6649_v52  ;;  %4762 = vmatprep.subr.bf16.mxu0 %v6654_v44 }
 0x1e8   : > { %4803 = vmatprep.subr.bf16.mxu1 %v6657_v37 }
 0x1ea   : > { %4763 = vmatpush1.bf16.msra.mxu0 %v6652_v59 }
 0x1eb   : > { %4804 = vmatpush1.bf16.msra.mxu1 %v6655_v16  ;;  %4764 = vmatprep.subr.bf16.mxu0 %v6660_v19 }
 0x1ec   : > { %4805 = vmatprep.subr.bf16.mxu1 %v6663_v23 }
 0x1ee   : > { %4765 = vmatpush2.bf16.msra.mxu0 %v6658_v30 }
 0x1ef   : > { %4806 = vmatpush2.bf16.msra.mxu1 %v6661_v32  ;;  %4766 = vmatprep.subr.bf16.mxu0 %v6666_v27 }
 0x1f0   : > { %4807 = vmatprep.subr.bf16.mxu1 %v6669_v63 }
 0x1f2   : > { %4767 = vmatpush2.bf16.msra.mxu0 %v6664_v24 }
 0x1f3   : > { %4808 = vmatpush2.bf16.msra.mxu1 %v6667_v33  ;;  %4768 = vmatprep.subr.bf16.mxu0 %v6672_v34  ;;  %v6726_v34 = vld [vmem:[%s8954_s2 + $0xe8c] ss:$16 sps:$4 sm:$0xff]  }
 0x1f4   : > { %4809 = vmatprep.subr.bf16.mxu1 %v6675_v35  ;;  %v6729_v35 = vld [vmem:[%s8954_s2 + $0x108c] ss:$16 sps:$4 sm:$0xff]  }
 0x1f6   : > { %4769 = vmatpush2.bf16.msra.mxu0 %v6670_v36 }
 0x1f7   : > { %4810 = vmatpush2.bf16.msra.mxu1 %v6673_v55  ;;  %4770 = vmatprep.subr.bf16.mxu0 %v6678_v41 }
 0x1f8   : > { %4811 = vmatprep.subr.bf16.mxu1 %v6681_v58 }
 0x1fa   : > { %4771 = vmatpush2.bf16.msra.mxu0 %v6676_v43  ;;  %v6724_v43 = vld [vmem:[%s8954_s2 + $0xe88] ss:$16 sps:$4 sm:$0xff]  }
 0x1fb   : > { %4812 = vmatpush2.bf16.msra.mxu1 %v6679_v39  ;;  %4772 = vmatprep.subr.bf16.mxu0 %v6684_v46  ;;  %v6727_v39 = vld [vmem:[%s8954_s2 + $0x1088] ss:$16 sps:$4 sm:$0xff]  }
 0x1fc   : > { %4813 = vmatprep.subr.bf16.mxu1 %v6687_v8 }
 0x1fe   : > { %4773 = vmatpush2.bf16.msra.mxu0 %v6682_v10 }
 0x1ff   : > { %4814 = vmatpush2.bf16.msra.mxu1 %v6685_v48  ;;  %4774 = vmatprep.subr.bf16.mxu0 %v6690_v45  ;;  %v6732_v45 = vld [vmem:[%s8954_s2 + $0xe6c] ss:$16 sps:$4 sm:$0xff]  }
 0x200   : > { %4815 = vmatprep.subr.bf16.mxu1 %v6693_v38  ;;  %v6735_v38 = vld [vmem:[%s8954_s2 + $0x106c] ss:$16 sps:$4 sm:$0xff]  }
 0x202   : > { %4775 = vmatpush2.bf16.msra.mxu0 %v6688_v17 }
 0x203   : > { %4816 = vmatpush2.bf16.msra.mxu1 %v6691_v62  ;;  %4776 = vmatprep.subr.bf16.mxu0 %v6696_v25 }
 0x204   : > { %4817 = vmatprep.subr.bf16.mxu1 %v6699_v29  ;;  %v6730_v29 = vld [vmem:[%s8954_s2 + $0xe68] ss:$16 sps:$4 sm:$0xff]  }
 0x206   : > { %4777 = vmatpush2.bf16.msra.mxu0 %v6694_v53  ;;  %v6733_v53 = vld [vmem:[%s8954_s2 + $0x1068] ss:$16 sps:$4 sm:$0xff]  }
 0x207   : > { %4818 = vmatpush2.bf16.msra.mxu1 %v6697_v60  ;;  %4778 = vmatprep.subr.bf16.mxu0 %v6702_v61  ;;  %v6738_v60 = vld [vmem:[%s8954_s2 + $0xe4c] ss:$16 sps:$4 sm:$0xff]  }
 0x208   : > { %4819 = vmatprep.subr.bf16.mxu1 %v6705_v28 }
 0x20a   : > { %4779 = vmatpush2.bf16.msra.mxu0 %v6700_v26 }
 0x20b   : > { %4820 = vmatpush2.bf16.msra.mxu1 %v6703_v0  ;;  %4830 = vmatprep.subr.bf16.mxu0 %v6708_v7  ;;  %v6741_v7 = vld [vmem:[%s8954_s2 + $0x104c] ss:$16 sps:$4 sm:$0xff]  }
 0x20c   : > { %4871 = vmatprep.subr.bf16.mxu1 %v6711_v1 }
 0x20d   : > { %v4536_v51 = vpop.f32.mrf.mxu0  ;;  %4781 = vmatmul.mubr.bf16.vlgmr.msra.gmra.mxu0 %v7642_v18  ;;  %v6720_v18 = vld [vmem:[%s8954_s2 + $0xeac] ss:$16 sps:$4 sm:$0xff]  }
 0x20e   : > { %v8704_v5 = vpop.f32.mrf.mxu1  ;;  %4822 = vmatmul.mubr.bf16.vlgmr.msra.gmra.mxu1 %v7867_v13  ;;  %v4537_v12 = vadd.f32 %v4536_v51, %v8517_v42  ;;  %4831 = vmatpush1.bf16.msra.mxu0 %v6706_v11  ;;  %v6723_v13 = vld [vmem:[%s8954_s2 + $0x10ac] ss:$16 sps:$4 sm:$0xff]   ;;  %v6736_v11 = vld [vmem:[%s8954_s2 + $0xe48] ss:$16 sps:$4 sm:$0xff]  }
 0x20f   : > { %4872 = vmatpush1.bf16.msra.mxu1 %v6709_v56  ;;  %v4538_v15 = vpop.f32.mrf.mxu0  ;;  %4832 = vmatprep.subr.bf16.mxu0 %v6714_v3  ;;  %v6739_v56 = vld [vmem:[%s8954_s2 + $0x1048] ss:$16 sps:$4 sm:$0xff]  }
 0x210   : > { %v8717_v52 = vpop.f32.mrf.mxu1  ;;  %4873 = vmatprep.subr.bf16.mxu1 %v6717_v22  ;;  %v4918_v31 = vsel %vm4917_vm2, %v4537_v12, 0.0  ;;  %v4539_v42 = vadd.f32 %v4538_v15, %v4498_v9  ;;  %4862 = vmatprep.mubr.bf16.mxu0 %v7658_v57  ;;  %v6718_v57 = vld [vmem:[%s8954_s2 + $0xea8] ss:$16 sps:$4 sm:$0xff]   ;;  %v6744_v9 = vld [vmem:[%s8954_s2 + $0xe2c] ss:$16 sps:$4 sm:$0xff]  }
 0x211   : > { %4903 = vmatprep.mubr.bf16.mxu1 %v7885_v20  ;;  %v4922_v44 = vrot.slane %v4918_v31, 4  ;;  %v4946_v37 = vmul.f32 %v4918_v31, %v4918_v31  ;;  %v4540_v59 = vpop.f32.mrf.mxu0  ;;  %v6721_v20 = vld [vmem:[%s8954_s2 + $0x10a8] ss:$16 sps:$4 sm:$0xff]  }
 0x212   : > { %v4581_v16 = vpop.f32.mrf.mxu1  ;;  %v4919_v19 = vsel %vm4917_vm2, %v4539_v42, 0.0  ;;  %v5908_v23 = vpack.c.bf16 %v4539_v42, %v4537_v12  ;;  %4833 = vmatpush1.bf16.msra.mxu0 %v6712_v4  ;;  %v6747_v12 = vld [vmem:[%s8954_s2 + $0x102c] ss:$16 sps:$4 sm:$0xff]  }
 0x213   : > { %4874 = vmatpush1.bf16.msra.mxu1 %v6715_v6  ;;  %v4923_v30 = vadd.f32 %v4922_v44, %v4918_v31  ;;  %v4950_v32 = vrot.slane %v4946_v37, 4  ;;  %v4928_v27 = vrot.slane %v4919_v19, 4  ;;  %v4947_v63 = vmul.f32 %v4919_v19, %v4919_v19  ;;  %v4541_v24 = vpop.f32.mrf.mxu0  ;;  %4834 = vmatprep.subr.bf16.mxu0 %v6720_v18  ;;  %v6742_v18 = vld [vmem:[%s8954_s2 + $0xe28] ss:$16 sps:$4 sm:$0xff]   ;;  %v6750_v31 = vld [vmem:[%s8954_s2 + $0xe0c] ss:$16 sps:$4 sm:$0xff]  }
 0x214   : > { %v4582_v33 = vpop.f32.mrf.mxu1  ;;  %4875 = vmatprep.subr.bf16.mxu1 %v6723_v13  ;;  %5107 = vst [vmem:[%s8732_s27] sm:$0xff] %v5908_v23  ;;  %v6745_v13 = vld [vmem:[%s8954_s2 + $0x1028] ss:$16 sps:$4 sm:$0xff]   ;;  %v6753_v42 = vld [vmem:[%s8954_s2 + $0x100c] ss:$16 sps:$4 sm:$0xff]  }
 0x215   : > { %v4924_v36 = vrot.slane %v4923_v30, 2  ;;  %v4951_v55 = vadd.f32 %v4950_v32, %v4946_v37  ;;  %v4929_v41 = vadd.f32 %v4928_v27, %v4919_v19  ;;  %v4956_v58 = vrot.slane %v4947_v63, 4  ;;  %v6748_v44 = vld [vmem:[%s8954_s2 + $0xe08] ss:$16 sps:$4 sm:$0xff]   ;;  %v6756_v59 = vld [vmem:[%s8954_s2 + $0xfec] ss:$16 sps:$4 sm:$0xff]  }
 0x216   : > { %4835 = vmatpush1.bf16.msra.mxu0 %v6718_v57  ;;  %v6751_v37 = vld [vmem:[%s8954_s2 + $0x1008] ss:$16 sps:$4 sm:$0xff]   ;;  %v6759_v16 = vld [vmem:[%s8954_s2 + $0x11ec] ss:$16 sps:$4 sm:$0xff]  }
 0x217   : > { %4876 = vmatpush1.bf16.msra.mxu1 %v6721_v20  ;;  %v4925_v46 = vadd.f32 %v4924_v36, %v4923_v30  ;;  %v4952_v8 = vrot.slane %v4951_v55, 2  ;;  %v4930_v10 = vrot.slane %v4929_v41, 2  ;;  %v4957_v48 = vadd.f32 %v4956_v58, %v4947_v63  ;;  %4836 = vmatprep.subr.bf16.mxu0 %v6726_v34  ;;  %v6754_v19 = vld [vmem:[%s8954_s2 + $0xfe8] ss:$16 sps:$4 sm:$0xff]   ;;  %v6762_v57 = vld [vmem:[%s8954_s2 + $0xfcc] ss:$16 sps:$4 sm:$0xff]  }
 0x218   : > { %4877 = vmatprep.subr.bf16.mxu1 %v6729_v35  ;;  %v6757_v23 = vld [vmem:[%s8954_s2 + $0x11e8] ss:$16 sps:$4 sm:$0xff]   ;;  %v6765_v20 = vld [vmem:[%s8954_s2 + $0x11cc] ss:$16 sps:$4 sm:$0xff]  }
 0x219   : > { %v4953_v17 = vadd.f32 %v4952_v8, %v4951_v55  ;;  %v4931_v62 = vadd.f32 %v4930_v10, %v4929_v41  ;;  %v4958_v25 = vrot.slane %v4957_v48, 2  ;;  %v4926_v61 = vrot.slane %v4925_v46, 1  ;;  %v6760_v30 = vld [vmem:[%s8954_s2 + $0xfc8] ss:$16 sps:$4 sm:$0xff]   ;;  %v6768_v27 = vld [vmem:[%s8954_s2 + $0xfac] ss:$16 sps:$4 sm:$0xff]  }
 0x21a   : > { %4837 = vmatpush1.bf16.msra.mxu0 %v6724_v43  ;;  %v6763_v32 = vld [vmem:[%s8954_s2 + $0x11c8] ss:$16 sps:$4 sm:$0xff]   ;;  %v6771_v63 = vld [vmem:[%s8954_s2 + $0x11ac] ss:$16 sps:$4 sm:$0xff]  }
 0x21b   : > { %4878 = vmatpush1.bf16.msra.mxu1 %v6727_v39  ;;  %v4954_v28 = vrot.slane %v4953_v17, 1  ;;  %v4932_v26 = vrot.slane %v4931_v62, 1  ;;  %v4959_v0 = vadd.f32 %v4958_v25, %v4957_v48  ;;  %4838 = vmatprep.subr.bf16.mxu0 %v6732_v45  ;;  %v4927_v3 = vadd.f32 %v4926_v61, %v4925_v46  ;;  %v6766_v24 = vld [vmem:[%s8954_s2 + $0xfa8] ss:$16 sps:$4 sm:$0xff]   ;;  %v6774_v34 = vld [vmem:[%s8954_s2 + $0xf8c] ss:$16 sps:$4 sm:$0xff]  }
 0x21c   : > { %4879 = vmatprep.subr.bf16.mxu1 %v6735_v38  ;;  %v6769_v33 = vld [vmem:[%s8954_s2 + $0x11a8] ss:$16 sps:$4 sm:$0xff]   ;;  %v6777_v35 = vld [vmem:[%s8954_s2 + $0x118c] ss:$16 sps:$4 sm:$0xff]   ;;  %v6804_v61 = vld [vmem:[%s8955_s3] sm:$0xf] }
 0x21d   : > { %v4955_v1 = vadd.f32 %v4954_v28, %v4953_v17  ;;  %v4960_v2 = vrot.slane %v4959_v0, 1  ;;  %v4933_v22 = vadd.f32 %v4932_v26, %v4931_v62  ;;  %v6772_v36 = vld [vmem:[%s8954_s2 + $0xf88] ss:$16 sps:$4 sm:$0xff]   ;;  %v6780_v41 = vld [vmem:[%s8954_s2 + $0xf6c] ss:$16 sps:$4 sm:$0xff]   ;;  %v1285_v28 = vrot.slane %v6804_v61, %v7053_v54 }
 0x21e   : > { %4839 = vmatpush1.bf16.msra.mxu0 %v6730_v29  ;;  %v6775_v55 = vld [vmem:[%s8954_s2 + $0x1188] ss:$16 sps:$4 sm:$0xff]   ;;  %v6783_v58 = vld [vmem:[%s8954_s2 + $0x116c] ss:$16 sps:$4 sm:$0xff]   ;;  %v1289_v26 = vrot.slane %v6804_v61, %v7040_v49 }
 0x21f   : > { %4880 = vmatpush1.bf16.msra.mxu1 %v6733_v53  ;;  %v4961_v51 = vadd.f32 %v4960_v2, %v4959_v0  ;;  %4840 = vmatprep.subr.bf16.mxu0 %v6738_v60  ;;  %v8786_v4 = vsel %vm4974_vm3, %v4927_v3, %v4955_v1  ;;  %v6778_v43 = vld [vmem:[%s8954_s2 + $0xf68] ss:$16 sps:$4 sm:$0xff]   ;;  %v6786_v46 = vld [vmem:[%s8954_s2 + $0xf4c] ss:$16 sps:$4 sm:$0xff]   ;;  %v4578_v0 = vadd.f32 %v8704_v5, %v1285_v28 }
 0x220   : > { %4881 = vmatprep.subr.bf16.mxu1 %v6741_v7  ;;  %v6781_v39 = vld [vmem:[%s8954_s2 + $0x1168] ss:$16 sps:$4 sm:$0xff]   ;;  %v6789_v8 = vld [vmem:[%s8954_s2 + $0x114c] ss:$16 sps:$4 sm:$0xff]   ;;  %v4580_v2 = vadd.f32 %v8717_v52, %v1289_v26 }
 0x221   : > { %v8789_v6 = vsel %vm4974_vm3, %v4933_v22, %v4961_v51  ;;  %v6784_v10 = vld [vmem:[%s8954_s2 + $0xf48] ss:$16 sps:$4 sm:$0xff]   ;;  %v6792_v45 = vld [vmem:[%s8954_s2 + $0xf2c] ss:$16 sps:$4 sm:$0xff]  }
 0x222   : > { %v4989_v15 = vcombine.low %v8786_v4, %v8789_v6  ;;  %4841 = vmatpush1.bf16.msra.mxu0 %v6736_v11  ;;  %v6787_v48 = vld [vmem:[%s8954_s2 + $0x1148] ss:$16 sps:$4 sm:$0xff]   ;;  %v6795_v38 = vld [vmem:[%s8954_s2 + $0x112c] ss:$16 sps:$4 sm:$0xff]  }
 0x223   : > { %4882 = vmatpush1.bf16.msra.mxu1 %v6739_v56  ;;  %4842 = vmatprep.subr.bf16.mxu0 %v6744_v9  ;;  %v6790_v17 = vld [vmem:[%s8954_s2 + $0xf28] ss:$16 sps:$4 sm:$0xff]   ;;  %v6798_v25 = vld [vmem:[%s8954_s2 + $0xf0c] ss:$16 sps:$4 sm:$0xff]  }
 0x224   : > { %4883 = vmatprep.subr.bf16.mxu1 %v6747_v12  ;;  %v6793_v62 = vld [vmem:[%s8954_s2 + $0x1128] ss:$16 sps:$4 sm:$0xff]   ;;  %v6801_v29 = vld [vmem:[%s8954_s2 + $0x110c] ss:$16 sps:$4 sm:$0xff]  }
 0x225   : > { %v6796_v53 = vld [vmem:[%s8954_s2 + $0xf08] ss:$16 sps:$4 sm:$0xff]  }
 0x226   : > { %4843 = vmatpush1.bf16.msra.mxu0 %v6742_v18  ;;  %v6799_v60 = vld [vmem:[%s8954_s2 + $0x1108] ss:$16 sps:$4 sm:$0xff]  }
 0x227   : > { %4884 = vmatpush1.bf16.msra.mxu1 %v6745_v13  ;;  %4844 = vmatprep.subr.bf16.mxu0 %v6750_v31 }
 0x228   : > { %4885 = vmatprep.subr.bf16.mxu1 %v6753_v42 }
 0x22a   : > { %4845 = vmatpush1.bf16.msra.mxu0 %v6748_v44 }
 0x22b   : > { %4886 = vmatpush1.bf16.msra.mxu1 %v6751_v37  ;;  %4846 = vmatprep.subr.bf16.mxu0 %v6756_v59 }
 0x22c   : > { %4887 = vmatprep.subr.bf16.mxu1 %v6759_v16 }
 0x22e   : > { %4847 = vmatpush2.bf16.msra.mxu0 %v6754_v19 }
 0x22f   : > { %4888 = vmatpush2.bf16.msra.mxu1 %v6757_v23  ;;  %4848 = vmatprep.subr.bf16.mxu0 %v6762_v57 }
 0x230   : > { %4889 = vmatprep.subr.bf16.mxu1 %v6765_v20 }
 0x232   : > { %4849 = vmatpush2.bf16.msra.mxu0 %v6760_v30 }
 0x233   : > { %4890 = vmatpush2.bf16.msra.mxu1 %v6763_v32  ;;  %4850 = vmatprep.subr.bf16.mxu0 %v6768_v27 }
 0x234   : > { %4891 = vmatprep.subr.bf16.mxu1 %v6771_v63 }
 0x236   : > { %4851 = vmatpush2.bf16.msra.mxu0 %v6766_v24 }
 0x237   : > { %4892 = vmatpush2.bf16.msra.mxu1 %v6769_v33  ;;  %4852 = vmatprep.subr.bf16.mxu0 %v6774_v34 }
 0x238   : > { %4893 = vmatprep.subr.bf16.mxu1 %v6777_v35 }
 0x23a   : > { %4853 = vmatpush2.bf16.msra.mxu0 %v6772_v36 }
 0x23b   : > { %4894 = vmatpush2.bf16.msra.mxu1 %v6775_v55  ;;  %4854 = vmatprep.subr.bf16.mxu0 %v6780_v41 }
 0x23c   : > { %4895 = vmatprep.subr.bf16.mxu1 %v6783_v58 }
 0x23e   : > { %4855 = vmatpush2.bf16.msra.mxu0 %v6778_v43 }
 0x23f   : > { %4896 = vmatpush2.bf16.msra.mxu1 %v6781_v39  ;;  %4856 = vmatprep.subr.bf16.mxu0 %v6786_v46 }
 0x240   : > { %4897 = vmatprep.subr.bf16.mxu1 %v6789_v8 }
 0x242   : > { %4857 = vmatpush2.bf16.msra.mxu0 %v6784_v10 }
 0x243   : > { %4898 = vmatpush2.bf16.msra.mxu1 %v6787_v48  ;;  %4858 = vmatprep.subr.bf16.mxu0 %v6792_v45 }
 0x244   : > { %4899 = vmatprep.subr.bf16.mxu1 %v6795_v38 }
 0x246   : > { %4859 = vmatpush2.bf16.msra.mxu0 %v6790_v17 }
 0x247   : > { %4900 = vmatpush2.bf16.msra.mxu1 %v6793_v62  ;;  %4860 = vmatprep.subr.bf16.mxu0 %v6798_v25 }
 0x248   : > { %4901 = vmatprep.subr.bf16.mxu1 %v6801_v29 }
 0x24a   : > { %4861 = vmatpush2.bf16.msra.mxu0 %v6796_v53 }
 0x24b   : > { %4902 = vmatpush2.bf16.msra.mxu1 %v6799_v60 }
 0x24d   : > { %v4618_v7 = vpop.f32.mrf.mxu0  ;;  %4863 = vmatmul.mubr.bf16.vlgmr.msra.gmra.mxu0 %v7869_v14 }
 0x24e   : > { %v4659_v1 = vpop.f32.mrf.mxu1  ;;  %4904 = vmatmul.mubr.bf16.vlgmr.msra.gmra.mxu1 %v8086_v21  ;;  %v4619_v11 = vadd.f32 %v4618_v7, %v4578_v0 }
 0x24f   : > { %v4620_v56 = vpop.f32.mrf.mxu0 }
 0x250   : > { %v4661_v3 = vpop.f32.mrf.mxu1  ;;  %v4660_v22 = vadd.f32 %v4659_v1, %v4619_v11  ;;  %v4621_v51 = vadd.f32 %v4620_v56, %v4580_v2 }
 0x251   : > { %v4622_v9 = vpop.f32.mrf.mxu0 }
 0x252   : > { %v4663_v12 = vpop.f32.mrf.mxu1  ;;  %v4662_v18 = vadd.f32 %v4661_v3, %v4621_v51 }
 0x253   : > { %v4623_v13 = vpop.f32.mrf.mxu0 }
 0x254   : > { %v4664_v31 = vpop.f32.mrf.mxu1 }
 0x28d   : > { %v4700_v42 = vpop.f32.mrf.mxu0 }
 0x28e   : > { %v4741_v5 = vpop.f32.mrf.mxu1  ;;  %v4701_v44 = vadd.f32 %v4700_v42, %v4660_v22 }
 0x28f   : > { %v4702_v37 = vpop.f32.mrf.mxu0 }
 0x290   : > { %v4743_v59 = vpop.f32.mrf.mxu1  ;;  %v4742_v14 = vadd.f32 %v4741_v5, %v4701_v44  ;;  %v4703_v16 = vadd.f32 %v4702_v37, %v4662_v18  ;;  %v6829_v18 = vmov 1983009808  }
 0x291   : > { %v4704_v21 = vpop.f32.mrf.mxu0  ;;  %v4992_v13 = vunpack.c.l.s4 %v6829_v18 }
 0x292   : > { %v4745_v19 = vpop.f32.mrf.mxu1  ;;  %v4744_v52 = vadd.f32 %v4743_v59, %v4703_v16 }
 0x293   : > { %v4705_v23 = vpop.f32.mrf.mxu0  ;;  %v4993_v16 = vunpack.c.0.s8 %v4992_v13 }
 0x294   : > { %v4746_v57 = vpop.f32.mrf.mxu1 }
 0x2cd   : > { %v4782_v20 = vpop.f32.mrf.mxu0 }
 0x2ce   : > { %v4823_v30 = vpop.f32.mrf.mxu1  ;;  %v4783_v32 = vadd.f32 %v4782_v20, %v4742_v14  ;;  %v4996_v20 = vsub.s32 %v4993_v16, %v7002_v40 }
 0x2cf   : > { %v4784_v27 = vpop.f32.mrf.mxu0 }
 0x2d0   : > { %v4825_v63 = vpop.f32.mrf.mxu1  ;;  %v4824_v24 = vadd.f32 %v4823_v30, %v4783_v32  ;;  %v4785_v55 = vadd.f32 %v4784_v27, %v4744_v52 }
 0x2d1   : > { %v4786_v33 = vpop.f32.mrf.mxu0 }
 0x2d2   : > { %v4827_v34 = vpop.f32.mrf.mxu1  ;;  %v4826_v43 = vadd.f32 %v4825_v63, %v4785_v55  ;;  %v4997_v63 = vrot.slane %v4989_v15, %v4996_v20 }
 0x2d3   : > { %v4787_v35 = vpop.f32.mrf.mxu0 }
 0x2d4   : > { %v4828_v36 = vpop.f32.mrf.mxu1 }
 0x30d   : > { %v4864_v41 = vpop.f32.mrf.mxu0 }
 0x30e   : > { %v4905_v58 = vpop.f32.mrf.mxu1  ;;  %v4865_v39 = vadd.f32 %v4864_v41, %v4824_v24 }
 0x30f   : > { %v4866_v46 = vpop.f32.mrf.mxu0 }
 0x310   : > { %v4907_v8 = vpop.f32.mrf.mxu1  ;;  %v4906_v10 = vadd.f32 %v4905_v58, %v4865_v39  ;;  %v4867_v48 = vadd.f32 %v4866_v46, %v4826_v43 }
 0x311   : > { %v4868_v45 = vpop.f32.mrf.mxu0 }
 0x312   : > { %v4909_v38 = vpop.f32.mrf.mxu1  ;;  %v4920_v17 = vsel %vm4917_vm2, %v4906_v10, 0.0  ;;  %v4908_v62 = vadd.f32 %v4907_v8, %v4867_v48 }
 0x313   : > { %v4934_v25 = vrot.slane %v4920_v17, 4  ;;  %v4948_v29 = vmul.f32 %v4920_v17, %v4920_v17  ;;  %v4869_v53 = vpop.f32.mrf.mxu0 }
 0x314   : > { %v4910_v60 = vpop.f32.mrf.mxu1  ;;  %v4921_v61 = vsel %vm4917_vm2, %v4908_v62, 0.0  ;;  %v5909_v28 = vpack.c.bf16 %v4908_v62, %v4906_v10 }
 0x315   : > { %v4935_v26 = vadd.f32 %v4934_v25, %v4920_v17  ;;  %v4962_v0 = vrot.slane %v4948_v29, 4  ;;  %v4940_v7 = vrot.slane %v4921_v61, 4  ;;  %v4949_v1 = vmul.f32 %v4921_v61, %v4921_v61 }
 0x316   : > { %5108 = vst [vmem:[%s8732_s27 + $0x8] sm:$0xff] %v5909_v28  ;;  %s5907_s27 = sshll.u32 %s8963_s18, 3 }
 0x317   : > { %v4936_v2 = vrot.slane %v4935_v26, 2  ;;  %v4963_v11 = vadd.f32 %v4962_v0, %v4948_v29  ;;  %v4941_v56 = vadd.f32 %v4940_v7, %v4921_v61  ;;  %v4968_v3 = vrot.slane %v4949_v1, 4  ;;  %s362_s15 = scalar_lea.vmem %s8957_s5, %s5907_s27 }
 0x319   : > { %v4937_v22 = vadd.f32 %v4936_v2, %v4935_v26  ;;  %v4964_v51 = vrot.slane %v4963_v11, 2  ;;  %v4942_v9 = vrot.slane %v4941_v56, 2  ;;  %v4969_v12 = vadd.f32 %v4968_v3, %v4949_v1 }
 0x31b   : > { %v4965_v31 = vadd.f32 %v4964_v51, %v4963_v11  ;;  %v4943_v42 = vadd.f32 %v4942_v9, %v4941_v56  ;;  %v4970_v5 = vrot.slane %v4969_v12, 2  ;;  %v4938_v44 = vrot.slane %v4937_v22, 1 }
 0x31d   : > { %v4966_v37 = vrot.slane %v4965_v31, 1  ;;  %v4944_v59 = vrot.slane %v4943_v42, 1  ;;  %v4971_v14 = vadd.f32 %v4970_v5, %v4969_v12  ;;  %v4939_v52 = vadd.f32 %v4938_v44, %v4937_v22 }
 0x31f   : > { %v4967_v21 = vadd.f32 %v4966_v37, %v4965_v31  ;;  %v4972_v19 = vrot.slane %v4971_v14, 1  ;;  %v4945_v23 = vadd.f32 %v4944_v59, %v4943_v42 }
 0x321   : > { %v4973_v57 = vadd.f32 %v4972_v19, %v4971_v14  ;;  %v4977_v30 = vsel %vm4974_vm3, %v4939_v52, %v4967_v21 }
 0x323   : > { %v4978_v32 = vsel %vm4974_vm3, %v4945_v23, %v4973_v57 }
 0x324   : > { %v4990_v27 = vcombine.low %v4977_v30, %v4978_v32 }
 0x326   : > { %v5004_v24 = vrot.slane %v4990_v27, %v4996_v20 }
 0x328   : > { %v5005_v33 = vcombine.low %v4997_v63, %v5004_v24 }
 0x32a   : > { %5008 = vst [vmem:[%s362_s15] sm:$0xff] %v5005_v33 }
 0x331   : > { %v5012_v34 = vld [vmem:[%s362_s15] ss:$2 sm:$0xf]  ;;  %v5901_v35 = vld [vmem:[%s362_s15 + $0x1] ss:$2 sm:$0xf] }
 0x332   : > { %v5013_v40 = vmul.f32 0.25, %v5012_v34  ;;  %v5016_v36 = vmul.f32 0.25, %v5901_v35 }
 0x334   : > { %v5017_v55 = vmul.f32 %v5013_v40, %v5013_v40  ;;  %v5026_v4 = vrot.slane %v5013_v40, %v7043_v50  ;;  %v5030_v6 = vrot.slane %v5013_v40, %v7034_v47  ;;  %v5034_v15 = vrot.slane %v5013_v40, %v7053_v54 }
 0x335   : > { %v5038_v46 = vrot.slane %v5013_v40, %v7040_v49 }
 0x336   : > { %v5018_v41 = vsub.f32 %v5016_v36, %v5017_v55 }
 0x338   : > { %v5019_v58 = vmax.f32 %v5018_v41, 0.0 }
 0x33a   : > { %v5020_v43 = vadd.f32 1e-05, %v5019_v58 }
 0x33c   : > { %6802 = vrsqrt.f32 %v5020_v43 }
 0x349   : > { %v6803_v39 = vpop.eup %6802 }
 0x34a   : > { %v5047_v8 = vrot.slane %v6803_v39, %v7043_v50  ;;  %v5051_v10 = vrot.slane %v6803_v39, %v7034_v47  ;;  %v5055_v48 = vrot.slane %v6803_v39, %v7053_v54  ;;  %v5059_v45 = vrot.slane %v6803_v39, %v7040_v49 }
 0x34c   : > { %v5064_v38 = vsel %vm4974_vm3, %v5026_v4, %v5047_v8  ;;  %v5065_v17 = vsel %vm4974_vm3, %v5030_v6, %v5051_v10  ;;  %v5066_v62 = vsel %vm4974_vm3, %v5034_v15, %v5055_v48  ;;  %v5067_v25 = vsel %vm4974_vm3, %v5038_v46, %v5059_v45 }
 0x34d   : > { %v5072_v29 = vcombine.low %v5064_v38, %v5065_v17  ;;  %v5073_v53 = vcombine.low %v5066_v62, %v5067_v25 }
 0x34f   : > { %v5080_v60 = vrot.slane %v5072_v29, %v4996_v20  ;;  %v5087_v61 = vrot.slane %v5073_v53, %v4996_v20 }
 0x351   : > { %v5088_v28 = vcombine.low %v5080_v60, %v5087_v61 }
 0x353   : > { %5090 = vst [vmem:[%s362_s15] sm:$0xff] %v5088_v28 }
 0x354 PF: > { %s16_s20 = sadd.s32 1, %s6827_s20   ;;  %s8958_s18 = smov %s6823_s19 }
 0x355   : > { %p13_p5 = scmp.ge.s32.totalorder %s16_s20, 4   ;;  %s8959_s19 = smov %s8961_s21 }
 0x357   :  { %15 = sbr.rel (!%p13_p5) target bundleno = 2 (0x2), region = 101 }

// kernel: conditional_discriminator_forward.9
= control target key start
LH: loop header
LB: loop body
LE: loop exit
PB: predicated region body
PF: predicated region fallthrough
CT: control target
= control target key end

     0   :  { %s5190_s15 = smov 0   ;;  %s5192_s16 = smov 0   ;;  %s6318_s0 = inlined_call_operand.vmem [shape: f32[2,2,4608], index: 0, kind: input, shape index: {}]   ;;  %s6319_s1 = inlined_call_operand.vmem [shape: bf16[2,8,4608], index: 1, kind: input, shape index: {}]   ;;  %s6320_s2 = inlined_call_operand.vmem [shape: bf16[4608,128], index: 2, kind: input, shape index: {}]   ;;  %s6321_s3 = inlined_call_operand.vmem [shape: f32[1,128], index: 3, kind: input, shape index: {}]   ;;  %s6322_s4 = inlined_call_operand.vmem [shape: f32[2,8,128], index: 4, kind: output, shape index: {}]  }
   0x1   :  { %s5194_s17 = smov 0  }
   0x2 LB: > { %s33_s18 = sadd.s32 1, %s5159_s16  ;;  %p4127_p0 = scmp.ge.s32.totalorder %s5163_s17, 1  ;;  %s5163_s17 = sphi %s5194_s17, %s14_s17   ;;  %s5159_s16 = sphi %s5192_s16, %s6324_s16   ;;  %s5155_s15 = sphi %s5190_s15, %s6323_s15  }
   0x3   : > { %p35_p1 = scmp.ge.s32.totalorder %s33_s18, 2  ;;  %p218_p2 = scmp.lt.s32.totalorder %s5163_s17, 3 }
   0x5   : > { %s6326_s18 = smov (%p35_p1, %s33_s18), 0  ;;  %p219_p3 = pnand %p4127_p0, %p218_p2 }
   0x6   : > { %p265_p4 = scmp.lt.s32.totalorder (!%p219_p3), %s5155_s15, 1 }
   0x7   : > { %222 = sbr.rel (%p219_p3) target bundleno = 519 (0x207), region = 36 }
   0xc   : > { %v4853_v0 = vld [vmem:[%s6320_s2 + $0x78] sm:$0xff]   ;;  %v4857_v4 = vld [vmem:[%s6320_s2 + $0x70] sm:$0xff]   ;;  %v4861_v8 = vld [vmem:[%s6320_s2 + $0x68] sm:$0xff]   ;;  %v365_v20 = vlaneseq  ;;  %s6328_s15 = smov (!%p265_p4, %s5155_s15), 1 }
   0xd   : > { %v4854_v1 = vld [vmem:[%s6320_s2 + $0xf8] sm:$0xff]   ;;  %4431 = vmatprep.subr.bf16.mxu0 %v4853_v0  ;;  %v4858_v5 = vld [vmem:[%s6320_s2 + $0xf0] sm:$0xff]   ;;  %v4862_v9 = vld [vmem:[%s6320_s2 + $0xe8] sm:$0xff]   ;;  %s4827_s25 = smul.u32 72, %s6328_s15  ;;  %s4130_s11 = sshll.u32 %s6328_s15, 3 }
   0xe   : > { %v4855_v2 = vld [vmem:[%s6320_s2 + $0x38] sm:$0xff]   ;;  %4453 = vmatprep.subr.bf16.mxu1 %v4854_v1  ;;  %v4859_v6 = vld [vmem:[%s6320_s2 + $0x30] sm:$0xff]   ;;  %v4863_v10 = vld [vmem:[%s6320_s2 + $0x28] sm:$0xff]   ;;  %v5286_v25 = vshrl.u32 %v365_v20, 7  ;;  %s4828_s28 = smul.u32 144, %s6328_s15  ;;  %s295_s19 = scalar_lea.vmem %s6322_s4, %s4130_s11 }
   0xf   : > { %v4856_v3 = vld [vmem:[%s6320_s2 + $0xb8] sm:$0xff]   ;;  %4432 = vmatpush3.bf16.msra.mxu0 %v4855_v2  ;;  %v4860_v7 = vld [vmem:[%s6320_s2 + $0xb0] sm:$0xff]   ;;  %v4864_v11 = vld [vmem:[%s6320_s2 + $0xa8] sm:$0xff]   ;;  %s5314_s13 = scalar_lea.vmem %s6318_s0, %s4827_s25 }
  0x10   : > { %4454 = vmatpush3.bf16.msra.mxu1 %v4856_v3  ;;  %4433 = vmatprep.subr.bf16.mxu0 %v4857_v4  ;;  %v4865_v12 = vld [vmem:[%s6320_s2 + $0x60] sm:$0xff]   ;;  %v4869_v16 = vld [vmem:[%s6320_s2 + $0x58] sm:$0xff]   ;;  %v4873_v21 = vld [vmem:[%s6320_s2 + $0x50] sm:$0xff]   ;;  %v5306_v31 = vsub.s32 1, %v5286_v25  ;;  %s5319_s20 = scalar_lea.vmem %s6319_s1, %s4828_s28  ;;  %v5322_v33 = vsub.s32 3, %v5286_v25  ;;  %v5328_v35 = vsub.s32 0, %v5286_v25 }
  0x11   : > { %4455 = vmatprep.subr.bf16.mxu1 %v4858_v5  ;;  %v4866_v13 = vld [vmem:[%s6320_s2 + $0xe0] sm:$0xff]   ;;  %v4870_v17 = vld [vmem:[%s6320_s2 + $0xd8] sm:$0xff]   ;;  %v4874_v22 = vld [vmem:[%s6320_s2 + $0xd0] sm:$0xff]   ;;  %v5334_v37 = vsub.s32 2, %v5286_v25 }
  0x12   : > { %v4867_v14 = vld [vmem:[%s6320_s2 + $0x20] sm:$0xff]   ;;  %v4871_v18 = vld [vmem:[%s6320_s2 + $0x18] sm:$0xff]   ;;  %v4875_v23 = vld [vmem:[%s6320_s2 + $0x10] sm:$0xff]  }
  0x13   : > { %4434 = vmatpush3.bf16.msra.mxu0 %v4859_v6  ;;  %v4868_v15 = vld [vmem:[%s6320_s2 + $0xa0] sm:$0xff]   ;;  %v4872_v19 = vld [vmem:[%s6320_s2 + $0x98] sm:$0xff]   ;;  %v4876_v24 = vld [vmem:[%s6320_s2 + $0x90] sm:$0xff]  }
  0x14   : > { %4456 = vmatpush3.bf16.msra.mxu1 %v4860_v7  ;;  %4435 = vmatprep.subr.bf16.mxu0 %v4861_v8  ;;  %v4877_v26 = vld [vmem:[%s6320_s2 + $0x48] sm:$0xff]   ;;  %v4881_v30 = vld [vmem:[%s6320_s2 + $0x40] sm:$0xff]   ;;  %v4885_v50 = vld [vmem:[%s6320_s2 + $0x178] sm:$0xff]  }
  0x15   : > { %4457 = vmatprep.subr.bf16.mxu1 %v4862_v9  ;;  %v4878_v27 = vld [vmem:[%s6320_s2 + $0xc8] sm:$0xff]   ;;  %v4882_v32 = vld [vmem:[%s6320_s2 + $0xc0] sm:$0xff]   ;;  %v4886_v55 = vld [vmem:[%s6320_s2 + $0x1f8] sm:$0xff]  }
  0x16   : > { %v4879_v28 = vld [vmem:[%s6320_s2 + $0x8] sm:$0xff]   ;;  %v4883_v34 = vld [vmem:[%s6320_s2] sm:$0xff]   ;;  %v4887_v4 = vld [vmem:[%s6320_s2 + $0x138] sm:$0xff]  }
  0x17   : > { %4436 = vmatpush3.bf16.msra.mxu0 %v4863_v10  ;;  %v4880_v29 = vld [vmem:[%s6320_s2 + $0x88] sm:$0xff]   ;;  %v4884_v36 = vld [vmem:[%s6320_s2 + $0x80] sm:$0xff]   ;;  %v4888_v8 = vld [vmem:[%s6320_s2 + $0x1b8] sm:$0xff]  }
  0x18   : > { %4458 = vmatpush3.bf16.msra.mxu1 %v4864_v11  ;;  %4437 = vmatprep.subr.bf16.mxu0 %v4865_v12  ;;  %v297_v38 = vld [vmem:[%s5319_s20] sm:$0xff]  ;;  %v298_v45 = vld [vmem:[%s5319_s20 + $0x8] sm:$0xff]  ;;  %v4889_v9 = vld [vmem:[%s6320_s2 + $0x170] sm:$0xff]  }
  0x19   : > { %4459 = vmatprep.subr.bf16.mxu1 %v4866_v13  ;;  %v5338_v39 = vld [vmem:[%s5314_s13] ss:$2 sm:$0xff]  ;;  %v5341_v40 = vld [vmem:[%s5314_s13 + $0x1] ss:$2 sm:$0xff]  ;;  %v315_v41 = vunpack.c.l.bf16 %v297_v38  ;;  %v316_v42 = vunpack.c.h.bf16 %v297_v38  ;;  %v317_v46 = vunpack.c.l.bf16 %v298_v45  ;;  %v318_v47 = vunpack.c.h.bf16 %v298_v45 }
  0x1a   : > { %v372_v43 = vrot.slane %v5338_v39, %v5306_v31  ;;  %v603_v44 = vrot.slane %v5341_v40, %v5306_v31  ;;  %v380_v48 = vrot.slane %v5338_v39, %v5322_v33  ;;  %v611_v49 = vrot.slane %v5341_v40, %v5322_v33  ;;  %v4895_v20 = vld [vmem:[%s6320_s2 + $0x128] sm:$0xff]  }
  0x1b   : > { %4438 = vmatpush3.bf16.msra.mxu0 %v4867_v14  ;;  %v368_v52 = vrot.slane %v5338_v39, %v5328_v35  ;;  %v599_v53 = vrot.slane %v5341_v40, %v5328_v35  ;;  %v376_v54 = vrot.slane %v5338_v39, %v5334_v37  ;;  %v607_v57 = vrot.slane %v5341_v40, %v5334_v37  ;;  %v4890_v14 = vld [vmem:[%s6320_s2 + $0x1f0] sm:$0xff]   ;;  %v4909_v45 = vld [vmem:[%s6320_s2 + $0x148] sm:$0xff]  }
  0x1c   : > { %4460 = vmatpush3.bf16.msra.mxu1 %v4868_v15  ;;  %4439 = vmatprep.subr.bf16.mxu0 %v4869_v16  ;;  %v546_v51 = vsub.f32 %v316_v42, %v372_v43  ;;  %v548_v56 = vsub.f32 %v318_v47, %v380_v48  ;;  %v4891_v16 = vld [vmem:[%s6320_s2 + $0x130] sm:$0xff]   ;;  %v5430_v38 = vsub.s32 7, %v5286_v25  ;;  %v5436_v42 = vsub.s32 4, %v5286_v25  ;;  %v4911_v47 = vld [vmem:[%s6320_s2 + $0x108] sm:$0xff]  }
  0x1d   : > { %4461 = vmatprep.subr.bf16.mxu1 %v4870_v17  ;;  %v545_v59 = vsub.f32 %v315_v41, %v368_v52  ;;  %v547_v60 = vsub.f32 %v317_v46, %v376_v54  ;;  %v4892_v17 = vld [vmem:[%s6320_s2 + $0x1b0] sm:$0xff]   ;;  %v4910_v46 = vld [vmem:[%s6320_s2 + $0x1c8] sm:$0xff]  }
  0x1e   : > { %v777_v58 = vmul.f32 %v603_v44, %v546_v51  ;;  %v779_v61 = vmul.f32 %v611_v49, %v548_v56  ;;  %v4907_v41 = vld [vmem:[%s6320_s2 + $0x110] sm:$0xff]   ;;  %v5442_v44 = vsub.s32 6, %v5286_v25  ;;  %v384_v48 = vrot.slane %v5338_v39, %v5436_v42  ;;  %v4912_v49 = vld [vmem:[%s6320_s2 + $0x188] sm:$0xff]  }
  0x1f   : > { %4440 = vmatpush3.bf16.msra.mxu0 %v4871_v18  ;;  %v776_v63 = vmul.f32 %v599_v53, %v545_v59  ;;  %v778_v0 = vmul.f32 %v607_v57, %v547_v60  ;;  %v4893_v18 = vld [vmem:[%s6320_s2 + $0x168] sm:$0xff]   ;;  %v4908_v43 = vld [vmem:[%s6320_s2 + $0x190] sm:$0xff]   ;;  %v396_v52 = vrot.slane %v5338_v39, %v5430_v38  ;;  %v300_v57 = vld [vmem:[%s5319_s20 + $0x18] sm:$0xff] }
  0x20   : > { %4462 = vmatpush3.bf16.msra.mxu1 %v4872_v19  ;;  %4441 = vmatprep.subr.bf16.mxu0 %v4873_v21  ;;  %vm813_vm0 = vcmp.gt.f32.partialorder %v777_v58, 0.0  ;;  %v849_v62 = vmul.f32 0.2, %v777_v58  ;;  %vm815_vm1 = vcmp.gt.f32.partialorder %v779_v61, 0.0  ;;  %v851_v1 = vmul.f32 0.2, %v779_v61 }
  0x21   : > { %4463 = vmatprep.subr.bf16.mxu1 %v4874_v22  ;;  %vm812_vm2 = vcmp.gt.f32.partialorder %v776_v63, 0.0  ;;  %v848_v3 = vmul.f32 0.2, %v776_v63  ;;  %vm814_vm3 = vcmp.gt.f32.partialorder %v778_v0, 0.0  ;;  %v850_v7 = vmul.f32 0.2, %v778_v0 }
  0x22   : > { %v885_v2 = vsel %vm813_vm0, %v777_v58, %v849_v62  ;;  %v887_v6 = vsel %vm815_vm1, %v779_v61, %v851_v1  ;;  %v4894_v19 = vld [vmem:[%s6320_s2 + $0x1e8] sm:$0xff]   ;;  %v4897_v22 = vld [vmem:[%s6320_s2 + $0x160] sm:$0xff]   ;;  %v299_v51 = vld [vmem:[%s5319_s20 + $0x10] sm:$0xff]  ;;  %v392_v53 = vrot.slane %v5338_v39, %v5442_v44  ;;  %v615_v58 = vrot.slane %v5341_v40, %v5436_v42 }
  0x23   : > { %4442 = vmatpush3.bf16.msra.mxu0 %v4875_v23  ;;  %v921_v5 = vpack.c.bf16 %v885_v2, %v885_v2  ;;  %v923_v10 = vpack.c.bf16 %v887_v6, %v887_v6  ;;  %v884_v11 = vsel %vm812_vm2, %v776_v63, %v848_v3  ;;  %v886_v13 = vsel %vm814_vm3, %v778_v0, %v850_v7  ;;  %v4896_v21 = vld [vmem:[%s6320_s2 + $0x1a8] sm:$0xff]   ;;  %v4898_v23 = vld [vmem:[%s6320_s2 + $0x1e0] sm:$0xff]  }
  0x24   : > { %4464 = vmatpush3.bf16.msra.mxu1 %v4876_v24  ;;  %4443 = vmatprep.subr.bf16.mxu0 %v4877_v26  ;;  %v920_v12 = vpack.c.bf16 %v884_v11, %v884_v11  ;;  %v922_v15 = vpack.c.bf16 %v886_v13, %v886_v13  ;;  %v4899_v24 = vld [vmem:[%s6320_s2 + $0x120] sm:$0xff]   ;;  %v319_v54 = vunpack.c.l.bf16 %v299_v51  ;;  %v321_v60 = vunpack.c.l.bf16 %v300_v57 }
  0x25   : > { %4465 = vmatprep.subr.bf16.mxu1 %v4878_v27  ;;  %3299 = vmatprep.mubr.bf16.mxu0 %v921_v5  ;;  %v4900_v26 = vld [vmem:[%s6320_s2 + $0x1a0] sm:$0xff]   ;;  %v4901_v27 = vld [vmem:[%s6320_s2 + $0x158] sm:$0xff]   ;;  %v322_v61 = vunpack.c.h.bf16 %v300_v57  ;;  %v623_v62 = vrot.slane %v5341_v40, %v5442_v44  ;;  %v4944_v57 = vld [vmem:[%s6320_s2 + $0x288] sm:$0xff]  }
  0x26   : > { %3339 = vmatprep.mubr.bf16.mxu1 %v923_v10  ;;  %v4914_v59 = vld [vmem:[%s6320_s2 + $0x1c0] sm:$0xff]   ;;  %v549_v1 = vsub.f32 %v319_v54, %v384_v48  ;;  %v4935_v48 = vld [vmem:[%s6320_s2 + $0x218] sm:$0xff]   ;;  %v4941_v54 = vld [vmem:[%s6320_s2 + $0x248] sm:$0xff]  }
  0x27   : > { %4444 = vmatpush3.bf16.msra.mxu0 %v4879_v28  ;;  %v4902_v28 = vld [vmem:[%s6320_s2 + $0x1d8] sm:$0xff]   ;;  %v4915_v63 = vld [vmem:[%s6320_s2 + $0x100] sm:$0xff]   ;;  %v552_v3 = vsub.f32 %v322_v61, %v396_v52  ;;  %v4939_v52 = vld [vmem:[%s6320_s2 + $0x210] sm:$0xff]  }
  0x28   : > { %4466 = vmatpush3.bf16.msra.mxu1 %v4880_v29  ;;  %4445 = vmatprep.subr.bf16.mxu0 %v4881_v30  ;;  %v4903_v29 = vld [vmem:[%s6320_s2 + $0x118] sm:$0xff]   ;;  %v4916_v2 = vld [vmem:[%s6320_s2 + $0x180] sm:$0xff]   ;;  %v780_v6 = vmul.f32 %v615_v58, %v549_v1  ;;  %v302_v1 = vld [vmem:[%s5319_s20 + $0x28] sm:$0xff] }
  0x29   : > { %4467 = vmatprep.subr.bf16.mxu1 %v4882_v32  ;;  %v4904_v30 = vld [vmem:[%s6320_s2 + $0x198] sm:$0xff]   ;;  %v4905_v32 = vld [vmem:[%s6320_s2 + $0x150] sm:$0xff]   ;;  %v4945_v58 = vld [vmem:[%s6320_s2 + $0x240] sm:$0xff]  }
  0x2a   : > { %vm816_vm5 = vcmp.gt.f32.partialorder %v780_v6, 0.0  ;;  %v852_v11 = vmul.f32 0.2, %v780_v6  ;;  %v5578_v61 = vld [vmem:[%s5314_s13 + $0x10] ss:$2 sm:$0xff] }
  0x2b   : > { %4446 = vmatpush3.bf16.msra.mxu0 %v4883_v34  ;;  %v5424_v34 = vsub.s32 5, %v5286_v25 }
  0x2c   : > { %4468 = vmatpush3.bf16.msra.mxu1 %v4884_v36  ;;  %4475 = vmatprep.subr.bf16.mxu0 %v4885_v50  ;;  %v4906_v36 = vld [vmem:[%s6320_s2 + $0x1d0] sm:$0xff]   ;;  %v4913_v50 = vld [vmem:[%s6320_s2 + $0x140] sm:$0xff]  }
  0x2d   : > { %4497 = vmatprep.subr.bf16.mxu1 %v4886_v55  ;;  %v388_v25 = vrot.slane %v5338_v39, %v5424_v34  ;;  %v320_v55 = vunpack.c.h.bf16 %v299_v51  ;;  %v619_v56 = vrot.slane %v5341_v40, %v5424_v34  ;;  %v627_v39 = vrot.slane %v5341_v40, %v5430_v38  ;;  %v4917_v40 = vld [vmem:[%s6320_s2 + $0x278] sm:$0xff]   ;;  %v4938_v51 = vld [vmem:[%s6320_s2 + $0x2d0] sm:$0xff]  }
  0x2e   : > { %3300 = vmatmul.mubr.bf16.vlgmr.msra.gmra.mxu0 %v920_v12 }
  0x2f   : > { %3340 = vmatmul.mubr.bf16.vlgmr.msra.gmra.mxu1 %v922_v15  ;;  %4476 = vmatpush3.bf16.msra.mxu0 %v4887_v4  ;;  %v550_v0 = vsub.f32 %v320_v55, %v388_v25  ;;  %v551_v4 = vsub.f32 %v321_v60, %v392_v53  ;;  %v783_v7 = vmul.f32 %v627_v39, %v552_v3  ;;  %v4934_v25 = vld [vmem:[%s6320_s2 + $0x2d8] sm:$0xff]   ;;  %v4940_v53 = vld [vmem:[%s6320_s2 + $0x290] sm:$0xff]   ;;  %v4942_v55 = vld [vmem:[%s6320_s2 + $0x2c8] sm:$0xff]  }
  0x30   : > { %4498 = vmatpush3.bf16.msra.mxu1 %v4888_v8  ;;  %4477 = vmatprep.subr.bf16.mxu0 %v4889_v9  ;;  %v4918_v9 = vld [vmem:[%s6320_s2 + $0x2f8] sm:$0xff]   ;;  %v301_v60 = vld [vmem:[%s5319_s20 + $0x20] sm:$0xff] }
  0x31   : > { %4499 = vmatprep.subr.bf16.mxu1 %v4890_v14  ;;  %v781_v5 = vmul.f32 %v619_v56, %v550_v0  ;;  %v782_v8 = vmul.f32 %v623_v62, %v551_v4  ;;  %vm819_vm6 = vcmp.gt.f32.partialorder %v783_v7, 0.0  ;;  %v855_v12 = vmul.f32 0.2, %v783_v7  ;;  %v4919_v14 = vld [vmem:[%s6320_s2 + $0x238] sm:$0xff]   ;;  %v4943_v56 = vld [vmem:[%s6320_s2 + $0x208] sm:$0xff]   ;;  %v4947_v3 = vld [vmem:[%s6320_s2 + $0x200] sm:$0xff]  }
  0x32   : > { %v323_v39 = vunpack.c.l.bf16 %v301_v60  ;;  %v324_v62 = vunpack.c.h.bf16 %v301_v60  ;;  %v5583_v0 = vld [vmem:[%s5314_s13 + $0x11] ss:$2 sm:$0xff] }
  0x33   : > { %4478 = vmatpush3.bf16.msra.mxu0 %v4891_v16  ;;  %vm817_vm4 = vcmp.gt.f32.partialorder %v781_v5, 0.0  ;;  %v853_v10 = vmul.f32 0.2, %v781_v5  ;;  %vm818_vm7 = vcmp.gt.f32.partialorder %v782_v8, 0.0  ;;  %v854_v13 = vmul.f32 0.2, %v782_v8 }
  0x34   : > { %4500 = vmatpush3.bf16.msra.mxu1 %v4892_v17  ;;  %4479 = vmatprep.subr.bf16.mxu0 %v4893_v18  ;;  %v888_v16 = vsel %vm816_vm5, %v780_v6, %v852_v11  ;;  %v4920_v17 = vld [vmem:[%s6320_s2 + $0x2b8] sm:$0xff]   ;;  %v635_v4 = vrot.slane %v5583_v0, %v5306_v31  ;;  %v326_v6 = vunpack.c.h.bf16 %v302_v1  ;;  %v408_v11 = vrot.slane %v5578_v61, %v5334_v37 }
  0x35   : > { %4501 = vmatprep.subr.bf16.mxu1 %v4894_v19  ;;  %v889_v15 = vsel %vm817_vm4, %v781_v5, %v853_v10  ;;  %v891_v19 = vsel %vm819_vm6, %v783_v7, %v855_v12  ;;  %v325_v5 = vunpack.c.l.bf16 %v302_v1  ;;  %v4948_v7 = vld [vmem:[%s6320_s2 + $0x280] sm:$0xff]   ;;  %v631_v10 = vrot.slane %v5583_v0, %v5328_v35  ;;  %v4967_v60 = vld [vmem:[%s6320_s2 + $0x318] sm:$0xff]   ;;  %v4971_v1 = vld [vmem:[%s6320_s2 + $0x310] sm:$0xff]  }
  0x36   : > { %v925_v18 = vpack.c.bf16 %v889_v15, %v889_v15 }
  0x37   : > { %4480 = vmatpush3.bf16.msra.mxu0 %v4895_v20  ;;  %v924_v20 = vpack.c.bf16 %v888_v16, %v888_v16 }
  0x38   : > { %4502 = vmatpush3.bf16.msra.mxu1 %v4896_v21  ;;  %4481 = vmatprep.subr.bf16.mxu0 %v4897_v22  ;;  %v890_v21 = vsel %vm818_vm7, %v782_v8, %v854_v13  ;;  %v4921_v22 = vld [vmem:[%s6320_s2 + $0x270] sm:$0xff]   ;;  %v639_v13 = vrot.slane %v5583_v0, %v5334_v37 }
  0x39   : > { %4503 = vmatprep.subr.bf16.mxu1 %v4898_v23  ;;  %v927_v23 = vpack.c.bf16 %v891_v19, %v891_v19  ;;  %3379 = vmatprep.mubr.bf16.mxu0 %v925_v18  ;;  %v4950_v18 = vld [vmem:[%s6320_s2 + $0x3f8] sm:$0xff]  }
  0x3b   : > { %4482 = vmatpush3.bf16.msra.mxu0 %v4899_v24  ;;  %v926_v24 = vpack.c.bf16 %v890_v21, %v890_v21  ;;  %3419 = vmatprep.mubr.bf16.mxu1 %v927_v23 }
  0x3c   : > { %4504 = vmatpush3.bf16.msra.mxu1 %v4900_v26  ;;  %4483 = vmatprep.subr.bf16.mxu0 %v4901_v27  ;;  %v4922_v26 = vld [vmem:[%s6320_s2 + $0x2f0] sm:$0xff]  }
  0x3d   : > { %4505 = vmatprep.subr.bf16.mxu1 %v4902_v28  ;;  %v4923_v27 = vld [vmem:[%s6320_s2 + $0x230] sm:$0xff]  }
  0x3e   : > { %v4924_v28 = vld [vmem:[%s6320_s2 + $0x2b0] sm:$0xff]  }
  0x3f   : > { %4484 = vmatpush3.bf16.msra.mxu0 %v4903_v29  ;;  %v4925_v29 = vld [vmem:[%s6320_s2 + $0x268] sm:$0xff]  }
  0x40   : > { %4506 = vmatpush3.bf16.msra.mxu1 %v4904_v30  ;;  %4485 = vmatprep.subr.bf16.mxu0 %v4905_v32  ;;  %v4926_v30 = vld [vmem:[%s6320_s2 + $0x2e8] sm:$0xff]  }
  0x41   : > { %4507 = vmatprep.subr.bf16.mxu1 %v4906_v36  ;;  %v4927_v32 = vld [vmem:[%s6320_s2 + $0x228] sm:$0xff]  }
  0x42   : > { %v4928_v36 = vld [vmem:[%s6320_s2 + $0x2a8] sm:$0xff]  }
  0x43   : > { %4486 = vmatpush3.bf16.msra.mxu0 %v4907_v41  ;;  %v4929_v41 = vld [vmem:[%s6320_s2 + $0x260] sm:$0xff]  }
  0x44   : > { %4508 = vmatpush3.bf16.msra.mxu1 %v4908_v43  ;;  %4487 = vmatprep.subr.bf16.mxu0 %v4909_v45  ;;  %v4930_v43 = vld [vmem:[%s6320_s2 + $0x2e0] sm:$0xff]  }
  0x45   : > { %4509 = vmatprep.subr.bf16.mxu1 %v4910_v46  ;;  %v4931_v45 = vld [vmem:[%s6320_s2 + $0x220] sm:$0xff]  }
  0x46   : > { %v4932_v46 = vld [vmem:[%s6320_s2 + $0x2a0] sm:$0xff]  }
  0x47   : > { %4488 = vmatpush3.bf16.msra.mxu0 %v4911_v47  ;;  %v4933_v47 = vld [vmem:[%s6320_s2 + $0x258] sm:$0xff]  }
  0x48   : > { %4510 = vmatpush3.bf16.msra.mxu1 %v4912_v49  ;;  %4489 = vmatprep.subr.bf16.mxu0 %v4913_v50  ;;  %v4936_v49 = vld [vmem:[%s6320_s2 + $0x298] sm:$0xff]   ;;  %v4937_v50 = vld [vmem:[%s6320_s2 + $0x250] sm:$0xff]  }
  0x49   : > { %4511 = vmatprep.subr.bf16.mxu1 %v4914_v59  ;;  %v4946_v59 = vld [vmem:[%s6320_s2 + $0x2c0] sm:$0xff]  }
  0x4b   : > { %4490 = vmatpush3.bf16.msra.mxu0 %v4915_v63  ;;  %v404_v63 = vrot.slane %v5578_v61, %v5306_v31 }
  0x4c   : > { %4512 = vmatpush3.bf16.msra.mxu1 %v4916_v2  ;;  %4519 = vmatprep.subr.bf16.mxu0 %v4917_v40  ;;  %v412_v2 = vrot.slane %v5578_v61, %v5322_v33  ;;  %v643_v40 = vrot.slane %v5583_v0, %v5322_v33 }
  0x4d   : > { %4541 = vmatprep.subr.bf16.mxu1 %v4918_v9  ;;  %v554_v8 = vsub.f32 %v324_v62, %v404_v63  ;;  %v400_v9 = vrot.slane %v5578_v61, %v5328_v35  ;;  %v4969_v62 = vld [vmem:[%s6320_s2 + $0x350] sm:$0xff]  }
  0x4e   : > { %3380 = vmatmul.mubr.bf16.vlgmr.msra.gmra.mxu0 %v924_v20  ;;  %v556_v12 = vsub.f32 %v326_v6, %v412_v2  ;;  %v4970_v63 = vld [vmem:[%s6320_s2 + $0x3d0] sm:$0xff]   ;;  %v420_v6 = vrot.slane %v5578_v61, %v5424_v34 }
  0x4f   : > { %3420 = vmatmul.mubr.bf16.vlgmr.msra.gmra.mxu1 %v926_v24  ;;  %4520 = vmatpush3.bf16.msra.mxu0 %v4919_v14  ;;  %v4949_v14 = vld [vmem:[%s6320_s2 + $0x378] sm:$0xff]   ;;  %v785_v15 = vmul.f32 %v635_v4, %v554_v8  ;;  %v553_v16 = vsub.f32 %v323_v39, %v400_v9  ;;  %v4972_v2 = vld [vmem:[%s6320_s2 + $0x390] sm:$0xff]   ;;  %v4974_v4 = vld [vmem:[%s6320_s2 + $0x3c8] sm:$0xff]   ;;  %v424_v8 = vrot.slane %v5578_v61, %v5442_v44 }
  0x50   : > { %4542 = vmatpush3.bf16.msra.mxu1 %v4920_v17  ;;  %4521 = vmatprep.subr.bf16.mxu0 %v4921_v22  ;;  %v555_v17 = vsub.f32 %v325_v5, %v408_v11  ;;  %v787_v19 = vmul.f32 %v643_v40, %v556_v12  ;;  %v4968_v39 = vld [vmem:[%s6320_s2 + $0x398] sm:$0xff]   ;;  %v4975_v5 = vld [vmem:[%s6320_s2 + $0x308] sm:$0xff]   ;;  %v428_v40 = vrot.slane %v5578_v61, %v5430_v38 }
  0x51   : > { %4543 = vmatprep.subr.bf16.mxu1 %v4922_v26  ;;  %vm821_vm8 = vcmp.gt.f32.partialorder %v785_v15, 0.0  ;;  %v857_v20 = vmul.f32 0.2, %v785_v15  ;;  %v784_v21 = vmul.f32 %v631_v10, %v553_v16  ;;  %v4976_v9 = vld [vmem:[%s6320_s2 + $0x388] sm:$0xff]   ;;  %v303_v10 = vld [vmem:[%s5319_s20 + $0x30] sm:$0xff]  ;;  %v651_v11 = vrot.slane %v5583_v0, %v5424_v34  ;;  %v304_v12 = vld [vmem:[%s5319_s20 + $0x38] sm:$0xff] }
  0x52   : > { %v786_v22 = vmul.f32 %v639_v13, %v555_v17  ;;  %vm823_vm9 = vcmp.gt.f32.partialorder %v787_v19, 0.0  ;;  %v859_v23 = vmul.f32 0.2, %v787_v19  ;;  %v659_v13 = vrot.slane %v5583_v0, %v5430_v38 }
  0x53   : > { %4522 = vmatpush3.bf16.msra.mxu0 %v4923_v27  ;;  %v893_v24 = vsel %vm821_vm8, %v785_v15, %v857_v20  ;;  %vm820_vm10 = vcmp.gt.f32.partialorder %v784_v21, 0.0  ;;  %v856_v26 = vmul.f32 0.2, %v784_v21  ;;  %v4951_v27 = vld [vmem:[%s6320_s2 + $0x338] sm:$0xff]   ;;  %v327_v15 = vunpack.c.l.bf16 %v303_v10 }
  0x54   : > { %4544 = vmatpush3.bf16.msra.mxu1 %v4924_v28  ;;  %4523 = vmatprep.subr.bf16.mxu0 %v4925_v29  ;;  %vm822_vm11 = vcmp.gt.f32.partialorder %v786_v22, 0.0  ;;  %v929_v28 = vpack.c.bf16 %v893_v24, %v893_v24  ;;  %v895_v29 = vsel %vm823_vm9, %v787_v19, %v859_v23  ;;  %v328_v16 = vunpack.c.h.bf16 %v303_v10  ;;  %v4978_v19 = vld [vmem:[%s6320_s2 + $0x3c0] sm:$0xff]   ;;  %v5003_v10 = vld [vmem:[%s6320_s2 + $0x410] sm:$0xff]  }
  0x55   : > { %4545 = vmatprep.subr.bf16.mxu1 %v4926_v30  ;;  %v858_v30 = vmul.f32 0.2, %v786_v22  ;;  %v329_v17 = vunpack.c.l.bf16 %v304_v12  ;;  %v655_v20 = vrot.slane %v5583_v0, %v5442_v44 }
  0x56   : > { %3459 = vmatprep.mubr.bf16.mxu0 %v929_v28 }
  0x57   : > { %4524 = vmatpush3.bf16.msra.mxu0 %v4927_v32  ;;  %v931_v32 = vpack.c.bf16 %v895_v29, %v895_v29 }
  0x58   : > { %4546 = vmatpush3.bf16.msra.mxu1 %v4928_v36  ;;  %4525 = vmatprep.subr.bf16.mxu0 %v4929_v41  ;;  %v892_v36 = vsel %vm820_vm10, %v784_v21, %v856_v26  ;;  %v4952_v41 = vld [vmem:[%s6320_s2 + $0x3b8] sm:$0xff]   ;;  %v4979_v21 = vld [vmem:[%s6320_s2 + $0x300] sm:$0xff]   ;;  %v559_v26 = vsub.f32 %v329_v17, %v424_v8  ;;  %v5001_v8 = vld [vmem:[%s6320_s2 + $0x450] sm:$0xff]  }
  0x59   : > { %4547 = vmatprep.subr.bf16.mxu1 %v4930_v43  ;;  %v928_v43 = vpack.c.bf16 %v892_v36, %v892_v36  ;;  %3499 = vmatprep.mubr.bf16.mxu1 %v931_v32  ;;  %v4982_v36 = vld [vmem:[%s6320_s2 + $0x4f8] sm:$0xff]   ;;  %v305_v17 = vld [vmem:[%s5319_s20 + $0x40] sm:$0xff] }
  0x5a   : > { %v790_v32 = vmul.f32 %v655_v20, %v559_v26  ;;  %v5011_v20 = vld [vmem:[%s6320_s2 + $0x400] sm:$0xff]   ;;  %v306_v26 = vld [vmem:[%s5319_s20 + $0x48] sm:$0xff] }
  0x5b   : > { %4526 = vmatpush3.bf16.msra.mxu0 %v4931_v45  ;;  %v894_v45 = vsel %vm822_vm11, %v786_v22, %v858_v30  ;;  %v558_v22 = vsub.f32 %v328_v16, %v420_v6  ;;  %v4998_v6 = vld [vmem:[%s6320_s2 + $0x4d8] sm:$0xff]   ;;  %v5010_v16 = vld [vmem:[%s6320_s2 + $0x4c0] sm:$0xff]  }
  0x5c   : > { %4548 = vmatpush3.bf16.msra.mxu1 %v4932_v46  ;;  %4527 = vmatprep.subr.bf16.mxu0 %v4933_v47  ;;  %v4953_v46 = vld [vmem:[%s6320_s2 + $0x370] sm:$0xff]   ;;  %v930_v47 = vpack.c.bf16 %v894_v45, %v894_v45  ;;  %vm826_vm15 = vcmp.gt.f32.partialorder %v790_v32, 0.0 }
  0x5d   : > { %4549 = vmatprep.subr.bf16.mxu1 %v4934_v25  ;;  %v4954_v25 = vld [vmem:[%s6320_s2 + $0x3f0] sm:$0xff]   ;;  %v789_v28 = vmul.f32 %v651_v11, %v558_v22  ;;  %v332_v22 = vunpack.c.h.bf16 %v305_v17 }
  0x5e   : > { %v5004_v11 = vld [vmem:[%s6320_s2 + $0x490] sm:$0xff]  }
  0x5f   : > { %4528 = vmatpush3.bf16.msra.mxu0 %v4935_v48  ;;  %v4955_v48 = vld [vmem:[%s6320_s2 + $0x330] sm:$0xff]   ;;  %vm825_vm12 = vcmp.gt.f32.partialorder %v789_v28, 0.0 }
  0x60   : > { %4550 = vmatpush3.bf16.msra.mxu1 %v4936_v49  ;;  %4529 = vmatprep.subr.bf16.mxu0 %v4937_v50  ;;  %v4956_v49 = vld [vmem:[%s6320_s2 + $0x3b0] sm:$0xff]   ;;  %v4957_v50 = vld [vmem:[%s6320_s2 + $0x368] sm:$0xff]  }
  0x61   : > { %4551 = vmatprep.subr.bf16.mxu1 %v4938_v51  ;;  %v4958_v51 = vld [vmem:[%s6320_s2 + $0x3e8] sm:$0xff]  }
  0x63   : > { %4530 = vmatpush3.bf16.msra.mxu0 %v4939_v52  ;;  %v4959_v52 = vld [vmem:[%s6320_s2 + $0x328] sm:$0xff]  }
  0x64   : > { %4552 = vmatpush3.bf16.msra.mxu1 %v4940_v53  ;;  %4531 = vmatprep.subr.bf16.mxu0 %v4941_v54  ;;  %v4960_v53 = vld [vmem:[%s6320_s2 + $0x3a8] sm:$0xff]   ;;  %v4961_v54 = vld [vmem:[%s6320_s2 + $0x360] sm:$0xff]  }
  0x65   : > { %4553 = vmatprep.subr.bf16.mxu1 %v4942_v55  ;;  %v4962_v55 = vld [vmem:[%s6320_s2 + $0x3e0] sm:$0xff]  }
  0x67   : > { %4532 = vmatpush3.bf16.msra.mxu0 %v4943_v56  ;;  %v4963_v56 = vld [vmem:[%s6320_s2 + $0x320] sm:$0xff]  }
  0x68   : > { %4554 = vmatpush3.bf16.msra.mxu1 %v4944_v57  ;;  %4533 = vmatprep.subr.bf16.mxu0 %v4945_v58  ;;  %v4964_v57 = vld [vmem:[%s6320_s2 + $0x3a0] sm:$0xff]   ;;  %v4965_v58 = vld [vmem:[%s6320_s2 + $0x358] sm:$0xff]  }
  0x69   : > { %4555 = vmatprep.subr.bf16.mxu1 %v4946_v59  ;;  %v4966_v59 = vld [vmem:[%s6320_s2 + $0x3d8] sm:$0xff]  }
  0x6b   : > { %4534 = vmatpush3.bf16.msra.mxu0 %v4947_v3  ;;  %v4973_v3 = vld [vmem:[%s6320_s2 + $0x348] sm:$0xff]  }
  0x6c   : > { %4556 = vmatpush3.bf16.msra.mxu1 %v4948_v7  ;;  %4563 = vmatprep.subr.bf16.mxu0 %v4949_v14  ;;  %v416_v7 = vrot.slane %v5578_v61, %v5436_v42  ;;  %v647_v14 = vrot.slane %v5583_v0, %v5436_v42  ;;  %v4977_v61 = vld [vmem:[%s6320_s2 + $0x340] sm:$0xff]   ;;  %v4981_v0 = vld [vmem:[%s6320_s2 + $0x478] sm:$0xff]  }
  0x6d   : > { %4585 = vmatprep.subr.bf16.mxu1 %v4950_v18  ;;  %v330_v18 = vunpack.c.h.bf16 %v304_v12  ;;  %v5005_v12 = vld [vmem:[%s6320_s2 + $0x448] sm:$0xff]  }
  0x6e   : > { %3460 = vmatmul.mubr.bf16.vlgmr.msra.gmra.mxu0 %v928_v43  ;;  %v557_v24 = vsub.f32 %v327_v15, %v416_v7  ;;  %v5000_v7 = vld [vmem:[%s6320_s2 + $0x498] sm:$0xff]   ;;  %v5009_v15 = vld [vmem:[%s6320_s2 + $0x440] sm:$0xff]  }
  0x6f   : > { %3500 = vmatmul.mubr.bf16.vlgmr.msra.gmra.mxu1 %v930_v47  ;;  %4564 = vmatpush3.bf16.msra.mxu0 %v4951_v27  ;;  %v560_v23 = vsub.f32 %v330_v18, %v428_v40  ;;  %v4980_v27 = vld [vmem:[%s6320_s2 + $0x380] sm:$0xff]   ;;  %v4983_v47 = vld [vmem:[%s6320_s2 + $0x438] sm:$0xff]  }
  0x70   : > { %4586 = vmatpush3.bf16.msra.mxu1 %v4952_v41  ;;  %4565 = vmatprep.subr.bf16.mxu0 %v4953_v46  ;;  %v788_v30 = vmul.f32 %v647_v14, %v557_v24  ;;  %v861_v41 = vmul.f32 0.2, %v789_v28  ;;  %v862_v46 = vmul.f32 0.2, %v790_v32  ;;  %v4999_v40 = vld [vmem:[%s6320_s2 + $0x418] sm:$0xff]   ;;  %v5007_v14 = vld [vmem:[%s6320_s2 + $0x408] sm:$0xff]  }
  0x71   : > { %4587 = vmatprep.subr.bf16.mxu1 %v4954_v25  ;;  %v791_v29 = vmul.f32 %v659_v13, %v560_v23  ;;  %v5006_v13 = vld [vmem:[%s6320_s2 + $0x4c8] sm:$0xff]  }
  0x72   : > { %vm824_vm14 = vcmp.gt.f32.partialorder %v788_v30, 0.0  ;;  %v860_v45 = vmul.f32 0.2, %v788_v30  ;;  %v897_v25 = vsel %vm825_vm12, %v789_v28, %v861_v41  ;;  %v5812_v18 = vld [vmem:[%s5314_s13 + $0x20] ss:$2 sm:$0xff]  ;;  %v333_v28 = vunpack.c.l.bf16 %v306_v26 }
  0x73   : > { %4566 = vmatpush3.bf16.msra.mxu0 %v4955_v48  ;;  %vm827_vm13 = vcmp.gt.f32.partialorder %v791_v29, 0.0  ;;  %v863_v43 = vmul.f32 0.2, %v791_v29  ;;  %v436_v23 = vrot.slane %v5812_v18, %v5306_v31 }
  0x74   : > { %4588 = vmatpush3.bf16.msra.mxu1 %v4956_v49  ;;  %4567 = vmatprep.subr.bf16.mxu0 %v4957_v50  ;;  %v4984_v49 = vld [vmem:[%s6320_s2 + $0x4b8] sm:$0xff]   ;;  %v933_v50 = vpack.c.bf16 %v897_v25, %v897_v25 }
  0x75   : > { %4589 = vmatprep.subr.bf16.mxu1 %v4958_v51  ;;  %v899_v48 = vsel %vm827_vm13, %v791_v29, %v863_v43  ;;  %v334_v29 = vunpack.c.h.bf16 %v306_v26  ;;  %v5013_v43 = vld [vmem:[%s6320_s2 + $0x578] sm:$0xff]   ;;  %v5037_v26 = vld [vmem:[%s6320_s2 + $0x548] sm:$0xff]  }
  0x76   : > { %v935_v51 = vpack.c.bf16 %v899_v48, %v899_v48  ;;  %3539 = vmatprep.mubr.bf16.mxu0 %v933_v50  ;;  %v5014_v25 = vld [vmem:[%s6320_s2 + $0x5f8] sm:$0xff]  }
  0x77   : > { %4568 = vmatpush3.bf16.msra.mxu0 %v4959_v52  ;;  %v896_v52 = vsel %vm824_vm14, %v788_v30, %v860_v45  ;;  %v444_v30 = vrot.slane %v5812_v18, %v5322_v33 }
  0x78   : > { %4590 = vmatpush3.bf16.msra.mxu1 %v4960_v53  ;;  %4569 = vmatprep.subr.bf16.mxu0 %v4961_v54  ;;  %v898_v53 = vsel %vm826_vm15, %v790_v32, %v862_v46  ;;  %v4985_v54 = vld [vmem:[%s6320_s2 + $0x470] sm:$0xff]   ;;  %v562_v32 = vsub.f32 %v332_v22, %v436_v23  ;;  %v440_v46 = vrot.slane %v5812_v18, %v5334_v37 }
  0x79   : > { %4591 = vmatprep.subr.bf16.mxu1 %v4962_v55  ;;  %v932_v55 = vpack.c.bf16 %v896_v52, %v896_v52  ;;  %3579 = vmatprep.mubr.bf16.mxu1 %v935_v51  ;;  %v564_v45 = vsub.f32 %v334_v29, %v444_v30  ;;  %v5034_v22 = vld [vmem:[%s6320_s2 + $0x5d0] sm:$0xff]   ;;  %v452_v29 = vrot.slane %v5812_v18, %v5424_v34 }
  0x7a   : > { %v563_v51 = vsub.f32 %v333_v28, %v440_v46  ;;  %v5035_v23 = vld [vmem:[%s6320_s2 + $0x510] sm:$0xff]   ;;  %v5039_v28 = vld [vmem:[%s6320_s2 + $0x508] sm:$0xff]   ;;  %v448_v30 = vrot.slane %v5812_v18, %v5436_v42 }
  0x7b   : > { %4570 = vmatpush3.bf16.msra.mxu0 %v4963_v56  ;;  %v934_v56 = vpack.c.bf16 %v898_v53, %v898_v53 }
  0x7c   : > { %4592 = vmatpush3.bf16.msra.mxu1 %v4964_v57  ;;  %4571 = vmatprep.subr.bf16.mxu0 %v4965_v58  ;;  %v4986_v57 = vld [vmem:[%s6320_s2 + $0x4f0] sm:$0xff]  }
  0x7d   : > { %4593 = vmatprep.subr.bf16.mxu1 %v4966_v59  ;;  %v4987_v58 = vld [vmem:[%s6320_s2 + $0x430] sm:$0xff]  }
  0x7e   : > { %v4988_v59 = vld [vmem:[%s6320_s2 + $0x4b0] sm:$0xff]  }
  0x7f   : > { %4572 = vmatpush3.bf16.msra.mxu0 %v4967_v60  ;;  %v4989_v60 = vld [vmem:[%s6320_s2 + $0x468] sm:$0xff]  }
  0x80   : > { %4594 = vmatpush3.bf16.msra.mxu1 %v4968_v39  ;;  %4573 = vmatprep.subr.bf16.mxu0 %v4969_v62  ;;  %v4990_v39 = vld [vmem:[%s6320_s2 + $0x4e8] sm:$0xff]  }
  0x81   : > { %4595 = vmatprep.subr.bf16.mxu1 %v4970_v63  ;;  %v4991_v62 = vld [vmem:[%s6320_s2 + $0x428] sm:$0xff]  }
  0x82   : > { %v4992_v63 = vld [vmem:[%s6320_s2 + $0x4a8] sm:$0xff]  }
  0x83   : > { %4574 = vmatpush3.bf16.msra.mxu0 %v4971_v1  ;;  %v4993_v1 = vld [vmem:[%s6320_s2 + $0x460] sm:$0xff]  }
  0x84   : > { %4596 = vmatpush3.bf16.msra.mxu1 %v4972_v2  ;;  %4575 = vmatprep.subr.bf16.mxu0 %v4973_v3  ;;  %v4994_v2 = vld [vmem:[%s6320_s2 + $0x4e0] sm:$0xff]  }
  0x85   : > { %4597 = vmatprep.subr.bf16.mxu1 %v4974_v4  ;;  %v4995_v3 = vld [vmem:[%s6320_s2 + $0x420] sm:$0xff]  }
  0x86   : > { %v4996_v4 = vld [vmem:[%s6320_s2 + $0x4a0] sm:$0xff]  }
  0x87   : > { %4576 = vmatpush3.bf16.msra.mxu0 %v4975_v5  ;;  %v4997_v5 = vld [vmem:[%s6320_s2 + $0x458] sm:$0xff]  }
  0x88   : > { %4598 = vmatpush3.bf16.msra.mxu1 %v4976_v9  ;;  %4577 = vmatprep.subr.bf16.mxu0 %v4977_v61  ;;  %v5002_v9 = vld [vmem:[%s6320_s2 + $0x4d0] sm:$0xff]   ;;  %v5008_v61 = vld [vmem:[%s6320_s2 + $0x488] sm:$0xff]  }
  0x89   : > { %4599 = vmatprep.subr.bf16.mxu1 %v4978_v19  ;;  %v5815_v19 = vld [vmem:[%s5314_s13 + $0x21] ss:$2 sm:$0xff] }
  0x8a   : > { %v667_v24 = vrot.slane %v5815_v19, %v5306_v31  ;;  %v663_v41 = vrot.slane %v5815_v19, %v5328_v35 }
  0x8b   : > { %4578 = vmatpush3.bf16.msra.mxu0 %v4979_v21  ;;  %v331_v21 = vunpack.c.l.bf16 %v305_v17  ;;  %v5031_v17 = vld [vmem:[%s6320_s2 + $0x518] sm:$0xff]  }
  0x8c   : > { %4600 = vmatpush3.bf16.msra.mxu1 %v4980_v27  ;;  %4607 = vmatprep.subr.bf16.mxu0 %v4981_v0  ;;  %v5012_v27 = vld [vmem:[%s6320_s2 + $0x480] sm:$0xff]   ;;  %v675_v0 = vrot.slane %v5815_v19, %v5322_v33  ;;  %v793_v48 = vmul.f32 %v667_v24, %v562_v32  ;;  %v5036_v24 = vld [vmem:[%s6320_s2 + $0x590] sm:$0xff]  }
  0x8d   : > { %4629 = vmatprep.subr.bf16.mxu1 %v4982_v36  ;;  %v432_v36 = vrot.slane %v5812_v18, %v5328_v35  ;;  %v5041_v32 = vld [vmem:[%s6320_s2 + $0x540] sm:$0xff]  }
  0x8e   : > { %3540 = vmatmul.mubr.bf16.vlgmr.msra.gmra.mxu0 %v932_v55  ;;  %v795_v50 = vmul.f32 %v675_v0, %v564_v45  ;;  %vm829_vm0 = vcmp.gt.f32.partialorder %v793_v48, 0.0  ;;  %v865_v52 = vmul.f32 0.2, %v793_v48  ;;  %v5040_v0 = vld [vmem:[%s6320_s2 + $0x588] sm:$0xff]  }
  0x8f   : > { %3580 = vmatmul.mubr.bf16.vlgmr.msra.gmra.mxu1 %v934_v56  ;;  %4608 = vmatpush3.bf16.msra.mxu0 %v4983_v47  ;;  %v671_v47 = vrot.slane %v5815_v19, %v5334_v37 }
  0x90   : > { %4630 = vmatpush3.bf16.msra.mxu1 %v4984_v49  ;;  %4609 = vmatprep.subr.bf16.mxu0 %v4985_v54  ;;  %v561_v49 = vsub.f32 %v331_v21, %v432_v36  ;;  %vm831_vm1 = vcmp.gt.f32.partialorder %v795_v50, 0.0  ;;  %v867_v54 = vmul.f32 0.2, %v795_v50  ;;  %v901_v56 = vsel %vm829_vm0, %v793_v48, %v865_v52  ;;  %v5033_v21 = vld [vmem:[%s6320_s2 + $0x550] sm:$0xff]  }
  0x91   : > { %4631 = vmatprep.subr.bf16.mxu1 %v4986_v57  ;;  %v794_v55 = vmul.f32 %v671_v47, %v563_v51  ;;  %v307_v36 = vld [vmem:[%s5319_s20 + $0x50] sm:$0xff]  ;;  %v683_v47 = vrot.slane %v5815_v19, %v5424_v34  ;;  %v679_v48 = vrot.slane %v5815_v19, %v5436_v42  ;;  %v687_v52 = vrot.slane %v5815_v19, %v5442_v44 }
  0x92   : > { %v792_v53 = vmul.f32 %v663_v41, %v561_v49  ;;  %v460_v41 = vrot.slane %v5812_v18, %v5430_v38  ;;  %v335_v45 = vunpack.c.l.bf16 %v307_v36  ;;  %v336_v46 = vunpack.c.h.bf16 %v307_v36  ;;  %v5042_v49 = vld [vmem:[%s6320_s2 + $0x5c0] sm:$0xff]   ;;  %v5066_v36 = vld [vmem:[%s6320_s2 + $0x6d0] sm:$0xff]  }
  0x93   : > { %4610 = vmatpush3.bf16.msra.mxu0 %v4987_v58  ;;  %v5015_v58 = vld [vmem:[%s6320_s2 + $0x538] sm:$0xff]   ;;  %vm830_vm3 = vcmp.gt.f32.partialorder %v794_v55, 0.0 }
  0x94   : > { %4632 = vmatpush3.bf16.msra.mxu1 %v4988_v59  ;;  %4611 = vmatprep.subr.bf16.mxu0 %v4989_v60  ;;  %vm828_vm2 = vcmp.gt.f32.partialorder %v792_v53, 0.0  ;;  %v864_v57 = vmul.f32 0.2, %v792_v53  ;;  %v937_v59 = vpack.c.bf16 %v901_v56, %v901_v56  ;;  %v903_v60 = vsel %vm831_vm1, %v795_v50, %v867_v54  ;;  %v5044_v56 = vld [vmem:[%s6320_s2 + $0x580] sm:$0xff]  }
  0x95   : > { %4633 = vmatprep.subr.bf16.mxu1 %v4990_v39  ;;  %v866_v39 = vmul.f32 0.2, %v794_v55  ;;  %v566_v54 = vsub.f32 %v336_v46, %v452_v29  ;;  %v5062_v29 = vld [vmem:[%s6320_s2 + $0x6d8] sm:$0xff]   ;;  %v5070_v46 = vld [vmem:[%s6320_s2 + $0x6c8] sm:$0xff]  }
  0x96   : > { %3619 = vmatprep.mubr.bf16.mxu0 %v937_v59 }
  0x97   : > { %4612 = vmatpush3.bf16.msra.mxu0 %v4991_v62  ;;  %v5016_v62 = vld [vmem:[%s6320_s2 + $0x5b8] sm:$0xff]   ;;  %v797_v59 = vmul.f32 %v683_v47, %v566_v54  ;;  %v5071_v47 = vld [vmem:[%s6320_s2 + $0x608] sm:$0xff]  }
  0x98   : > { %4634 = vmatpush3.bf16.msra.mxu1 %v4992_v63  ;;  %4613 = vmatprep.subr.bf16.mxu0 %v4993_v1  ;;  %v5017_v63 = vld [vmem:[%s6320_s2 + $0x570] sm:$0xff]   ;;  %v939_v1 = vpack.c.bf16 %v903_v60, %v903_v60 }
  0x99   : > { %4635 = vmatprep.subr.bf16.mxu1 %v4994_v2  ;;  %v900_v2 = vsel %vm828_vm2, %v792_v53, %v864_v57  ;;  %v5043_v53 = vld [vmem:[%s6320_s2 + $0x500] sm:$0xff]   ;;  %vm833_vm4 = vcmp.gt.f32.partialorder %v797_v59, 0.0 }
  0x9a   : > { %3659 = vmatprep.mubr.bf16.mxu1 %v939_v1  ;;  %v869_v1 = vmul.f32 0.2, %v797_v59 }
  0x9b   : > { %4614 = vmatpush3.bf16.msra.mxu0 %v4995_v3  ;;  %v936_v3 = vpack.c.bf16 %v900_v2, %v900_v2 }
  0x9c   : > { %4636 = vmatpush3.bf16.msra.mxu1 %v4996_v4  ;;  %4615 = vmatprep.subr.bf16.mxu0 %v4997_v5  ;;  %v902_v4 = vsel %vm830_vm3, %v794_v55, %v866_v39  ;;  %v5018_v5 = vld [vmem:[%s6320_s2 + $0x5f0] sm:$0xff]   ;;  %v565_v55 = vsub.f32 %v335_v45, %v448_v30  ;;  %v5063_v30 = vld [vmem:[%s6320_s2 + $0x618] sm:$0xff]   ;;  %v5069_v45 = vld [vmem:[%s6320_s2 + $0x648] sm:$0xff]  }
  0x9d   : > { %4637 = vmatprep.subr.bf16.mxu1 %v4998_v6  ;;  %v938_v6 = vpack.c.bf16 %v902_v4, %v902_v4 }
  0x9e   : > { %v796_v60 = vmul.f32 %v679_v48, %v565_v55 }
  0x9f   : > { %4616 = vmatpush3.bf16.msra.mxu0 %v4999_v40  ;;  %v5019_v40 = vld [vmem:[%s6320_s2 + $0x530] sm:$0xff]  }
  0xa0   : > { %4638 = vmatpush3.bf16.msra.mxu1 %v5000_v7  ;;  %4617 = vmatprep.subr.bf16.mxu0 %v5001_v8  ;;  %v5020_v7 = vld [vmem:[%s6320_s2 + $0x5b0] sm:$0xff]   ;;  %v5021_v8 = vld [vmem:[%s6320_s2 + $0x568] sm:$0xff]   ;;  %vm832_vm5 = vcmp.gt.f32.partialorder %v796_v60, 0.0  ;;  %v868_v2 = vmul.f32 0.2, %v796_v60 }
  0xa1   : > { %4639 = vmatprep.subr.bf16.mxu1 %v5002_v9  ;;  %v5022_v9 = vld [vmem:[%s6320_s2 + $0x5e8] sm:$0xff]  }
  0xa3   : > { %4618 = vmatpush3.bf16.msra.mxu0 %v5003_v10  ;;  %v5023_v10 = vld [vmem:[%s6320_s2 + $0x528] sm:$0xff]  }
  0xa4   : > { %4640 = vmatpush3.bf16.msra.mxu1 %v5004_v11  ;;  %4619 = vmatprep.subr.bf16.mxu0 %v5005_v12  ;;  %v5024_v11 = vld [vmem:[%s6320_s2 + $0x5a8] sm:$0xff]   ;;  %v5025_v12 = vld [vmem:[%s6320_s2 + $0x560] sm:$0xff]  }
  0xa5   : > { %4641 = vmatprep.subr.bf16.mxu1 %v5006_v13  ;;  %v5026_v13 = vld [vmem:[%s6320_s2 + $0x5e0] sm:$0xff]  }
  0xa7   : > { %4620 = vmatpush3.bf16.msra.mxu0 %v5007_v14  ;;  %v5027_v14 = vld [vmem:[%s6320_s2 + $0x520] sm:$0xff]  }
  0xa8   : > { %4642 = vmatpush3.bf16.msra.mxu1 %v5008_v61  ;;  %4621 = vmatprep.subr.bf16.mxu0 %v5009_v15  ;;  %v5028_v61 = vld [vmem:[%s6320_s2 + $0x5a0] sm:$0xff]   ;;  %v5029_v15 = vld [vmem:[%s6320_s2 + $0x558] sm:$0xff]  }
  0xa9   : > { %4643 = vmatprep.subr.bf16.mxu1 %v5010_v16  ;;  %v5030_v16 = vld [vmem:[%s6320_s2 + $0x5d8] sm:$0xff]  }
  0xab   : > { %4622 = vmatpush3.bf16.msra.mxu0 %v5011_v20  ;;  %v5032_v20 = vld [vmem:[%s6320_s2 + $0x598] sm:$0xff]  }
  0xac   : > { %4644 = vmatpush3.bf16.msra.mxu1 %v5012_v27  ;;  %4651 = vmatprep.subr.bf16.mxu0 %v5013_v43  ;;  %v5038_v27 = vld [vmem:[%s6320_s2 + $0x5c8] sm:$0xff]   ;;  %v456_v43 = vrot.slane %v5812_v18, %v5442_v44  ;;  %v691_v18 = vrot.slane %v5815_v19, %v5430_v38  ;;  %v5045_v19 = vld [vmem:[%s6320_s2 + $0x678] sm:$0xff]  }
  0xad   : > { %4673 = vmatprep.subr.bf16.mxu1 %v5014_v25  ;;  %v308_v25 = vld [vmem:[%s5319_s20 + $0x58] sm:$0xff] }
  0xae   : > { %3620 = vmatmul.mubr.bf16.vlgmr.msra.gmra.mxu0 %v936_v3  ;;  %v337_v50 = vunpack.c.l.bf16 %v308_v25  ;;  %v338_v51 = vunpack.c.h.bf16 %v308_v25  ;;  %v5072_v25 = vld [vmem:[%s6320_s2 + $0x688] sm:$0xff]  }
  0xaf   : > { %3660 = vmatmul.mubr.bf16.vlgmr.msra.gmra.mxu1 %v938_v6  ;;  %4652 = vmatpush3.bf16.msra.mxu0 %v5015_v58  ;;  %v905_v6 = vsel %vm833_vm4, %v797_v59, %v869_v1 }
  0xb0   : > { %4674 = vmatpush3.bf16.msra.mxu1 %v5016_v62  ;;  %4653 = vmatprep.subr.bf16.mxu0 %v5017_v63  ;;  %v568_v57 = vsub.f32 %v338_v51, %v460_v41  ;;  %v567_v58 = vsub.f32 %v337_v50, %v456_v43  ;;  %v5046_v63 = vld [vmem:[%s6320_s2 + $0x6f8] sm:$0xff]   ;;  %v5067_v41 = vld [vmem:[%s6320_s2 + $0x610] sm:$0xff]   ;;  %v5074_v51 = vld [vmem:[%s6320_s2 + $0x6c0] sm:$0xff]  }
  0xb1   : > { %4675 = vmatprep.subr.bf16.mxu1 %v5018_v5  ;;  %v5047_v5 = vld [vmem:[%s6320_s2 + $0x638] sm:$0xff]   ;;  %v5068_v43 = vld [vmem:[%s6320_s2 + $0x690] sm:$0xff]  }
  0xb2   : > { %v799_v39 = vmul.f32 %v691_v18, %v568_v57  ;;  %v798_v62 = vmul.f32 %v687_v52, %v567_v58  ;;  %v309_v18 = vld [vmem:[%s5319_s20 + $0x60] sm:$0xff]  ;;  %v6046_v52 = vld [vmem:[%s5314_s13 + $0x30] ss:$2 sm:$0xff]  ;;  %v6051_v57 = vld [vmem:[%s5314_s13 + $0x31] ss:$2 sm:$0xff] }
  0xb3   : > { %4654 = vmatpush3.bf16.msra.mxu0 %v5019_v40  ;;  %v904_v40 = vsel %vm832_vm5, %v796_v60, %v868_v2  ;;  %v339_v54 = vunpack.c.l.bf16 %v309_v18  ;;  %v340_v55 = vunpack.c.h.bf16 %v309_v18  ;;  %v310_v58 = vld [vmem:[%s5319_s20 + $0x68] sm:$0xff]  ;;  %v476_v59 = vrot.slane %v6046_v52, %v5322_v33  ;;  %v5084_v18 = vld [vmem:[%s6320_s2 + $0x7b0] sm:$0xff]  }
  0xb4   : > { %4676 = vmatpush3.bf16.msra.mxu1 %v5020_v7  ;;  %4655 = vmatprep.subr.bf16.mxu0 %v5021_v8  ;;  %vm835_vm6 = vcmp.gt.f32.partialorder %v799_v39, 0.0  ;;  %v871_v3 = vmul.f32 0.2, %v799_v39  ;;  %vm834_vm7 = vcmp.gt.f32.partialorder %v798_v62, 0.0  ;;  %v870_v4 = vmul.f32 0.2, %v798_v62 }
  0xb5   : > { %4677 = vmatprep.subr.bf16.mxu1 %v5022_v9  ;;  %v5048_v7 = vld [vmem:[%s6320_s2 + $0x6b8] sm:$0xff]   ;;  %v941_v8 = vpack.c.bf16 %v905_v6, %v905_v6  ;;  %v707_v1 = vrot.slane %v6051_v57, %v5322_v33  ;;  %v695_v6 = vrot.slane %v6051_v57, %v5328_v35 }
  0xb6   : > { %v907_v9 = vsel %vm835_vm6, %v799_v39, %v871_v3  ;;  %v699_v39 = vrot.slane %v6051_v57, %v5306_v31  ;;  %v5076_v3 = vld [vmem:[%s6320_s2 + $0x680] sm:$0xff]  }
  0xb7   : > { %4656 = vmatpush3.bf16.msra.mxu0 %v5023_v10  ;;  %v940_v10 = vpack.c.bf16 %v904_v40, %v904_v40  ;;  %3699 = vmatprep.mubr.bf16.mxu0 %v941_v8  ;;  %v472_v40 = vrot.slane %v6046_v52, %v5334_v37 }
  0xb8   : > { %4678 = vmatpush3.bf16.msra.mxu1 %v5024_v11  ;;  %4657 = vmatprep.subr.bf16.mxu0 %v5025_v12  ;;  %v906_v11 = vsel %vm834_vm7, %v798_v62, %v870_v4  ;;  %v5049_v12 = vld [vmem:[%s6320_s2 + $0x670] sm:$0xff]   ;;  %v341_v62 = vunpack.c.l.bf16 %v310_v58 }
  0xb9   : > { %4679 = vmatprep.subr.bf16.mxu1 %v5026_v13  ;;  %v943_v13 = vpack.c.bf16 %v907_v9, %v907_v9  ;;  %v703_v9 = vrot.slane %v6051_v57, %v5334_v37 }
  0xbb   : > { %4658 = vmatpush3.bf16.msra.mxu0 %v5027_v14  ;;  %v942_v14 = vpack.c.bf16 %v906_v11, %v906_v11  ;;  %3739 = vmatprep.mubr.bf16.mxu1 %v943_v13 }
  0xbc   : > { %4680 = vmatpush3.bf16.msra.mxu1 %v5028_v61  ;;  %4659 = vmatprep.subr.bf16.mxu0 %v5029_v15  ;;  %v5050_v61 = vld [vmem:[%s6320_s2 + $0x6f0] sm:$0xff]  }
  0xbd   : > { %4681 = vmatprep.subr.bf16.mxu1 %v5030_v16  ;;  %v5051_v15 = vld [vmem:[%s6320_s2 + $0x630] sm:$0xff]  }
  0xbe   : > { %v5052_v16 = vld [vmem:[%s6320_s2 + $0x6b0] sm:$0xff]  }
  0xbf   : > { %4660 = vmatpush3.bf16.msra.mxu0 %v5031_v17  ;;  %v5053_v17 = vld [vmem:[%s6320_s2 + $0x668] sm:$0xff]  }
  0xc0   : > { %4682 = vmatpush3.bf16.msra.mxu1 %v5032_v20  ;;  %4661 = vmatprep.subr.bf16.mxu0 %v5033_v21  ;;  %v5054_v20 = vld [vmem:[%s6320_s2 + $0x6e8] sm:$0xff]  }
  0xc1   : > { %4683 = vmatprep.subr.bf16.mxu1 %v5034_v22  ;;  %v5055_v21 = vld [vmem:[%s6320_s2 + $0x628] sm:$0xff]  }
  0xc2   : > { %v5056_v22 = vld [vmem:[%s6320_s2 + $0x6a8] sm:$0xff]  }
  0xc3   : > { %4662 = vmatpush3.bf16.msra.mxu0 %v5035_v23  ;;  %v5057_v23 = vld [vmem:[%s6320_s2 + $0x660] sm:$0xff]  }
  0xc4   : > { %4684 = vmatpush3.bf16.msra.mxu1 %v5036_v24  ;;  %4663 = vmatprep.subr.bf16.mxu0 %v5037_v26  ;;  %v5058_v24 = vld [vmem:[%s6320_s2 + $0x6e0] sm:$0xff]  }
  0xc5   : > { %4685 = vmatprep.subr.bf16.mxu1 %v5038_v27  ;;  %v5059_v26 = vld [vmem:[%s6320_s2 + $0x620] sm:$0xff]  }
  0xc6   : > { %v5060_v27 = vld [vmem:[%s6320_s2 + $0x6a0] sm:$0xff]  }
  0xc7   : > { %4664 = vmatpush3.bf16.msra.mxu0 %v5039_v28  ;;  %v5061_v28 = vld [vmem:[%s6320_s2 + $0x658] sm:$0xff]  }
  0xc8   : > { %4686 = vmatpush3.bf16.msra.mxu1 %v5040_v0  ;;  %4665 = vmatprep.subr.bf16.mxu0 %v5041_v32  ;;  %v5064_v0 = vld [vmem:[%s6320_s2 + $0x698] sm:$0xff]   ;;  %v5065_v32 = vld [vmem:[%s6320_s2 + $0x650] sm:$0xff]  }
  0xc9   : > { %4687 = vmatprep.subr.bf16.mxu1 %v5042_v49  ;;  %v5073_v49 = vld [vmem:[%s6320_s2 + $0x640] sm:$0xff]  }
  0xcb   : > { %4666 = vmatpush3.bf16.msra.mxu0 %v5043_v53 }
  0xcc   : > { %4688 = vmatpush3.bf16.msra.mxu1 %v5044_v56  ;;  %4695 = vmatprep.subr.bf16.mxu0 %v5045_v19  ;;  %v468_v56 = vrot.slane %v6046_v52, %v5306_v31  ;;  %v5075_v19 = vld [vmem:[%s6320_s2 + $0x600] sm:$0xff]  }
  0xcd   : > { %4717 = vmatprep.subr.bf16.mxu1 %v5046_v63  ;;  %v342_v63 = vunpack.c.h.bf16 %v310_v58  ;;  %v5089_v58 = vld [vmem:[%s6320_s2 + $0x760] sm:$0xff]  }
  0xce   : > { %3700 = vmatmul.mubr.bf16.vlgmr.msra.gmra.mxu0 %v940_v10  ;;  %v570_v4 = vsub.f32 %v340_v55, %v468_v56  ;;  %v5077_v10 = vld [vmem:[%s6320_s2 + $0x778] sm:$0xff]   ;;  %v5087_v55 = vld [vmem:[%s6320_s2 + $0x728] sm:$0xff]  }
  0xcf   : > { %3740 = vmatmul.mubr.bf16.vlgmr.msra.gmra.mxu1 %v942_v14  ;;  %4696 = vmatpush3.bf16.msra.mxu0 %v5047_v5  ;;  %v464_v5 = vrot.slane %v6046_v52, %v5328_v35  ;;  %v572_v8 = vsub.f32 %v342_v63, %v476_v59  ;;  %v5088_v56 = vld [vmem:[%s6320_s2 + $0x7a8] sm:$0xff]   ;;  %v5090_v59 = vld [vmem:[%s6320_s2 + $0x7e0] sm:$0xff]   ;;  %v5095_v63 = vld [vmem:[%s6320_s2 + $0x718] sm:$0xff]  }
  0xd0   : > { %4718 = vmatpush3.bf16.msra.mxu1 %v5048_v7  ;;  %4697 = vmatprep.subr.bf16.mxu0 %v5049_v12  ;;  %v801_v13 = vmul.f32 %v699_v39, %v570_v4  ;;  %v5093_v39 = vld [vmem:[%s6320_s2 + $0x758] sm:$0xff]   ;;  %v5099_v4 = vld [vmem:[%s6320_s2 + $0x710] sm:$0xff]  }
  0xd1   : > { %4719 = vmatprep.subr.bf16.mxu1 %v5050_v61  ;;  %v569_v14 = vsub.f32 %v339_v54, %v464_v5  ;;  %v571_v61 = vsub.f32 %v341_v62, %v472_v40  ;;  %v5086_v54 = vld [vmem:[%s6320_s2 + $0x7e8] sm:$0xff]   ;;  %v5094_v62 = vld [vmem:[%s6320_s2 + $0x7d8] sm:$0xff]   ;;  %v5100_v5 = vld [vmem:[%s6320_s2 + $0x790] sm:$0xff]  }
  0xd2   : > { %vm837_vm8 = vcmp.gt.f32.partialorder %v801_v13, 0.0 }
  0xd3   : > { %4698 = vmatpush3.bf16.msra.mxu0 %v5051_v15  ;;  %v5078_v15 = vld [vmem:[%s6320_s2 + $0x7f8] sm:$0xff]  }
  0xd4   : > { %4720 = vmatpush3.bf16.msra.mxu1 %v5052_v16  ;;  %4699 = vmatprep.subr.bf16.mxu0 %v5053_v17  ;;  %v4140_v16 = vld [vmem:[%s6321_s3] ss:$0 sm:$0xff] }
  0xd5   : > { %4721 = vmatprep.subr.bf16.mxu1 %v5054_v20 }
  0xd7   : > { %4700 = vmatpush3.bf16.msra.mxu0 %v5055_v21  ;;  %v803_v21 = vmul.f32 %v707_v1, %v572_v8  ;;  %v5096_v1 = vld [vmem:[%s6320_s2 + $0x798] sm:$0xff]  }
  0xd8   : > { %4722 = vmatpush3.bf16.msra.mxu1 %v5056_v22  ;;  %4701 = vmatprep.subr.bf16.mxu0 %v5057_v23  ;;  %v873_v23 = vmul.f32 0.2, %v801_v13 }
  0xd9   : > { %4723 = vmatprep.subr.bf16.mxu1 %v5058_v24  ;;  %v800_v24 = vmul.f32 %v695_v6, %v569_v14  ;;  %vm839_vm9 = vcmp.gt.f32.partialorder %v803_v21, 0.0  ;;  %v5101_v6 = vld [vmem:[%s6320_s2 + $0x748] sm:$0xff]  }
  0xdb   : > { %4702 = vmatpush3.bf16.msra.mxu0 %v5059_v26  ;;  %v802_v26 = vmul.f32 %v703_v9, %v571_v61  ;;  %vm836_vm10 = vcmp.gt.f32.partialorder %v800_v24, 0.0  ;;  %v5103_v9 = vld [vmem:[%s6320_s2 + $0x708] sm:$0xff]  }
  0xdc   : > { %4724 = vmatpush3.bf16.msra.mxu1 %v5060_v27  ;;  %4703 = vmatprep.subr.bf16.mxu0 %v5061_v28  ;;  %v875_v27 = vmul.f32 0.2, %v803_v21 }
  0xdd   : > { %4725 = vmatprep.subr.bf16.mxu1 %v5062_v29  ;;  %v909_v29 = vsel %vm837_vm8, %v801_v13, %v873_v23  ;;  %vm838_vm11 = vcmp.gt.f32.partialorder %v802_v26, 0.0  ;;  %v480_v13 = vrot.slane %v6046_v52, %v5436_v42 }
  0xdf   : > { %4704 = vmatpush3.bf16.msra.mxu0 %v5063_v30  ;;  %v872_v30 = vmul.f32 0.2, %v800_v24 }
  0xe0   : > { %4726 = vmatpush3.bf16.msra.mxu1 %v5064_v0  ;;  %4705 = vmatprep.subr.bf16.mxu0 %v5065_v32  ;;  %v5079_v0 = vld [vmem:[%s6320_s2 + $0x738] sm:$0xff]   ;;  %v945_v32 = vpack.c.bf16 %v909_v29, %v909_v29  ;;  %v711_v29 = vrot.slane %v6051_v57, %v5436_v42  ;;  %v5107_v42 = vld [vmem:[%s6320_s2 + $0x700] sm:$0xff]  }
  0xe1   : > { %4727 = vmatprep.subr.bf16.mxu1 %v5066_v36  ;;  %v911_v36 = vsel %vm839_vm9, %v803_v21, %v875_v27  ;;  %v488_v21 = vrot.slane %v6046_v52, %v5442_v44  ;;  %v312_v27 = vld [vmem:[%s5319_s20 + $0x78] sm:$0xff] }
  0xe2   : > { %3779 = vmatprep.mubr.bf16.mxu0 %v945_v32  ;;  %v345_v32 = vunpack.c.l.bf16 %v312_v27 }
  0xe3   : > { %4706 = vmatpush3.bf16.msra.mxu0 %v5067_v41  ;;  %v874_v41 = vmul.f32 0.2, %v802_v26 }
  0xe4   : > { %4728 = vmatpush3.bf16.msra.mxu1 %v5068_v43  ;;  %4707 = vmatprep.subr.bf16.mxu0 %v5069_v45  ;;  %v5080_v43 = vld [vmem:[%s6320_s2 + $0x7b8] sm:$0xff]   ;;  %v947_v45 = vpack.c.bf16 %v911_v36, %v911_v36  ;;  %v723_v36 = vrot.slane %v6051_v57, %v5430_v38 }
  0xe5   : > { %4729 = vmatprep.subr.bf16.mxu1 %v5070_v46  ;;  %v908_v46 = vsel %vm836_vm10, %v800_v24, %v872_v30 }
  0xe6   : > { %3819 = vmatprep.mubr.bf16.mxu1 %v947_v45 }
  0xe7   : > { %4708 = vmatpush3.bf16.msra.mxu0 %v5071_v47  ;;  %v5081_v47 = vld [vmem:[%s6320_s2 + $0x770] sm:$0xff]  }
  0xe8   : > { %4730 = vmatpush3.bf16.msra.mxu1 %v5072_v25  ;;  %4709 = vmatprep.subr.bf16.mxu0 %v5073_v49  ;;  %v944_v25 = vpack.c.bf16 %v908_v46, %v908_v46  ;;  %v5082_v49 = vld [vmem:[%s6320_s2 + $0x7f0] sm:$0xff]  }
  0xe9   : > { %4731 = vmatprep.subr.bf16.mxu1 %v5074_v51  ;;  %v5083_v51 = vld [vmem:[%s6320_s2 + $0x730] sm:$0xff]  }
  0xeb   : > { %4710 = vmatpush3.bf16.msra.mxu0 %v5075_v19  ;;  %v5092_v19 = vld [vmem:[%s6320_s2 + $0x7a0] sm:$0xff]  }
  0xec   : > { %4732 = vmatpush3.bf16.msra.mxu1 %v5076_v3  ;;  %4739 = vmatprep.subr.bf16.mxu0 %v5077_v10  ;;  %v5098_v3 = vld [vmem:[%s6320_s2 + $0x7d0] sm:$0xff]  }
  0xed   : > { %4761 = vmatprep.subr.bf16.mxu1 %v5078_v15  ;;  %v5105_v15 = vld [vmem:[%s6320_s2 + $0x740] sm:$0xff]  }
  0xee   : > { %v4447_v48 = vpop.f32.mrf.mxu0  ;;  %3780 = vmatmul.mubr.bf16.vlgmr.msra.gmra.mxu0 %v944_v25  ;;  %v5108_v25 = vld [vmem:[%s6320_s2 + $0x780] sm:$0xff]  }
  0xef   : > { %v4469_v50 = vpop.f32.mrf.mxu1  ;;  %4740 = vmatpush3.bf16.msra.mxu0 %v5079_v0 }
  0xf0   : > { %v4448_v53 = vpop.f32.mrf.mxu0  ;;  %4741 = vmatprep.subr.bf16.mxu0 %v5081_v47 }
  0xf1   : > { %v4470_v60 = vpop.f32.mrf.mxu1  ;;  %v4449_v11 = vadd.f32 %v4448_v53, %v4447_v48  ;;  %v910_v48 = vsel %vm838_vm11, %v802_v26, %v874_v41  ;;  %v5085_v53 = vld [vmem:[%s6320_s2 + $0x768] sm:$0xff]   ;;  %v719_v41 = vrot.slane %v6051_v57, %v5442_v44 }
  0xf2   : > { %v4450_v2 = vpop.f32.mrf.mxu0  ;;  %v4471_v17 = vadd.f32 %v4470_v60, %v4469_v50  ;;  %v946_v50 = vpack.c.bf16 %v910_v48, %v910_v48  ;;  %v5091_v60 = vld [vmem:[%s6320_s2 + $0x720] sm:$0xff]  }
  0xf3   : > { %v4472_v7 = vpop.f32.mrf.mxu1  ;;  %v3302_v22 = vadd.f32 %v4449_v11, %v4140_v16  ;;  %4742 = vmatpush3.bf16.msra.mxu0 %v5083_v51  ;;  %v5097_v2 = vld [vmem:[%s6320_s2 + $0x750] sm:$0xff]   ;;  %v5104_v11 = vld [vmem:[%s6320_s2 + $0x788] sm:$0xff]  }
  0xf4   : > { %v4451_v12 = vpop.f32.mrf.mxu0  ;;  %3820 = vmatmul.mubr.bf16.vlgmr.msra.gmra.mxu1 %v946_v50  ;;  %4743 = vmatprep.subr.bf16.mxu0 %v5085_v53  ;;  %v5102_v7 = vld [vmem:[%s6320_s2 + $0x7c8] sm:$0xff]   ;;  %v311_v16 = vld [vmem:[%s5319_s20 + $0x70] sm:$0xff] }
  0xf5   : > { %v4473_v20 = vpop.f32.mrf.mxu1  ;;  %v6083_v28 = vadd.f32 %v4471_v17, %v3302_v22  ;;  %4762 = vmatpush3.bf16.msra.mxu1 %v5080_v43  ;;  %v484_v12 = vrot.slane %v6046_v52, %v5424_v34  ;;  %v715_v17 = vrot.slane %v6051_v57, %v5424_v34  ;;  %v343_v24 = vunpack.c.l.bf16 %v311_v16  ;;  %v5106_v34 = vld [vmem:[%s6320_s2 + $0x7c0] sm:$0xff]  }
  0xf6   : > { %4763 = vmatprep.subr.bf16.mxu1 %v5082_v49  ;;  %v492_v20 = vrot.slane %v6046_v52, %v5430_v38  ;;  %v344_v26 = vunpack.c.h.bf16 %v311_v16  ;;  %v346_v52 = vunpack.c.h.bf16 %v312_v27  ;;  %v575_v38 = vsub.f32 %v345_v32, %v488_v21  ;;  %v5109_v49 = vld [vmem:[%s6320_s2 + $0x878] sm:$0xff]   ;;  %v5130_v21 = vld [vmem:[%s6320_s2 + $0x8d0] sm:$0xff]   ;;  %v5137_v32 = vld [vmem:[%s6320_s2 + $0x840] sm:$0xff]  }
  0xf7   : > { %4744 = vmatpush3.bf16.msra.mxu0 %v5087_v55  ;;  %v573_v45 = vsub.f32 %v343_v24, %v480_v13  ;;  %v5123_v13 = vld [vmem:[%s6320_s2 + $0x820] sm:$0xff]   ;;  %v5127_v16 = vld [vmem:[%s6320_s2 + $0x818] sm:$0xff]   ;;  %v5133_v24 = vld [vmem:[%s6320_s2 + $0x848] sm:$0xff]  }
  0xf8   : > { %4745 = vmatprep.subr.bf16.mxu0 %v5089_v58  ;;  %v576_v48 = vsub.f32 %v346_v52, %v492_v20  ;;  %v806_v51 = vmul.f32 %v719_v41, %v575_v38  ;;  %v5129_v20 = vld [vmem:[%s6320_s2 + $0x850] sm:$0xff]   ;;  %v313_v52 = vld [vmem:[%s5319_s20 + $0x80] sm:$0xff] }
  0xf9   : > { %4764 = vmatpush3.bf16.msra.mxu1 %v5084_v18  ;;  %v804_v57 = vmul.f32 %v711_v29, %v573_v45  ;;  %v5110_v18 = vld [vmem:[%s6320_s2 + $0x8f8] sm:$0xff]   ;;  %v5135_v29 = vld [vmem:[%s6320_s2 + $0x808] sm:$0xff]   ;;  %v348_v45 = vunpack.c.h.bf16 %v313_v52 }
  0xfa   : > { %4765 = vmatprep.subr.bf16.mxu1 %v5086_v54  ;;  %v807_v50 = vmul.f32 %v723_v36, %v576_v48  ;;  %vm842_vm15 = vcmp.gt.f32.partialorder %v806_v51, 0.0  ;;  %v4134_v36 = vld [vmem:[%s5314_s13 + $0x40] ss:$2 sm:$0xf]  ;;  %v314_v48 = vld [vmem:[%s5319_s20 + $0x88] sm:$0xff] }
  0xfb   : > { %4746 = vmatpush3.bf16.msra.mxu0 %v5091_v60  ;;  %vm840_vm13 = vcmp.gt.f32.partialorder %v804_v57, 0.0  ;;  %v876_v54 = vmul.f32 0.2, %v804_v57  ;;  %v5111_v60 = vld [vmem:[%s6320_s2 + $0x838] sm:$0xff]   ;;  %v508_v38 = vrot.slane %v4134_v36, %v5322_v33 }
  0xfc   : > { %4747 = vmatprep.subr.bf16.mxu0 %v5093_v39  ;;  %vm843_vm14 = vcmp.gt.f32.partialorder %v807_v50, 0.0  ;;  %v879_v55 = vmul.f32 0.2, %v807_v50 }
  0xfd   : > { %4766 = vmatpush3.bf16.msra.mxu1 %v5088_v56  ;;  %v878_v56 = vmul.f32 0.2, %v806_v51 }
  0xfe   : > { %4767 = vmatprep.subr.bf16.mxu1 %v5090_v59  ;;  %v912_v59 = vsel %vm840_vm13, %v804_v57, %v876_v54  ;;  %v915_v39 = vsel %vm843_vm14, %v807_v50, %v879_v55  ;;  %v350_v50 = vunpack.c.h.bf16 %v314_v48  ;;  %v496_v55 = vrot.slane %v4134_v36, %v5328_v35 }
  0xff   : > { %4748 = vmatpush3.bf16.msra.mxu0 %v5095_v63  ;;  %v914_v63 = vsel %vm842_vm15, %v806_v51, %v878_v56 }
 0x100   : > { %4749 = vmatprep.subr.bf16.mxu0 %v5097_v2  ;;  %v951_v2 = vpack.c.bf16 %v915_v39, %v915_v39 }
 0x101   : > { %4768 = vmatpush3.bf16.msra.mxu1 %v5092_v19 }
 0x102   : > { %4769 = vmatprep.subr.bf16.mxu1 %v5094_v62  ;;  %v948_v62 = vpack.c.bf16 %v912_v59, %v912_v59  ;;  %3899 = vmatprep.mubr.bf16.mxu1 %v951_v2 }
 0x103   : > { %4750 = vmatpush3.bf16.msra.mxu0 %v5099_v4  ;;  %v5113_v4 = vld [vmem:[%s6320_s2 + $0x870] sm:$0xff]  }
 0x104   : > { %4751 = vmatprep.subr.bf16.mxu0 %v5101_v6  ;;  %v5115_v6 = vld [vmem:[%s6320_s2 + $0x830] sm:$0xff]  }
 0x105   : > { %4770 = vmatpush3.bf16.msra.mxu1 %v5096_v1  ;;  %v5112_v1 = vld [vmem:[%s6320_s2 + $0x8b8] sm:$0xff]  }
 0x106   : > { %4771 = vmatprep.subr.bf16.mxu1 %v5098_v3  ;;  %v950_v3 = vpack.c.bf16 %v914_v63, %v914_v63 }
 0x107   : > { %4752 = vmatpush3.bf16.msra.mxu0 %v5103_v9  ;;  %v5119_v9 = vld [vmem:[%s6320_s2 + $0x828] sm:$0xff]  }
 0x108   : > { %4753 = vmatprep.subr.bf16.mxu0 %v5105_v15  ;;  %v5126_v15 = vld [vmem:[%s6320_s2 + $0x8d8] sm:$0xff]  }
 0x109   : > { %4772 = vmatpush3.bf16.msra.mxu1 %v5100_v5  ;;  %v5114_v5 = vld [vmem:[%s6320_s2 + $0x8f0] sm:$0xff]  }
 0x10a   : > { %4773 = vmatprep.subr.bf16.mxu1 %v5102_v7  ;;  %v5117_v7 = vld [vmem:[%s6320_s2 + $0x868] sm:$0xff]  }
 0x10b   : > { %4754 = vmatpush3.bf16.msra.mxu0 %v5107_v42  ;;  %v5138_v42 = vld [vmem:[%s6320_s2 + $0x8c0] sm:$0xff]  }
 0x10c   : > { %4783 = vmatprep.subr.bf16.mxu0 %v5109_v49  ;;  %v349_v49 = vunpack.c.l.bf16 %v314_v48 }
 0x10d   : > { %4774 = vmatpush3.bf16.msra.mxu1 %v5104_v11  ;;  %v5121_v11 = vld [vmem:[%s6320_s2 + $0x860] sm:$0xff]  }
 0x10e   : > { %v4491_v40 = vpop.f32.mrf.mxu0  ;;  %4775 = vmatprep.subr.bf16.mxu1 %v5106_v34 }
 0x10f   : > { %v4513_v8 = vpop.f32.mrf.mxu1 }
 0x110   : > { %v4492_v10 = vpop.f32.mrf.mxu0 }
 0x111   : > { %v4493_v14 = vadd.f32 %v4492_v10, %v4491_v40  ;;  %v4514_v61 = vpop.f32.mrf.mxu1  ;;  %4776 = vmatpush3.bf16.msra.mxu1 %v5108_v25  ;;  %v5116_v40 = vld [vmem:[%s6320_s2 + $0x8b0] sm:$0xff]   ;;  %v5120_v10 = vld [vmem:[%s6320_s2 + $0x8a8] sm:$0xff]   ;;  %v4139_v25 = vld [vmem:[%s5314_s13 + $0x41] ss:$2 sm:$0xf] }
 0x112   : > { %v4515_v22 = vadd.f32 %v4514_v61, %v4513_v8  ;;  %v4494_v23 = vpop.f32.mrf.mxu0  ;;  %4805 = vmatprep.subr.bf16.mxu1 %v5110_v18  ;;  %v5118_v8 = vld [vmem:[%s6320_s2 + $0x8e8] sm:$0xff]   ;;  %v5125_v61 = vld [vmem:[%s6320_s2 + $0x858] sm:$0xff]   ;;  %v731_v57 = vrot.slane %v4139_v25, %v5306_v31  ;;  %v739_v51 = vrot.slane %v4139_v25, %v5322_v33  ;;  %v727_v56 = vrot.slane %v4139_v25, %v5328_v35 }
 0x113   : > { %v3382_v30 = vadd.f32 %v4493_v14, %v6083_v28  ;;  %v4516_v0 = vpop.f32.mrf.mxu1  ;;  %v574_v28 = vsub.f32 %v344_v26, %v484_v12  ;;  %v5122_v12 = vld [vmem:[%s6320_s2 + $0x8e0] sm:$0xff]   ;;  %v5132_v23 = vld [vmem:[%s6320_s2 + $0x890] sm:$0xff]   ;;  %v5134_v26 = vld [vmem:[%s6320_s2 + $0x8c8] sm:$0xff]   ;;  %v580_v33 = vsub.f32 %v350_v50, %v508_v38 }
 0x114   : > { %v4495_v43 = vpop.f32.mrf.mxu0  ;;  %3900 = vmatmul.mubr.bf16.vlgmr.msra.gmra.mxu1 %v950_v3  ;;  %v5124_v14 = vld [vmem:[%s6320_s2 + $0x8a0] sm:$0xff]   ;;  %v5136_v0 = vld [vmem:[%s6320_s2 + $0x888] sm:$0xff]  }
 0x115   : > { %v6191_v46 = vadd.f32 %v4515_v22, %v3382_v30  ;;  %v4517_v47 = vpop.f32.mrf.mxu1  ;;  %v805_v44 = vmul.f32 %v715_v17, %v574_v28  ;;  %4806 = vmatpush3.bf16.msra.mxu1 %v5112_v1  ;;  %v5128_v17 = vld [vmem:[%s6320_s2 + $0x898] sm:$0xff]   ;;  %v5131_v22 = vld [vmem:[%s6320_s2 + $0x810] sm:$0xff]   ;;  %v347_v28 = vunpack.c.l.bf16 %v313_v52  ;;  %v811_v2 = vmul.f32 %v739_v51, %v580_v33 }
 0x116   : > { %4807 = vmatprep.subr.bf16.mxu1 %v5114_v5  ;;  %v500_v47 = vrot.slane %v4134_v36, %v5306_v31  ;;  %v5140_v31 = vld [vmem:[%s6320_s2 + $0x880] sm:$0xff]  }
 0x117   : > { %vm841_vm12 = vcmp.gt.f32.partialorder %v805_v44, 0.0  ;;  %v877_v53 = vmul.f32 0.2, %v805_v44  ;;  %v577_v63 = vsub.f32 %v347_v28, %v496_v55  ;;  %vm847_vm1 = vcmp.gt.f32.partialorder %v811_v2, 0.0 }
 0x118   : > { %v578_v54 = vsub.f32 %v348_v45, %v500_v47 }
 0x119   : > { %v913_v58 = vsel %vm841_vm12, %v805_v44, %v877_v53  ;;  %4808 = vmatpush3.bf16.msra.mxu1 %v5116_v40  ;;  %v5139_v53 = vld [vmem:[%s6320_s2 + $0x800] sm:$0xff]  }
 0x11a   : > { %v949_v19 = vpack.c.bf16 %v913_v58, %v913_v58  ;;  %4809 = vmatprep.subr.bf16.mxu1 %v5118_v8  ;;  %v504_v58 = vrot.slane %v4134_v36, %v5334_v37 }
 0x11c   : > { %3859 = vmatprep.mubr.bf16.mxu0 %v949_v19  ;;  %v579_v1 = vsub.f32 %v349_v49, %v504_v58 }
 0x11d   : > { %3860 = vmatmul.mubr.bf16.vlgmr.msra.gmra.mxu0 %v948_v62  ;;  %4810 = vmatpush3.bf16.msra.mxu1 %v5120_v10  ;;  %v809_v62 = vmul.f32 %v731_v57, %v578_v54 }
 0x11e   : > { %4784 = vmatpush3.bf16.msra.mxu0 %v5111_v60  ;;  %4811 = vmatprep.subr.bf16.mxu1 %v5122_v12  ;;  %v735_v60 = vrot.slane %v4139_v25, %v5334_v37 }
 0x11f   : > { %4785 = vmatprep.subr.bf16.mxu0 %v5113_v4  ;;  %vm845_vm0 = vcmp.gt.f32.partialorder %v809_v62, 0.0  ;;  %v881_v3 = vmul.f32 0.2, %v809_v62  ;;  %v808_v4 = vmul.f32 %v727_v56, %v577_v63 }
 0x120   : > { %v810_v5 = vmul.f32 %v735_v60, %v579_v1 }
 0x121   : > { %4812 = vmatpush3.bf16.msra.mxu1 %v5124_v14  ;;  %vm844_vm2 = vcmp.gt.f32.partialorder %v808_v4, 0.0  ;;  %v880_v37 = vmul.f32 0.2, %v808_v4 }
 0x122   : > { %4786 = vmatpush3.bf16.msra.mxu0 %v5115_v6  ;;  %4813 = vmatprep.subr.bf16.mxu1 %v5126_v15  ;;  %v883_v6 = vmul.f32 0.2, %v811_v2  ;;  %vm846_vm3 = vcmp.gt.f32.partialorder %v810_v5, 0.0 }
 0x123   : > { %4787 = vmatprep.subr.bf16.mxu0 %v5117_v7  ;;  %v917_v7 = vsel %vm845_vm0, %v809_v62, %v881_v3 }
 0x124   : > { %v919_v8 = vsel %vm847_vm1, %v811_v2, %v883_v6 }
 0x125   : > { %4814 = vmatpush3.bf16.msra.mxu1 %v5128_v17  ;;  %v955_v10 = vpack.c.bf16 %v919_v8, %v919_v8 }
 0x126   : > { %4788 = vmatpush3.bf16.msra.mxu0 %v5119_v9  ;;  %4815 = vmatprep.subr.bf16.mxu1 %v5130_v21  ;;  %v882_v9 = vmul.f32 0.2, %v810_v5 }
 0x127   : > { %4789 = vmatprep.subr.bf16.mxu0 %v5121_v11  ;;  %v916_v11 = vsel %vm844_vm2, %v808_v4, %v880_v37  ;;  %3979 = vmatprep.mubr.bf16.mxu1 %v955_v10 }
 0x128   : > { %v952_v12 = vpack.c.bf16 %v916_v11, %v916_v11 }
 0x129   : > { %4816 = vmatpush3.bf16.msra.mxu1 %v5132_v23 }
 0x12a   : > { %4790 = vmatpush3.bf16.msra.mxu0 %v5123_v13  ;;  %4817 = vmatprep.subr.bf16.mxu1 %v5134_v26  ;;  %v918_v13 = vsel %vm846_vm3, %v810_v5, %v882_v9 }
 0x12b   : > { %4791 = vmatprep.subr.bf16.mxu0 %v5125_v61  ;;  %v954_v14 = vpack.c.bf16 %v918_v13, %v918_v13 }
 0x12d   : > { %4818 = vmatpush3.bf16.msra.mxu1 %v5136_v0 }
 0x12e   : > { %4792 = vmatpush3.bf16.msra.mxu0 %v5127_v16  ;;  %v4535_v27 = vpop.f32.mrf.mxu0  ;;  %4819 = vmatprep.subr.bf16.mxu1 %v5138_v42 }
 0x12f   : > { %4793 = vmatprep.subr.bf16.mxu0 %v5129_v20  ;;  %v4557_v30 = vpop.f32.mrf.mxu1 }
 0x130   : > { %v4536_v34 = vpop.f32.mrf.mxu0 }
 0x131   : > { %v4537_v41 = vadd.f32 %v4536_v34, %v4535_v27  ;;  %v4558_v43 = vpop.f32.mrf.mxu1  ;;  %4820 = vmatpush3.bf16.msra.mxu1 %v5140_v31 }
 0x132   : > { %4794 = vmatpush3.bf16.msra.mxu0 %v5131_v22  ;;  %v4538_v44 = vpop.f32.mrf.mxu0  ;;  %v4559_v35 = vadd.f32 %v4558_v43, %v4557_v30 }
 0x133   : > { %4795 = vmatprep.subr.bf16.mxu0 %v5133_v24  ;;  %v4560_v18 = vpop.f32.mrf.mxu1  ;;  %v3462_v19 = vadd.f32 %v4537_v41, %v6191_v46  ;;  %v953_v46 = vpack.c.bf16 %v917_v7, %v917_v7 }
 0x134   : > { %v4539_v59 = vpop.f32.mrf.mxu0  ;;  %3980 = vmatmul.mubr.bf16.vlgmr.msra.gmra.mxu1 %v954_v14 }
 0x135   : > { %v4561_v39 = vpop.f32.mrf.mxu1  ;;  %v3502_v40 = vadd.f32 %v4559_v35, %v3462_v19  ;;  %3939 = vmatprep.mubr.bf16.mxu0 %v953_v46 }
 0x136   : > { %4796 = vmatpush3.bf16.msra.mxu0 %v5135_v29 }
 0x137   : > { %4797 = vmatprep.subr.bf16.mxu0 %v5137_v32 }
 0x13a   : > { %4798 = vmatpush3.bf16.msra.mxu0 %v5139_v53 }
 0x13d   : > { %3940 = vmatmul.mubr.bf16.vlgmr.msra.gmra.mxu0 %v952_v12 }
 0x14e   : > { %v4579_v61 = vpop.f32.mrf.mxu0 }
 0x14f   : > { %v4601_v15 = vpop.f32.mrf.mxu1 }
 0x150   : > { %v4580_v16 = vpop.f32.mrf.mxu0 }
 0x151   : > { %v4602_v17 = vpop.f32.mrf.mxu1  ;;  %v4581_v20 = vadd.f32 %v4580_v16, %v4579_v61 }
 0x152   : > { %v4603_v21 = vadd.f32 %v4602_v17, %v4601_v15  ;;  %v4582_v22 = vpop.f32.mrf.mxu0 }
 0x153   : > { %v4604_v23 = vpop.f32.mrf.mxu1  ;;  %v3542_v24 = vadd.f32 %v4581_v20, %v3502_v40 }
 0x154   : > { %v4583_v26 = vpop.f32.mrf.mxu0 }
 0x155   : > { %v4605_v27 = vpop.f32.mrf.mxu1  ;;  %v3582_v29 = vadd.f32 %v4603_v21, %v3542_v24 }
 0x16e   : > { %v4623_v30 = vpop.f32.mrf.mxu0 }
 0x16f   : > { %v4645_v0 = vpop.f32.mrf.mxu1 }
 0x170   : > { %v4624_v34 = vpop.f32.mrf.mxu0 }
 0x171   : > { %v4625_v32 = vadd.f32 %v4624_v34, %v4623_v30  ;;  %v4646_v52 = vpop.f32.mrf.mxu1 }
 0x172   : > { %v4647_v36 = vadd.f32 %v4646_v52, %v4645_v0  ;;  %v4626_v41 = vpop.f32.mrf.mxu0 }
 0x173   : > { %v3622_v43 = vadd.f32 %v4625_v32, %v3582_v29  ;;  %v4648_v42 = vpop.f32.mrf.mxu1 }
 0x174   : > { %v4627_v28 = vpop.f32.mrf.mxu0 }
 0x175   : > { %v3662_v45 = vadd.f32 %v4647_v36, %v3622_v43  ;;  %v4649_v47 = vpop.f32.mrf.mxu1 }
 0x18e   : > { %v4667_v25 = vpop.f32.mrf.mxu0 }
 0x18f   : > { %v4689_v48 = vpop.f32.mrf.mxu1 }
 0x190   : > { %v4668_v38 = vpop.f32.mrf.mxu0 }
 0x191   : > { %v4669_v44 = vadd.f32 %v4668_v38, %v4667_v25  ;;  %v4690_v57 = vpop.f32.mrf.mxu1 }
 0x192   : > { %v4691_v49 = vadd.f32 %v4690_v57, %v4689_v48  ;;  %v4670_v50 = vpop.f32.mrf.mxu0 }
 0x193   : > { %v3702_v51 = vadd.f32 %v4669_v44, %v3662_v45  ;;  %v4692_v18 = vpop.f32.mrf.mxu1 }
 0x194   : > { %v4671_v53 = vpop.f32.mrf.mxu0 }
 0x195   : > { %v3742_v54 = vadd.f32 %v4691_v49, %v3702_v51  ;;  %v4693_v55 = vpop.f32.mrf.mxu1 }
 0x1ae   : > { %v4711_v56 = vpop.f32.mrf.mxu0 }
 0x1b0   : > { %v4712_v59 = vpop.f32.mrf.mxu0 }
 0x1b1   : > { %v4713_v31 = vadd.f32 %v4712_v59, %v4711_v56 }
 0x1b2   : > { %v4714_v19 = vpop.f32.mrf.mxu0 }
 0x1b3   : > { %v3782_v39 = vadd.f32 %v4713_v31, %v3742_v54 }
 0x1b4   : > { %v4733_v58 = vpop.f32.mrf.mxu1  ;;  %v4715_v63 = vpop.f32.mrf.mxu0 }
 0x1b6   : > { %v4734_v33 = vpop.f32.mrf.mxu1 }
 0x1b7   : > { %v4735_v60 = vadd.f32 %v4734_v33, %v4733_v58 }
 0x1b8   : > { %v4736_v62 = vpop.f32.mrf.mxu1 }
 0x1b9   : > { %v3822_v1 = vadd.f32 %v4735_v60, %v3782_v39 }
 0x1ba   : > { %v4737_v35 = vpop.f32.mrf.mxu1 }
 0x1d4   : > { %v4777_v3 = vpop.f32.mrf.mxu1 }
 0x1d6   : > { %v4778_v5 = vpop.f32.mrf.mxu1 }
 0x1d7   : > { %v4779_v9 = vadd.f32 %v4778_v5, %v4777_v3 }
 0x1d8   : > { %v4780_v40 = vpop.f32.mrf.mxu1 }
 0x1da   : > { %v4781_v37 = vpop.f32.mrf.mxu1 }
 0x1dd   : > { %v4755_v2 = vpop.f32.mrf.mxu0 }
 0x1df   : > { %v4756_v4 = vpop.f32.mrf.mxu0 }
 0x1e0   : > { %v4757_v46 = vadd.f32 %v4756_v4, %v4755_v2 }
 0x1e1   : > { %v4758_v6 = vpop.f32.mrf.mxu0 }
 0x1e2   : > { %v3862_v8 = vadd.f32 %v4757_v46, %v3822_v1 }
 0x1e3   : > { %v4759_v7 = vpop.f32.mrf.mxu0 }
 0x1e4   : > { %v3902_v13 = vadd.f32 %v4779_v9, %v3862_v8 }
 0x1f4   : > { %v4821_v11 = vpop.f32.mrf.mxu1 }
 0x1f6   : > { %v4822_v61 = vpop.f32.mrf.mxu1 }
 0x1f7   : > { %v4823_v17 = vadd.f32 %v4822_v61, %v4821_v11 }
 0x1f8   : > { %v4824_v20 = vpop.f32.mrf.mxu1 }
 0x1fa   : > { %v4825_v23 = vpop.f32.mrf.mxu1 }
 0x1fd   : > { %v4799_v10 = vpop.f32.mrf.mxu0 }
 0x1ff   : > { %v4800_v12 = vpop.f32.mrf.mxu0 }
 0x200   : > { %v4801_v14 = vadd.f32 %v4800_v12, %v4799_v10 }
 0x201   : > { %v4802_v15 = vpop.f32.mrf.mxu0 }
 0x202   : > { %v3942_v16 = vadd.f32 %v4801_v14, %v3902_v13 }
 0x203   : > { %v4803_v21 = vpop.f32.mrf.mxu0 }
 0x204   : > { %v3982_v22 = vadd.f32 %v4823_v17, %v3942_v16 }
 0x206   : > { %3987 = vst [vmem:[%s295_s19] sm:$0xff] %v3982_v22 }
 0x207 PF: > { %s14_s17 = sadd.s32 1, %s5163_s17   ;;  %s6323_s15 = smov %s5159_s16 }
 0x208   : > { %p11_p5 = scmp.ge.s32.totalorder %s14_s17, 4   ;;  %s6324_s16 = smov %s6326_s18 }
 0x20a   :  { %13 = sbr.rel (!%p11_p5) target bundleno = 2 (0x2), region = 84 }

</bundles_post_ra>
